<compile_context>
chip_gen: v6e
topology: v6e:2x2x1
jax: 0.10.0
libtpu: 0.0.40
codegen_flags: <defaults>
</compile_context>

<pallas_src>
import jax
import jax.numpy as jnp
from jax.experimental import pallas as pl
from jax.experimental.pallas import tpu as pltpu


# ----------------------------------------------------------------------------
# Fused bidirectional RITS kernel (single invocation, both directions inside)
# ----------------------------------------------------------------------------
def brits_kernel(
    x_ref, m_ref, d_ref,
    wgh_ref, bgh_ref, wgxd_ref, bgx_ref,
    whist_ref, bhist_ref, wfeat_ref, bfeat_ref,
    wcombg_ref, wcombm_ref, bcomb_ref,
    wihc_r_ref, wihc_z_ref, wihc_n_ref,
    wihm_r_ref, wihm_z_ref, wihm_n_ref,
    bgi_r_ref, bgi_z_ref, bgi_n_ref, bhh_n_ref,
    whh_r_ref, whh_z_ref, whh_n_ref,
    imp_ref, loss_ref,
    gh_scr, alpha_scr, gim_r_scr, gim_z_scr, gim_n_scr, lw_scr, imp_scr,
):
    T, B, D = x_ref.shape
    H = gh_scr.shape[-1]
    f32 = jnp.float32

    # -------- time-independent precompute: a few batched (T*B, .) matmuls ----
    m_all = m_ref[...].reshape(T * B, D)
    d_all = d_ref[...].reshape(T * B, D)

    for dd in range(2):                       # 0 = forward, 1 = backward
        # Temporal decay of the hidden state: gamma_h = exp(-relu(d Wgh + b)).
        gamma_h = jnp.exp(-jnp.maximum(
            jnp.dot(d_all, wgh_ref[dd], preferred_element_type=f32)
            + bgh_ref[dd], 0.0))
        # Diagonal temporal decay of the inputs: elementwise on the VPU.
        gamma_x = jnp.exp(-jnp.maximum(d_all * wgxd_ref[dd] + bgx_ref[dd], 0.0))
        # weight_combine (alpha) depends only on (gamma_x, m): precomputable.
        alpha = jax.nn.sigmoid(
            jnp.dot(gamma_x, wcombg_ref[dd], preferred_element_type=f32)
            + jnp.dot(m_all, wcombm_ref[dd], preferred_element_type=f32)
            + bcomb_ref[dd])
        # Mask half of the GRU input projection, per gate, with b_ih (and for
        # the r/z gates also b_hh) folded in.
        gim_r = jnp.dot(m_all, wihm_r_ref[dd], preferred_element_type=f32) + bgi_r_ref[dd]
        gim_z = jnp.dot(m_all, wihm_z_ref[dd], preferred_element_type=f32) + bgi_z_ref[dd]
        gim_n = jnp.dot(m_all, wihm_n_ref[dd], preferred_element_type=f32) + bgi_n_ref[dd]

        gh_scr[dd] = gamma_h.reshape(T, B, H)
        alpha_scr[dd] = alpha.reshape(T, B, D)
        gim_r_scr[dd] = gim_r.reshape(T, B, H)
        gim_z_scr[dd] = gim_z.reshape(T, B, H)
        gim_n_scr[dd] = gim_n.reshape(T, B, H)

    # Per-step loss normaliser hoisted out of the recurrence (off the h-chain):
    # lw_t = m_t / (sum(m_t) + eps), exact reciprocal.
    for t in range(T):
        m_t = m_ref[t]
        inv_t = 1.0 / (jnp.sum(m_t) + 1e-5)
        lw_scr[t] = m_t * inv_t

    # -------- hoisted bias broadcasts (JAX does not CSE broadcast_in_dim) ----
    bhist_b = tuple(jnp.broadcast_to(bhist_ref[dd], (B, D)) for dd in range(2))
    bfeat_b = tuple(jnp.broadcast_to(bfeat_ref[dd], (B, D)) for dd in range(2))
    bhh_n_b = tuple(jnp.broadcast_to(bhh_n_ref[dd], (B, H)) for dd in range(2))

    h = [jnp.zeros((B, H), f32), jnp.zeros((B, H), f32)]
    loss_acc = jnp.zeros((B, D), f32)

    # -------- serial RITS recurrence, both directions interleaved ------------
    for s in range(T):
        for dd in range(2):
            t = s if dd == 0 else T - 1 - s        # static time index

            x = x_ref[t]
            m = m_ref[t]
            lw = lw_scr[t]
            gamma_h = gh_scr[dd, t]
            alpha = alpha_scr[dd, t]

            hd = h[dd] * gamma_h                   # decayed hidden state

            # History regression.
            x_h = jnp.dot(hd, whist_ref[dd], preferred_element_type=f32) + bhist_b[dd]
            mx = m * x
            om = 1.0 - m
            x_c = mx + om * x_h
            # Feature regression (Wfeat diagonal zeroed in the wrapper).
            z_h = jnp.dot(x_c, wfeat_ref[dd], preferred_element_type=f32) + bfeat_b[dd]
            c_h = alpha * z_h + (1.0 - alpha) * x_h
            c_c = mx + om * c_h
            imp_scr[dd, t] = c_c

            # Deferred loss: elementwise accumulate, single reduce at the end.
            loss_acc = loss_acc + (jnp.abs(x - x_h) + jnp.abs(x - z_h)
                                   + jnp.abs(x - c_h)) * lw

            # GRU cell on [c_c, m] (mask half precomputed), gates [r, z, n];
            # every gate split so no lane-offset slices sit on the chain.
            gh_r = jnp.dot(hd, whh_r_ref[dd], preferred_element_type=f32)
            gh_z = jnp.dot(hd, whh_z_ref[dd], preferred_element_type=f32)
            gh_n = jnp.dot(hd, whh_n_ref[dd], preferred_element_type=f32) + bhh_n_b[dd]
            gi_r = jnp.dot(c_c, wihc_r_ref[dd], preferred_element_type=f32) + gim_r_scr[dd, t]
            gi_z = jnp.dot(c_c, wihc_z_ref[dd], preferred_element_type=f32) + gim_z_scr[dd, t]
            gi_n = jnp.dot(c_c, wihc_n_ref[dd], preferred_element_type=f32) + gim_n_scr[dd, t]

            r = jax.nn.sigmoid(gi_r + gh_r)
            z = jax.nn.sigmoid(gi_z + gh_z)
            n = jnp.tanh(gi_n + r * gh_n)
            h[dd] = (1.0 - z) * n + z * hd

    # -------- BRITS merge (everything already VMEM-resident) -----------------
    imp_f = imp_scr[0]
    imp_b = imp_scr[1]                              # already in original time order
    imp_ref[...] = (imp_f + imp_b) * 0.5
    loss_c = jnp.sum(jnp.abs(imp_f - imp_b)) * (0.1 / float(T * B * D))
    total = jnp.sum(loss_acc) + loss_c
    loss_ref[...] = jnp.reshape(total, (1, 1))


# ----------------------------------------------------------------------------
# Wrapper: repack forward/backward params (per-gate split), one pallas_call
# ----------------------------------------------------------------------------
def pack_params(pf, pb):
    """Repack + stack forward/backward RITS params for the fused kernel."""
    def repack(p):
        D, H = p["Wgh"].shape
        eye = jnp.eye(D, dtype=jnp.float32)
        Wih_c, Wih_m = p["Wih"][:D], p["Wih"][D:]          # cat([c_c, m]) split
        bih, bhh, Whh = p["bih"], p["bhh"], p["Whh"]
        g = lambda a, k: a[..., k * H:(k + 1) * H]         # gate slice [r,z,n]
        return [
            p["Wgh"], p["bgh"],
            p["Wgx_diag"], p["bgx"],
            p["Whist"], p["bhist"],
            p["Wfeat"] * (1.0 - eye), p["bfeat"],           # FeatureRegression mask
            p["Wcomb"][:D], p["Wcomb"][D:], p["bcomb"],
            g(Wih_c, 0), g(Wih_c, 1), g(Wih_c, 2),
            g(Wih_m, 0), g(Wih_m, 1), g(Wih_m, 2),
            g(bih, 0) + g(bhh, 0),                          # b_ir + b_hr
            g(bih, 1) + g(bhh, 1),                          # b_iz + b_hz
            g(bih, 2),                                      # b_in
            g(bhh, 2),                                      # b_hn (stays inside r*(.))
            g(Whh, 0), g(Whh, 1), g(Whh, 2),
        ]
    rf, rb = repack(pf), repack(pb)
    return [jnp.stack([a, b], axis=0) for a, b in zip(rf, rb)]   # leading dim 2


def brits_forward(values, masks, deltas, params_f, params_b):
    """values/masks/deltas: (B, T, D).  Returns {'loss', 'imputations'}."""
    B, T, D = values.shape
    H = params_f["Wgh"].shape[1]

    # (B, T, D) -> (T, B, D): time on a cheap untiled leading axis, D on lanes.
    vx = jnp.transpose(values, (1, 0, 2)).astype(jnp.float32)
    vm = jnp.transpose(masks, (1, 0, 2)).astype(jnp.float32)
    vd = jnp.transpose(deltas, (1, 0, 2)).astype(jnp.float32)

    # TODO(synk): backward deltas are simply the forward deltas read in reverse
    # time order here; real BRITS data prep recomputes deltas for the reversed
    # sequence.
    stacked = pack_params(params_f, params_b)

    imp_tm, loss = pl.pallas_call(
        brits_kernel,
        out_shape=(jax.ShapeDtypeStruct((T, B, D), jnp.float32),
                   jax.ShapeDtypeStruct((1, 1), jnp.float32)),
        scratch_shapes=[
            pltpu.VMEM((2, T, B, H), jnp.float32),   # gamma_h
            pltpu.VMEM((2, T, B, D), jnp.float32),   # alpha
            pltpu.VMEM((2, T, B, H), jnp.float32),   # gim_r
            pltpu.VMEM((2, T, B, H), jnp.float32),   # gim_z
            pltpu.VMEM((2, T, B, H), jnp.float32),   # gim_n
            pltpu.VMEM((T, B, D), jnp.float32),      # lw = m_t/(sum(m_t)+eps)
            pltpu.VMEM((2, T, B, D), jnp.float32),   # per-direction imputations
        ],
    )(vx, vm, vd, *stacked)

    # TODO(synk): rits source (aug/ext args, label/prediction head) was not
    # provided; only the imputation path + losses used by merge_ret exist here.
    return {"loss": loss[0, 0],
            "imputations": jnp.transpose(imp_tm, (1, 0, 2))}   # (B, T, D)


# ----------------------------------------------------------------------------
# Deterministic parameter init (shapes per BRITS rits layers, GRU variant)
# ----------------------------------------------------------------------------
def init_rits_params(key, D, H):
    ks = jax.random.split(key, 14)

    def u(k, shape, fan_in):
        bound = 1.0 / (fan_in ** 0.5)
        return jax.random.uniform(k, shape, jnp.float32, -bound, bound)

    return {
        # TemporalDecay(input_size -> hidden), dense
        "Wgh": u(ks[0], (D, H), D), "bgh": u(ks[1], (1, H), D),
        # TemporalDecay(input_size -> input_size), diag=True -> only diag matters
        "Wgx_diag": u(ks[2], (1, D), D), "bgx": u(ks[3], (1, D), D),
        # hist_reg: Linear(hidden -> input)
        "Whist": u(ks[4], (H, D), H), "bhist": u(ks[5], (1, D), H),
        # feat_reg: FeatureRegression (diagonal masked in pack_params)
        "Wfeat": u(ks[6], (D, D), D), "bfeat": u(ks[7], (1, D), D),
        # weight_combine: Linear(2*input -> input)
        "Wcomb": u(ks[8], (2 * D, D), 2 * D), "bcomb": u(ks[9], (1, D), 2 * D),
        # GRUCell(2*input -> hidden), gates [r, z, n]
        "Wih": u(ks[10], (2 * D, 3 * H), 2 * D), "bih": u(ks[11], (1, 3 * H), 2 * D),
        "Whh": u(ks[12], (H, 3 * H), H), "bhh": u(ks[13], (1, 3 * H), H),
    }


if __name__ == "__main__":
    key = jax.random.PRNGKey(0)
    B, T, D, H = 8, 8, 16, 32

    k1, k2, k3, kf, kb = jax.random.split(key, 5)
    values = jax.random.normal(k1, (B, T, D), jnp.float32)
    masks = (jax.random.uniform(k2, (B, T, D)) > 0.3).astype(jnp.float32)
    deltas = jax.random.uniform(k3, (B, T, D), jnp.float32, 0.0, 2.0)
    values = values * masks   # missing entries zeroed, as in BRITS data prep

    params_f = init_rits_params(kf, D, H)
    params_b = init_rits_params(kb, D, H)

    ret = jax.jit(brits_forward)(values, masks, deltas, params_f, params_b)
    jax.block_until_ready(ret)

    assert ret["imputations"].shape == (B, T, D)
    assert ret["loss"].shape == ()
    print("KERNEL_OK")
</pallas_src>

<mosaic_0001>
module attributes {stable_mosaic.version = 11 : i64} {
  func.func @brits_kernel(%arg0: memref<8x8x16xf32, #tpu.memory_space<vmem>>, %arg1: memref<8x8x16xf32, #tpu.memory_space<vmem>>, %arg2: memref<8x8x16xf32, #tpu.memory_space<vmem>>, %arg3: memref<2x16x32xf32, #tpu.memory_space<vmem>>, %arg4: memref<2x1x32xf32, #tpu.memory_space<vmem>>, %arg5: memref<2x1x16xf32, #tpu.memory_space<vmem>>, %arg6: memref<2x1x16xf32, #tpu.memory_space<vmem>>, %arg7: memref<2x32x16xf32, #tpu.memory_space<vmem>>, %arg8: memref<2x1x16xf32, #tpu.memory_space<vmem>>, %arg9: memref<2x16x16xf32, #tpu.memory_space<vmem>>, %arg10: memref<2x1x16xf32, #tpu.memory_space<vmem>>, %arg11: memref<2x16x16xf32, #tpu.memory_space<vmem>>, %arg12: memref<2x16x16xf32, #tpu.memory_space<vmem>>, %arg13: memref<2x1x16xf32, #tpu.memory_space<vmem>>, %arg14: memref<2x16x32xf32, #tpu.memory_space<vmem>>, %arg15: memref<2x16x32xf32, #tpu.memory_space<vmem>>, %arg16: memref<2x16x32xf32, #tpu.memory_space<vmem>>, %arg17: memref<2x16x32xf32, #tpu.memory_space<vmem>>, %arg18: memref<2x16x32xf32, #tpu.memory_space<vmem>>, %arg19: memref<2x16x32xf32, #tpu.memory_space<vmem>>, %arg20: memref<2x1x32xf32, #tpu.memory_space<vmem>>, %arg21: memref<2x1x32xf32, #tpu.memory_space<vmem>>, %arg22: memref<2x1x32xf32, #tpu.memory_space<vmem>>, %arg23: memref<2x1x32xf32, #tpu.memory_space<vmem>>, %arg24: memref<2x32x32xf32, #tpu.memory_space<vmem>>, %arg25: memref<2x32x32xf32, #tpu.memory_space<vmem>>, %arg26: memref<2x32x32xf32, #tpu.memory_space<vmem>>, %arg27: memref<8x8x16xf32, #tpu.memory_space<vmem>>, %arg28: memref<1x1xf32, #tpu.memory_space<vmem>>, %arg29: memref<2x8x8x32xf32, #tpu.memory_space<vmem>>, %arg30: memref<2x8x8x16xf32, #tpu.memory_space<vmem>>, %arg31: memref<2x8x8x32xf32, #tpu.memory_space<vmem>>, %arg32: memref<2x8x8x32xf32, #tpu.memory_space<vmem>>, %arg33: memref<2x8x8x32xf32, #tpu.memory_space<vmem>>, %arg34: memref<8x8x16xf32, #tpu.memory_space<vmem>>, %arg35: memref<2x8x8x16xf32, #tpu.memory_space<vmem>>) attributes {dimension_semantics = [], scalar_prefetch = 0 : i64, scratch_operands = 7 : i64, tpu.core_type = #tpu.core_type<tc>} {
    %c0 = arith.constant 0 : index
    %c0_0 = arith.constant 0 : index
    %c0_1 = arith.constant 0 : index
    %0 = vector.load %arg1[%c0, %c0_0, %c0_1] : memref<8x8x16xf32, #tpu.memory_space<vmem>>, vector<8x8x16xf32>
    %1 = vector.shape_cast %0 : vector<8x8x16xf32> to vector<64x16xf32>
    %c0_2 = arith.constant 0 : index
    %c0_3 = arith.constant 0 : index
    %c0_4 = arith.constant 0 : index
    %2 = vector.load %arg2[%c0_2, %c0_3, %c0_4] : memref<8x8x16xf32, #tpu.memory_space<vmem>>, vector<8x8x16xf32>
    %3 = vector.shape_cast %2 : vector<8x8x16xf32> to vector<64x16xf32>
    %c0_5 = arith.constant 0 : index
    %c0_6 = arith.constant 0 : index
    %c0_7 = arith.constant 0 : index
    %4 = vector.load %arg3[%c0_5, %c0_6, %c0_7] : memref<2x16x32xf32, #tpu.memory_space<vmem>>, vector<1x16x32xf32>
    %5 = vector.shape_cast %4 : vector<1x16x32xf32> to vector<16x32xf32>
    %cst = arith.constant dense<0.000000e+00> : vector<64x32xf32>
    %6 = tpu.matmul %3, %5, %cst {dimension_numbers = #tpu.dot_dimension_numbers<[1], [0], [0], [1], [0, 0, 1, 1], [], []>} : vector<64x16xf32>, vector<16x32xf32>, vector<64x32xf32> -> vector<64x32xf32>
    %c0_8 = arith.constant 0 : index
    %c0_9 = arith.constant 0 : index
    %c0_10 = arith.constant 0 : index
    %7 = vector.load %arg4[%c0_8, %c0_9, %c0_10] : memref<2x1x32xf32, #tpu.memory_space<vmem>>, vector<1x1x32xf32>
    %8 = vector.shape_cast %7 : vector<1x1x32xf32> to vector<1x32xf32>
    %9 = vector.broadcast %8 : vector<1x32xf32> to vector<64x32xf32>
    %10 = arith.addf %6, %9 : vector<64x32xf32>
    %cst_11 = arith.constant 0.000000e+00 : f32
    %11 = vector.broadcast %cst_11 : f32 to vector<64x32xf32>
    %12 = arith.maximumf %10, %11 : vector<64x32xf32>
    %cst_12 = arith.constant 0.000000e+00 : f32
    %13 = vector.broadcast %cst_12 : f32 to vector<64x32xf32>
    %14 = arith.subf %13, %12 : vector<64x32xf32>
    %15 = math.exp %14 : vector<64x32xf32>
    %c0_13 = arith.constant 0 : index
    %c0_14 = arith.constant 0 : index
    %c0_15 = arith.constant 0 : index
    %16 = vector.load %arg5[%c0_13, %c0_14, %c0_15] : memref<2x1x16xf32, #tpu.memory_space<vmem>>, vector<1x1x16xf32>
    %17 = vector.shape_cast %16 : vector<1x1x16xf32> to vector<1x16xf32>
    %18 = vector.broadcast %17 : vector<1x16xf32> to vector<64x16xf32>
    %19 = arith.mulf %3, %18 : vector<64x16xf32>
    %c0_16 = arith.constant 0 : index
    %c0_17 = arith.constant 0 : index
    %c0_18 = arith.constant 0 : index
    %20 = vector.load %arg6[%c0_16, %c0_17, %c0_18] : memref<2x1x16xf32, #tpu.memory_space<vmem>>, vector<1x1x16xf32>
    %21 = vector.shape_cast %20 : vector<1x1x16xf32> to vector<1x16xf32>
    %22 = vector.broadcast %21 : vector<1x16xf32> to vector<64x16xf32>
    %23 = arith.addf %19, %22 : vector<64x16xf32>
    %cst_19 = arith.constant 0.000000e+00 : f32
    %24 = vector.broadcast %cst_19 : f32 to vector<64x16xf32>
    %25 = arith.maximumf %23, %24 : vector<64x16xf32>
    %cst_20 = arith.constant 0.000000e+00 : f32
    %26 = vector.broadcast %cst_20 : f32 to vector<64x16xf32>
    %27 = arith.subf %26, %25 : vector<64x16xf32>
    %28 = math.exp %27 : vector<64x16xf32>
    %c0_21 = arith.constant 0 : index
    %c0_22 = arith.constant 0 : index
    %c0_23 = arith.constant 0 : index
    %29 = vector.load %arg11[%c0_21, %c0_22, %c0_23] : memref<2x16x16xf32, #tpu.memory_space<vmem>>, vector<1x16x16xf32>
    %30 = vector.shape_cast %29 : vector<1x16x16xf32> to vector<16x16xf32>
    %cst_24 = arith.constant dense<0.000000e+00> : vector<64x16xf32>
    %31 = tpu.matmul %28, %30, %cst_24 {dimension_numbers = #tpu.dot_dimension_numbers<[1], [0], [0], [1], [0, 0, 1, 1], [], []>} : vector<64x16xf32>, vector<16x16xf32>, vector<64x16xf32> -> vector<64x16xf32>
    %c0_25 = arith.constant 0 : index
    %c0_26 = arith.constant 0 : index
    %c0_27 = arith.constant 0 : index
    %32 = vector.load %arg12[%c0_25, %c0_26, %c0_27] : memref<2x16x16xf32, #tpu.memory_space<vmem>>, vector<1x16x16xf32>
    %33 = vector.shape_cast %32 : vector<1x16x16xf32> to vector<16x16xf32>
    %cst_28 = arith.constant dense<0.000000e+00> : vector<64x16xf32>
    %34 = tpu.matmul %1, %33, %cst_28 {dimension_numbers = #tpu.dot_dimension_numbers<[1], [0], [0], [1], [0, 0, 1, 1], [], []>} : vector<64x16xf32>, vector<16x16xf32>, vector<64x16xf32> -> vector<64x16xf32>
    %35 = arith.addf %31, %34 : vector<64x16xf32>
    %c0_29 = arith.constant 0 : index
    %c0_30 = arith.constant 0 : index
    %c0_31 = arith.constant 0 : index
    %36 = vector.load %arg13[%c0_29, %c0_30, %c0_31] : memref<2x1x16xf32, #tpu.memory_space<vmem>>, vector<1x1x16xf32>
    %37 = vector.shape_cast %36 : vector<1x1x16xf32> to vector<1x16xf32>
    %38 = vector.broadcast %37 : vector<1x16xf32> to vector<64x16xf32>
    %39 = arith.addf %35, %38 : vector<64x16xf32>
    %40 = arith.negf %39 : vector<64x16xf32>
    %41 = math.exp %40 : vector<64x16xf32>
    %cst_32 = arith.constant 1.000000e+00 : f32
    %42 = vector.broadcast %cst_32 : f32 to vector<64x16xf32>
    %43 = arith.addf %42, %41 : vector<64x16xf32>
    %44 = arith.divf %42, %43 : vector<64x16xf32>
    %c0_33 = arith.constant 0 : index
    %c0_34 = arith.constant 0 : index
    %c0_35 = arith.constant 0 : index
    %45 = vector.load %arg17[%c0_33, %c0_34, %c0_35] : memref<2x16x32xf32, #tpu.memory_space<vmem>>, vector<1x16x32xf32>
    %46 = vector.shape_cast %45 : vector<1x16x32xf32> to vector<16x32xf32>
    %cst_36 = arith.constant dense<0.000000e+00> : vector<64x32xf32>
    %47 = tpu.matmul %1, %46, %cst_36 {dimension_numbers = #tpu.dot_dimension_numbers<[1], [0], [0], [1], [0, 0, 1, 1], [], []>} : vector<64x16xf32>, vector<16x32xf32>, vector<64x32xf32> -> vector<64x32xf32>
    %c0_37 = arith.constant 0 : index
    %c0_38 = arith.constant 0 : index
    %c0_39 = arith.constant 0 : index
    %48 = vector.load %arg20[%c0_37, %c0_38, %c0_39] : memref<2x1x32xf32, #tpu.memory_space<vmem>>, vector<1x1x32xf32>
    %49 = vector.shape_cast %48 : vector<1x1x32xf32> to vector<1x32xf32>
    %50 = vector.broadcast %49 : vector<1x32xf32> to vector<64x32xf32>
    %51 = arith.addf %47, %50 : vector<64x32xf32>
    %c0_40 = arith.constant 0 : index
    %c0_41 = arith.constant 0 : index
    %c0_42 = arith.constant 0 : index
    %52 = vector.load %arg18[%c0_40, %c0_41, %c0_42] : memref<2x16x32xf32, #tpu.memory_space<vmem>>, vector<1x16x32xf32>
    %53 = vector.shape_cast %52 : vector<1x16x32xf32> to vector<16x32xf32>
    %cst_43 = arith.constant dense<0.000000e+00> : vector<64x32xf32>
    %54 = tpu.matmul %1, %53, %cst_43 {dimension_numbers = #tpu.dot_dimension_numbers<[1], [0], [0], [1], [0, 0, 1, 1], [], []>} : vector<64x16xf32>, vector<16x32xf32>, vector<64x32xf32> -> vector<64x32xf32>
    %c0_44 = arith.constant 0 : index
    %c0_45 = arith.constant 0 : index
    %c0_46 = arith.constant 0 : index
    %55 = vector.load %arg21[%c0_44, %c0_45, %c0_46] : memref<2x1x32xf32, #tpu.memory_space<vmem>>, vector<1x1x32xf32>
    %56 = vector.shape_cast %55 : vector<1x1x32xf32> to vector<1x32xf32>
    %57 = vector.broadcast %56 : vector<1x32xf32> to vector<64x32xf32>
    %58 = arith.addf %54, %57 : vector<64x32xf32>
    %c0_47 = arith.constant 0 : index
    %c0_48 = arith.constant 0 : index
    %c0_49 = arith.constant 0 : index
    %59 = vector.load %arg19[%c0_47, %c0_48, %c0_49] : memref<2x16x32xf32, #tpu.memory_space<vmem>>, vector<1x16x32xf32>
    %60 = vector.shape_cast %59 : vector<1x16x32xf32> to vector<16x32xf32>
    %cst_50 = arith.constant dense<0.000000e+00> : vector<64x32xf32>
    %61 = tpu.matmul %1, %60, %cst_50 {dimension_numbers = #tpu.dot_dimension_numbers<[1], [0], [0], [1], [0, 0, 1, 1], [], []>} : vector<64x16xf32>, vector<16x32xf32>, vector<64x32xf32> -> vector<64x32xf32>
    %c0_51 = arith.constant 0 : index
    %c0_52 = arith.constant 0 : index
    %c0_53 = arith.constant 0 : index
    %62 = vector.load %arg22[%c0_51, %c0_52, %c0_53] : memref<2x1x32xf32, #tpu.memory_space<vmem>>, vector<1x1x32xf32>
    %63 = vector.shape_cast %62 : vector<1x1x32xf32> to vector<1x32xf32>
    %64 = vector.broadcast %63 : vector<1x32xf32> to vector<64x32xf32>
    %65 = arith.addf %61, %64 : vector<64x32xf32>
    %66 = vector.shape_cast %15 : vector<64x32xf32> to vector<8x8x32xf32>
    %c0_54 = arith.constant 0 : index
    %c0_55 = arith.constant 0 : index
    %c0_56 = arith.constant 0 : index
    %c0_57 = arith.constant 0 : index
    %67 = vector.load %arg29[%c0_54, %c0_55, %c0_56, %c0_57] : memref<2x8x8x32xf32, #tpu.memory_space<vmem>>, vector<1x8x8x32xf32>
    %68 = vector.shape_cast %67 : vector<1x8x8x32xf32> to vector<8x8x32xf32>
    %69 = vector.shape_cast %66 : vector<8x8x32xf32> to vector<1x8x8x32xf32>
    tpu.vector_store %arg29[%c0_54, %c0_55, %c0_56, %c0_57], %69 {strides = array<i32>} : memref<2x8x8x32xf32, #tpu.memory_space<vmem>>, vector<1x8x8x32xf32>,
    %70 = vector.shape_cast %44 : vector<64x16xf32> to vector<8x8x16xf32>
    %c0_58 = arith.constant 0 : index
    %c0_59 = arith.constant 0 : index
    %c0_60 = arith.constant 0 : index
    %c0_61 = arith.constant 0 : index
    %71 = vector.load %arg30[%c0_58, %c0_59, %c0_60, %c0_61] : memref<2x8x8x16xf32, #tpu.memory_space<vmem>>, vector<1x8x8x16xf32>
    %72 = vector.shape_cast %71 : vector<1x8x8x16xf32> to vector<8x8x16xf32>
    %73 = vector.shape_cast %70 : vector<8x8x16xf32> to vector<1x8x8x16xf32>
    tpu.vector_store %arg30[%c0_58, %c0_59, %c0_60, %c0_61], %73 {strides = array<i32>} : memref<2x8x8x16xf32, #tpu.memory_space<vmem>>, vector<1x8x8x16xf32>,
    %74 = vector.shape_cast %51 : vector<64x32xf32> to vector<8x8x32xf32>
    %c0_62 = arith.constant 0 : index
    %c0_63 = arith.constant 0 : index
    %c0_64 = arith.constant 0 : index
    %c0_65 = arith.constant 0 : index
    %75 = vector.load %arg31[%c0_62, %c0_63, %c0_64, %c0_65] : memref<2x8x8x32xf32, #tpu.memory_space<vmem>>, vector<1x8x8x32xf32>
    %76 = vector.shape_cast %75 : vector<1x8x8x32xf32> to vector<8x8x32xf32>
    %77 = vector.shape_cast %74 : vector<8x8x32xf32> to vector<1x8x8x32xf32>
    tpu.vector_store %arg31[%c0_62, %c0_63, %c0_64, %c0_65], %77 {strides = array<i32>} : memref<2x8x8x32xf32, #tpu.memory_space<vmem>>, vector<1x8x8x32xf32>,
    %78 = vector.shape_cast %58 : vector<64x32xf32> to vector<8x8x32xf32>
    %c0_66 = arith.constant 0 : index
    %c0_67 = arith.constant 0 : index
    %c0_68 = arith.constant 0 : index
    %c0_69 = arith.constant 0 : index
    %79 = vector.load %arg32[%c0_66, %c0_67, %c0_68, %c0_69] : memref<2x8x8x32xf32, #tpu.memory_space<vmem>>, vector<1x8x8x32xf32>
    %80 = vector.shape_cast %79 : vector<1x8x8x32xf32> to vector<8x8x32xf32>
    %81 = vector.shape_cast %78 : vector<8x8x32xf32> to vector<1x8x8x32xf32>
    tpu.vector_store %arg32[%c0_66, %c0_67, %c0_68, %c0_69], %81 {strides = array<i32>} : memref<2x8x8x32xf32, #tpu.memory_space<vmem>>, vector<1x8x8x32xf32>,
    %82 = vector.shape_cast %65 : vector<64x32xf32> to vector<8x8x32xf32>
    %c0_70 = arith.constant 0 : index
    %c0_71 = arith.constant 0 : index
    %c0_72 = arith.constant 0 : index
    %c0_73 = arith.constant 0 : index
    %83 = vector.load %arg33[%c0_70, %c0_71, %c0_72, %c0_73] : memref<2x8x8x32xf32, #tpu.memory_space<vmem>>, vector<1x8x8x32xf32>
    %84 = vector.shape_cast %83 : vector<1x8x8x32xf32> to vector<8x8x32xf32>
    %85 = vector.shape_cast %82 : vector<8x8x32xf32> to vector<1x8x8x32xf32>
    tpu.vector_store %arg33[%c0_70, %c0_71, %c0_72, %c0_73], %85 {strides = array<i32>} : memref<2x8x8x32xf32, #tpu.memory_space<vmem>>, vector<1x8x8x32xf32>,
    %c1 = arith.constant 1 : index
    %c0_74 = arith.constant 0 : index
    %c0_75 = arith.constant 0 : index
    %86 = vector.load %arg3[%c1, %c0_74, %c0_75] : memref<2x16x32xf32, #tpu.memory_space<vmem>>, vector<1x16x32xf32>
    %87 = vector.shape_cast %86 : vector<1x16x32xf32> to vector<16x32xf32>
    %cst_76 = arith.constant dense<0.000000e+00> : vector<64x32xf32>
    %88 = tpu.matmul %3, %87, %cst_76 {dimension_numbers = #tpu.dot_dimension_numbers<[1], [0], [0], [1], [0, 0, 1, 1], [], []>} : vector<64x16xf32>, vector<16x32xf32>, vector<64x32xf32> -> vector<64x32xf32>
    %c1_77 = arith.constant 1 : index
    %c0_78 = arith.constant 0 : index
    %c0_79 = arith.constant 0 : index
    %89 = vector.load %arg4[%c1_77, %c0_78, %c0_79] : memref<2x1x32xf32, #tpu.memory_space<vmem>>, vector<1x1x32xf32>
    %90 = vector.shape_cast %89 : vector<1x1x32xf32> to vector<1x32xf32>
    %91 = vector.broadcast %90 : vector<1x32xf32> to vector<64x32xf32>
    %92 = arith.addf %88, %91 : vector<64x32xf32>
    %cst_80 = arith.constant 0.000000e+00 : f32
    %93 = vector.broadcast %cst_80 : f32 to vector<64x32xf32>
    %94 = arith.maximumf %92, %93 : vector<64x32xf32>
    %cst_81 = arith.constant 0.000000e+00 : f32
    %95 = vector.broadcast %cst_81 : f32 to vector<64x32xf32>
    %96 = arith.subf %95, %94 : vector<64x32xf32>
    %97 = math.exp %96 : vector<64x32xf32>
    %c1_82 = arith.constant 1 : index
    %c0_83 = arith.constant 0 : index
    %c0_84 = arith.constant 0 : index
    %98 = vector.load %arg5[%c1_82, %c0_83, %c0_84] : memref<2x1x16xf32, #tpu.memory_space<vmem>>, vector<1x1x16xf32>
    %99 = vector.shape_cast %98 : vector<1x1x16xf32> to vector<1x16xf32>
    %100 = vector.broadcast %99 : vector<1x16xf32> to vector<64x16xf32>
    %101 = arith.mulf %3, %100 : vector<64x16xf32>
    %c1_85 = arith.constant 1 : index
    %c0_86 = arith.constant 0 : index
    %c0_87 = arith.constant 0 : index
    %102 = vector.load %arg6[%c1_85, %c0_86, %c0_87] : memref<2x1x16xf32, #tpu.memory_space<vmem>>, vector<1x1x16xf32>
    %103 = vector.shape_cast %102 : vector<1x1x16xf32> to vector<1x16xf32>
    %104 = vector.broadcast %103 : vector<1x16xf32> to vector<64x16xf32>
    %105 = arith.addf %101, %104 : vector<64x16xf32>
    %cst_88 = arith.constant 0.000000e+00 : f32
    %106 = vector.broadcast %cst_88 : f32 to vector<64x16xf32>
    %107 = arith.maximumf %105, %106 : vector<64x16xf32>
    %cst_89 = arith.constant 0.000000e+00 : f32
    %108 = vector.broadcast %cst_89 : f32 to vector<64x16xf32>
    %109 = arith.subf %108, %107 : vector<64x16xf32>
    %110 = math.exp %109 : vector<64x16xf32>
    %c1_90 = arith.constant 1 : index
    %c0_91 = arith.constant 0 : index
    %c0_92 = arith.constant 0 : index
    %111 = vector.load %arg11[%c1_90, %c0_91, %c0_92] : memref<2x16x16xf32, #tpu.memory_space<vmem>>, vector<1x16x16xf32>
    %112 = vector.shape_cast %111 : vector<1x16x16xf32> to vector<16x16xf32>
    %cst_93 = arith.constant dense<0.000000e+00> : vector<64x16xf32>
    %113 = tpu.matmul %110, %112, %cst_93 {dimension_numbers = #tpu.dot_dimension_numbers<[1], [0], [0], [1], [0, 0, 1, 1], [], []>} : vector<64x16xf32>, vector<16x16xf32>, vector<64x16xf32> -> vector<64x16xf32>
    %c1_94 = arith.constant 1 : index
    %c0_95 = arith.constant 0 : index
    %c0_96 = arith.constant 0 : index
    %114 = vector.load %arg12[%c1_94, %c0_95, %c0_96] : memref<2x16x16xf32, #tpu.memory_space<vmem>>, vector<1x16x16xf32>
    %115 = vector.shape_cast %114 : vector<1x16x16xf32> to vector<16x16xf32>
    %cst_97 = arith.constant dense<0.000000e+00> : vector<64x16xf32>
    %116 = tpu.matmul %1, %115, %cst_97 {dimension_numbers = #tpu.dot_dimension_numbers<[1], [0], [0], [1], [0, 0, 1, 1], [], []>} : vector<64x16xf32>, vector<16x16xf32>, vector<64x16xf32> -> vector<64x16xf32>
    %117 = arith.addf %113, %116 : vector<64x16xf32>
    %c1_98 = arith.constant 1 : index
    %c0_99 = arith.constant 0 : index
    %c0_100 = arith.constant 0 : index
    %118 = vector.load %arg13[%c1_98, %c0_99, %c0_100] : memref<2x1x16xf32, #tpu.memory_space<vmem>>, vector<1x1x16xf32>
    %119 = vector.shape_cast %118 : vector<1x1x16xf32> to vector<1x16xf32>
    %120 = vector.broadcast %119 : vector<1x16xf32> to vector<64x16xf32>
    %121 = arith.addf %117, %120 : vector<64x16xf32>
    %122 = arith.negf %121 : vector<64x16xf32>
    %123 = math.exp %122 : vector<64x16xf32>
    %cst_101 = arith.constant 1.000000e+00 : f32
    %124 = vector.broadcast %cst_101 : f32 to vector<64x16xf32>
    %125 = arith.addf %124, %123 : vector<64x16xf32>
    %126 = arith.divf %124, %125 : vector<64x16xf32>
    %c1_102 = arith.constant 1 : index
    %c0_103 = arith.constant 0 : index
    %c0_104 = arith.constant 0 : index
    %127 = vector.load %arg17[%c1_102, %c0_103, %c0_104] : memref<2x16x32xf32, #tpu.memory_space<vmem>>, vector<1x16x32xf32>
    %128 = vector.shape_cast %127 : vector<1x16x32xf32> to vector<16x32xf32>
    %cst_105 = arith.constant dense<0.000000e+00> : vector<64x32xf32>
    %129 = tpu.matmul %1, %128, %cst_105 {dimension_numbers = #tpu.dot_dimension_numbers<[1], [0], [0], [1], [0, 0, 1, 1], [], []>} : vector<64x16xf32>, vector<16x32xf32>, vector<64x32xf32> -> vector<64x32xf32>
    %c1_106 = arith.constant 1 : index
    %c0_107 = arith.constant 0 : index
    %c0_108 = arith.constant 0 : index
    %130 = vector.load %arg20[%c1_106, %c0_107, %c0_108] : memref<2x1x32xf32, #tpu.memory_space<vmem>>, vector<1x1x32xf32>
    %131 = vector.shape_cast %130 : vector<1x1x32xf32> to vector<1x32xf32>
    %132 = vector.broadcast %131 : vector<1x32xf32> to vector<64x32xf32>
    %133 = arith.addf %129, %132 : vector<64x32xf32>
    %c1_109 = arith.constant 1 : index
    %c0_110 = arith.constant 0 : index
    %c0_111 = arith.constant 0 : index
    %134 = vector.load %arg18[%c1_109, %c0_110, %c0_111] : memref<2x16x32xf32, #tpu.memory_space<vmem>>, vector<1x16x32xf32>
    %135 = vector.shape_cast %134 : vector<1x16x32xf32> to vector<16x32xf32>
    %cst_112 = arith.constant dense<0.000000e+00> : vector<64x32xf32>
    %136 = tpu.matmul %1, %135, %cst_112 {dimension_numbers = #tpu.dot_dimension_numbers<[1], [0], [0], [1], [0, 0, 1, 1], [], []>} : vector<64x16xf32>, vector<16x32xf32>, vector<64x32xf32> -> vector<64x32xf32>
    %c1_113 = arith.constant 1 : index
    %c0_114 = arith.constant 0 : index
    %c0_115 = arith.constant 0 : index
    %137 = vector.load %arg21[%c1_113, %c0_114, %c0_115] : memref<2x1x32xf32, #tpu.memory_space<vmem>>, vector<1x1x32xf32>
    %138 = vector.shape_cast %137 : vector<1x1x32xf32> to vector<1x32xf32>
    %139 = vector.broadcast %138 : vector<1x32xf32> to vector<64x32xf32>
    %140 = arith.addf %136, %139 : vector<64x32xf32>
    %c1_116 = arith.constant 1 : index
    %c0_117 = arith.constant 0 : index
    %c0_118 = arith.constant 0 : index
    %141 = vector.load %arg19[%c1_116, %c0_117, %c0_118] : memref<2x16x32xf32, #tpu.memory_space<vmem>>, vector<1x16x32xf32>
    %142 = vector.shape_cast %141 : vector<1x16x32xf32> to vector<16x32xf32>
    %cst_119 = arith.constant dense<0.000000e+00> : vector<64x32xf32>
    %143 = tpu.matmul %1, %142, %cst_119 {dimension_numbers = #tpu.dot_dimension_numbers<[1], [0], [0], [1], [0, 0, 1, 1], [], []>} : vector<64x16xf32>, vector<16x32xf32>, vector<64x32xf32> -> vector<64x32xf32>
    %c1_120 = arith.constant 1 : index
    %c0_121 = arith.constant 0 : index
    %c0_122 = arith.constant 0 : index
    %144 = vector.load %arg22[%c1_120, %c0_121, %c0_122] : memref<2x1x32xf32, #tpu.memory_space<vmem>>, vector<1x1x32xf32>
    %145 = vector.shape_cast %144 : vector<1x1x32xf32> to vector<1x32xf32>
    %146 = vector.broadcast %145 : vector<1x32xf32> to vector<64x32xf32>
    %147 = arith.addf %143, %146 : vector<64x32xf32>
    %148 = vector.shape_cast %97 : vector<64x32xf32> to vector<8x8x32xf32>
    %c1_123 = arith.constant 1 : index
    %c0_124 = arith.constant 0 : index
    %c0_125 = arith.constant 0 : index
    %c0_126 = arith.constant 0 : index
    %149 = vector.load %arg29[%c1_123, %c0_124, %c0_125, %c0_126] : memref<2x8x8x32xf32, #tpu.memory_space<vmem>>, vector<1x8x8x32xf32>
    %150 = vector.shape_cast %149 : vector<1x8x8x32xf32> to vector<8x8x32xf32>
    %151 = vector.shape_cast %148 : vector<8x8x32xf32> to vector<1x8x8x32xf32>
    tpu.vector_store %arg29[%c1_123, %c0_124, %c0_125, %c0_126], %151 {strides = array<i32>} : memref<2x8x8x32xf32, #tpu.memory_space<vmem>>, vector<1x8x8x32xf32>,
    %152 = vector.shape_cast %126 : vector<64x16xf32> to vector<8x8x16xf32>
    %c1_127 = arith.constant 1 : index
    %c0_128 = arith.constant 0 : index
    %c0_129 = arith.constant 0 : index
    %c0_130 = arith.constant 0 : index
    %153 = vector.load %arg30[%c1_127, %c0_128, %c0_129, %c0_130] : memref<2x8x8x16xf32, #tpu.memory_space<vmem>>, vector<1x8x8x16xf32>
    %154 = vector.shape_cast %153 : vector<1x8x8x16xf32> to vector<8x8x16xf32>
    %155 = vector.shape_cast %152 : vector<8x8x16xf32> to vector<1x8x8x16xf32>
    tpu.vector_store %arg30[%c1_127, %c0_128, %c0_129, %c0_130], %155 {strides = array<i32>} : memref<2x8x8x16xf32, #tpu.memory_space<vmem>>, vector<1x8x8x16xf32>,
    %156 = vector.shape_cast %133 : vector<64x32xf32> to vector<8x8x32xf32>
    %c1_131 = arith.constant 1 : index
    %c0_132 = arith.constant 0 : index
    %c0_133 = arith.constant 0 : index
    %c0_134 = arith.constant 0 : index
    %157 = vector.load %arg31[%c1_131, %c0_132, %c0_133, %c0_134] : memref<2x8x8x32xf32, #tpu.memory_space<vmem>>, vector<1x8x8x32xf32>
    %158 = vector.shape_cast %157 : vector<1x8x8x32xf32> to vector<8x8x32xf32>
    %159 = vector.shape_cast %156 : vector<8x8x32xf32> to vector<1x8x8x32xf32>
    tpu.vector_store %arg31[%c1_131, %c0_132, %c0_133, %c0_134], %159 {strides = array<i32>} : memref<2x8x8x32xf32, #tpu.memory_space<vmem>>, vector<1x8x8x32xf32>,
    %160 = vector.shape_cast %140 : vector<64x32xf32> to vector<8x8x32xf32>
    %c1_135 = arith.constant 1 : index
    %c0_136 = arith.constant 0 : index
    %c0_137 = arith.constant 0 : index
    %c0_138 = arith.constant 0 : index
    %161 = vector.load %arg32[%c1_135, %c0_136, %c0_137, %c0_138] : memref<2x8x8x32xf32, #tpu.memory_space<vmem>>, vector<1x8x8x32xf32>
    %162 = vector.shape_cast %161 : vector<1x8x8x32xf32> to vector<8x8x32xf32>
    %163 = vector.shape_cast %160 : vector<8x8x32xf32> to vector<1x8x8x32xf32>
    tpu.vector_store %arg32[%c1_135, %c0_136, %c0_137, %c0_138], %163 {strides = array<i32>} : memref<2x8x8x32xf32, #tpu.memory_space<vmem>>, vector<1x8x8x32xf32>,
    %164 = vector.shape_cast %147 : vector<64x32xf32> to vector<8x8x32xf32>
    %c1_139 = arith.constant 1 : index
    %c0_140 = arith.constant 0 : index
    %c0_141 = arith.constant 0 : index
    %c0_142 = arith.constant 0 : index
    %165 = vector.load %arg33[%c1_139, %c0_140, %c0_141, %c0_142] : memref<2x8x8x32xf32, #tpu.memory_space<vmem>>, vector<1x8x8x32xf32>
    %166 = vector.shape_cast %165 : vector<1x8x8x32xf32> to vector<8x8x32xf32>
    %167 = vector.shape_cast %164 : vector<8x8x32xf32> to vector<1x8x8x32xf32>
    tpu.vector_store %arg33[%c1_139, %c0_140, %c0_141, %c0_142], %167 {strides = array<i32>} : memref<2x8x8x32xf32, #tpu.memory_space<vmem>>, vector<1x8x8x32xf32>,
    %c0_143 = arith.constant 0 : index
    %c0_144 = arith.constant 0 : index
    %c0_145 = arith.constant 0 : index
    %168 = vector.load %arg1[%c0_143, %c0_144, %c0_145] : memref<8x8x16xf32, #tpu.memory_space<vmem>>, vector<1x8x16xf32>
    %169 = vector.shape_cast %168 : vector<1x8x16xf32> to vector<8x16xf32>
    %170 = vector.shape_cast %169 : vector<8x16xf32> to vector<1x8x16xf32>
    %cst_146 = arith.constant dense<0.000000e+00> : vector<1xf32>
    %171 = vector.multi_reduction <add>, %170, %cst_146 [1, 2] : vector<1x8x16xf32> to vector<1xf32>
    %172 = vector.shape_cast %171 : vector<1xf32> to vector<1x1x1xf32>
    %173 = vector.extract %172[0, 0, 0] : f32 from vector<1x1x1xf32>
    %cst_147 = arith.constant 9.99999974E-6 : f32
    %174 = arith.addf %173, %cst_147 : f32
    %cst_148 = arith.constant 1.000000e+00 : f32
    %175 = arith.divf %cst_148, %174 : f32
    %176 = vector.broadcast %175 : f32 to vector<8x16xf32>
    %177 = arith.mulf %169, %176 : vector<8x16xf32>
    %c0_149 = arith.constant 0 : index
    %c0_150 = arith.constant 0 : index
    %c0_151 = arith.constant 0 : index
    %178 = vector.load %arg34[%c0_149, %c0_150, %c0_151] : memref<8x8x16xf32, #tpu.memory_space<vmem>>, vector<1x8x16xf32>
    %179 = vector.shape_cast %178 : vector<1x8x16xf32> to vector<8x16xf32>
    %180 = vector.shape_cast %177 : vector<8x16xf32> to vector<1x8x16xf32>
    tpu.vector_store %arg34[%c0_149, %c0_150, %c0_151], %180 {strides = array<i32>} : memref<8x8x16xf32, #tpu.memory_space<vmem>>, vector<1x8x16xf32>,
    %c1_152 = arith.constant 1 : index
    %c0_153 = arith.constant 0 : index
    %c0_154 = arith.constant 0 : index
    %181 = vector.load %arg1[%c1_152, %c0_153, %c0_154] : memref<8x8x16xf32, #tpu.memory_space<vmem>>, vector<1x8x16xf32>
    %182 = vector.shape_cast %181 : vector<1x8x16xf32> to vector<8x16xf32>
    %183 = vector.shape_cast %182 : vector<8x16xf32> to vector<1x8x16xf32>
    %cst_155 = arith.constant dense<0.000000e+00> : vector<1xf32>
    %184 = vector.multi_reduction <add>, %183, %cst_155 [1, 2] : vector<1x8x16xf32> to vector<1xf32>
    %185 = vector.shape_cast %184 : vector<1xf32> to vector<1x1x1xf32>
    %186 = vector.extract %185[0, 0, 0] : f32 from vector<1x1x1xf32>
    %cst_156 = arith.constant 9.99999974E-6 : f32
    %187 = arith.addf %186, %cst_156 : f32
    %cst_157 = arith.constant 1.000000e+00 : f32
    %188 = arith.divf %cst_157, %187 : f32
    %189 = vector.broadcast %188 : f32 to vector<8x16xf32>
    %190 = arith.mulf %182, %189 : vector<8x16xf32>
    %c1_158 = arith.constant 1 : index
    %c0_159 = arith.constant 0 : index
    %c0_160 = arith.constant 0 : index
    %191 = vector.load %arg34[%c1_158, %c0_159, %c0_160] : memref<8x8x16xf32, #tpu.memory_space<vmem>>, vector<1x8x16xf32>
    %192 = vector.shape_cast %191 : vector<1x8x16xf32> to vector<8x16xf32>
    %193 = vector.shape_cast %190 : vector<8x16xf32> to vector<1x8x16xf32>
    tpu.vector_store %arg34[%c1_158, %c0_159, %c0_160], %193 {strides = array<i32>} : memref<8x8x16xf32, #tpu.memory_space<vmem>>, vector<1x8x16xf32>,
    %c2 = arith.constant 2 : index
    %c0_161 = arith.constant 0 : index
    %c0_162 = arith.constant 0 : index
    %194 = vector.load %arg1[%c2, %c0_161, %c0_162] : memref<8x8x16xf32, #tpu.memory_space<vmem>>, vector<1x8x16xf32>
    %195 = vector.shape_cast %194 : vector<1x8x16xf32> to vector<8x16xf32>
    %196 = vector.shape_cast %195 : vector<8x16xf32> to vector<1x8x16xf32>
    %cst_163 = arith.constant dense<0.000000e+00> : vector<1xf32>
    %197 = vector.multi_reduction <add>, %196, %cst_163 [1, 2] : vector<1x8x16xf32> to vector<1xf32>
    %198 = vector.shape_cast %197 : vector<1xf32> to vector<1x1x1xf32>
    %199 = vector.extract %198[0, 0, 0] : f32 from vector<1x1x1xf32>
    %cst_164 = arith.constant 9.99999974E-6 : f32
    %200 = arith.addf %199, %cst_164 : f32
    %cst_165 = arith.constant 1.000000e+00 : f32
    %201 = arith.divf %cst_165, %200 : f32
    %202 = vector.broadcast %201 : f32 to vector<8x16xf32>
    %203 = arith.mulf %195, %202 : vector<8x16xf32>
    %c2_166 = arith.constant 2 : index
    %c0_167 = arith.constant 0 : index
    %c0_168 = arith.constant 0 : index
    %204 = vector.load %arg34[%c2_166, %c0_167, %c0_168] : memref<8x8x16xf32, #tpu.memory_space<vmem>>, vector<1x8x16xf32>
    %205 = vector.shape_cast %204 : vector<1x8x16xf32> to vector<8x16xf32>
    %206 = vector.shape_cast %203 : vector<8x16xf32> to vector<1x8x16xf32>
    tpu.vector_store %arg34[%c2_166, %c0_167, %c0_168], %206 {strides = array<i32>} : memref<8x8x16xf32, #tpu.memory_space<vmem>>, vector<1x8x16xf32>,
    %c3 = arith.constant 3 : index
    %c0_169 = arith.constant 0 : index
    %c0_170 = arith.constant 0 : index
    %207 = vector.load %arg1[%c3, %c0_169, %c0_170] : memref<8x8x16xf32, #tpu.memory_space<vmem>>, vector<1x8x16xf32>
    %208 = vector.shape_cast %207 : vector<1x8x16xf32> to vector<8x16xf32>
    %209 = vector.shape_cast %208 : vector<8x16xf32> to vector<1x8x16xf32>
    %cst_171 = arith.constant dense<0.000000e+00> : vector<1xf32>
    %210 = vector.multi_reduction <add>, %209, %cst_171 [1, 2] : vector<1x8x16xf32> to vector<1xf32>
    %211 = vector.shape_cast %210 : vector<1xf32> to vector<1x1x1xf32>
    %212 = vector.extract %211[0, 0, 0] : f32 from vector<1x1x1xf32>
    %cst_172 = arith.constant 9.99999974E-6 : f32
    %213 = arith.addf %212, %cst_172 : f32
    %cst_173 = arith.constant 1.000000e+00 : f32
    %214 = arith.divf %cst_173, %213 : f32
    %215 = vector.broadcast %214 : f32 to vector<8x16xf32>
    %216 = arith.mulf %208, %215 : vector<8x16xf32>
    %c3_174 = arith.constant 3 : index
    %c0_175 = arith.constant 0 : index
    %c0_176 = arith.constant 0 : index
    %217 = vector.load %arg34[%c3_174, %c0_175, %c0_176] : memref<8x8x16xf32, #tpu.memory_space<vmem>>, vector<1x8x16xf32>
    %218 = vector.shape_cast %217 : vector<1x8x16xf32> to vector<8x16xf32>
    %219 = vector.shape_cast %216 : vector<8x16xf32> to vector<1x8x16xf32>
    tpu.vector_store %arg34[%c3_174, %c0_175, %c0_176], %219 {strides = array<i32>} : memref<8x8x16xf32, #tpu.memory_space<vmem>>, vector<1x8x16xf32>,
    %c4 = arith.constant 4 : index
    %c0_177 = arith.constant 0 : index
    %c0_178 = arith.constant 0 : index
    %220 = vector.load %arg1[%c4, %c0_177, %c0_178] : memref<8x8x16xf32, #tpu.memory_space<vmem>>, vector<1x8x16xf32>
    %221 = vector.shape_cast %220 : vector<1x8x16xf32> to vector<8x16xf32>
    %222 = vector.shape_cast %221 : vector<8x16xf32> to vector<1x8x16xf32>
    %cst_179 = arith.constant dense<0.000000e+00> : vector<1xf32>
    %223 = vector.multi_reduction <add>, %222, %cst_179 [1, 2] : vector<1x8x16xf32> to vector<1xf32>
    %224 = vector.shape_cast %223 : vector<1xf32> to vector<1x1x1xf32>
    %225 = vector.extract %224[0, 0, 0] : f32 from vector<1x1x1xf32>
    %cst_180 = arith.constant 9.99999974E-6 : f32
    %226 = arith.addf %225, %cst_180 : f32
    %cst_181 = arith.constant 1.000000e+00 : f32
    %227 = arith.divf %cst_181, %226 : f32
    %228 = vector.broadcast %227 : f32 to vector<8x16xf32>
    %229 = arith.mulf %221, %228 : vector<8x16xf32>
    %c4_182 = arith.constant 4 : index
    %c0_183 = arith.constant 0 : index
    %c0_184 = arith.constant 0 : index
    %230 = vector.load %arg34[%c4_182, %c0_183, %c0_184] : memref<8x8x16xf32, #tpu.memory_space<vmem>>, vector<1x8x16xf32>
    %231 = vector.shape_cast %230 : vector<1x8x16xf32> to vector<8x16xf32>
    %232 = vector.shape_cast %229 : vector<8x16xf32> to vector<1x8x16xf32>
    tpu.vector_store %arg34[%c4_182, %c0_183, %c0_184], %232 {strides = array<i32>} : memref<8x8x16xf32, #tpu.memory_space<vmem>>, vector<1x8x16xf32>,
    %c5 = arith.constant 5 : index
    %c0_185 = arith.constant 0 : index
    %c0_186 = arith.constant 0 : index
    %233 = vector.load %arg1[%c5, %c0_185, %c0_186] : memref<8x8x16xf32, #tpu.memory_space<vmem>>, vector<1x8x16xf32>
    %234 = vector.shape_cast %233 : vector<1x8x16xf32> to vector<8x16xf32>
    %235 = vector.shape_cast %234 : vector<8x16xf32> to vector<1x8x16xf32>
    %cst_187 = arith.constant dense<0.000000e+00> : vector<1xf32>
    %236 = vector.multi_reduction <add>, %235, %cst_187 [1, 2] : vector<1x8x16xf32> to vector<1xf32>
    %237 = vector.shape_cast %236 : vector<1xf32> to vector<1x1x1xf32>
    %238 = vector.extract %237[0, 0, 0] : f32 from vector<1x1x1xf32>
    %cst_188 = arith.constant 9.99999974E-6 : f32
    %239 = arith.addf %238, %cst_188 : f32
    %cst_189 = arith.constant 1.000000e+00 : f32
    %240 = arith.divf %cst_189, %239 : f32
    %241 = vector.broadcast %240 : f32 to vector<8x16xf32>
    %242 = arith.mulf %234, %241 : vector<8x16xf32>
    %c5_190 = arith.constant 5 : index
    %c0_191 = arith.constant 0 : index
    %c0_192 = arith.constant 0 : index
    %243 = vector.load %arg34[%c5_190, %c0_191, %c0_192] : memref<8x8x16xf32, #tpu.memory_space<vmem>>, vector<1x8x16xf32>
    %244 = vector.shape_cast %243 : vector<1x8x16xf32> to vector<8x16xf32>
    %245 = vector.shape_cast %242 : vector<8x16xf32> to vector<1x8x16xf32>
    tpu.vector_store %arg34[%c5_190, %c0_191, %c0_192], %245 {strides = array<i32>} : memref<8x8x16xf32, #tpu.memory_space<vmem>>, vector<1x8x16xf32>,
    %c6 = arith.constant 6 : index
    %c0_193 = arith.constant 0 : index
    %c0_194 = arith.constant 0 : index
    %246 = vector.load %arg1[%c6, %c0_193, %c0_194] : memref<8x8x16xf32, #tpu.memory_space<vmem>>, vector<1x8x16xf32>
    %247 = vector.shape_cast %246 : vector<1x8x16xf32> to vector<8x16xf32>
    %248 = vector.shape_cast %247 : vector<8x16xf32> to vector<1x8x16xf32>
    %cst_195 = arith.constant dense<0.000000e+00> : vector<1xf32>
    %249 = vector.multi_reduction <add>, %248, %cst_195 [1, 2] : vector<1x8x16xf32> to vector<1xf32>
    %250 = vector.shape_cast %249 : vector<1xf32> to vector<1x1x1xf32>
    %251 = vector.extract %250[0, 0, 0] : f32 from vector<1x1x1xf32>
    %cst_196 = arith.constant 9.99999974E-6 : f32
    %252 = arith.addf %251, %cst_196 : f32
    %cst_197 = arith.constant 1.000000e+00 : f32
    %253 = arith.divf %cst_197, %252 : f32
    %254 = vector.broadcast %253 : f32 to vector<8x16xf32>
    %255 = arith.mulf %247, %254 : vector<8x16xf32>
    %c6_198 = arith.constant 6 : index
    %c0_199 = arith.constant 0 : index
    %c0_200 = arith.constant 0 : index
    %256 = vector.load %arg34[%c6_198, %c0_199, %c0_200] : memref<8x8x16xf32, #tpu.memory_space<vmem>>, vector<1x8x16xf32>
    %257 = vector.shape_cast %256 : vector<1x8x16xf32> to vector<8x16xf32>
    %258 = vector.shape_cast %255 : vector<8x16xf32> to vector<1x8x16xf32>
    tpu.vector_store %arg34[%c6_198, %c0_199, %c0_200], %258 {strides = array<i32>} : memref<8x8x16xf32, #tpu.memory_space<vmem>>, vector<1x8x16xf32>,
    %c7 = arith.constant 7 : index
    %c0_201 = arith.constant 0 : index
    %c0_202 = arith.constant 0 : index
    %259 = vector.load %arg1[%c7, %c0_201, %c0_202] : memref<8x8x16xf32, #tpu.memory_space<vmem>>, vector<1x8x16xf32>
    %260 = vector.shape_cast %259 : vector<1x8x16xf32> to vector<8x16xf32>
    %261 = vector.shape_cast %260 : vector<8x16xf32> to vector<1x8x16xf32>
    %cst_203 = arith.constant dense<0.000000e+00> : vector<1xf32>
    %262 = vector.multi_reduction <add>, %261, %cst_203 [1, 2] : vector<1x8x16xf32> to vector<1xf32>
    %263 = vector.shape_cast %262 : vector<1xf32> to vector<1x1x1xf32>
    %264 = vector.extract %263[0, 0, 0] : f32 from vector<1x1x1xf32>
    %cst_204 = arith.constant 9.99999974E-6 : f32
    %265 = arith.addf %264, %cst_204 : f32
    %cst_205 = arith.constant 1.000000e+00 : f32
    %266 = arith.divf %cst_205, %265 : f32
    %267 = vector.broadcast %266 : f32 to vector<8x16xf32>
    %268 = arith.mulf %260, %267 : vector<8x16xf32>
    %c7_206 = arith.constant 7 : index
    %c0_207 = arith.constant 0 : index
    %c0_208 = arith.constant 0 : index
    %269 = vector.load %arg34[%c7_206, %c0_207, %c0_208] : memref<8x8x16xf32, #tpu.memory_space<vmem>>, vector<1x8x16xf32>
    %270 = vector.shape_cast %269 : vector<1x8x16xf32> to vector<8x16xf32>
    %271 = vector.shape_cast %268 : vector<8x16xf32> to vector<1x8x16xf32>
    tpu.vector_store %arg34[%c7_206, %c0_207, %c0_208], %271 {strides = array<i32>} : memref<8x8x16xf32, #tpu.memory_space<vmem>>, vector<1x8x16xf32>,
    %c0_209 = arith.constant 0 : index
    %c0_210 = arith.constant 0 : index
    %c0_211 = arith.constant 0 : index
    %272 = vector.load %arg8[%c0_209, %c0_210, %c0_211] : memref<2x1x16xf32, #tpu.memory_space<vmem>>, vector<1x1x16xf32>
    %273 = vector.shape_cast %272 : vector<1x1x16xf32> to vector<1x16xf32>
    %274 = vector.shape_cast %273 : vector<1x16xf32> to vector<1x16xf32>
    %275 = vector.broadcast %274 : vector<1x16xf32> to vector<8x16xf32>
    %c1_212 = arith.constant 1 : index
    %c0_213 = arith.constant 0 : index
    %c0_214 = arith.constant 0 : index
    %276 = vector.load %arg8[%c1_212, %c0_213, %c0_214] : memref<2x1x16xf32, #tpu.memory_space<vmem>>, vector<1x1x16xf32>
    %277 = vector.shape_cast %276 : vector<1x1x16xf32> to vector<1x16xf32>
    %278 = vector.shape_cast %277 : vector<1x16xf32> to vector<1x16xf32>
    %279 = vector.broadcast %278 : vector<1x16xf32> to vector<8x16xf32>
    %c0_215 = arith.constant 0 : index
    %c0_216 = arith.constant 0 : index
    %c0_217 = arith.constant 0 : index
    %280 = vector.load %arg10[%c0_215, %c0_216, %c0_217] : memref<2x1x16xf32, #tpu.memory_space<vmem>>, vector<1x1x16xf32>
    %281 = vector.shape_cast %280 : vector<1x1x16xf32> to vector<1x16xf32>
    %282 = vector.shape_cast %281 : vector<1x16xf32> to vector<1x16xf32>
    %283 = vector.broadcast %282 : vector<1x16xf32> to vector<8x16xf32>
    %c1_218 = arith.constant 1 : index
    %c0_219 = arith.constant 0 : index
    %c0_220 = arith.constant 0 : index
    %284 = vector.load %arg10[%c1_218, %c0_219, %c0_220] : memref<2x1x16xf32, #tpu.memory_space<vmem>>, vector<1x1x16xf32>
    %285 = vector.shape_cast %284 : vector<1x1x16xf32> to vector<1x16xf32>
    %286 = vector.shape_cast %285 : vector<1x16xf32> to vector<1x16xf32>
    %287 = vector.broadcast %286 : vector<1x16xf32> to vector<8x16xf32>
    %c0_221 = arith.constant 0 : index
    %c0_222 = arith.constant 0 : index
    %c0_223 = arith.constant 0 : index
    %288 = vector.load %arg23[%c0_221, %c0_222, %c0_223] : memref<2x1x32xf32, #tpu.memory_space<vmem>>, vector<1x1x32xf32>
    %289 = vector.shape_cast %288 : vector<1x1x32xf32> to vector<1x32xf32>
    %290 = vector.shape_cast %289 : vector<1x32xf32> to vector<1x32xf32>
    %291 = vector.broadcast %290 : vector<1x32xf32> to vector<8x32xf32>
    %c1_224 = arith.constant 1 : index
    %c0_225 = arith.constant 0 : index
    %c0_226 = arith.constant 0 : index
    %292 = vector.load %arg23[%c1_224, %c0_225, %c0_226] : memref<2x1x32xf32, #tpu.memory_space<vmem>>, vector<1x1x32xf32>
    %293 = vector.shape_cast %292 : vector<1x1x32xf32> to vector<1x32xf32>
    %294 = vector.shape_cast %293 : vector<1x32xf32> to vector<1x32xf32>
    %295 = vector.broadcast %294 : vector<1x32xf32> to vector<8x32xf32>
    %cst_227 = arith.constant 0.000000e+00 : f32
    %296 = vector.broadcast %cst_227 : f32 to vector<8x32xf32>
    %cst_228 = arith.constant 0.000000e+00 : f32
    %297 = vector.broadcast %cst_228 : f32 to vector<8x32xf32>
    %cst_229 = arith.constant 0.000000e+00 : f32
    %298 = vector.broadcast %cst_229 : f32 to vector<8x16xf32>
    %c0_230 = arith.constant 0 : index
    %c0_231 = arith.constant 0 : index
    %c0_232 = arith.constant 0 : index
    %299 = vector.load %arg0[%c0_230, %c0_231, %c0_232] : memref<8x8x16xf32, #tpu.memory_space<vmem>>, vector<1x8x16xf32>
    %300 = vector.shape_cast %299 : vector<1x8x16xf32> to vector<8x16xf32>
    %c0_233 = arith.constant 0 : index
    %c0_234 = arith.constant 0 : index
    %c0_235 = arith.constant 0 : index
    %301 = vector.load %arg1[%c0_233, %c0_234, %c0_235] : memref<8x8x16xf32, #tpu.memory_space<vmem>>, vector<1x8x16xf32>
    %302 = vector.shape_cast %301 : vector<1x8x16xf32> to vector<8x16xf32>
    %c0_236 = arith.constant 0 : index
    %c0_237 = arith.constant 0 : index
    %c0_238 = arith.constant 0 : index
    %303 = vector.load %arg34[%c0_236, %c0_237, %c0_238] : memref<8x8x16xf32, #tpu.memory_space<vmem>>, vector<1x8x16xf32>
    %304 = vector.shape_cast %303 : vector<1x8x16xf32> to vector<8x16xf32>
    %c0_239 = arith.constant 0 : index
    %c0_240 = arith.constant 0 : index
    %c0_241 = arith.constant 0 : index
    %c0_242 = arith.constant 0 : index
    %305 = vector.load %arg29[%c0_239, %c0_240, %c0_241, %c0_242] : memref<2x8x8x32xf32, #tpu.memory_space<vmem>>, vector<1x1x8x32xf32>
    %306 = vector.shape_cast %305 : vector<1x1x8x32xf32> to vector<8x32xf32>
    %c0_243 = arith.constant 0 : index
    %c0_244 = arith.constant 0 : index
    %c0_245 = arith.constant 0 : index
    %c0_246 = arith.constant 0 : index
    %307 = vector.load %arg30[%c0_243, %c0_244, %c0_245, %c0_246] : memref<2x8x8x16xf32, #tpu.memory_space<vmem>>, vector<1x1x8x16xf32>
    %308 = vector.shape_cast %307 : vector<1x1x8x16xf32> to vector<8x16xf32>
    %309 = arith.mulf %296, %306 : vector<8x32xf32>
    %c0_247 = arith.constant 0 : index
    %c0_248 = arith.constant 0 : index
    %c0_249 = arith.constant 0 : index
    %310 = vector.load %arg7[%c0_247, %c0_248, %c0_249] : memref<2x32x16xf32, #tpu.memory_space<vmem>>, vector<1x32x16xf32>
    %311 = vector.shape_cast %310 : vector<1x32x16xf32> to vector<32x16xf32>
    %cst_250 = arith.constant dense<0.000000e+00> : vector<8x16xf32>
    %312 = tpu.matmul %309, %311, %cst_250 {dimension_numbers = #tpu.dot_dimension_numbers<[1], [0], [0], [1], [0, 0, 1, 1], [], []>} : vector<8x32xf32>, vector<32x16xf32>, vector<8x16xf32> -> vector<8x16xf32>
    %313 = arith.addf %312, %275 : vector<8x16xf32>
    %314 = arith.mulf %302, %300 : vector<8x16xf32>
    %cst_251 = arith.constant 1.000000e+00 : f32
    %315 = vector.broadcast %cst_251 : f32 to vector<8x16xf32>
    %316 = arith.subf %315, %302 : vector<8x16xf32>
    %317 = arith.mulf %316, %313 : vector<8x16xf32>
    %318 = arith.addf %314, %317 : vector<8x16xf32>
    %c0_252 = arith.constant 0 : index
    %c0_253 = arith.constant 0 : index
    %c0_254 = arith.constant 0 : index
    %319 = vector.load %arg9[%c0_252, %c0_253, %c0_254] : memref<2x16x16xf32, #tpu.memory_space<vmem>>, vector<1x16x16xf32>
    %320 = vector.shape_cast %319 : vector<1x16x16xf32> to vector<16x16xf32>
    %cst_255 = arith.constant dense<0.000000e+00> : vector<8x16xf32>
    %321 = tpu.matmul %318, %320, %cst_255 {dimension_numbers = #tpu.dot_dimension_numbers<[1], [0], [0], [1], [0, 0, 1, 1], [], []>} : vector<8x16xf32>, vector<16x16xf32>, vector<8x16xf32> -> vector<8x16xf32>
    %322 = arith.addf %321, %283 : vector<8x16xf32>
    %323 = arith.mulf %308, %322 : vector<8x16xf32>
    %cst_256 = arith.constant 1.000000e+00 : f32
    %324 = vector.broadcast %cst_256 : f32 to vector<8x16xf32>
    %325 = arith.subf %324, %308 : vector<8x16xf32>
    %326 = arith.mulf %325, %313 : vector<8x16xf32>
    %327 = arith.addf %323, %326 : vector<8x16xf32>
    %328 = arith.mulf %316, %327 : vector<8x16xf32>
    %329 = arith.addf %314, %328 : vector<8x16xf32>
    %c0_257 = arith.constant 0 : index
    %c0_258 = arith.constant 0 : index
    %c0_259 = arith.constant 0 : index
    %c0_260 = arith.constant 0 : index
    %330 = vector.load %arg35[%c0_257, %c0_258, %c0_259, %c0_260] : memref<2x8x8x16xf32, #tpu.memory_space<vmem>>, vector<1x1x8x16xf32>
    %331 = vector.shape_cast %330 : vector<1x1x8x16xf32> to vector<8x16xf32>
    %332 = vector.shape_cast %329 : vector<8x16xf32> to vector<1x1x8x16xf32>
    tpu.vector_store %arg35[%c0_257, %c0_258, %c0_259, %c0_260], %332 {strides = array<i32>} : memref<2x8x8x16xf32, #tpu.memory_space<vmem>>, vector<1x1x8x16xf32>,
    %333 = arith.subf %300, %313 : vector<8x16xf32>
    %334 = math.absf %333 : vector<8x16xf32>
    %335 = arith.subf %300, %322 : vector<8x16xf32>
    %336 = math.absf %335 : vector<8x16xf32>
    %337 = arith.addf %334, %336 : vector<8x16xf32>
    %338 = arith.subf %300, %327 : vector<8x16xf32>
    %339 = math.absf %338 : vector<8x16xf32>
    %340 = arith.addf %337, %339 : vector<8x16xf32>
    %341 = arith.mulf %340, %304 : vector<8x16xf32>
    %342 = arith.addf %298, %341 : vector<8x16xf32>
    %c0_261 = arith.constant 0 : index
    %c0_262 = arith.constant 0 : index
    %c0_263 = arith.constant 0 : index
    %343 = vector.load %arg24[%c0_261, %c0_262, %c0_263] : memref<2x32x32xf32, #tpu.memory_space<vmem>>, vector<1x32x32xf32>
    %344 = vector.shape_cast %343 : vector<1x32x32xf32> to vector<32x32xf32>
    %cst_264 = arith.constant dense<0.000000e+00> : vector<8x32xf32>
    %345 = tpu.matmul %309, %344, %cst_264 {dimension_numbers = #tpu.dot_dimension_numbers<[1], [0], [0], [1], [0, 0, 1, 1], [], []>} : vector<8x32xf32>, vector<32x32xf32>, vector<8x32xf32> -> vector<8x32xf32>
    %c0_265 = arith.constant 0 : index
    %c0_266 = arith.constant 0 : index
    %c0_267 = arith.constant 0 : index
    %346 = vector.load %arg25[%c0_265, %c0_266, %c0_267] : memref<2x32x32xf32, #tpu.memory_space<vmem>>, vector<1x32x32xf32>
    %347 = vector.shape_cast %346 : vector<1x32x32xf32> to vector<32x32xf32>
    %cst_268 = arith.constant dense<0.000000e+00> : vector<8x32xf32>
    %348 = tpu.matmul %309, %347, %cst_268 {dimension_numbers = #tpu.dot_dimension_numbers<[1], [0], [0], [1], [0, 0, 1, 1], [], []>} : vector<8x32xf32>, vector<32x32xf32>, vector<8x32xf32> -> vector<8x32xf32>
    %c0_269 = arith.constant 0 : index
    %c0_270 = arith.constant 0 : index
    %c0_271 = arith.constant 0 : index
    %349 = vector.load %arg26[%c0_269, %c0_270, %c0_271] : memref<2x32x32xf32, #tpu.memory_space<vmem>>, vector<1x32x32xf32>
    %350 = vector.shape_cast %349 : vector<1x32x32xf32> to vector<32x32xf32>
    %cst_272 = arith.constant dense<0.000000e+00> : vector<8x32xf32>
    %351 = tpu.matmul %309, %350, %cst_272 {dimension_numbers = #tpu.dot_dimension_numbers<[1], [0], [0], [1], [0, 0, 1, 1], [], []>} : vector<8x32xf32>, vector<32x32xf32>, vector<8x32xf32> -> vector<8x32xf32>
    %352 = arith.addf %351, %291 : vector<8x32xf32>
    %c0_273 = arith.constant 0 : index
    %c0_274 = arith.constant 0 : index
    %c0_275 = arith.constant 0 : index
    %353 = vector.load %arg14[%c0_273, %c0_274, %c0_275] : memref<2x16x32xf32, #tpu.memory_space<vmem>>, vector<1x16x32xf32>
    %354 = vector.shape_cast %353 : vector<1x16x32xf32> to vector<16x32xf32>
    %cst_276 = arith.constant dense<0.000000e+00> : vector<8x32xf32>
    %355 = tpu.matmul %329, %354, %cst_276 {dimension_numbers = #tpu.dot_dimension_numbers<[1], [0], [0], [1], [0, 0, 1, 1], [], []>} : vector<8x16xf32>, vector<16x32xf32>, vector<8x32xf32> -> vector<8x32xf32>
    %c0_277 = arith.constant 0 : index
    %c0_278 = arith.constant 0 : index
    %c0_279 = arith.constant 0 : index
    %c0_280 = arith.constant 0 : index
    %356 = vector.load %arg31[%c0_277, %c0_278, %c0_279, %c0_280] : memref<2x8x8x32xf32, #tpu.memory_space<vmem>>, vector<1x1x8x32xf32>
    %357 = vector.shape_cast %356 : vector<1x1x8x32xf32> to vector<8x32xf32>
    %358 = arith.addf %355, %357 : vector<8x32xf32>
    %c0_281 = arith.constant 0 : index
    %c0_282 = arith.constant 0 : index
    %c0_283 = arith.constant 0 : index
    %359 = vector.load %arg15[%c0_281, %c0_282, %c0_283] : memref<2x16x32xf32, #tpu.memory_space<vmem>>, vector<1x16x32xf32>
    %360 = vector.shape_cast %359 : vector<1x16x32xf32> to vector<16x32xf32>
    %cst_284 = arith.constant dense<0.000000e+00> : vector<8x32xf32>
    %361 = tpu.matmul %329, %360, %cst_284 {dimension_numbers = #tpu.dot_dimension_numbers<[1], [0], [0], [1], [0, 0, 1, 1], [], []>} : vector<8x16xf32>, vector<16x32xf32>, vector<8x32xf32> -> vector<8x32xf32>
    %c0_285 = arith.constant 0 : index
    %c0_286 = arith.constant 0 : index
    %c0_287 = arith.constant 0 : index
    %c0_288 = arith.constant 0 : index
    %362 = vector.load %arg32[%c0_285, %c0_286, %c0_287, %c0_288] : memref<2x8x8x32xf32, #tpu.memory_space<vmem>>, vector<1x1x8x32xf32>
    %363 = vector.shape_cast %362 : vector<1x1x8x32xf32> to vector<8x32xf32>
    %364 = arith.addf %361, %363 : vector<8x32xf32>
    %c0_289 = arith.constant 0 : index
    %c0_290 = arith.constant 0 : index
    %c0_291 = arith.constant 0 : index
    %365 = vector.load %arg16[%c0_289, %c0_290, %c0_291] : memref<2x16x32xf32, #tpu.memory_space<vmem>>, vector<1x16x32xf32>
    %366 = vector.shape_cast %365 : vector<1x16x32xf32> to vector<16x32xf32>
    %cst_292 = arith.constant dense<0.000000e+00> : vector<8x32xf32>
    %367 = tpu.matmul %329, %366, %cst_292 {dimension_numbers = #tpu.dot_dimension_numbers<[1], [0], [0], [1], [0, 0, 1, 1], [], []>} : vector<8x16xf32>, vector<16x32xf32>, vector<8x32xf32> -> vector<8x32xf32>
    %c0_293 = arith.constant 0 : index
    %c0_294 = arith.constant 0 : index
    %c0_295 = arith.constant 0 : index
    %c0_296 = arith.constant 0 : index
    %368 = vector.load %arg33[%c0_293, %c0_294, %c0_295, %c0_296] : memref<2x8x8x32xf32, #tpu.memory_space<vmem>>, vector<1x1x8x32xf32>
    %369 = vector.shape_cast %368 : vector<1x1x8x32xf32> to vector<8x32xf32>
    %370 = arith.addf %367, %369 : vector<8x32xf32>
    %371 = arith.addf %358, %345 : vector<8x32xf32>
    %372 = arith.negf %371 : vector<8x32xf32>
    %373 = math.exp %372 : vector<8x32xf32>
    %cst_297 = arith.constant 1.000000e+00 : f32
    %374 = vector.broadcast %cst_297 : f32 to vector<8x32xf32>
    %375 = arith.addf %374, %373 : vector<8x32xf32>
    %376 = arith.divf %374, %375 : vector<8x32xf32>
    %377 = arith.addf %364, %348 : vector<8x32xf32>
    %378 = arith.negf %377 : vector<8x32xf32>
    %379 = math.exp %378 : vector<8x32xf32>
    %cst_298 = arith.constant 1.000000e+00 : f32
    %380 = vector.broadcast %cst_298 : f32 to vector<8x32xf32>
    %381 = arith.addf %380, %379 : vector<8x32xf32>
    %382 = arith.divf %380, %381 : vector<8x32xf32>
    %383 = arith.mulf %376, %352 : vector<8x32xf32>
    %384 = arith.addf %370, %383 : vector<8x32xf32>
    %385 = math.tanh %384 : vector<8x32xf32>
    %cst_299 = arith.constant 1.000000e+00 : f32
    %386 = vector.broadcast %cst_299 : f32 to vector<8x32xf32>
    %387 = arith.subf %386, %382 : vector<8x32xf32>
    %388 = arith.mulf %387, %385 : vector<8x32xf32>
    %389 = arith.mulf %382, %309 : vector<8x32xf32>
    %390 = arith.addf %388, %389 : vector<8x32xf32>
    %c7_300 = arith.constant 7 : index
    %c0_301 = arith.constant 0 : index
    %c0_302 = arith.constant 0 : index
    %391 = vector.load %arg0[%c7_300, %c0_301, %c0_302] : memref<8x8x16xf32, #tpu.memory_space<vmem>>, vector<1x8x16xf32>
    %392 = vector.shape_cast %391 : vector<1x8x16xf32> to vector<8x16xf32>
    %c7_303 = arith.constant 7 : index
    %c0_304 = arith.constant 0 : index
    %c0_305 = arith.constant 0 : index
    %393 = vector.load %arg1[%c7_303, %c0_304, %c0_305] : memref<8x8x16xf32, #tpu.memory_space<vmem>>, vector<1x8x16xf32>
    %394 = vector.shape_cast %393 : vector<1x8x16xf32> to vector<8x16xf32>
    %c7_306 = arith.constant 7 : index
    %c0_307 = arith.constant 0 : index
    %c0_308 = arith.constant 0 : index
    %395 = vector.load %arg34[%c7_306, %c0_307, %c0_308] : memref<8x8x16xf32, #tpu.memory_space<vmem>>, vector<1x8x16xf32>
    %396 = vector.shape_cast %395 : vector<1x8x16xf32> to vector<8x16xf32>
    %c1_309 = arith.constant 1 : index
    %c7_310 = arith.constant 7 : index
    %c0_311 = arith.constant 0 : index
    %c0_312 = arith.constant 0 : index
    %397 = vector.load %arg29[%c1_309, %c7_310, %c0_311, %c0_312] : memref<2x8x8x32xf32, #tpu.memory_space<vmem>>, vector<1x1x8x32xf32>
    %398 = vector.shape_cast %397 : vector<1x1x8x32xf32> to vector<8x32xf32>
    %c1_313 = arith.constant 1 : index
    %c7_314 = arith.constant 7 : index
    %c0_315 = arith.constant 0 : index
    %c0_316 = arith.constant 0 : index
    %399 = vector.load %arg30[%c1_313, %c7_314, %c0_315, %c0_316] : memref<2x8x8x16xf32, #tpu.memory_space<vmem>>, vector<1x1x8x16xf32>
    %400 = vector.shape_cast %399 : vector<1x1x8x16xf32> to vector<8x16xf32>
    %401 = arith.mulf %297, %398 : vector<8x32xf32>
    %c1_317 = arith.constant 1 : index
    %c0_318 = arith.constant 0 : index
    %c0_319 = arith.constant 0 : index
    %402 = vector.load %arg7[%c1_317, %c0_318, %c0_319] : memref<2x32x16xf32, #tpu.memory_space<vmem>>, vector<1x32x16xf32>
    %403 = vector.shape_cast %402 : vector<1x32x16xf32> to vector<32x16xf32>
    %cst_320 = arith.constant dense<0.000000e+00> : vector<8x16xf32>
    %404 = tpu.matmul %401, %403, %cst_320 {dimension_numbers = #tpu.dot_dimension_numbers<[1], [0], [0], [1], [0, 0, 1, 1], [], []>} : vector<8x32xf32>, vector<32x16xf32>, vector<8x16xf32> -> vector<8x16xf32>
    %405 = arith.addf %404, %279 : vector<8x16xf32>
    %406 = arith.mulf %394, %392 : vector<8x16xf32>
    %cst_321 = arith.constant 1.000000e+00 : f32
    %407 = vector.broadcast %cst_321 : f32 to vector<8x16xf32>
    %408 = arith.subf %407, %394 : vector<8x16xf32>
    %409 = arith.mulf %408, %405 : vector<8x16xf32>
    %410 = arith.addf %406, %409 : vector<8x16xf32>
    %c1_322 = arith.constant 1 : index
    %c0_323 = arith.constant 0 : index
    %c0_324 = arith.constant 0 : index
    %411 = vector.load %arg9[%c1_322, %c0_323, %c0_324] : memref<2x16x16xf32, #tpu.memory_space<vmem>>, vector<1x16x16xf32>
    %412 = vector.shape_cast %411 : vector<1x16x16xf32> to vector<16x16xf32>
    %cst_325 = arith.constant dense<0.000000e+00> : vector<8x16xf32>
    %413 = tpu.matmul %410, %412, %cst_325 {dimension_numbers = #tpu.dot_dimension_numbers<[1], [0], [0], [1], [0, 0, 1, 1], [], []>} : vector<8x16xf32>, vector<16x16xf32>, vector<8x16xf32> -> vector<8x16xf32>
    %414 = arith.addf %413, %287 : vector<8x16xf32>
    %415 = arith.mulf %400, %414 : vector<8x16xf32>
    %cst_326 = arith.constant 1.000000e+00 : f32
    %416 = vector.broadcast %cst_326 : f32 to vector<8x16xf32>
    %417 = arith.subf %416, %400 : vector<8x16xf32>
    %418 = arith.mulf %417, %405 : vector<8x16xf32>
    %419 = arith.addf %415, %418 : vector<8x16xf32>
    %420 = arith.mulf %408, %419 : vector<8x16xf32>
    %421 = arith.addf %406, %420 : vector<8x16xf32>
    %c1_327 = arith.constant 1 : index
    %c7_328 = arith.constant 7 : index
    %c0_329 = arith.constant 0 : index
    %c0_330 = arith.constant 0 : index
    %422 = vector.load %arg35[%c1_327, %c7_328, %c0_329, %c0_330] : memref<2x8x8x16xf32, #tpu.memory_space<vmem>>, vector<1x1x8x16xf32>
    %423 = vector.shape_cast %422 : vector<1x1x8x16xf32> to vector<8x16xf32>
    %424 = vector.shape_cast %421 : vector<8x16xf32> to vector<1x1x8x16xf32>
    tpu.vector_store %arg35[%c1_327, %c7_328, %c0_329, %c0_330], %424 {strides = array<i32>} : memref<2x8x8x16xf32, #tpu.memory_space<vmem>>, vector<1x1x8x16xf32>,
    %425 = arith.subf %392, %405 : vector<8x16xf32>
    %426 = math.absf %425 : vector<8x16xf32>
    %427 = arith.subf %392, %414 : vector<8x16xf32>
    %428 = math.absf %427 : vector<8x16xf32>
    %429 = arith.addf %426, %428 : vector<8x16xf32>
    %430 = arith.subf %392, %419 : vector<8x16xf32>
    %431 = math.absf %430 : vector<8x16xf32>
    %432 = arith.addf %429, %431 : vector<8x16xf32>
    %433 = arith.mulf %432, %396 : vector<8x16xf32>
    %434 = arith.addf %342, %433 : vector<8x16xf32>
    %c1_331 = arith.constant 1 : index
    %c0_332 = arith.constant 0 : index
    %c0_333 = arith.constant 0 : index
    %435 = vector.load %arg24[%c1_331, %c0_332, %c0_333] : memref<2x32x32xf32, #tpu.memory_space<vmem>>, vector<1x32x32xf32>
    %436 = vector.shape_cast %435 : vector<1x32x32xf32> to vector<32x32xf32>
    %cst_334 = arith.constant dense<0.000000e+00> : vector<8x32xf32>
    %437 = tpu.matmul %401, %436, %cst_334 {dimension_numbers = #tpu.dot_dimension_numbers<[1], [0], [0], [1], [0, 0, 1, 1], [], []>} : vector<8x32xf32>, vector<32x32xf32>, vector<8x32xf32> -> vector<8x32xf32>
    %c1_335 = arith.constant 1 : index
    %c0_336 = arith.constant 0 : index
    %c0_337 = arith.constant 0 : index
    %438 = vector.load %arg25[%c1_335, %c0_336, %c0_337] : memref<2x32x32xf32, #tpu.memory_space<vmem>>, vector<1x32x32xf32>
    %439 = vector.shape_cast %438 : vector<1x32x32xf32> to vector<32x32xf32>
    %cst_338 = arith.constant dense<0.000000e+00> : vector<8x32xf32>
    %440 = tpu.matmul %401, %439, %cst_338 {dimension_numbers = #tpu.dot_dimension_numbers<[1], [0], [0], [1], [0, 0, 1, 1], [], []>} : vector<8x32xf32>, vector<32x32xf32>, vector<8x32xf32> -> vector<8x32xf32>
    %c1_339 = arith.constant 1 : index
    %c0_340 = arith.constant 0 : index
    %c0_341 = arith.constant 0 : index
    %441 = vector.load %arg26[%c1_339, %c0_340, %c0_341] : memref<2x32x32xf32, #tpu.memory_space<vmem>>, vector<1x32x32xf32>
    %442 = vector.shape_cast %441 : vector<1x32x32xf32> to vector<32x32xf32>
    %cst_342 = arith.constant dense<0.000000e+00> : vector<8x32xf32>
    %443 = tpu.matmul %401, %442, %cst_342 {dimension_numbers = #tpu.dot_dimension_numbers<[1], [0], [0], [1], [0, 0, 1, 1], [], []>} : vector<8x32xf32>, vector<32x32xf32>, vector<8x32xf32> -> vector<8x32xf32>
    %444 = arith.addf %443, %295 : vector<8x32xf32>
    %c1_343 = arith.constant 1 : index
    %c0_344 = arith.constant 0 : index
    %c0_345 = arith.constant 0 : index
    %445 = vector.load %arg14[%c1_343, %c0_344, %c0_345] : memref<2x16x32xf32, #tpu.memory_space<vmem>>, vector<1x16x32xf32>
    %446 = vector.shape_cast %445 : vector<1x16x32xf32> to vector<16x32xf32>
    %cst_346 = arith.constant dense<0.000000e+00> : vector<8x32xf32>
    %447 = tpu.matmul %421, %446, %cst_346 {dimension_numbers = #tpu.dot_dimension_numbers<[1], [0], [0], [1], [0, 0, 1, 1], [], []>} : vector<8x16xf32>, vector<16x32xf32>, vector<8x32xf32> -> vector<8x32xf32>
    %c1_347 = arith.constant 1 : index
    %c7_348 = arith.constant 7 : index
    %c0_349 = arith.constant 0 : index
    %c0_350 = arith.constant 0 : index
    %448 = vector.load %arg31[%c1_347, %c7_348, %c0_349, %c0_350] : memref<2x8x8x32xf32, #tpu.memory_space<vmem>>, vector<1x1x8x32xf32>
    %449 = vector.shape_cast %448 : vector<1x1x8x32xf32> to vector<8x32xf32>
    %450 = arith.addf %447, %449 : vector<8x32xf32>
    %c1_351 = arith.constant 1 : index
    %c0_352 = arith.constant 0 : index
    %c0_353 = arith.constant 0 : index
    %451 = vector.load %arg15[%c1_351, %c0_352, %c0_353] : memref<2x16x32xf32, #tpu.memory_space<vmem>>, vector<1x16x32xf32>
    %452 = vector.shape_cast %451 : vector<1x16x32xf32> to vector<16x32xf32>
    %cst_354 = arith.constant dense<0.000000e+00> : vector<8x32xf32>
    %453 = tpu.matmul %421, %452, %cst_354 {dimension_numbers = #tpu.dot_dimension_numbers<[1], [0], [0], [1], [0, 0, 1, 1], [], []>} : vector<8x16xf32>, vector<16x32xf32>, vector<8x32xf32> -> vector<8x32xf32>
    %c1_355 = arith.constant 1 : index
    %c7_356 = arith.constant 7 : index
    %c0_357 = arith.constant 0 : index
    %c0_358 = arith.constant 0 : index
    %454 = vector.load %arg32[%c1_355, %c7_356, %c0_357, %c0_358] : memref<2x8x8x32xf32, #tpu.memory_space<vmem>>, vector<1x1x8x32xf32>
    %455 = vector.shape_cast %454 : vector<1x1x8x32xf32> to vector<8x32xf32>
    %456 = arith.addf %453, %455 : vector<8x32xf32>
    %c1_359 = arith.constant 1 : index
    %c0_360 = arith.constant 0 : index
    %c0_361 = arith.constant 0 : index
    %457 = vector.load %arg16[%c1_359, %c0_360, %c0_361] : memref<2x16x32xf32, #tpu.memory_space<vmem>>, vector<1x16x32xf32>
    %458 = vector.shape_cast %457 : vector<1x16x32xf32> to vector<16x32xf32>
    %cst_362 = arith.constant dense<0.000000e+00> : vector<8x32xf32>
    %459 = tpu.matmul %421, %458, %cst_362 {dimension_numbers = #tpu.dot_dimension_numbers<[1], [0], [0], [1], [0, 0, 1, 1], [], []>} : vector<8x16xf32>, vector<16x32xf32>, vector<8x32xf32> -> vector<8x32xf32>
    %c1_363 = arith.constant 1 : index
    %c7_364 = arith.constant 7 : index
    %c0_365 = arith.constant 0 : index
    %c0_366 = arith.constant 0 : index
    %460 = vector.load %arg33[%c1_363, %c7_364, %c0_365, %c0_366] : memref<2x8x8x32xf32, #tpu.memory_space<vmem>>, vector<1x1x8x32xf32>
    %461 = vector.shape_cast %460 : vector<1x1x8x32xf32> to vector<8x32xf32>
    %462 = arith.addf %459, %461 : vector<8x32xf32>
    %463 = arith.addf %450, %437 : vector<8x32xf32>
    %464 = arith.negf %463 : vector<8x32xf32>
    %465 = math.exp %464 : vector<8x32xf32>
    %cst_367 = arith.constant 1.000000e+00 : f32
    %466 = vector.broadcast %cst_367 : f32 to vector<8x32xf32>
    %467 = arith.addf %466, %465 : vector<8x32xf32>
    %468 = arith.divf %466, %467 : vector<8x32xf32>
    %469 = arith.addf %456, %440 : vector<8x32xf32>
    %470 = arith.negf %469 : vector<8x32xf32>
    %471 = math.exp %470 : vector<8x32xf32>
    %cst_368 = arith.constant 1.000000e+00 : f32
    %472 = vector.broadcast %cst_368 : f32 to vector<8x32xf32>
    %473 = arith.addf %472, %471 : vector<8x32xf32>
    %474 = arith.divf %472, %473 : vector<8x32xf32>
    %475 = arith.mulf %468, %444 : vector<8x32xf32>
    %476 = arith.addf %462, %475 : vector<8x32xf32>
    %477 = math.tanh %476 : vector<8x32xf32>
    %cst_369 = arith.constant 1.000000e+00 : f32
    %478 = vector.broadcast %cst_369 : f32 to vector<8x32xf32>
    %479 = arith.subf %478, %474 : vector<8x32xf32>
    %480 = arith.mulf %479, %477 : vector<8x32xf32>
    %481 = arith.mulf %474, %401 : vector<8x32xf32>
    %482 = arith.addf %480, %481 : vector<8x32xf32>
    %c1_370 = arith.constant 1 : index
    %c0_371 = arith.constant 0 : index
    %c0_372 = arith.constant 0 : index
    %483 = vector.load %arg0[%c1_370, %c0_371, %c0_372] : memref<8x8x16xf32, #tpu.memory_space<vmem>>, vector<1x8x16xf32>
    %484 = vector.shape_cast %483 : vector<1x8x16xf32> to vector<8x16xf32>
    %c1_373 = arith.constant 1 : index
    %c0_374 = arith.constant 0 : index
    %c0_375 = arith.constant 0 : index
    %485 = vector.load %arg1[%c1_373, %c0_374, %c0_375] : memref<8x8x16xf32, #tpu.memory_space<vmem>>, vector<1x8x16xf32>
    %486 = vector.shape_cast %485 : vector<1x8x16xf32> to vector<8x16xf32>
    %c1_376 = arith.constant 1 : index
    %c0_377 = arith.constant 0 : index
    %c0_378 = arith.constant 0 : index
    %487 = vector.load %arg34[%c1_376, %c0_377, %c0_378] : memref<8x8x16xf32, #tpu.memory_space<vmem>>, vector<1x8x16xf32>
    %488 = vector.shape_cast %487 : vector<1x8x16xf32> to vector<8x16xf32>
    %c0_379 = arith.constant 0 : index
    %c1_380 = arith.constant 1 : index
    %c0_381 = arith.constant 0 : index
    %c0_382 = arith.constant 0 : index
    %489 = vector.load %arg29[%c0_379, %c1_380, %c0_381, %c0_382] : memref<2x8x8x32xf32, #tpu.memory_space<vmem>>, vector<1x1x8x32xf32>
    %490 = vector.shape_cast %489 : vector<1x1x8x32xf32> to vector<8x32xf32>
    %c0_383 = arith.constant 0 : index
    %c1_384 = arith.constant 1 : index
    %c0_385 = arith.constant 0 : index
    %c0_386 = arith.constant 0 : index
    %491 = vector.load %arg30[%c0_383, %c1_384, %c0_385, %c0_386] : memref<2x8x8x16xf32, #tpu.memory_space<vmem>>, vector<1x1x8x16xf32>
    %492 = vector.shape_cast %491 : vector<1x1x8x16xf32> to vector<8x16xf32>
    %493 = arith.mulf %390, %490 : vector<8x32xf32>
    %c0_387 = arith.constant 0 : index
    %c0_388 = arith.constant 0 : index
    %c0_389 = arith.constant 0 : index
    %494 = vector.load %arg7[%c0_387, %c0_388, %c0_389] : memref<2x32x16xf32, #tpu.memory_space<vmem>>, vector<1x32x16xf32>
    %495 = vector.shape_cast %494 : vector<1x32x16xf32> to vector<32x16xf32>
    %cst_390 = arith.constant dense<0.000000e+00> : vector<8x16xf32>
    %496 = tpu.matmul %493, %495, %cst_390 {dimension_numbers = #tpu.dot_dimension_numbers<[1], [0], [0], [1], [0, 0, 1, 1], [], []>} : vector<8x32xf32>, vector<32x16xf32>, vector<8x16xf32> -> vector<8x16xf32>
    %497 = arith.addf %496, %275 : vector<8x16xf32>
    %498 = arith.mulf %486, %484 : vector<8x16xf32>
    %cst_391 = arith.constant 1.000000e+00 : f32
    %499 = vector.broadcast %cst_391 : f32 to vector<8x16xf32>
    %500 = arith.subf %499, %486 : vector<8x16xf32>
    %501 = arith.mulf %500, %497 : vector<8x16xf32>
    %502 = arith.addf %498, %501 : vector<8x16xf32>
    %c0_392 = arith.constant 0 : index
    %c0_393 = arith.constant 0 : index
    %c0_394 = arith.constant 0 : index
    %503 = vector.load %arg9[%c0_392, %c0_393, %c0_394] : memref<2x16x16xf32, #tpu.memory_space<vmem>>, vector<1x16x16xf32>
    %504 = vector.shape_cast %503 : vector<1x16x16xf32> to vector<16x16xf32>
    %cst_395 = arith.constant dense<0.000000e+00> : vector<8x16xf32>
    %505 = tpu.matmul %502, %504, %cst_395 {dimension_numbers = #tpu.dot_dimension_numbers<[1], [0], [0], [1], [0, 0, 1, 1], [], []>} : vector<8x16xf32>, vector<16x16xf32>, vector<8x16xf32> -> vector<8x16xf32>
    %506 = arith.addf %505, %283 : vector<8x16xf32>
    %507 = arith.mulf %492, %506 : vector<8x16xf32>
    %cst_396 = arith.constant 1.000000e+00 : f32
    %508 = vector.broadcast %cst_396 : f32 to vector<8x16xf32>
    %509 = arith.subf %508, %492 : vector<8x16xf32>
    %510 = arith.mulf %509, %497 : vector<8x16xf32>
    %511 = arith.addf %507, %510 : vector<8x16xf32>
    %512 = arith.mulf %500, %511 : vector<8x16xf32>
    %513 = arith.addf %498, %512 : vector<8x16xf32>
    %c0_397 = arith.constant 0 : index
    %c1_398 = arith.constant 1 : index
    %c0_399 = arith.constant 0 : index
    %c0_400 = arith.constant 0 : index
    %514 = vector.load %arg35[%c0_397, %c1_398, %c0_399, %c0_400] : memref<2x8x8x16xf32, #tpu.memory_space<vmem>>, vector<1x1x8x16xf32>
    %515 = vector.shape_cast %514 : vector<1x1x8x16xf32> to vector<8x16xf32>
    %516 = vector.shape_cast %513 : vector<8x16xf32> to vector<1x1x8x16xf32>
    tpu.vector_store %arg35[%c0_397, %c1_398, %c0_399, %c0_400], %516 {strides = array<i32>} : memref<2x8x8x16xf32, #tpu.memory_space<vmem>>, vector<1x1x8x16xf32>,
    %517 = arith.subf %484, %497 : vector<8x16xf32>
    %518 = math.absf %517 : vector<8x16xf32>
    %519 = arith.subf %484, %506 : vector<8x16xf32>
    %520 = math.absf %519 : vector<8x16xf32>
    %521 = arith.addf %518, %520 : vector<8x16xf32>
    %522 = arith.subf %484, %511 : vector<8x16xf32>
    %523 = math.absf %522 : vector<8x16xf32>
    %524 = arith.addf %521, %523 : vector<8x16xf32>
    %525 = arith.mulf %524, %488 : vector<8x16xf32>
    %526 = arith.addf %434, %525 : vector<8x16xf32>
    %c0_401 = arith.constant 0 : index
    %c0_402 = arith.constant 0 : index
    %c0_403 = arith.constant 0 : index
    %527 = vector.load %arg24[%c0_401, %c0_402, %c0_403] : memref<2x32x32xf32, #tpu.memory_space<vmem>>, vector<1x32x32xf32>
    %528 = vector.shape_cast %527 : vector<1x32x32xf32> to vector<32x32xf32>
    %cst_404 = arith.constant dense<0.000000e+00> : vector<8x32xf32>
    %529 = tpu.matmul %493, %528, %cst_404 {dimension_numbers = #tpu.dot_dimension_numbers<[1], [0], [0], [1], [0, 0, 1, 1], [], []>} : vector<8x32xf32>, vector<32x32xf32>, vector<8x32xf32> -> vector<8x32xf32>
    %c0_405 = arith.constant 0 : index
    %c0_406 = arith.constant 0 : index
    %c0_407 = arith.constant 0 : index
    %530 = vector.load %arg25[%c0_405, %c0_406, %c0_407] : memref<2x32x32xf32, #tpu.memory_space<vmem>>, vector<1x32x32xf32>
    %531 = vector.shape_cast %530 : vector<1x32x32xf32> to vector<32x32xf32>
    %cst_408 = arith.constant dense<0.000000e+00> : vector<8x32xf32>
    %532 = tpu.matmul %493, %531, %cst_408 {dimension_numbers = #tpu.dot_dimension_numbers<[1], [0], [0], [1], [0, 0, 1, 1], [], []>} : vector<8x32xf32>, vector<32x32xf32>, vector<8x32xf32> -> vector<8x32xf32>
    %c0_409 = arith.constant 0 : index
    %c0_410 = arith.constant 0 : index
    %c0_411 = arith.constant 0 : index
    %533 = vector.load %arg26[%c0_409, %c0_410, %c0_411] : memref<2x32x32xf32, #tpu.memory_space<vmem>>, vector<1x32x32xf32>
    %534 = vector.shape_cast %533 : vector<1x32x32xf32> to vector<32x32xf32>
    %cst_412 = arith.constant dense<0.000000e+00> : vector<8x32xf32>
    %535 = tpu.matmul %493, %534, %cst_412 {dimension_numbers = #tpu.dot_dimension_numbers<[1], [0], [0], [1], [0, 0, 1, 1], [], []>} : vector<8x32xf32>, vector<32x32xf32>, vector<8x32xf32> -> vector<8x32xf32>
    %536 = arith.addf %535, %291 : vector<8x32xf32>
    %c0_413 = arith.constant 0 : index
    %c0_414 = arith.constant 0 : index
    %c0_415 = arith.constant 0 : index
    %537 = vector.load %arg14[%c0_413, %c0_414, %c0_415] : memref<2x16x32xf32, #tpu.memory_space<vmem>>, vector<1x16x32xf32>
    %538 = vector.shape_cast %537 : vector<1x16x32xf32> to vector<16x32xf32>
    %cst_416 = arith.constant dense<0.000000e+00> : vector<8x32xf32>
    %539 = tpu.matmul %513, %538, %cst_416 {dimension_numbers = #tpu.dot_dimension_numbers<[1], [0], [0], [1], [0, 0, 1, 1], [], []>} : vector<8x16xf32>, vector<16x32xf32>, vector<8x32xf32> -> vector<8x32xf32>
    %c0_417 = arith.constant 0 : index
    %c1_418 = arith.constant 1 : index
    %c0_419 = arith.constant 0 : index
    %c0_420 = arith.constant 0 : index
    %540 = vector.load %arg31[%c0_417, %c1_418, %c0_419, %c0_420] : memref<2x8x8x32xf32, #tpu.memory_space<vmem>>, vector<1x1x8x32xf32>
    %541 = vector.shape_cast %540 : vector<1x1x8x32xf32> to vector<8x32xf32>
    %542 = arith.addf %539, %541 : vector<8x32xf32>
    %c0_421 = arith.constant 0 : index
    %c0_422 = arith.constant 0 : index
    %c0_423 = arith.constant 0 : index
    %543 = vector.load %arg15[%c0_421, %c0_422, %c0_423] : memref<2x16x32xf32, #tpu.memory_space<vmem>>, vector<1x16x32xf32>
    %544 = vector.shape_cast %543 : vector<1x16x32xf32> to vector<16x32xf32>
    %cst_424 = arith.constant dense<0.000000e+00> : vector<8x32xf32>
    %545 = tpu.matmul %513, %544, %cst_424 {dimension_numbers = #tpu.dot_dimension_numbers<[1], [0], [0], [1], [0, 0, 1, 1], [], []>} : vector<8x16xf32>, vector<16x32xf32>, vector<8x32xf32> -> vector<8x32xf32>
    %c0_425 = arith.constant 0 : index
    %c1_426 = arith.constant 1 : index
    %c0_427 = arith.constant 0 : index
    %c0_428 = arith.constant 0 : index
    %546 = vector.load %arg32[%c0_425, %c1_426, %c0_427, %c0_428] : memref<2x8x8x32xf32, #tpu.memory_space<vmem>>, vector<1x1x8x32xf32>
    %547 = vector.shape_cast %546 : vector<1x1x8x32xf32> to vector<8x32xf32>
    %548 = arith.addf %545, %547 : vector<8x32xf32>
    %c0_429 = arith.constant 0 : index
    %c0_430 = arith.constant 0 : index
    %c0_431 = arith.constant 0 : index
    %549 = vector.load %arg16[%c0_429, %c0_430, %c0_431] : memref<2x16x32xf32, #tpu.memory_space<vmem>>, vector<1x16x32xf32>
    %550 = vector.shape_cast %549 : vector<1x16x32xf32> to vector<16x32xf32>
    %cst_432 = arith.constant dense<0.000000e+00> : vector<8x32xf32>
    %551 = tpu.matmul %513, %550, %cst_432 {dimension_numbers = #tpu.dot_dimension_numbers<[1], [0], [0], [1], [0, 0, 1, 1], [], []>} : vector<8x16xf32>, vector<16x32xf32>, vector<8x32xf32> -> vector<8x32xf32>
    %c0_433 = arith.constant 0 : index
    %c1_434 = arith.constant 1 : index
    %c0_435 = arith.constant 0 : index
    %c0_436 = arith.constant 0 : index
    %552 = vector.load %arg33[%c0_433, %c1_434, %c0_435, %c0_436] : memref<2x8x8x32xf32, #tpu.memory_space<vmem>>, vector<1x1x8x32xf32>
    %553 = vector.shape_cast %552 : vector<1x1x8x32xf32> to vector<8x32xf32>
    %554 = arith.addf %551, %553 : vector<8x32xf32>
    %555 = arith.addf %542, %529 : vector<8x32xf32>
    %556 = arith.negf %555 : vector<8x32xf32>
    %557 = math.exp %556 : vector<8x32xf32>
    %cst_437 = arith.constant 1.000000e+00 : f32
    %558 = vector.broadcast %cst_437 : f32 to vector<8x32xf32>
    %559 = arith.addf %558, %557 : vector<8x32xf32>
    %560 = arith.divf %558, %559 : vector<8x32xf32>
    %561 = arith.addf %548, %532 : vector<8x32xf32>
    %562 = arith.negf %561 : vector<8x32xf32>
    %563 = math.exp %562 : vector<8x32xf32>
    %cst_438 = arith.constant 1.000000e+00 : f32
    %564 = vector.broadcast %cst_438 : f32 to vector<8x32xf32>
    %565 = arith.addf %564, %563 : vector<8x32xf32>
    %566 = arith.divf %564, %565 : vector<8x32xf32>
    %567 = arith.mulf %560, %536 : vector<8x32xf32>
    %568 = arith.addf %554, %567 : vector<8x32xf32>
    %569 = math.tanh %568 : vector<8x32xf32>
    %cst_439 = arith.constant 1.000000e+00 : f32
    %570 = vector.broadcast %cst_439 : f32 to vector<8x32xf32>
    %571 = arith.subf %570, %566 : vector<8x32xf32>
    %572 = arith.mulf %571, %569 : vector<8x32xf32>
    %573 = arith.mulf %566, %493 : vector<8x32xf32>
    %574 = arith.addf %572, %573 : vector<8x32xf32>
    %c6_440 = arith.constant 6 : index
    %c0_441 = arith.constant 0 : index
    %c0_442 = arith.constant 0 : index
    %575 = vector.load %arg0[%c6_440, %c0_441, %c0_442] : memref<8x8x16xf32, #tpu.memory_space<vmem>>, vector<1x8x16xf32>
    %576 = vector.shape_cast %575 : vector<1x8x16xf32> to vector<8x16xf32>
    %c6_443 = arith.constant 6 : index
    %c0_444 = arith.constant 0 : index
    %c0_445 = arith.constant 0 : index
    %577 = vector.load %arg1[%c6_443, %c0_444, %c0_445] : memref<8x8x16xf32, #tpu.memory_space<vmem>>, vector<1x8x16xf32>
    %578 = vector.shape_cast %577 : vector<1x8x16xf32> to vector<8x16xf32>
    %c6_446 = arith.constant 6 : index
    %c0_447 = arith.constant 0 : index
    %c0_448 = arith.constant 0 : index
    %579 = vector.load %arg34[%c6_446, %c0_447, %c0_448] : memref<8x8x16xf32, #tpu.memory_space<vmem>>, vector<1x8x16xf32>
    %580 = vector.shape_cast %579 : vector<1x8x16xf32> to vector<8x16xf32>
    %c1_449 = arith.constant 1 : index
    %c6_450 = arith.constant 6 : index
    %c0_451 = arith.constant 0 : index
    %c0_452 = arith.constant 0 : index
    %581 = vector.load %arg29[%c1_449, %c6_450, %c0_451, %c0_452] : memref<2x8x8x32xf32, #tpu.memory_space<vmem>>, vector<1x1x8x32xf32>
    %582 = vector.shape_cast %581 : vector<1x1x8x32xf32> to vector<8x32xf32>
    %c1_453 = arith.constant 1 : index
    %c6_454 = arith.constant 6 : index
    %c0_455 = arith.constant 0 : index
    %c0_456 = arith.constant 0 : index
    %583 = vector.load %arg30[%c1_453, %c6_454, %c0_455, %c0_456] : memref<2x8x8x16xf32, #tpu.memory_space<vmem>>, vector<1x1x8x16xf32>
    %584 = vector.shape_cast %583 : vector<1x1x8x16xf32> to vector<8x16xf32>
    %585 = arith.mulf %482, %582 : vector<8x32xf32>
    %c1_457 = arith.constant 1 : index
    %c0_458 = arith.constant 0 : index
    %c0_459 = arith.constant 0 : index
    %586 = vector.load %arg7[%c1_457, %c0_458, %c0_459] : memref<2x32x16xf32, #tpu.memory_space<vmem>>, vector<1x32x16xf32>
    %587 = vector.shape_cast %586 : vector<1x32x16xf32> to vector<32x16xf32>
    %cst_460 = arith.constant dense<0.000000e+00> : vector<8x16xf32>
    %588 = tpu.matmul %585, %587, %cst_460 {dimension_numbers = #tpu.dot_dimension_numbers<[1], [0], [0], [1], [0, 0, 1, 1], [], []>} : vector<8x32xf32>, vector<32x16xf32>, vector<8x16xf32> -> vector<8x16xf32>
    %589 = arith.addf %588, %279 : vector<8x16xf32>
    %590 = arith.mulf %578, %576 : vector<8x16xf32>
    %cst_461 = arith.constant 1.000000e+00 : f32
    %591 = vector.broadcast %cst_461 : f32 to vector<8x16xf32>
    %592 = arith.subf %591, %578 : vector<8x16xf32>
    %593 = arith.mulf %592, %589 : vector<8x16xf32>
    %594 = arith.addf %590, %593 : vector<8x16xf32>
    %c1_462 = arith.constant 1 : index
    %c0_463 = arith.constant 0 : index
    %c0_464 = arith.constant 0 : index
    %595 = vector.load %arg9[%c1_462, %c0_463, %c0_464] : memref<2x16x16xf32, #tpu.memory_space<vmem>>, vector<1x16x16xf32>
    %596 = vector.shape_cast %595 : vector<1x16x16xf32> to vector<16x16xf32>
    %cst_465 = arith.constant dense<0.000000e+00> : vector<8x16xf32>
    %597 = tpu.matmul %594, %596, %cst_465 {dimension_numbers = #tpu.dot_dimension_numbers<[1], [0], [0], [1], [0, 0, 1, 1], [], []>} : vector<8x16xf32>, vector<16x16xf32>, vector<8x16xf32> -> vector<8x16xf32>
    %598 = arith.addf %597, %287 : vector<8x16xf32>
    %599 = arith.mulf %584, %598 : vector<8x16xf32>
    %cst_466 = arith.constant 1.000000e+00 : f32
    %600 = vector.broadcast %cst_466 : f32 to vector<8x16xf32>
    %601 = arith.subf %600, %584 : vector<8x16xf32>
    %602 = arith.mulf %601, %589 : vector<8x16xf32>
    %603 = arith.addf %599, %602 : vector<8x16xf32>
    %604 = arith.mulf %592, %603 : vector<8x16xf32>
    %605 = arith.addf %590, %604 : vector<8x16xf32>
    %c1_467 = arith.constant 1 : index
    %c6_468 = arith.constant 6 : index
    %c0_469 = arith.constant 0 : index
    %c0_470 = arith.constant 0 : index
    %606 = vector.load %arg35[%c1_467, %c6_468, %c0_469, %c0_470] : memref<2x8x8x16xf32, #tpu.memory_space<vmem>>, vector<1x1x8x16xf32>
    %607 = vector.shape_cast %606 : vector<1x1x8x16xf32> to vector<8x16xf32>
    %608 = vector.shape_cast %605 : vector<8x16xf32> to vector<1x1x8x16xf32>
    tpu.vector_store %arg35[%c1_467, %c6_468, %c0_469, %c0_470], %608 {strides = array<i32>} : memref<2x8x8x16xf32, #tpu.memory_space<vmem>>, vector<1x1x8x16xf32>,
    %609 = arith.subf %576, %589 : vector<8x16xf32>
    %610 = math.absf %609 : vector<8x16xf32>
    %611 = arith.subf %576, %598 : vector<8x16xf32>
    %612 = math.absf %611 : vector<8x16xf32>
    %613 = arith.addf %610, %612 : vector<8x16xf32>
    %614 = arith.subf %576, %603 : vector<8x16xf32>
    %615 = math.absf %614 : vector<8x16xf32>
    %616 = arith.addf %613, %615 : vector<8x16xf32>
    %617 = arith.mulf %616, %580 : vector<8x16xf32>
    %618 = arith.addf %526, %617 : vector<8x16xf32>
    %c1_471 = arith.constant 1 : index
    %c0_472 = arith.constant 0 : index
    %c0_473 = arith.constant 0 : index
    %619 = vector.load %arg24[%c1_471, %c0_472, %c0_473] : memref<2x32x32xf32, #tpu.memory_space<vmem>>, vector<1x32x32xf32>
    %620 = vector.shape_cast %619 : vector<1x32x32xf32> to vector<32x32xf32>
    %cst_474 = arith.constant dense<0.000000e+00> : vector<8x32xf32>
    %621 = tpu.matmul %585, %620, %cst_474 {dimension_numbers = #tpu.dot_dimension_numbers<[1], [0], [0], [1], [0, 0, 1, 1], [], []>} : vector<8x32xf32>, vector<32x32xf32>, vector<8x32xf32> -> vector<8x32xf32>
    %c1_475 = arith.constant 1 : index
    %c0_476 = arith.constant 0 : index
    %c0_477 = arith.constant 0 : index
    %622 = vector.load %arg25[%c1_475, %c0_476, %c0_477] : memref<2x32x32xf32, #tpu.memory_space<vmem>>, vector<1x32x32xf32>
    %623 = vector.shape_cast %622 : vector<1x32x32xf32> to vector<32x32xf32>
    %cst_478 = arith.constant dense<0.000000e+00> : vector<8x32xf32>
    %624 = tpu.matmul %585, %623, %cst_478 {dimension_numbers = #tpu.dot_dimension_numbers<[1], [0], [0], [1], [0, 0, 1, 1], [], []>} : vector<8x32xf32>, vector<32x32xf32>, vector<8x32xf32> -> vector<8x32xf32>
    %c1_479 = arith.constant 1 : index
    %c0_480 = arith.constant 0 : index
    %c0_481 = arith.constant 0 : index
    %625 = vector.load %arg26[%c1_479, %c0_480, %c0_481] : memref<2x32x32xf32, #tpu.memory_space<vmem>>, vector<1x32x32xf32>
    %626 = vector.shape_cast %625 : vector<1x32x32xf32> to vector<32x32xf32>
    %cst_482 = arith.constant dense<0.000000e+00> : vector<8x32xf32>
    %627 = tpu.matmul %585, %626, %cst_482 {dimension_numbers = #tpu.dot_dimension_numbers<[1], [0], [0], [1], [0, 0, 1, 1], [], []>} : vector<8x32xf32>, vector<32x32xf32>, vector<8x32xf32> -> vector<8x32xf32>
    %628 = arith.addf %627, %295 : vector<8x32xf32>
    %c1_483 = arith.constant 1 : index
    %c0_484 = arith.constant 0 : index
    %c0_485 = arith.constant 0 : index
    %629 = vector.load %arg14[%c1_483, %c0_484, %c0_485] : memref<2x16x32xf32, #tpu.memory_space<vmem>>, vector<1x16x32xf32>
    %630 = vector.shape_cast %629 : vector<1x16x32xf32> to vector<16x32xf32>
    %cst_486 = arith.constant dense<0.000000e+00> : vector<8x32xf32>
    %631 = tpu.matmul %605, %630, %cst_486 {dimension_numbers = #tpu.dot_dimension_numbers<[1], [0], [0], [1], [0, 0, 1, 1], [], []>} : vector<8x16xf32>, vector<16x32xf32>, vector<8x32xf32> -> vector<8x32xf32>
    %c1_487 = arith.constant 1 : index
    %c6_488 = arith.constant 6 : index
    %c0_489 = arith.constant 0 : index
    %c0_490 = arith.constant 0 : index
    %632 = vector.load %arg31[%c1_487, %c6_488, %c0_489, %c0_490] : memref<2x8x8x32xf32, #tpu.memory_space<vmem>>, vector<1x1x8x32xf32>
    %633 = vector.shape_cast %632 : vector<1x1x8x32xf32> to vector<8x32xf32>
    %634 = arith.addf %631, %633 : vector<8x32xf32>
    %c1_491 = arith.constant 1 : index
    %c0_492 = arith.constant 0 : index
    %c0_493 = arith.constant 0 : index
    %635 = vector.load %arg15[%c1_491, %c0_492, %c0_493] : memref<2x16x32xf32, #tpu.memory_space<vmem>>, vector<1x16x32xf32>
    %636 = vector.shape_cast %635 : vector<1x16x32xf32> to vector<16x32xf32>
    %cst_494 = arith.constant dense<0.000000e+00> : vector<8x32xf32>
    %637 = tpu.matmul %605, %636, %cst_494 {dimension_numbers = #tpu.dot_dimension_numbers<[1], [0], [0], [1], [0, 0, 1, 1], [], []>} : vector<8x16xf32>, vector<16x32xf32>, vector<8x32xf32> -> vector<8x32xf32>
    %c1_495 = arith.constant 1 : index
    %c6_496 = arith.constant 6 : index
    %c0_497 = arith.constant 0 : index
    %c0_498 = arith.constant 0 : index
    %638 = vector.load %arg32[%c1_495, %c6_496, %c0_497, %c0_498] : memref<2x8x8x32xf32, #tpu.memory_space<vmem>>, vector<1x1x8x32xf32>
    %639 = vector.shape_cast %638 : vector<1x1x8x32xf32> to vector<8x32xf32>
    %640 = arith.addf %637, %639 : vector<8x32xf32>
    %c1_499 = arith.constant 1 : index
    %c0_500 = arith.constant 0 : index
    %c0_501 = arith.constant 0 : index
    %641 = vector.load %arg16[%c1_499, %c0_500, %c0_501] : memref<2x16x32xf32, #tpu.memory_space<vmem>>, vector<1x16x32xf32>
    %642 = vector.shape_cast %641 : vector<1x16x32xf32> to vector<16x32xf32>
    %cst_502 = arith.constant dense<0.000000e+00> : vector<8x32xf32>
    %643 = tpu.matmul %605, %642, %cst_502 {dimension_numbers = #tpu.dot_dimension_numbers<[1], [0], [0], [1], [0, 0, 1, 1], [], []>} : vector<8x16xf32>, vector<16x32xf32>, vector<8x32xf32> -> vector<8x32xf32>
    %c1_503 = arith.constant 1 : index
    %c6_504 = arith.constant 6 : index
    %c0_505 = arith.constant 0 : index
    %c0_506 = arith.constant 0 : index
    %644 = vector.load %arg33[%c1_503, %c6_504, %c0_505, %c0_506] : memref<2x8x8x32xf32, #tpu.memory_space<vmem>>, vector<1x1x8x32xf32>
    %645 = vector.shape_cast %644 : vector<1x1x8x32xf32> to vector<8x32xf32>
    %646 = arith.addf %643, %645 : vector<8x32xf32>
    %647 = arith.addf %634, %621 : vector<8x32xf32>
    %648 = arith.negf %647 : vector<8x32xf32>
    %649 = math.exp %648 : vector<8x32xf32>
    %cst_507 = arith.constant 1.000000e+00 : f32
    %650 = vector.broadcast %cst_507 : f32 to vector<8x32xf32>
    %651 = arith.addf %650, %649 : vector<8x32xf32>
    %652 = arith.divf %650, %651 : vector<8x32xf32>
    %653 = arith.addf %640, %624 : vector<8x32xf32>
    %654 = arith.negf %653 : vector<8x32xf32>
    %655 = math.exp %654 : vector<8x32xf32>
    %cst_508 = arith.constant 1.000000e+00 : f32
    %656 = vector.broadcast %cst_508 : f32 to vector<8x32xf32>
    %657 = arith.addf %656, %655 : vector<8x32xf32>
    %658 = arith.divf %656, %657 : vector<8x32xf32>
    %659 = arith.mulf %652, %628 : vector<8x32xf32>
    %660 = arith.addf %646, %659 : vector<8x32xf32>
    %661 = math.tanh %660 : vector<8x32xf32>
    %cst_509 = arith.constant 1.000000e+00 : f32
    %662 = vector.broadcast %cst_509 : f32 to vector<8x32xf32>
    %663 = arith.subf %662, %658 : vector<8x32xf32>
    %664 = arith.mulf %663, %661 : vector<8x32xf32>
    %665 = arith.mulf %658, %585 : vector<8x32xf32>
    %666 = arith.addf %664, %665 : vector<8x32xf32>
    %c2_510 = arith.constant 2 : index
    %c0_511 = arith.constant 0 : index
    %c0_512 = arith.constant 0 : index
    %667 = vector.load %arg0[%c2_510, %c0_511, %c0_512] : memref<8x8x16xf32, #tpu.memory_space<vmem>>, vector<1x8x16xf32>
    %668 = vector.shape_cast %667 : vector<1x8x16xf32> to vector<8x16xf32>
    %c2_513 = arith.constant 2 : index
    %c0_514 = arith.constant 0 : index
    %c0_515 = arith.constant 0 : index
    %669 = vector.load %arg1[%c2_513, %c0_514, %c0_515] : memref<8x8x16xf32, #tpu.memory_space<vmem>>, vector<1x8x16xf32>
    %670 = vector.shape_cast %669 : vector<1x8x16xf32> to vector<8x16xf32>
    %c2_516 = arith.constant 2 : index
    %c0_517 = arith.constant 0 : index
    %c0_518 = arith.constant 0 : index
    %671 = vector.load %arg34[%c2_516, %c0_517, %c0_518] : memref<8x8x16xf32, #tpu.memory_space<vmem>>, vector<1x8x16xf32>
    %672 = vector.shape_cast %671 : vector<1x8x16xf32> to vector<8x16xf32>
    %c0_519 = arith.constant 0 : index
    %c2_520 = arith.constant 2 : index
    %c0_521 = arith.constant 0 : index
    %c0_522 = arith.constant 0 : index
    %673 = vector.load %arg29[%c0_519, %c2_520, %c0_521, %c0_522] : memref<2x8x8x32xf32, #tpu.memory_space<vmem>>, vector<1x1x8x32xf32>
    %674 = vector.shape_cast %673 : vector<1x1x8x32xf32> to vector<8x32xf32>
    %c0_523 = arith.constant 0 : index
    %c2_524 = arith.constant 2 : index
    %c0_525 = arith.constant 0 : index
    %c0_526 = arith.constant 0 : index
    %675 = vector.load %arg30[%c0_523, %c2_524, %c0_525, %c0_526] : memref<2x8x8x16xf32, #tpu.memory_space<vmem>>, vector<1x1x8x16xf32>
    %676 = vector.shape_cast %675 : vector<1x1x8x16xf32> to vector<8x16xf32>
    %677 = arith.mulf %574, %674 : vector<8x32xf32>
    %c0_527 = arith.constant 0 : index
    %c0_528 = arith.constant 0 : index
    %c0_529 = arith.constant 0 : index
    %678 = vector.load %arg7[%c0_527, %c0_528, %c0_529] : memref<2x32x16xf32, #tpu.memory_space<vmem>>, vector<1x32x16xf32>
    %679 = vector.shape_cast %678 : vector<1x32x16xf32> to vector<32x16xf32>
    %cst_530 = arith.constant dense<0.000000e+00> : vector<8x16xf32>
    %680 = tpu.matmul %677, %679, %cst_530 {dimension_numbers = #tpu.dot_dimension_numbers<[1], [0], [0], [1], [0, 0, 1, 1], [], []>} : vector<8x32xf32>, vector<32x16xf32>, vector<8x16xf32> -> vector<8x16xf32>
    %681 = arith.addf %680, %275 : vector<8x16xf32>
    %682 = arith.mulf %670, %668 : vector<8x16xf32>
    %cst_531 = arith.constant 1.000000e+00 : f32
    %683 = vector.broadcast %cst_531 : f32 to vector<8x16xf32>
    %684 = arith.subf %683, %670 : vector<8x16xf32>
    %685 = arith.mulf %684, %681 : vector<8x16xf32>
    %686 = arith.addf %682, %685 : vector<8x16xf32>
    %c0_532 = arith.constant 0 : index
    %c0_533 = arith.constant 0 : index
    %c0_534 = arith.constant 0 : index
    %687 = vector.load %arg9[%c0_532, %c0_533, %c0_534] : memref<2x16x16xf32, #tpu.memory_space<vmem>>, vector<1x16x16xf32>
    %688 = vector.shape_cast %687 : vector<1x16x16xf32> to vector<16x16xf32>
    %cst_535 = arith.constant dense<0.000000e+00> : vector<8x16xf32>
    %689 = tpu.matmul %686, %688, %cst_535 {dimension_numbers = #tpu.dot_dimension_numbers<[1], [0], [0], [1], [0, 0, 1, 1], [], []>} : vector<8x16xf32>, vector<16x16xf32>, vector<8x16xf32> -> vector<8x16xf32>
    %690 = arith.addf %689, %283 : vector<8x16xf32>
    %691 = arith.mulf %676, %690 : vector<8x16xf32>
    %cst_536 = arith.constant 1.000000e+00 : f32
    %692 = vector.broadcast %cst_536 : f32 to vector<8x16xf32>
    %693 = arith.subf %692, %676 : vector<8x16xf32>
    %694 = arith.mulf %693, %681 : vector<8x16xf32>
    %695 = arith.addf %691, %694 : vector<8x16xf32>
    %696 = arith.mulf %684, %695 : vector<8x16xf32>
    %697 = arith.addf %682, %696 : vector<8x16xf32>
    %c0_537 = arith.constant 0 : index
    %c2_538 = arith.constant 2 : index
    %c0_539 = arith.constant 0 : index
    %c0_540 = arith.constant 0 : index
    %698 = vector.load %arg35[%c0_537, %c2_538, %c0_539, %c0_540] : memref<2x8x8x16xf32, #tpu.memory_space<vmem>>, vector<1x1x8x16xf32>
    %699 = vector.shape_cast %698 : vector<1x1x8x16xf32> to vector<8x16xf32>
    %700 = vector.shape_cast %697 : vector<8x16xf32> to vector<1x1x8x16xf32>
    tpu.vector_store %arg35[%c0_537, %c2_538, %c0_539, %c0_540], %700 {strides = array<i32>} : memref<2x8x8x16xf32, #tpu.memory_space<vmem>>, vector<1x1x8x16xf32>,
    %701 = arith.subf %668, %681 : vector<8x16xf32>
    %702 = math.absf %701 : vector<8x16xf32>
    %703 = arith.subf %668, %690 : vector<8x16xf32>
    %704 = math.absf %703 : vector<8x16xf32>
    %705 = arith.addf %702, %704 : vector<8x16xf32>
    %706 = arith.subf %668, %695 : vector<8x16xf32>
    %707 = math.absf %706 : vector<8x16xf32>
    %708 = arith.addf %705, %707 : vector<8x16xf32>
    %709 = arith.mulf %708, %672 : vector<8x16xf32>
    %710 = arith.addf %618, %709 : vector<8x16xf32>
    %c0_541 = arith.constant 0 : index
    %c0_542 = arith.constant 0 : index
    %c0_543 = arith.constant 0 : index
    %711 = vector.load %arg24[%c0_541, %c0_542, %c0_543] : memref<2x32x32xf32, #tpu.memory_space<vmem>>, vector<1x32x32xf32>
    %712 = vector.shape_cast %711 : vector<1x32x32xf32> to vector<32x32xf32>
    %cst_544 = arith.constant dense<0.000000e+00> : vector<8x32xf32>
    %713 = tpu.matmul %677, %712, %cst_544 {dimension_numbers = #tpu.dot_dimension_numbers<[1], [0], [0], [1], [0, 0, 1, 1], [], []>} : vector<8x32xf32>, vector<32x32xf32>, vector<8x32xf32> -> vector<8x32xf32>
    %c0_545 = arith.constant 0 : index
    %c0_546 = arith.constant 0 : index
    %c0_547 = arith.constant 0 : index
    %714 = vector.load %arg25[%c0_545, %c0_546, %c0_547] : memref<2x32x32xf32, #tpu.memory_space<vmem>>, vector<1x32x32xf32>
    %715 = vector.shape_cast %714 : vector<1x32x32xf32> to vector<32x32xf32>
    %cst_548 = arith.constant dense<0.000000e+00> : vector<8x32xf32>
    %716 = tpu.matmul %677, %715, %cst_548 {dimension_numbers = #tpu.dot_dimension_numbers<[1], [0], [0], [1], [0, 0, 1, 1], [], []>} : vector<8x32xf32>, vector<32x32xf32>, vector<8x32xf32> -> vector<8x32xf32>
    %c0_549 = arith.constant 0 : index
    %c0_550 = arith.constant 0 : index
    %c0_551 = arith.constant 0 : index
    %717 = vector.load %arg26[%c0_549, %c0_550, %c0_551] : memref<2x32x32xf32, #tpu.memory_space<vmem>>, vector<1x32x32xf32>
    %718 = vector.shape_cast %717 : vector<1x32x32xf32> to vector<32x32xf32>
    %cst_552 = arith.constant dense<0.000000e+00> : vector<8x32xf32>
    %719 = tpu.matmul %677, %718, %cst_552 {dimension_numbers = #tpu.dot_dimension_numbers<[1], [0], [0], [1], [0, 0, 1, 1], [], []>} : vector<8x32xf32>, vector<32x32xf32>, vector<8x32xf32> -> vector<8x32xf32>
    %720 = arith.addf %719, %291 : vector<8x32xf32>
    %c0_553 = arith.constant 0 : index
    %c0_554 = arith.constant 0 : index
    %c0_555 = arith.constant 0 : index
    %721 = vector.load %arg14[%c0_553, %c0_554, %c0_555] : memref<2x16x32xf32, #tpu.memory_space<vmem>>, vector<1x16x32xf32>
    %722 = vector.shape_cast %721 : vector<1x16x32xf32> to vector<16x32xf32>
    %cst_556 = arith.constant dense<0.000000e+00> : vector<8x32xf32>
    %723 = tpu.matmul %697, %722, %cst_556 {dimension_numbers = #tpu.dot_dimension_numbers<[1], [0], [0], [1], [0, 0, 1, 1], [], []>} : vector<8x16xf32>, vector<16x32xf32>, vector<8x32xf32> -> vector<8x32xf32>
    %c0_557 = arith.constant 0 : index
    %c2_558 = arith.constant 2 : index
    %c0_559 = arith.constant 0 : index
    %c0_560 = arith.constant 0 : index
    %724 = vector.load %arg31[%c0_557, %c2_558, %c0_559, %c0_560] : memref<2x8x8x32xf32, #tpu.memory_space<vmem>>, vector<1x1x8x32xf32>
    %725 = vector.shape_cast %724 : vector<1x1x8x32xf32> to vector<8x32xf32>
    %726 = arith.addf %723, %725 : vector<8x32xf32>
    %c0_561 = arith.constant 0 : index
    %c0_562 = arith.constant 0 : index
    %c0_563 = arith.constant 0 : index
    %727 = vector.load %arg15[%c0_561, %c0_562, %c0_563] : memref<2x16x32xf32, #tpu.memory_space<vmem>>, vector<1x16x32xf32>
    %728 = vector.shape_cast %727 : vector<1x16x32xf32> to vector<16x32xf32>
    %cst_564 = arith.constant dense<0.000000e+00> : vector<8x32xf32>
    %729 = tpu.matmul %697, %728, %cst_564 {dimension_numbers = #tpu.dot_dimension_numbers<[1], [0], [0], [1], [0, 0, 1, 1], [], []>} : vector<8x16xf32>, vector<16x32xf32>, vector<8x32xf32> -> vector<8x32xf32>
    %c0_565 = arith.constant 0 : index
    %c2_566 = arith.constant 2 : index
    %c0_567 = arith.constant 0 : index
    %c0_568 = arith.constant 0 : index
    %730 = vector.load %arg32[%c0_565, %c2_566, %c0_567, %c0_568] : memref<2x8x8x32xf32, #tpu.memory_space<vmem>>, vector<1x1x8x32xf32>
    %731 = vector.shape_cast %730 : vector<1x1x8x32xf32> to vector<8x32xf32>
    %732 = arith.addf %729, %731 : vector<8x32xf32>
    %c0_569 = arith.constant 0 : index
    %c0_570 = arith.constant 0 : index
    %c0_571 = arith.constant 0 : index
    %733 = vector.load %arg16[%c0_569, %c0_570, %c0_571] : memref<2x16x32xf32, #tpu.memory_space<vmem>>, vector<1x16x32xf32>
    %734 = vector.shape_cast %733 : vector<1x16x32xf32> to vector<16x32xf32>
    %cst_572 = arith.constant dense<0.000000e+00> : vector<8x32xf32>
    %735 = tpu.matmul %697, %734, %cst_572 {dimension_numbers = #tpu.dot_dimension_numbers<[1], [0], [0], [1], [0, 0, 1, 1], [], []>} : vector<8x16xf32>, vector<16x32xf32>, vector<8x32xf32> -> vector<8x32xf32>
    %c0_573 = arith.constant 0 : index
    %c2_574 = arith.constant 2 : index
    %c0_575 = arith.constant 0 : index
    %c0_576 = arith.constant 0 : index
    %736 = vector.load %arg33[%c0_573, %c2_574, %c0_575, %c0_576] : memref<2x8x8x32xf32, #tpu.memory_space<vmem>>, vector<1x1x8x32xf32>
    %737 = vector.shape_cast %736 : vector<1x1x8x32xf32> to vector<8x32xf32>
    %738 = arith.addf %735, %737 : vector<8x32xf32>
    %739 = arith.addf %726, %713 : vector<8x32xf32>
    %740 = arith.negf %739 : vector<8x32xf32>
    %741 = math.exp %740 : vector<8x32xf32>
    %cst_577 = arith.constant 1.000000e+00 : f32
    %742 = vector.broadcast %cst_577 : f32 to vector<8x32xf32>
    %743 = arith.addf %742, %741 : vector<8x32xf32>
    %744 = arith.divf %742, %743 : vector<8x32xf32>
    %745 = arith.addf %732, %716 : vector<8x32xf32>
    %746 = arith.negf %745 : vector<8x32xf32>
    %747 = math.exp %746 : vector<8x32xf32>
    %cst_578 = arith.constant 1.000000e+00 : f32
    %748 = vector.broadcast %cst_578 : f32 to vector<8x32xf32>
    %749 = arith.addf %748, %747 : vector<8x32xf32>
    %750 = arith.divf %748, %749 : vector<8x32xf32>
    %751 = arith.mulf %744, %720 : vector<8x32xf32>
    %752 = arith.addf %738, %751 : vector<8x32xf32>
    %753 = math.tanh %752 : vector<8x32xf32>
    %cst_579 = arith.constant 1.000000e+00 : f32
    %754 = vector.broadcast %cst_579 : f32 to vector<8x32xf32>
    %755 = arith.subf %754, %750 : vector<8x32xf32>
    %756 = arith.mulf %755, %753 : vector<8x32xf32>
    %757 = arith.mulf %750, %677 : vector<8x32xf32>
    %758 = arith.addf %756, %757 : vector<8x32xf32>
    %c5_580 = arith.constant 5 : index
    %c0_581 = arith.constant 0 : index
    %c0_582 = arith.constant 0 : index
    %759 = vector.load %arg0[%c5_580, %c0_581, %c0_582] : memref<8x8x16xf32, #tpu.memory_space<vmem>>, vector<1x8x16xf32>
    %760 = vector.shape_cast %759 : vector<1x8x16xf32> to vector<8x16xf32>
    %c5_583 = arith.constant 5 : index
    %c0_584 = arith.constant 0 : index
    %c0_585 = arith.constant 0 : index
    %761 = vector.load %arg1[%c5_583, %c0_584, %c0_585] : memref<8x8x16xf32, #tpu.memory_space<vmem>>, vector<1x8x16xf32>
    %762 = vector.shape_cast %761 : vector<1x8x16xf32> to vector<8x16xf32>
    %c5_586 = arith.constant 5 : index
    %c0_587 = arith.constant 0 : index
    %c0_588 = arith.constant 0 : index
    %763 = vector.load %arg34[%c5_586, %c0_587, %c0_588] : memref<8x8x16xf32, #tpu.memory_space<vmem>>, vector<1x8x16xf32>
    %764 = vector.shape_cast %763 : vector<1x8x16xf32> to vector<8x16xf32>
    %c1_589 = arith.constant 1 : index
    %c5_590 = arith.constant 5 : index
    %c0_591 = arith.constant 0 : index
    %c0_592 = arith.constant 0 : index
    %765 = vector.load %arg29[%c1_589, %c5_590, %c0_591, %c0_592] : memref<2x8x8x32xf32, #tpu.memory_space<vmem>>, vector<1x1x8x32xf32>
    %766 = vector.shape_cast %765 : vector<1x1x8x32xf32> to vector<8x32xf32>
    %c1_593 = arith.constant 1 : index
    %c5_594 = arith.constant 5 : index
    %c0_595 = arith.constant 0 : index
    %c0_596 = arith.constant 0 : index
    %767 = vector.load %arg30[%c1_593, %c5_594, %c0_595, %c0_596] : memref<2x8x8x16xf32, #tpu.memory_space<vmem>>, vector<1x1x8x16xf32>
    %768 = vector.shape_cast %767 : vector<1x1x8x16xf32> to vector<8x16xf32>
    %769 = arith.mulf %666, %766 : vector<8x32xf32>
    %c1_597 = arith.constant 1 : index
    %c0_598 = arith.constant 0 : index
    %c0_599 = arith.constant 0 : index
    %770 = vector.load %arg7[%c1_597, %c0_598, %c0_599] : memref<2x32x16xf32, #tpu.memory_space<vmem>>, vector<1x32x16xf32>
    %771 = vector.shape_cast %770 : vector<1x32x16xf32> to vector<32x16xf32>
    %cst_600 = arith.constant dense<0.000000e+00> : vector<8x16xf32>
    %772 = tpu.matmul %769, %771, %cst_600 {dimension_numbers = #tpu.dot_dimension_numbers<[1], [0], [0], [1], [0, 0, 1, 1], [], []>} : vector<8x32xf32>, vector<32x16xf32>, vector<8x16xf32> -> vector<8x16xf32>
    %773 = arith.addf %772, %279 : vector<8x16xf32>
    %774 = arith.mulf %762, %760 : vector<8x16xf32>
    %cst_601 = arith.constant 1.000000e+00 : f32
    %775 = vector.broadcast %cst_601 : f32 to vector<8x16xf32>
    %776 = arith.subf %775, %762 : vector<8x16xf32>
    %777 = arith.mulf %776, %773 : vector<8x16xf32>
    %778 = arith.addf %774, %777 : vector<8x16xf32>
    %c1_602 = arith.constant 1 : index
    %c0_603 = arith.constant 0 : index
    %c0_604 = arith.constant 0 : index
    %779 = vector.load %arg9[%c1_602, %c0_603, %c0_604] : memref<2x16x16xf32, #tpu.memory_space<vmem>>, vector<1x16x16xf32>
    %780 = vector.shape_cast %779 : vector<1x16x16xf32> to vector<16x16xf32>
    %cst_605 = arith.constant dense<0.000000e+00> : vector<8x16xf32>
    %781 = tpu.matmul %778, %780, %cst_605 {dimension_numbers = #tpu.dot_dimension_numbers<[1], [0], [0], [1], [0, 0, 1, 1], [], []>} : vector<8x16xf32>, vector<16x16xf32>, vector<8x16xf32> -> vector<8x16xf32>
    %782 = arith.addf %781, %287 : vector<8x16xf32>
    %783 = arith.mulf %768, %782 : vector<8x16xf32>
    %cst_606 = arith.constant 1.000000e+00 : f32
    %784 = vector.broadcast %cst_606 : f32 to vector<8x16xf32>
    %785 = arith.subf %784, %768 : vector<8x16xf32>
    %786 = arith.mulf %785, %773 : vector<8x16xf32>
    %787 = arith.addf %783, %786 : vector<8x16xf32>
    %788 = arith.mulf %776, %787 : vector<8x16xf32>
    %789 = arith.addf %774, %788 : vector<8x16xf32>
    %c1_607 = arith.constant 1 : index
    %c5_608 = arith.constant 5 : index
    %c0_609 = arith.constant 0 : index
    %c0_610 = arith.constant 0 : index
    %790 = vector.load %arg35[%c1_607, %c5_608, %c0_609, %c0_610] : memref<2x8x8x16xf32, #tpu.memory_space<vmem>>, vector<1x1x8x16xf32>
    %791 = vector.shape_cast %790 : vector<1x1x8x16xf32> to vector<8x16xf32>
    %792 = vector.shape_cast %789 : vector<8x16xf32> to vector<1x1x8x16xf32>
    tpu.vector_store %arg35[%c1_607, %c5_608, %c0_609, %c0_610], %792 {strides = array<i32>} : memref<2x8x8x16xf32, #tpu.memory_space<vmem>>, vector<1x1x8x16xf32>,
    %793 = arith.subf %760, %773 : vector<8x16xf32>
    %794 = math.absf %793 : vector<8x16xf32>
    %795 = arith.subf %760, %782 : vector<8x16xf32>
    %796 = math.absf %795 : vector<8x16xf32>
    %797 = arith.addf %794, %796 : vector<8x16xf32>
    %798 = arith.subf %760, %787 : vector<8x16xf32>
    %799 = math.absf %798 : vector<8x16xf32>
    %800 = arith.addf %797, %799 : vector<8x16xf32>
    %801 = arith.mulf %800, %764 : vector<8x16xf32>
    %802 = arith.addf %710, %801 : vector<8x16xf32>
    %c1_611 = arith.constant 1 : index
    %c0_612 = arith.constant 0 : index
    %c0_613 = arith.constant 0 : index
    %803 = vector.load %arg24[%c1_611, %c0_612, %c0_613] : memref<2x32x32xf32, #tpu.memory_space<vmem>>, vector<1x32x32xf32>
    %804 = vector.shape_cast %803 : vector<1x32x32xf32> to vector<32x32xf32>
    %cst_614 = arith.constant dense<0.000000e+00> : vector<8x32xf32>
    %805 = tpu.matmul %769, %804, %cst_614 {dimension_numbers = #tpu.dot_dimension_numbers<[1], [0], [0], [1], [0, 0, 1, 1], [], []>} : vector<8x32xf32>, vector<32x32xf32>, vector<8x32xf32> -> vector<8x32xf32>
    %c1_615 = arith.constant 1 : index
    %c0_616 = arith.constant 0 : index
    %c0_617 = arith.constant 0 : index
    %806 = vector.load %arg25[%c1_615, %c0_616, %c0_617] : memref<2x32x32xf32, #tpu.memory_space<vmem>>, vector<1x32x32xf32>
    %807 = vector.shape_cast %806 : vector<1x32x32xf32> to vector<32x32xf32>
    %cst_618 = arith.constant dense<0.000000e+00> : vector<8x32xf32>
    %808 = tpu.matmul %769, %807, %cst_618 {dimension_numbers = #tpu.dot_dimension_numbers<[1], [0], [0], [1], [0, 0, 1, 1], [], []>} : vector<8x32xf32>, vector<32x32xf32>, vector<8x32xf32> -> vector<8x32xf32>
    %c1_619 = arith.constant 1 : index
    %c0_620 = arith.constant 0 : index
    %c0_621 = arith.constant 0 : index
    %809 = vector.load %arg26[%c1_619, %c0_620, %c0_621] : memref<2x32x32xf32, #tpu.memory_space<vmem>>, vector<1x32x32xf32>
    %810 = vector.shape_cast %809 : vector<1x32x32xf32> to vector<32x32xf32>
    %cst_622 = arith.constant dense<0.000000e+00> : vector<8x32xf32>
    %811 = tpu.matmul %769, %810, %cst_622 {dimension_numbers = #tpu.dot_dimension_numbers<[1], [0], [0], [1], [0, 0, 1, 1], [], []>} : vector<8x32xf32>, vector<32x32xf32>, vector<8x32xf32> -> vector<8x32xf32>
    %812 = arith.addf %811, %295 : vector<8x32xf32>
    %c1_623 = arith.constant 1 : index
    %c0_624 = arith.constant 0 : index
    %c0_625 = arith.constant 0 : index
    %813 = vector.load %arg14[%c1_623, %c0_624, %c0_625] : memref<2x16x32xf32, #tpu.memory_space<vmem>>, vector<1x16x32xf32>
    %814 = vector.shape_cast %813 : vector<1x16x32xf32> to vector<16x32xf32>
    %cst_626 = arith.constant dense<0.000000e+00> : vector<8x32xf32>
    %815 = tpu.matmul %789, %814, %cst_626 {dimension_numbers = #tpu.dot_dimension_numbers<[1], [0], [0], [1], [0, 0, 1, 1], [], []>} : vector<8x16xf32>, vector<16x32xf32>, vector<8x32xf32> -> vector<8x32xf32>
    %c1_627 = arith.constant 1 : index
    %c5_628 = arith.constant 5 : index
    %c0_629 = arith.constant 0 : index
    %c0_630 = arith.constant 0 : index
    %816 = vector.load %arg31[%c1_627, %c5_628, %c0_629, %c0_630] : memref<2x8x8x32xf32, #tpu.memory_space<vmem>>, vector<1x1x8x32xf32>
    %817 = vector.shape_cast %816 : vector<1x1x8x32xf32> to vector<8x32xf32>
    %818 = arith.addf %815, %817 : vector<8x32xf32>
    %c1_631 = arith.constant 1 : index
    %c0_632 = arith.constant 0 : index
    %c0_633 = arith.constant 0 : index
    %819 = vector.load %arg15[%c1_631, %c0_632, %c0_633] : memref<2x16x32xf32, #tpu.memory_space<vmem>>, vector<1x16x32xf32>
    %820 = vector.shape_cast %819 : vector<1x16x32xf32> to vector<16x32xf32>
    %cst_634 = arith.constant dense<0.000000e+00> : vector<8x32xf32>
    %821 = tpu.matmul %789, %820, %cst_634 {dimension_numbers = #tpu.dot_dimension_numbers<[1], [0], [0], [1], [0, 0, 1, 1], [], []>} : vector<8x16xf32>, vector<16x32xf32>, vector<8x32xf32> -> vector<8x32xf32>
    %c1_635 = arith.constant 1 : index
    %c5_636 = arith.constant 5 : index
    %c0_637 = arith.constant 0 : index
    %c0_638 = arith.constant 0 : index
    %822 = vector.load %arg32[%c1_635, %c5_636, %c0_637, %c0_638] : memref<2x8x8x32xf32, #tpu.memory_space<vmem>>, vector<1x1x8x32xf32>
    %823 = vector.shape_cast %822 : vector<1x1x8x32xf32> to vector<8x32xf32>
    %824 = arith.addf %821, %823 : vector<8x32xf32>
    %c1_639 = arith.constant 1 : index
    %c0_640 = arith.constant 0 : index
    %c0_641 = arith.constant 0 : index
    %825 = vector.load %arg16[%c1_639, %c0_640, %c0_641] : memref<2x16x32xf32, #tpu.memory_space<vmem>>, vector<1x16x32xf32>
    %826 = vector.shape_cast %825 : vector<1x16x32xf32> to vector<16x32xf32>
    %cst_642 = arith.constant dense<0.000000e+00> : vector<8x32xf32>
    %827 = tpu.matmul %789, %826, %cst_642 {dimension_numbers = #tpu.dot_dimension_numbers<[1], [0], [0], [1], [0, 0, 1, 1], [], []>} : vector<8x16xf32>, vector<16x32xf32>, vector<8x32xf32> -> vector<8x32xf32>
    %c1_643 = arith.constant 1 : index
    %c5_644 = arith.constant 5 : index
    %c0_645 = arith.constant 0 : index
    %c0_646 = arith.constant 0 : index
    %828 = vector.load %arg33[%c1_643, %c5_644, %c0_645, %c0_646] : memref<2x8x8x32xf32, #tpu.memory_space<vmem>>, vector<1x1x8x32xf32>
    %829 = vector.shape_cast %828 : vector<1x1x8x32xf32> to vector<8x32xf32>
    %830 = arith.addf %827, %829 : vector<8x32xf32>
    %831 = arith.addf %818, %805 : vector<8x32xf32>
    %832 = arith.negf %831 : vector<8x32xf32>
    %833 = math.exp %832 : vector<8x32xf32>
    %cst_647 = arith.constant 1.000000e+00 : f32
    %834 = vector.broadcast %cst_647 : f32 to vector<8x32xf32>
    %835 = arith.addf %834, %833 : vector<8x32xf32>
    %836 = arith.divf %834, %835 : vector<8x32xf32>
    %837 = arith.addf %824, %808 : vector<8x32xf32>
    %838 = arith.negf %837 : vector<8x32xf32>
    %839 = math.exp %838 : vector<8x32xf32>
    %cst_648 = arith.constant 1.000000e+00 : f32
    %840 = vector.broadcast %cst_648 : f32 to vector<8x32xf32>
    %841 = arith.addf %840, %839 : vector<8x32xf32>
    %842 = arith.divf %840, %841 : vector<8x32xf32>
    %843 = arith.mulf %836, %812 : vector<8x32xf32>
    %844 = arith.addf %830, %843 : vector<8x32xf32>
    %845 = math.tanh %844 : vector<8x32xf32>
    %cst_649 = arith.constant 1.000000e+00 : f32
    %846 = vector.broadcast %cst_649 : f32 to vector<8x32xf32>
    %847 = arith.subf %846, %842 : vector<8x32xf32>
    %848 = arith.mulf %847, %845 : vector<8x32xf32>
    %849 = arith.mulf %842, %769 : vector<8x32xf32>
    %850 = arith.addf %848, %849 : vector<8x32xf32>
    %c3_650 = arith.constant 3 : index
    %c0_651 = arith.constant 0 : index
    %c0_652 = arith.constant 0 : index
    %851 = vector.load %arg0[%c3_650, %c0_651, %c0_652] : memref<8x8x16xf32, #tpu.memory_space<vmem>>, vector<1x8x16xf32>
    %852 = vector.shape_cast %851 : vector<1x8x16xf32> to vector<8x16xf32>
    %c3_653 = arith.constant 3 : index
    %c0_654 = arith.constant 0 : index
    %c0_655 = arith.constant 0 : index
    %853 = vector.load %arg1[%c3_653, %c0_654, %c0_655] : memref<8x8x16xf32, #tpu.memory_space<vmem>>, vector<1x8x16xf32>
    %854 = vector.shape_cast %853 : vector<1x8x16xf32> to vector<8x16xf32>
    %c3_656 = arith.constant 3 : index
    %c0_657 = arith.constant 0 : index
    %c0_658 = arith.constant 0 : index
    %855 = vector.load %arg34[%c3_656, %c0_657, %c0_658] : memref<8x8x16xf32, #tpu.memory_space<vmem>>, vector<1x8x16xf32>
    %856 = vector.shape_cast %855 : vector<1x8x16xf32> to vector<8x16xf32>
    %c0_659 = arith.constant 0 : index
    %c3_660 = arith.constant 3 : index
    %c0_661 = arith.constant 0 : index
    %c0_662 = arith.constant 0 : index
    %857 = vector.load %arg29[%c0_659, %c3_660, %c0_661, %c0_662] : memref<2x8x8x32xf32, #tpu.memory_space<vmem>>, vector<1x1x8x32xf32>
    %858 = vector.shape_cast %857 : vector<1x1x8x32xf32> to vector<8x32xf32>
    %c0_663 = arith.constant 0 : index
    %c3_664 = arith.constant 3 : index
    %c0_665 = arith.constant 0 : index
    %c0_666 = arith.constant 0 : index
    %859 = vector.load %arg30[%c0_663, %c3_664, %c0_665, %c0_666] : memref<2x8x8x16xf32, #tpu.memory_space<vmem>>, vector<1x1x8x16xf32>
    %860 = vector.shape_cast %859 : vector<1x1x8x16xf32> to vector<8x16xf32>
    %861 = arith.mulf %758, %858 : vector<8x32xf32>
    %c0_667 = arith.constant 0 : index
    %c0_668 = arith.constant 0 : index
    %c0_669 = arith.constant 0 : index
    %862 = vector.load %arg7[%c0_667, %c0_668, %c0_669] : memref<2x32x16xf32, #tpu.memory_space<vmem>>, vector<1x32x16xf32>
    %863 = vector.shape_cast %862 : vector<1x32x16xf32> to vector<32x16xf32>
    %cst_670 = arith.constant dense<0.000000e+00> : vector<8x16xf32>
    %864 = tpu.matmul %861, %863, %cst_670 {dimension_numbers = #tpu.dot_dimension_numbers<[1], [0], [0], [1], [0, 0, 1, 1], [], []>} : vector<8x32xf32>, vector<32x16xf32>, vector<8x16xf32> -> vector<8x16xf32>
    %865 = arith.addf %864, %275 : vector<8x16xf32>
    %866 = arith.mulf %854, %852 : vector<8x16xf32>
    %cst_671 = arith.constant 1.000000e+00 : f32
    %867 = vector.broadcast %cst_671 : f32 to vector<8x16xf32>
    %868 = arith.subf %867, %854 : vector<8x16xf32>
    %869 = arith.mulf %868, %865 : vector<8x16xf32>
    %870 = arith.addf %866, %869 : vector<8x16xf32>
    %c0_672 = arith.constant 0 : index
    %c0_673 = arith.constant 0 : index
    %c0_674 = arith.constant 0 : index
    %871 = vector.load %arg9[%c0_672, %c0_673, %c0_674] : memref<2x16x16xf32, #tpu.memory_space<vmem>>, vector<1x16x16xf32>
    %872 = vector.shape_cast %871 : vector<1x16x16xf32> to vector<16x16xf32>
    %cst_675 = arith.constant dense<0.000000e+00> : vector<8x16xf32>
    %873 = tpu.matmul %870, %872, %cst_675 {dimension_numbers = #tpu.dot_dimension_numbers<[1], [0], [0], [1], [0, 0, 1, 1], [], []>} : vector<8x16xf32>, vector<16x16xf32>, vector<8x16xf32> -> vector<8x16xf32>
    %874 = arith.addf %873, %283 : vector<8x16xf32>
    %875 = arith.mulf %860, %874 : vector<8x16xf32>
    %cst_676 = arith.constant 1.000000e+00 : f32
    %876 = vector.broadcast %cst_676 : f32 to vector<8x16xf32>
    %877 = arith.subf %876, %860 : vector<8x16xf32>
    %878 = arith.mulf %877, %865 : vector<8x16xf32>
    %879 = arith.addf %875, %878 : vector<8x16xf32>
    %880 = arith.mulf %868, %879 : vector<8x16xf32>
    %881 = arith.addf %866, %880 : vector<8x16xf32>
    %c0_677 = arith.constant 0 : index
    %c3_678 = arith.constant 3 : index
    %c0_679 = arith.constant 0 : index
    %c0_680 = arith.constant 0 : index
    %882 = vector.load %arg35[%c0_677, %c3_678, %c0_679, %c0_680] : memref<2x8x8x16xf32, #tpu.memory_space<vmem>>, vector<1x1x8x16xf32>
    %883 = vector.shape_cast %882 : vector<1x1x8x16xf32> to vector<8x16xf32>
    %884 = vector.shape_cast %881 : vector<8x16xf32> to vector<1x1x8x16xf32>
    tpu.vector_store %arg35[%c0_677, %c3_678, %c0_679, %c0_680], %884 {strides = array<i32>} : memref<2x8x8x16xf32, #tpu.memory_space<vmem>>, vector<1x1x8x16xf32>,
    %885 = arith.subf %852, %865 : vector<8x16xf32>
    %886 = math.absf %885 : vector<8x16xf32>
    %887 = arith.subf %852, %874 : vector<8x16xf32>
    %888 = math.absf %887 : vector<8x16xf32>
    %889 = arith.addf %886, %888 : vector<8x16xf32>
    %890 = arith.subf %852, %879 : vector<8x16xf32>
    %891 = math.absf %890 : vector<8x16xf32>
    %892 = arith.addf %889, %891 : vector<8x16xf32>
    %893 = arith.mulf %892, %856 : vector<8x16xf32>
    %894 = arith.addf %802, %893 : vector<8x16xf32>
    %c0_681 = arith.constant 0 : index
    %c0_682 = arith.constant 0 : index
    %c0_683 = arith.constant 0 : index
    %895 = vector.load %arg24[%c0_681, %c0_682, %c0_683] : memref<2x32x32xf32, #tpu.memory_space<vmem>>, vector<1x32x32xf32>
    %896 = vector.shape_cast %895 : vector<1x32x32xf32> to vector<32x32xf32>
    %cst_684 = arith.constant dense<0.000000e+00> : vector<8x32xf32>
    %897 = tpu.matmul %861, %896, %cst_684 {dimension_numbers = #tpu.dot_dimension_numbers<[1], [0], [0], [1], [0, 0, 1, 1], [], []>} : vector<8x32xf32>, vector<32x32xf32>, vector<8x32xf32> -> vector<8x32xf32>
    %c0_685 = arith.constant 0 : index
    %c0_686 = arith.constant 0 : index
    %c0_687 = arith.constant 0 : index
    %898 = vector.load %arg25[%c0_685, %c0_686, %c0_687] : memref<2x32x32xf32, #tpu.memory_space<vmem>>, vector<1x32x32xf32>
    %899 = vector.shape_cast %898 : vector<1x32x32xf32> to vector<32x32xf32>
    %cst_688 = arith.constant dense<0.000000e+00> : vector<8x32xf32>
    %900 = tpu.matmul %861, %899, %cst_688 {dimension_numbers = #tpu.dot_dimension_numbers<[1], [0], [0], [1], [0, 0, 1, 1], [], []>} : vector<8x32xf32>, vector<32x32xf32>, vector<8x32xf32> -> vector<8x32xf32>
    %c0_689 = arith.constant 0 : index
    %c0_690 = arith.constant 0 : index
    %c0_691 = arith.constant 0 : index
    %901 = vector.load %arg26[%c0_689, %c0_690, %c0_691] : memref<2x32x32xf32, #tpu.memory_space<vmem>>, vector<1x32x32xf32>
    %902 = vector.shape_cast %901 : vector<1x32x32xf32> to vector<32x32xf32>
    %cst_692 = arith.constant dense<0.000000e+00> : vector<8x32xf32>
    %903 = tpu.matmul %861, %902, %cst_692 {dimension_numbers = #tpu.dot_dimension_numbers<[1], [0], [0], [1], [0, 0, 1, 1], [], []>} : vector<8x32xf32>, vector<32x32xf32>, vector<8x32xf32> -> vector<8x32xf32>
    %904 = arith.addf %903, %291 : vector<8x32xf32>
    %c0_693 = arith.constant 0 : index
    %c0_694 = arith.constant 0 : index
    %c0_695 = arith.constant 0 : index
    %905 = vector.load %arg14[%c0_693, %c0_694, %c0_695] : memref<2x16x32xf32, #tpu.memory_space<vmem>>, vector<1x16x32xf32>
    %906 = vector.shape_cast %905 : vector<1x16x32xf32> to vector<16x32xf32>
    %cst_696 = arith.constant dense<0.000000e+00> : vector<8x32xf32>
    %907 = tpu.matmul %881, %906, %cst_696 {dimension_numbers = #tpu.dot_dimension_numbers<[1], [0], [0], [1], [0, 0, 1, 1], [], []>} : vector<8x16xf32>, vector<16x32xf32>, vector<8x32xf32> -> vector<8x32xf32>
    %c0_697 = arith.constant 0 : index
    %c3_698 = arith.constant 3 : index
    %c0_699 = arith.constant 0 : index
    %c0_700 = arith.constant 0 : index
    %908 = vector.load %arg31[%c0_697, %c3_698, %c0_699, %c0_700] : memref<2x8x8x32xf32, #tpu.memory_space<vmem>>, vector<1x1x8x32xf32>
    %909 = vector.shape_cast %908 : vector<1x1x8x32xf32> to vector<8x32xf32>
    %910 = arith.addf %907, %909 : vector<8x32xf32>
    %c0_701 = arith.constant 0 : index
    %c0_702 = arith.constant 0 : index
    %c0_703 = arith.constant 0 : index
    %911 = vector.load %arg15[%c0_701, %c0_702, %c0_703] : memref<2x16x32xf32, #tpu.memory_space<vmem>>, vector<1x16x32xf32>
    %912 = vector.shape_cast %911 : vector<1x16x32xf32> to vector<16x32xf32>
    %cst_704 = arith.constant dense<0.000000e+00> : vector<8x32xf32>
    %913 = tpu.matmul %881, %912, %cst_704 {dimension_numbers = #tpu.dot_dimension_numbers<[1], [0], [0], [1], [0, 0, 1, 1], [], []>} : vector<8x16xf32>, vector<16x32xf32>, vector<8x32xf32> -> vector<8x32xf32>
    %c0_705 = arith.constant 0 : index
    %c3_706 = arith.constant 3 : index
    %c0_707 = arith.constant 0 : index
    %c0_708 = arith.constant 0 : index
    %914 = vector.load %arg32[%c0_705, %c3_706, %c0_707, %c0_708] : memref<2x8x8x32xf32, #tpu.memory_space<vmem>>, vector<1x1x8x32xf32>
    %915 = vector.shape_cast %914 : vector<1x1x8x32xf32> to vector<8x32xf32>
    %916 = arith.addf %913, %915 : vector<8x32xf32>
    %c0_709 = arith.constant 0 : index
    %c0_710 = arith.constant 0 : index
    %c0_711 = arith.constant 0 : index
    %917 = vector.load %arg16[%c0_709, %c0_710, %c0_711] : memref<2x16x32xf32, #tpu.memory_space<vmem>>, vector<1x16x32xf32>
    %918 = vector.shape_cast %917 : vector<1x16x32xf32> to vector<16x32xf32>
    %cst_712 = arith.constant dense<0.000000e+00> : vector<8x32xf32>
    %919 = tpu.matmul %881, %918, %cst_712 {dimension_numbers = #tpu.dot_dimension_numbers<[1], [0], [0], [1], [0, 0, 1, 1], [], []>} : vector<8x16xf32>, vector<16x32xf32>, vector<8x32xf32> -> vector<8x32xf32>
    %c0_713 = arith.constant 0 : index
    %c3_714 = arith.constant 3 : index
    %c0_715 = arith.constant 0 : index
    %c0_716 = arith.constant 0 : index
    %920 = vector.load %arg33[%c0_713, %c3_714, %c0_715, %c0_716] : memref<2x8x8x32xf32, #tpu.memory_space<vmem>>, vector<1x1x8x32xf32>
    %921 = vector.shape_cast %920 : vector<1x1x8x32xf32> to vector<8x32xf32>
    %922 = arith.addf %919, %921 : vector<8x32xf32>
    %923 = arith.addf %910, %897 : vector<8x32xf32>
    %924 = arith.negf %923 : vector<8x32xf32>
    %925 = math.exp %924 : vector<8x32xf32>
    %cst_717 = arith.constant 1.000000e+00 : f32
    %926 = vector.broadcast %cst_717 : f32 to vector<8x32xf32>
    %927 = arith.addf %926, %925 : vector<8x32xf32>
    %928 = arith.divf %926, %927 : vector<8x32xf32>
    %929 = arith.addf %916, %900 : vector<8x32xf32>
    %930 = arith.negf %929 : vector<8x32xf32>
    %931 = math.exp %930 : vector<8x32xf32>
    %cst_718 = arith.constant 1.000000e+00 : f32
    %932 = vector.broadcast %cst_718 : f32 to vector<8x32xf32>
    %933 = arith.addf %932, %931 : vector<8x32xf32>
    %934 = arith.divf %932, %933 : vector<8x32xf32>
    %935 = arith.mulf %928, %904 : vector<8x32xf32>
    %936 = arith.addf %922, %935 : vector<8x32xf32>
    %937 = math.tanh %936 : vector<8x32xf32>
    %cst_719 = arith.constant 1.000000e+00 : f32
    %938 = vector.broadcast %cst_719 : f32 to vector<8x32xf32>
    %939 = arith.subf %938, %934 : vector<8x32xf32>
    %940 = arith.mulf %939, %937 : vector<8x32xf32>
    %941 = arith.mulf %934, %861 : vector<8x32xf32>
    %942 = arith.addf %940, %941 : vector<8x32xf32>
    %c4_720 = arith.constant 4 : index
    %c0_721 = arith.constant 0 : index
    %c0_722 = arith.constant 0 : index
    %943 = vector.load %arg0[%c4_720, %c0_721, %c0_722] : memref<8x8x16xf32, #tpu.memory_space<vmem>>, vector<1x8x16xf32>
    %944 = vector.shape_cast %943 : vector<1x8x16xf32> to vector<8x16xf32>
    %c4_723 = arith.constant 4 : index
    %c0_724 = arith.constant 0 : index
    %c0_725 = arith.constant 0 : index
    %945 = vector.load %arg1[%c4_723, %c0_724, %c0_725] : memref<8x8x16xf32, #tpu.memory_space<vmem>>, vector<1x8x16xf32>
    %946 = vector.shape_cast %945 : vector<1x8x16xf32> to vector<8x16xf32>
    %c4_726 = arith.constant 4 : index
    %c0_727 = arith.constant 0 : index
    %c0_728 = arith.constant 0 : index
    %947 = vector.load %arg34[%c4_726, %c0_727, %c0_728] : memref<8x8x16xf32, #tpu.memory_space<vmem>>, vector<1x8x16xf32>
    %948 = vector.shape_cast %947 : vector<1x8x16xf32> to vector<8x16xf32>
    %c1_729 = arith.constant 1 : index
    %c4_730 = arith.constant 4 : index
    %c0_731 = arith.constant 0 : index
    %c0_732 = arith.constant 0 : index
    %949 = vector.load %arg29[%c1_729, %c4_730, %c0_731, %c0_732] : memref<2x8x8x32xf32, #tpu.memory_space<vmem>>, vector<1x1x8x32xf32>
    %950 = vector.shape_cast %949 : vector<1x1x8x32xf32> to vector<8x32xf32>
    %c1_733 = arith.constant 1 : index
    %c4_734 = arith.constant 4 : index
    %c0_735 = arith.constant 0 : index
    %c0_736 = arith.constant 0 : index
    %951 = vector.load %arg30[%c1_733, %c4_734, %c0_735, %c0_736] : memref<2x8x8x16xf32, #tpu.memory_space<vmem>>, vector<1x1x8x16xf32>
    %952 = vector.shape_cast %951 : vector<1x1x8x16xf32> to vector<8x16xf32>
    %953 = arith.mulf %850, %950 : vector<8x32xf32>
    %c1_737 = arith.constant 1 : index
    %c0_738 = arith.constant 0 : index
    %c0_739 = arith.constant 0 : index
    %954 = vector.load %arg7[%c1_737, %c0_738, %c0_739] : memref<2x32x16xf32, #tpu.memory_space<vmem>>, vector<1x32x16xf32>
    %955 = vector.shape_cast %954 : vector<1x32x16xf32> to vector<32x16xf32>
    %cst_740 = arith.constant dense<0.000000e+00> : vector<8x16xf32>
    %956 = tpu.matmul %953, %955, %cst_740 {dimension_numbers = #tpu.dot_dimension_numbers<[1], [0], [0], [1], [0, 0, 1, 1], [], []>} : vector<8x32xf32>, vector<32x16xf32>, vector<8x16xf32> -> vector<8x16xf32>
    %957 = arith.addf %956, %279 : vector<8x16xf32>
    %958 = arith.mulf %946, %944 : vector<8x16xf32>
    %cst_741 = arith.constant 1.000000e+00 : f32
    %959 = vector.broadcast %cst_741 : f32 to vector<8x16xf32>
    %960 = arith.subf %959, %946 : vector<8x16xf32>
    %961 = arith.mulf %960, %957 : vector<8x16xf32>
    %962 = arith.addf %958, %961 : vector<8x16xf32>
    %c1_742 = arith.constant 1 : index
    %c0_743 = arith.constant 0 : index
    %c0_744 = arith.constant 0 : index
    %963 = vector.load %arg9[%c1_742, %c0_743, %c0_744] : memref<2x16x16xf32, #tpu.memory_space<vmem>>, vector<1x16x16xf32>
    %964 = vector.shape_cast %963 : vector<1x16x16xf32> to vector<16x16xf32>
    %cst_745 = arith.constant dense<0.000000e+00> : vector<8x16xf32>
    %965 = tpu.matmul %962, %964, %cst_745 {dimension_numbers = #tpu.dot_dimension_numbers<[1], [0], [0], [1], [0, 0, 1, 1], [], []>} : vector<8x16xf32>, vector<16x16xf32>, vector<8x16xf32> -> vector<8x16xf32>
    %966 = arith.addf %965, %287 : vector<8x16xf32>
    %967 = arith.mulf %952, %966 : vector<8x16xf32>
    %cst_746 = arith.constant 1.000000e+00 : f32
    %968 = vector.broadcast %cst_746 : f32 to vector<8x16xf32>
    %969 = arith.subf %968, %952 : vector<8x16xf32>
    %970 = arith.mulf %969, %957 : vector<8x16xf32>
    %971 = arith.addf %967, %970 : vector<8x16xf32>
    %972 = arith.mulf %960, %971 : vector<8x16xf32>
    %973 = arith.addf %958, %972 : vector<8x16xf32>
    %c1_747 = arith.constant 1 : index
    %c4_748 = arith.constant 4 : index
    %c0_749 = arith.constant 0 : index
    %c0_750 = arith.constant 0 : index
    %974 = vector.load %arg35[%c1_747, %c4_748, %c0_749, %c0_750] : memref<2x8x8x16xf32, #tpu.memory_space<vmem>>, vector<1x1x8x16xf32>
    %975 = vector.shape_cast %974 : vector<1x1x8x16xf32> to vector<8x16xf32>
    %976 = vector.shape_cast %973 : vector<8x16xf32> to vector<1x1x8x16xf32>
    tpu.vector_store %arg35[%c1_747, %c4_748, %c0_749, %c0_750], %976 {strides = array<i32>} : memref<2x8x8x16xf32, #tpu.memory_space<vmem>>, vector<1x1x8x16xf32>,
    %977 = arith.subf %944, %957 : vector<8x16xf32>
    %978 = math.absf %977 : vector<8x16xf32>
    %979 = arith.subf %944, %966 : vector<8x16xf32>
    %980 = math.absf %979 : vector<8x16xf32>
    %981 = arith.addf %978, %980 : vector<8x16xf32>
    %982 = arith.subf %944, %971 : vector<8x16xf32>
    %983 = math.absf %982 : vector<8x16xf32>
    %984 = arith.addf %981, %983 : vector<8x16xf32>
    %985 = arith.mulf %984, %948 : vector<8x16xf32>
    %986 = arith.addf %894, %985 : vector<8x16xf32>
    %c1_751 = arith.constant 1 : index
    %c0_752 = arith.constant 0 : index
    %c0_753 = arith.constant 0 : index
    %987 = vector.load %arg24[%c1_751, %c0_752, %c0_753] : memref<2x32x32xf32, #tpu.memory_space<vmem>>, vector<1x32x32xf32>
    %988 = vector.shape_cast %987 : vector<1x32x32xf32> to vector<32x32xf32>
    %cst_754 = arith.constant dense<0.000000e+00> : vector<8x32xf32>
    %989 = tpu.matmul %953, %988, %cst_754 {dimension_numbers = #tpu.dot_dimension_numbers<[1], [0], [0], [1], [0, 0, 1, 1], [], []>} : vector<8x32xf32>, vector<32x32xf32>, vector<8x32xf32> -> vector<8x32xf32>
    %c1_755 = arith.constant 1 : index
    %c0_756 = arith.constant 0 : index
    %c0_757 = arith.constant 0 : index
    %990 = vector.load %arg25[%c1_755, %c0_756, %c0_757] : memref<2x32x32xf32, #tpu.memory_space<vmem>>, vector<1x32x32xf32>
    %991 = vector.shape_cast %990 : vector<1x32x32xf32> to vector<32x32xf32>
    %cst_758 = arith.constant dense<0.000000e+00> : vector<8x32xf32>
    %992 = tpu.matmul %953, %991, %cst_758 {dimension_numbers = #tpu.dot_dimension_numbers<[1], [0], [0], [1], [0, 0, 1, 1], [], []>} : vector<8x32xf32>, vector<32x32xf32>, vector<8x32xf32> -> vector<8x32xf32>
    %c1_759 = arith.constant 1 : index
    %c0_760 = arith.constant 0 : index
    %c0_761 = arith.constant 0 : index
    %993 = vector.load %arg26[%c1_759, %c0_760, %c0_761] : memref<2x32x32xf32, #tpu.memory_space<vmem>>, vector<1x32x32xf32>
    %994 = vector.shape_cast %993 : vector<1x32x32xf32> to vector<32x32xf32>
    %cst_762 = arith.constant dense<0.000000e+00> : vector<8x32xf32>
    %995 = tpu.matmul %953, %994, %cst_762 {dimension_numbers = #tpu.dot_dimension_numbers<[1], [0], [0], [1], [0, 0, 1, 1], [], []>} : vector<8x32xf32>, vector<32x32xf32>, vector<8x32xf32> -> vector<8x32xf32>
    %996 = arith.addf %995, %295 : vector<8x32xf32>
    %c1_763 = arith.constant 1 : index
    %c0_764 = arith.constant 0 : index
    %c0_765 = arith.constant 0 : index
    %997 = vector.load %arg14[%c1_763, %c0_764, %c0_765] : memref<2x16x32xf32, #tpu.memory_space<vmem>>, vector<1x16x32xf32>
    %998 = vector.shape_cast %997 : vector<1x16x32xf32> to vector<16x32xf32>
    %cst_766 = arith.constant dense<0.000000e+00> : vector<8x32xf32>
    %999 = tpu.matmul %973, %998, %cst_766 {dimension_numbers = #tpu.dot_dimension_numbers<[1], [0], [0], [1], [0, 0, 1, 1], [], []>} : vector<8x16xf32>, vector<16x32xf32>, vector<8x32xf32> -> vector<8x32xf32>
    %c1_767 = arith.constant 1 : index
    %c4_768 = arith.constant 4 : index
    %c0_769 = arith.constant 0 : index
    %c0_770 = arith.constant 0 : index
    %1000 = vector.load %arg31[%c1_767, %c4_768, %c0_769, %c0_770] : memref<2x8x8x32xf32, #tpu.memory_space<vmem>>, vector<1x1x8x32xf32>
    %1001 = vector.shape_cast %1000 : vector<1x1x8x32xf32> to vector<8x32xf32>
    %1002 = arith.addf %999, %1001 : vector<8x32xf32>
    %c1_771 = arith.constant 1 : index
    %c0_772 = arith.constant 0 : index
    %c0_773 = arith.constant 0 : index
    %1003 = vector.load %arg15[%c1_771, %c0_772, %c0_773] : memref<2x16x32xf32, #tpu.memory_space<vmem>>, vector<1x16x32xf32>
    %1004 = vector.shape_cast %1003 : vector<1x16x32xf32> to vector<16x32xf32>
    %cst_774 = arith.constant dense<0.000000e+00> : vector<8x32xf32>
    %1005 = tpu.matmul %973, %1004, %cst_774 {dimension_numbers = #tpu.dot_dimension_numbers<[1], [0], [0], [1], [0, 0, 1, 1], [], []>} : vector<8x16xf32>, vector<16x32xf32>, vector<8x32xf32> -> vector<8x32xf32>
    %c1_775 = arith.constant 1 : index
    %c4_776 = arith.constant 4 : index
    %c0_777 = arith.constant 0 : index
    %c0_778 = arith.constant 0 : index
    %1006 = vector.load %arg32[%c1_775, %c4_776, %c0_777, %c0_778] : memref<2x8x8x32xf32, #tpu.memory_space<vmem>>, vector<1x1x8x32xf32>
    %1007 = vector.shape_cast %1006 : vector<1x1x8x32xf32> to vector<8x32xf32>
    %1008 = arith.addf %1005, %1007 : vector<8x32xf32>
    %c1_779 = arith.constant 1 : index
    %c0_780 = arith.constant 0 : index
    %c0_781 = arith.constant 0 : index
    %1009 = vector.load %arg16[%c1_779, %c0_780, %c0_781] : memref<2x16x32xf32, #tpu.memory_space<vmem>>, vector<1x16x32xf32>
    %1010 = vector.shape_cast %1009 : vector<1x16x32xf32> to vector<16x32xf32>
    %cst_782 = arith.constant dense<0.000000e+00> : vector<8x32xf32>
    %1011 = tpu.matmul %973, %1010, %cst_782 {dimension_numbers = #tpu.dot_dimension_numbers<[1], [0], [0], [1], [0, 0, 1, 1], [], []>} : vector<8x16xf32>, vector<16x32xf32>, vector<8x32xf32> -> vector<8x32xf32>
    %c1_783 = arith.constant 1 : index
    %c4_784 = arith.constant 4 : index
    %c0_785 = arith.constant 0 : index
    %c0_786 = arith.constant 0 : index
    %1012 = vector.load %arg33[%c1_783, %c4_784, %c0_785, %c0_786] : memref<2x8x8x32xf32, #tpu.memory_space<vmem>>, vector<1x1x8x32xf32>
    %1013 = vector.shape_cast %1012 : vector<1x1x8x32xf32> to vector<8x32xf32>
    %1014 = arith.addf %1011, %1013 : vector<8x32xf32>
    %1015 = arith.addf %1002, %989 : vector<8x32xf32>
    %1016 = arith.negf %1015 : vector<8x32xf32>
    %1017 = math.exp %1016 : vector<8x32xf32>
    %cst_787 = arith.constant 1.000000e+00 : f32
    %1018 = vector.broadcast %cst_787 : f32 to vector<8x32xf32>
    %1019 = arith.addf %1018, %1017 : vector<8x32xf32>
    %1020 = arith.divf %1018, %1019 : vector<8x32xf32>
    %1021 = arith.addf %1008, %992 : vector<8x32xf32>
    %1022 = arith.negf %1021 : vector<8x32xf32>
    %1023 = math.exp %1022 : vector<8x32xf32>
    %cst_788 = arith.constant 1.000000e+00 : f32
    %1024 = vector.broadcast %cst_788 : f32 to vector<8x32xf32>
    %1025 = arith.addf %1024, %1023 : vector<8x32xf32>
    %1026 = arith.divf %1024, %1025 : vector<8x32xf32>
    %1027 = arith.mulf %1020, %996 : vector<8x32xf32>
    %1028 = arith.addf %1014, %1027 : vector<8x32xf32>
    %1029 = math.tanh %1028 : vector<8x32xf32>
    %cst_789 = arith.constant 1.000000e+00 : f32
    %1030 = vector.broadcast %cst_789 : f32 to vector<8x32xf32>
    %1031 = arith.subf %1030, %1026 : vector<8x32xf32>
    %1032 = arith.mulf %1031, %1029 : vector<8x32xf32>
    %1033 = arith.mulf %1026, %953 : vector<8x32xf32>
    %1034 = arith.addf %1032, %1033 : vector<8x32xf32>
    %c4_790 = arith.constant 4 : index
    %c0_791 = arith.constant 0 : index
    %c0_792 = arith.constant 0 : index
    %1035 = vector.load %arg0[%c4_790, %c0_791, %c0_792] : memref<8x8x16xf32, #tpu.memory_space<vmem>>, vector<1x8x16xf32>
    %1036 = vector.shape_cast %1035 : vector<1x8x16xf32> to vector<8x16xf32>
    %c4_793 = arith.constant 4 : index
    %c0_794 = arith.constant 0 : index
    %c0_795 = arith.constant 0 : index
    %1037 = vector.load %arg1[%c4_793, %c0_794, %c0_795] : memref<8x8x16xf32, #tpu.memory_space<vmem>>, vector<1x8x16xf32>
    %1038 = vector.shape_cast %1037 : vector<1x8x16xf32> to vector<8x16xf32>
    %c4_796 = arith.constant 4 : index
    %c0_797 = arith.constant 0 : index
    %c0_798 = arith.constant 0 : index
    %1039 = vector.load %arg34[%c4_796, %c0_797, %c0_798] : memref<8x8x16xf32, #tpu.memory_space<vmem>>, vector<1x8x16xf32>
    %1040 = vector.shape_cast %1039 : vector<1x8x16xf32> to vector<8x16xf32>
    %c0_799 = arith.constant 0 : index
    %c4_800 = arith.constant 4 : index
    %c0_801 = arith.constant 0 : index
    %c0_802 = arith.constant 0 : index
    %1041 = vector.load %arg29[%c0_799, %c4_800, %c0_801, %c0_802] : memref<2x8x8x32xf32, #tpu.memory_space<vmem>>, vector<1x1x8x32xf32>
    %1042 = vector.shape_cast %1041 : vector<1x1x8x32xf32> to vector<8x32xf32>
    %c0_803 = arith.constant 0 : index
    %c4_804 = arith.constant 4 : index
    %c0_805 = arith.constant 0 : index
    %c0_806 = arith.constant 0 : index
    %1043 = vector.load %arg30[%c0_803, %c4_804, %c0_805, %c0_806] : memref<2x8x8x16xf32, #tpu.memory_space<vmem>>, vector<1x1x8x16xf32>
    %1044 = vector.shape_cast %1043 : vector<1x1x8x16xf32> to vector<8x16xf32>
    %1045 = arith.mulf %942, %1042 : vector<8x32xf32>
    %c0_807 = arith.constant 0 : index
    %c0_808 = arith.constant 0 : index
    %c0_809 = arith.constant 0 : index
    %1046 = vector.load %arg7[%c0_807, %c0_808, %c0_809] : memref<2x32x16xf32, #tpu.memory_space<vmem>>, vector<1x32x16xf32>
    %1047 = vector.shape_cast %1046 : vector<1x32x16xf32> to vector<32x16xf32>
    %cst_810 = arith.constant dense<0.000000e+00> : vector<8x16xf32>
    %1048 = tpu.matmul %1045, %1047, %cst_810 {dimension_numbers = #tpu.dot_dimension_numbers<[1], [0], [0], [1], [0, 0, 1, 1], [], []>} : vector<8x32xf32>, vector<32x16xf32>, vector<8x16xf32> -> vector<8x16xf32>
    %1049 = arith.addf %1048, %275 : vector<8x16xf32>
    %1050 = arith.mulf %1038, %1036 : vector<8x16xf32>
    %cst_811 = arith.constant 1.000000e+00 : f32
    %1051 = vector.broadcast %cst_811 : f32 to vector<8x16xf32>
    %1052 = arith.subf %1051, %1038 : vector<8x16xf32>
    %1053 = arith.mulf %1052, %1049 : vector<8x16xf32>
    %1054 = arith.addf %1050, %1053 : vector<8x16xf32>
    %c0_812 = arith.constant 0 : index
    %c0_813 = arith.constant 0 : index
    %c0_814 = arith.constant 0 : index
    %1055 = vector.load %arg9[%c0_812, %c0_813, %c0_814] : memref<2x16x16xf32, #tpu.memory_space<vmem>>, vector<1x16x16xf32>
    %1056 = vector.shape_cast %1055 : vector<1x16x16xf32> to vector<16x16xf32>
    %cst_815 = arith.constant dense<0.000000e+00> : vector<8x16xf32>
    %1057 = tpu.matmul %1054, %1056, %cst_815 {dimension_numbers = #tpu.dot_dimension_numbers<[1], [0], [0], [1], [0, 0, 1, 1], [], []>} : vector<8x16xf32>, vector<16x16xf32>, vector<8x16xf32> -> vector<8x16xf32>
    %1058 = arith.addf %1057, %283 : vector<8x16xf32>
    %1059 = arith.mulf %1044, %1058 : vector<8x16xf32>
    %cst_816 = arith.constant 1.000000e+00 : f32
    %1060 = vector.broadcast %cst_816 : f32 to vector<8x16xf32>
    %1061 = arith.subf %1060, %1044 : vector<8x16xf32>
    %1062 = arith.mulf %1061, %1049 : vector<8x16xf32>
    %1063 = arith.addf %1059, %1062 : vector<8x16xf32>
    %1064 = arith.mulf %1052, %1063 : vector<8x16xf32>
    %1065 = arith.addf %1050, %1064 : vector<8x16xf32>
    %c0_817 = arith.constant 0 : index
    %c4_818 = arith.constant 4 : index
    %c0_819 = arith.constant 0 : index
    %c0_820 = arith.constant 0 : index
    %1066 = vector.load %arg35[%c0_817, %c4_818, %c0_819, %c0_820] : memref<2x8x8x16xf32, #tpu.memory_space<vmem>>, vector<1x1x8x16xf32>
    %1067 = vector.shape_cast %1066 : vector<1x1x8x16xf32> to vector<8x16xf32>
    %1068 = vector.shape_cast %1065 : vector<8x16xf32> to vector<1x1x8x16xf32>
    tpu.vector_store %arg35[%c0_817, %c4_818, %c0_819, %c0_820], %1068 {strides = array<i32>} : memref<2x8x8x16xf32, #tpu.memory_space<vmem>>, vector<1x1x8x16xf32>,
    %1069 = arith.subf %1036, %1049 : vector<8x16xf32>
    %1070 = math.absf %1069 : vector<8x16xf32>
    %1071 = arith.subf %1036, %1058 : vector<8x16xf32>
    %1072 = math.absf %1071 : vector<8x16xf32>
    %1073 = arith.addf %1070, %1072 : vector<8x16xf32>
    %1074 = arith.subf %1036, %1063 : vector<8x16xf32>
    %1075 = math.absf %1074 : vector<8x16xf32>
    %1076 = arith.addf %1073, %1075 : vector<8x16xf32>
    %1077 = arith.mulf %1076, %1040 : vector<8x16xf32>
    %1078 = arith.addf %986, %1077 : vector<8x16xf32>
    %c0_821 = arith.constant 0 : index
    %c0_822 = arith.constant 0 : index
    %c0_823 = arith.constant 0 : index
    %1079 = vector.load %arg24[%c0_821, %c0_822, %c0_823] : memref<2x32x32xf32, #tpu.memory_space<vmem>>, vector<1x32x32xf32>
    %1080 = vector.shape_cast %1079 : vector<1x32x32xf32> to vector<32x32xf32>
    %cst_824 = arith.constant dense<0.000000e+00> : vector<8x32xf32>
    %1081 = tpu.matmul %1045, %1080, %cst_824 {dimension_numbers = #tpu.dot_dimension_numbers<[1], [0], [0], [1], [0, 0, 1, 1], [], []>} : vector<8x32xf32>, vector<32x32xf32>, vector<8x32xf32> -> vector<8x32xf32>
    %c0_825 = arith.constant 0 : index
    %c0_826 = arith.constant 0 : index
    %c0_827 = arith.constant 0 : index
    %1082 = vector.load %arg25[%c0_825, %c0_826, %c0_827] : memref<2x32x32xf32, #tpu.memory_space<vmem>>, vector<1x32x32xf32>
    %1083 = vector.shape_cast %1082 : vector<1x32x32xf32> to vector<32x32xf32>
    %cst_828 = arith.constant dense<0.000000e+00> : vector<8x32xf32>
    %1084 = tpu.matmul %1045, %1083, %cst_828 {dimension_numbers = #tpu.dot_dimension_numbers<[1], [0], [0], [1], [0, 0, 1, 1], [], []>} : vector<8x32xf32>, vector<32x32xf32>, vector<8x32xf32> -> vector<8x32xf32>
    %c0_829 = arith.constant 0 : index
    %c0_830 = arith.constant 0 : index
    %c0_831 = arith.constant 0 : index
    %1085 = vector.load %arg26[%c0_829, %c0_830, %c0_831] : memref<2x32x32xf32, #tpu.memory_space<vmem>>, vector<1x32x32xf32>
    %1086 = vector.shape_cast %1085 : vector<1x32x32xf32> to vector<32x32xf32>
    %cst_832 = arith.constant dense<0.000000e+00> : vector<8x32xf32>
    %1087 = tpu.matmul %1045, %1086, %cst_832 {dimension_numbers = #tpu.dot_dimension_numbers<[1], [0], [0], [1], [0, 0, 1, 1], [], []>} : vector<8x32xf32>, vector<32x32xf32>, vector<8x32xf32> -> vector<8x32xf32>
    %1088 = arith.addf %1087, %291 : vector<8x32xf32>
    %c0_833 = arith.constant 0 : index
    %c0_834 = arith.constant 0 : index
    %c0_835 = arith.constant 0 : index
    %1089 = vector.load %arg14[%c0_833, %c0_834, %c0_835] : memref<2x16x32xf32, #tpu.memory_space<vmem>>, vector<1x16x32xf32>
    %1090 = vector.shape_cast %1089 : vector<1x16x32xf32> to vector<16x32xf32>
    %cst_836 = arith.constant dense<0.000000e+00> : vector<8x32xf32>
    %1091 = tpu.matmul %1065, %1090, %cst_836 {dimension_numbers = #tpu.dot_dimension_numbers<[1], [0], [0], [1], [0, 0, 1, 1], [], []>} : vector<8x16xf32>, vector<16x32xf32>, vector<8x32xf32> -> vector<8x32xf32>
    %c0_837 = arith.constant 0 : index
    %c4_838 = arith.constant 4 : index
    %c0_839 = arith.constant 0 : index
    %c0_840 = arith.constant 0 : index
    %1092 = vector.load %arg31[%c0_837, %c4_838, %c0_839, %c0_840] : memref<2x8x8x32xf32, #tpu.memory_space<vmem>>, vector<1x1x8x32xf32>
    %1093 = vector.shape_cast %1092 : vector<1x1x8x32xf32> to vector<8x32xf32>
    %1094 = arith.addf %1091, %1093 : vector<8x32xf32>
    %c0_841 = arith.constant 0 : index
    %c0_842 = arith.constant 0 : index
    %c0_843 = arith.constant 0 : index
    %1095 = vector.load %arg15[%c0_841, %c0_842, %c0_843] : memref<2x16x32xf32, #tpu.memory_space<vmem>>, vector<1x16x32xf32>
    %1096 = vector.shape_cast %1095 : vector<1x16x32xf32> to vector<16x32xf32>
    %cst_844 = arith.constant dense<0.000000e+00> : vector<8x32xf32>
    %1097 = tpu.matmul %1065, %1096, %cst_844 {dimension_numbers = #tpu.dot_dimension_numbers<[1], [0], [0], [1], [0, 0, 1, 1], [], []>} : vector<8x16xf32>, vector<16x32xf32>, vector<8x32xf32> -> vector<8x32xf32>
    %c0_845 = arith.constant 0 : index
    %c4_846 = arith.constant 4 : index
    %c0_847 = arith.constant 0 : index
    %c0_848 = arith.constant 0 : index
    %1098 = vector.load %arg32[%c0_845, %c4_846, %c0_847, %c0_848] : memref<2x8x8x32xf32, #tpu.memory_space<vmem>>, vector<1x1x8x32xf32>
    %1099 = vector.shape_cast %1098 : vector<1x1x8x32xf32> to vector<8x32xf32>
    %1100 = arith.addf %1097, %1099 : vector<8x32xf32>
    %c0_849 = arith.constant 0 : index
    %c0_850 = arith.constant 0 : index
    %c0_851 = arith.constant 0 : index
    %1101 = vector.load %arg16[%c0_849, %c0_850, %c0_851] : memref<2x16x32xf32, #tpu.memory_space<vmem>>, vector<1x16x32xf32>
    %1102 = vector.shape_cast %1101 : vector<1x16x32xf32> to vector<16x32xf32>
    %cst_852 = arith.constant dense<0.000000e+00> : vector<8x32xf32>
    %1103 = tpu.matmul %1065, %1102, %cst_852 {dimension_numbers = #tpu.dot_dimension_numbers<[1], [0], [0], [1], [0, 0, 1, 1], [], []>} : vector<8x16xf32>, vector<16x32xf32>, vector<8x32xf32> -> vector<8x32xf32>
    %c0_853 = arith.constant 0 : index
    %c4_854 = arith.constant 4 : index
    %c0_855 = arith.constant 0 : index
    %c0_856 = arith.constant 0 : index
    %1104 = vector.load %arg33[%c0_853, %c4_854, %c0_855, %c0_856] : memref<2x8x8x32xf32, #tpu.memory_space<vmem>>, vector<1x1x8x32xf32>
    %1105 = vector.shape_cast %1104 : vector<1x1x8x32xf32> to vector<8x32xf32>
    %1106 = arith.addf %1103, %1105 : vector<8x32xf32>
    %1107 = arith.addf %1094, %1081 : vector<8x32xf32>
    %1108 = arith.negf %1107 : vector<8x32xf32>
    %1109 = math.exp %1108 : vector<8x32xf32>
    %cst_857 = arith.constant 1.000000e+00 : f32
    %1110 = vector.broadcast %cst_857 : f32 to vector<8x32xf32>
    %1111 = arith.addf %1110, %1109 : vector<8x32xf32>
    %1112 = arith.divf %1110, %1111 : vector<8x32xf32>
    %1113 = arith.addf %1100, %1084 : vector<8x32xf32>
    %1114 = arith.negf %1113 : vector<8x32xf32>
    %1115 = math.exp %1114 : vector<8x32xf32>
    %cst_858 = arith.constant 1.000000e+00 : f32
    %1116 = vector.broadcast %cst_858 : f32 to vector<8x32xf32>
    %1117 = arith.addf %1116, %1115 : vector<8x32xf32>
    %1118 = arith.divf %1116, %1117 : vector<8x32xf32>
    %1119 = arith.mulf %1112, %1088 : vector<8x32xf32>
    %1120 = arith.addf %1106, %1119 : vector<8x32xf32>
    %1121 = math.tanh %1120 : vector<8x32xf32>
    %cst_859 = arith.constant 1.000000e+00 : f32
    %1122 = vector.broadcast %cst_859 : f32 to vector<8x32xf32>
    %1123 = arith.subf %1122, %1118 : vector<8x32xf32>
    %1124 = arith.mulf %1123, %1121 : vector<8x32xf32>
    %1125 = arith.mulf %1118, %1045 : vector<8x32xf32>
    %1126 = arith.addf %1124, %1125 : vector<8x32xf32>
    %c3_860 = arith.constant 3 : index
    %c0_861 = arith.constant 0 : index
    %c0_862 = arith.constant 0 : index
    %1127 = vector.load %arg0[%c3_860, %c0_861, %c0_862] : memref<8x8x16xf32, #tpu.memory_space<vmem>>, vector<1x8x16xf32>
    %1128 = vector.shape_cast %1127 : vector<1x8x16xf32> to vector<8x16xf32>
    %c3_863 = arith.constant 3 : index
    %c0_864 = arith.constant 0 : index
    %c0_865 = arith.constant 0 : index
    %1129 = vector.load %arg1[%c3_863, %c0_864, %c0_865] : memref<8x8x16xf32, #tpu.memory_space<vmem>>, vector<1x8x16xf32>
    %1130 = vector.shape_cast %1129 : vector<1x8x16xf32> to vector<8x16xf32>
    %c3_866 = arith.constant 3 : index
    %c0_867 = arith.constant 0 : index
    %c0_868 = arith.constant 0 : index
    %1131 = vector.load %arg34[%c3_866, %c0_867, %c0_868] : memref<8x8x16xf32, #tpu.memory_space<vmem>>, vector<1x8x16xf32>
    %1132 = vector.shape_cast %1131 : vector<1x8x16xf32> to vector<8x16xf32>
    %c1_869 = arith.constant 1 : index
    %c3_870 = arith.constant 3 : index
    %c0_871 = arith.constant 0 : index
    %c0_872 = arith.constant 0 : index
    %1133 = vector.load %arg29[%c1_869, %c3_870, %c0_871, %c0_872] : memref<2x8x8x32xf32, #tpu.memory_space<vmem>>, vector<1x1x8x32xf32>
    %1134 = vector.shape_cast %1133 : vector<1x1x8x32xf32> to vector<8x32xf32>
    %c1_873 = arith.constant 1 : index
    %c3_874 = arith.constant 3 : index
    %c0_875 = arith.constant 0 : index
    %c0_876 = arith.constant 0 : index
    %1135 = vector.load %arg30[%c1_873, %c3_874, %c0_875, %c0_876] : memref<2x8x8x16xf32, #tpu.memory_space<vmem>>, vector<1x1x8x16xf32>
    %1136 = vector.shape_cast %1135 : vector<1x1x8x16xf32> to vector<8x16xf32>
    %1137 = arith.mulf %1034, %1134 : vector<8x32xf32>
    %c1_877 = arith.constant 1 : index
    %c0_878 = arith.constant 0 : index
    %c0_879 = arith.constant 0 : index
    %1138 = vector.load %arg7[%c1_877, %c0_878, %c0_879] : memref<2x32x16xf32, #tpu.memory_space<vmem>>, vector<1x32x16xf32>
    %1139 = vector.shape_cast %1138 : vector<1x32x16xf32> to vector<32x16xf32>
    %cst_880 = arith.constant dense<0.000000e+00> : vector<8x16xf32>
    %1140 = tpu.matmul %1137, %1139, %cst_880 {dimension_numbers = #tpu.dot_dimension_numbers<[1], [0], [0], [1], [0, 0, 1, 1], [], []>} : vector<8x32xf32>, vector<32x16xf32>, vector<8x16xf32> -> vector<8x16xf32>
    %1141 = arith.addf %1140, %279 : vector<8x16xf32>
    %1142 = arith.mulf %1130, %1128 : vector<8x16xf32>
    %cst_881 = arith.constant 1.000000e+00 : f32
    %1143 = vector.broadcast %cst_881 : f32 to vector<8x16xf32>
    %1144 = arith.subf %1143, %1130 : vector<8x16xf32>
    %1145 = arith.mulf %1144, %1141 : vector<8x16xf32>
    %1146 = arith.addf %1142, %1145 : vector<8x16xf32>
    %c1_882 = arith.constant 1 : index
    %c0_883 = arith.constant 0 : index
    %c0_884 = arith.constant 0 : index
    %1147 = vector.load %arg9[%c1_882, %c0_883, %c0_884] : memref<2x16x16xf32, #tpu.memory_space<vmem>>, vector<1x16x16xf32>
    %1148 = vector.shape_cast %1147 : vector<1x16x16xf32> to vector<16x16xf32>
    %cst_885 = arith.constant dense<0.000000e+00> : vector<8x16xf32>
    %1149 = tpu.matmul %1146, %1148, %cst_885 {dimension_numbers = #tpu.dot_dimension_numbers<[1], [0], [0], [1], [0, 0, 1, 1], [], []>} : vector<8x16xf32>, vector<16x16xf32>, vector<8x16xf32> -> vector<8x16xf32>
    %1150 = arith.addf %1149, %287 : vector<8x16xf32>
    %1151 = arith.mulf %1136, %1150 : vector<8x16xf32>
    %cst_886 = arith.constant 1.000000e+00 : f32
    %1152 = vector.broadcast %cst_886 : f32 to vector<8x16xf32>
    %1153 = arith.subf %1152, %1136 : vector<8x16xf32>
    %1154 = arith.mulf %1153, %1141 : vector<8x16xf32>
    %1155 = arith.addf %1151, %1154 : vector<8x16xf32>
    %1156 = arith.mulf %1144, %1155 : vector<8x16xf32>
    %1157 = arith.addf %1142, %1156 : vector<8x16xf32>
    %c1_887 = arith.constant 1 : index
    %c3_888 = arith.constant 3 : index
    %c0_889 = arith.constant 0 : index
    %c0_890 = arith.constant 0 : index
    %1158 = vector.load %arg35[%c1_887, %c3_888, %c0_889, %c0_890] : memref<2x8x8x16xf32, #tpu.memory_space<vmem>>, vector<1x1x8x16xf32>
    %1159 = vector.shape_cast %1158 : vector<1x1x8x16xf32> to vector<8x16xf32>
    %1160 = vector.shape_cast %1157 : vector<8x16xf32> to vector<1x1x8x16xf32>
    tpu.vector_store %arg35[%c1_887, %c3_888, %c0_889, %c0_890], %1160 {strides = array<i32>} : memref<2x8x8x16xf32, #tpu.memory_space<vmem>>, vector<1x1x8x16xf32>,
    %1161 = arith.subf %1128, %1141 : vector<8x16xf32>
    %1162 = math.absf %1161 : vector<8x16xf32>
    %1163 = arith.subf %1128, %1150 : vector<8x16xf32>
    %1164 = math.absf %1163 : vector<8x16xf32>
    %1165 = arith.addf %1162, %1164 : vector<8x16xf32>
    %1166 = arith.subf %1128, %1155 : vector<8x16xf32>
    %1167 = math.absf %1166 : vector<8x16xf32>
    %1168 = arith.addf %1165, %1167 : vector<8x16xf32>
    %1169 = arith.mulf %1168, %1132 : vector<8x16xf32>
    %1170 = arith.addf %1078, %1169 : vector<8x16xf32>
    %c1_891 = arith.constant 1 : index
    %c0_892 = arith.constant 0 : index
    %c0_893 = arith.constant 0 : index
    %1171 = vector.load %arg24[%c1_891, %c0_892, %c0_893] : memref<2x32x32xf32, #tpu.memory_space<vmem>>, vector<1x32x32xf32>
    %1172 = vector.shape_cast %1171 : vector<1x32x32xf32> to vector<32x32xf32>
    %cst_894 = arith.constant dense<0.000000e+00> : vector<8x32xf32>
    %1173 = tpu.matmul %1137, %1172, %cst_894 {dimension_numbers = #tpu.dot_dimension_numbers<[1], [0], [0], [1], [0, 0, 1, 1], [], []>} : vector<8x32xf32>, vector<32x32xf32>, vector<8x32xf32> -> vector<8x32xf32>
    %c1_895 = arith.constant 1 : index
    %c0_896 = arith.constant 0 : index
    %c0_897 = arith.constant 0 : index
    %1174 = vector.load %arg25[%c1_895, %c0_896, %c0_897] : memref<2x32x32xf32, #tpu.memory_space<vmem>>, vector<1x32x32xf32>
    %1175 = vector.shape_cast %1174 : vector<1x32x32xf32> to vector<32x32xf32>
    %cst_898 = arith.constant dense<0.000000e+00> : vector<8x32xf32>
    %1176 = tpu.matmul %1137, %1175, %cst_898 {dimension_numbers = #tpu.dot_dimension_numbers<[1], [0], [0], [1], [0, 0, 1, 1], [], []>} : vector<8x32xf32>, vector<32x32xf32>, vector<8x32xf32> -> vector<8x32xf32>
    %c1_899 = arith.constant 1 : index
    %c0_900 = arith.constant 0 : index
    %c0_901 = arith.constant 0 : index
    %1177 = vector.load %arg26[%c1_899, %c0_900, %c0_901] : memref<2x32x32xf32, #tpu.memory_space<vmem>>, vector<1x32x32xf32>
    %1178 = vector.shape_cast %1177 : vector<1x32x32xf32> to vector<32x32xf32>
    %cst_902 = arith.constant dense<0.000000e+00> : vector<8x32xf32>
    %1179 = tpu.matmul %1137, %1178, %cst_902 {dimension_numbers = #tpu.dot_dimension_numbers<[1], [0], [0], [1], [0, 0, 1, 1], [], []>} : vector<8x32xf32>, vector<32x32xf32>, vector<8x32xf32> -> vector<8x32xf32>
    %1180 = arith.addf %1179, %295 : vector<8x32xf32>
    %c1_903 = arith.constant 1 : index
    %c0_904 = arith.constant 0 : index
    %c0_905 = arith.constant 0 : index
    %1181 = vector.load %arg14[%c1_903, %c0_904, %c0_905] : memref<2x16x32xf32, #tpu.memory_space<vmem>>, vector<1x16x32xf32>
    %1182 = vector.shape_cast %1181 : vector<1x16x32xf32> to vector<16x32xf32>
    %cst_906 = arith.constant dense<0.000000e+00> : vector<8x32xf32>
    %1183 = tpu.matmul %1157, %1182, %cst_906 {dimension_numbers = #tpu.dot_dimension_numbers<[1], [0], [0], [1], [0, 0, 1, 1], [], []>} : vector<8x16xf32>, vector<16x32xf32>, vector<8x32xf32> -> vector<8x32xf32>
    %c1_907 = arith.constant 1 : index
    %c3_908 = arith.constant 3 : index
    %c0_909 = arith.constant 0 : index
    %c0_910 = arith.constant 0 : index
    %1184 = vector.load %arg31[%c1_907, %c3_908, %c0_909, %c0_910] : memref<2x8x8x32xf32, #tpu.memory_space<vmem>>, vector<1x1x8x32xf32>
    %1185 = vector.shape_cast %1184 : vector<1x1x8x32xf32> to vector<8x32xf32>
    %1186 = arith.addf %1183, %1185 : vector<8x32xf32>
    %c1_911 = arith.constant 1 : index
    %c0_912 = arith.constant 0 : index
    %c0_913 = arith.constant 0 : index
    %1187 = vector.load %arg15[%c1_911, %c0_912, %c0_913] : memref<2x16x32xf32, #tpu.memory_space<vmem>>, vector<1x16x32xf32>
    %1188 = vector.shape_cast %1187 : vector<1x16x32xf32> to vector<16x32xf32>
    %cst_914 = arith.constant dense<0.000000e+00> : vector<8x32xf32>
    %1189 = tpu.matmul %1157, %1188, %cst_914 {dimension_numbers = #tpu.dot_dimension_numbers<[1], [0], [0], [1], [0, 0, 1, 1], [], []>} : vector<8x16xf32>, vector<16x32xf32>, vector<8x32xf32> -> vector<8x32xf32>
    %c1_915 = arith.constant 1 : index
    %c3_916 = arith.constant 3 : index
    %c0_917 = arith.constant 0 : index
    %c0_918 = arith.constant 0 : index
    %1190 = vector.load %arg32[%c1_915, %c3_916, %c0_917, %c0_918] : memref<2x8x8x32xf32, #tpu.memory_space<vmem>>, vector<1x1x8x32xf32>
    %1191 = vector.shape_cast %1190 : vector<1x1x8x32xf32> to vector<8x32xf32>
    %1192 = arith.addf %1189, %1191 : vector<8x32xf32>
    %c1_919 = arith.constant 1 : index
    %c0_920 = arith.constant 0 : index
    %c0_921 = arith.constant 0 : index
    %1193 = vector.load %arg16[%c1_919, %c0_920, %c0_921] : memref<2x16x32xf32, #tpu.memory_space<vmem>>, vector<1x16x32xf32>
    %1194 = vector.shape_cast %1193 : vector<1x16x32xf32> to vector<16x32xf32>
    %cst_922 = arith.constant dense<0.000000e+00> : vector<8x32xf32>
    %1195 = tpu.matmul %1157, %1194, %cst_922 {dimension_numbers = #tpu.dot_dimension_numbers<[1], [0], [0], [1], [0, 0, 1, 1], [], []>} : vector<8x16xf32>, vector<16x32xf32>, vector<8x32xf32> -> vector<8x32xf32>
    %c1_923 = arith.constant 1 : index
    %c3_924 = arith.constant 3 : index
    %c0_925 = arith.constant 0 : index
    %c0_926 = arith.constant 0 : index
    %1196 = vector.load %arg33[%c1_923, %c3_924, %c0_925, %c0_926] : memref<2x8x8x32xf32, #tpu.memory_space<vmem>>, vector<1x1x8x32xf32>
    %1197 = vector.shape_cast %1196 : vector<1x1x8x32xf32> to vector<8x32xf32>
    %1198 = arith.addf %1195, %1197 : vector<8x32xf32>
    %1199 = arith.addf %1186, %1173 : vector<8x32xf32>
    %1200 = arith.negf %1199 : vector<8x32xf32>
    %1201 = math.exp %1200 : vector<8x32xf32>
    %cst_927 = arith.constant 1.000000e+00 : f32
    %1202 = vector.broadcast %cst_927 : f32 to vector<8x32xf32>
    %1203 = arith.addf %1202, %1201 : vector<8x32xf32>
    %1204 = arith.divf %1202, %1203 : vector<8x32xf32>
    %1205 = arith.addf %1192, %1176 : vector<8x32xf32>
    %1206 = arith.negf %1205 : vector<8x32xf32>
    %1207 = math.exp %1206 : vector<8x32xf32>
    %cst_928 = arith.constant 1.000000e+00 : f32
    %1208 = vector.broadcast %cst_928 : f32 to vector<8x32xf32>
    %1209 = arith.addf %1208, %1207 : vector<8x32xf32>
    %1210 = arith.divf %1208, %1209 : vector<8x32xf32>
    %1211 = arith.mulf %1204, %1180 : vector<8x32xf32>
    %1212 = arith.addf %1198, %1211 : vector<8x32xf32>
    %1213 = math.tanh %1212 : vector<8x32xf32>
    %cst_929 = arith.constant 1.000000e+00 : f32
    %1214 = vector.broadcast %cst_929 : f32 to vector<8x32xf32>
    %1215 = arith.subf %1214, %1210 : vector<8x32xf32>
    %1216 = arith.mulf %1215, %1213 : vector<8x32xf32>
    %1217 = arith.mulf %1210, %1137 : vector<8x32xf32>
    %1218 = arith.addf %1216, %1217 : vector<8x32xf32>
    %c5_930 = arith.constant 5 : index
    %c0_931 = arith.constant 0 : index
    %c0_932 = arith.constant 0 : index
    %1219 = vector.load %arg0[%c5_930, %c0_931, %c0_932] : memref<8x8x16xf32, #tpu.memory_space<vmem>>, vector<1x8x16xf32>
    %1220 = vector.shape_cast %1219 : vector<1x8x16xf32> to vector<8x16xf32>
    %c5_933 = arith.constant 5 : index
    %c0_934 = arith.constant 0 : index
    %c0_935 = arith.constant 0 : index
    %1221 = vector.load %arg1[%c5_933, %c0_934, %c0_935] : memref<8x8x16xf32, #tpu.memory_space<vmem>>, vector<1x8x16xf32>
    %1222 = vector.shape_cast %1221 : vector<1x8x16xf32> to vector<8x16xf32>
    %c5_936 = arith.constant 5 : index
    %c0_937 = arith.constant 0 : index
    %c0_938 = arith.constant 0 : index
    %1223 = vector.load %arg34[%c5_936, %c0_937, %c0_938] : memref<8x8x16xf32, #tpu.memory_space<vmem>>, vector<1x8x16xf32>
    %1224 = vector.shape_cast %1223 : vector<1x8x16xf32> to vector<8x16xf32>
    %c0_939 = arith.constant 0 : index
    %c5_940 = arith.constant 5 : index
    %c0_941 = arith.constant 0 : index
    %c0_942 = arith.constant 0 : index
    %1225 = vector.load %arg29[%c0_939, %c5_940, %c0_941, %c0_942] : memref<2x8x8x32xf32, #tpu.memory_space<vmem>>, vector<1x1x8x32xf32>
    %1226 = vector.shape_cast %1225 : vector<1x1x8x32xf32> to vector<8x32xf32>
    %c0_943 = arith.constant 0 : index
    %c5_944 = arith.constant 5 : index
    %c0_945 = arith.constant 0 : index
    %c0_946 = arith.constant 0 : index
    %1227 = vector.load %arg30[%c0_943, %c5_944, %c0_945, %c0_946] : memref<2x8x8x16xf32, #tpu.memory_space<vmem>>, vector<1x1x8x16xf32>
    %1228 = vector.shape_cast %1227 : vector<1x1x8x16xf32> to vector<8x16xf32>
    %1229 = arith.mulf %1126, %1226 : vector<8x32xf32>
    %c0_947 = arith.constant 0 : index
    %c0_948 = arith.constant 0 : index
    %c0_949 = arith.constant 0 : index
    %1230 = vector.load %arg7[%c0_947, %c0_948, %c0_949] : memref<2x32x16xf32, #tpu.memory_space<vmem>>, vector<1x32x16xf32>
    %1231 = vector.shape_cast %1230 : vector<1x32x16xf32> to vector<32x16xf32>
    %cst_950 = arith.constant dense<0.000000e+00> : vector<8x16xf32>
    %1232 = tpu.matmul %1229, %1231, %cst_950 {dimension_numbers = #tpu.dot_dimension_numbers<[1], [0], [0], [1], [0, 0, 1, 1], [], []>} : vector<8x32xf32>, vector<32x16xf32>, vector<8x16xf32> -> vector<8x16xf32>
    %1233 = arith.addf %1232, %275 : vector<8x16xf32>
    %1234 = arith.mulf %1222, %1220 : vector<8x16xf32>
    %cst_951 = arith.constant 1.000000e+00 : f32
    %1235 = vector.broadcast %cst_951 : f32 to vector<8x16xf32>
    %1236 = arith.subf %1235, %1222 : vector<8x16xf32>
    %1237 = arith.mulf %1236, %1233 : vector<8x16xf32>
    %1238 = arith.addf %1234, %1237 : vector<8x16xf32>
    %c0_952 = arith.constant 0 : index
    %c0_953 = arith.constant 0 : index
    %c0_954 = arith.constant 0 : index
    %1239 = vector.load %arg9[%c0_952, %c0_953, %c0_954] : memref<2x16x16xf32, #tpu.memory_space<vmem>>, vector<1x16x16xf32>
    %1240 = vector.shape_cast %1239 : vector<1x16x16xf32> to vector<16x16xf32>
    %cst_955 = arith.constant dense<0.000000e+00> : vector<8x16xf32>
    %1241 = tpu.matmul %1238, %1240, %cst_955 {dimension_numbers = #tpu.dot_dimension_numbers<[1], [0], [0], [1], [0, 0, 1, 1], [], []>} : vector<8x16xf32>, vector<16x16xf32>, vector<8x16xf32> -> vector<8x16xf32>
    %1242 = arith.addf %1241, %283 : vector<8x16xf32>
    %1243 = arith.mulf %1228, %1242 : vector<8x16xf32>
    %cst_956 = arith.constant 1.000000e+00 : f32
    %1244 = vector.broadcast %cst_956 : f32 to vector<8x16xf32>
    %1245 = arith.subf %1244, %1228 : vector<8x16xf32>
    %1246 = arith.mulf %1245, %1233 : vector<8x16xf32>
    %1247 = arith.addf %1243, %1246 : vector<8x16xf32>
    %1248 = arith.mulf %1236, %1247 : vector<8x16xf32>
    %1249 = arith.addf %1234, %1248 : vector<8x16xf32>
    %c0_957 = arith.constant 0 : index
    %c5_958 = arith.constant 5 : index
    %c0_959 = arith.constant 0 : index
    %c0_960 = arith.constant 0 : index
    %1250 = vector.load %arg35[%c0_957, %c5_958, %c0_959, %c0_960] : memref<2x8x8x16xf32, #tpu.memory_space<vmem>>, vector<1x1x8x16xf32>
    %1251 = vector.shape_cast %1250 : vector<1x1x8x16xf32> to vector<8x16xf32>
    %1252 = vector.shape_cast %1249 : vector<8x16xf32> to vector<1x1x8x16xf32>
    tpu.vector_store %arg35[%c0_957, %c5_958, %c0_959, %c0_960], %1252 {strides = array<i32>} : memref<2x8x8x16xf32, #tpu.memory_space<vmem>>, vector<1x1x8x16xf32>,
    %1253 = arith.subf %1220, %1233 : vector<8x16xf32>
    %1254 = math.absf %1253 : vector<8x16xf32>
    %1255 = arith.subf %1220, %1242 : vector<8x16xf32>
    %1256 = math.absf %1255 : vector<8x16xf32>
    %1257 = arith.addf %1254, %1256 : vector<8x16xf32>
    %1258 = arith.subf %1220, %1247 : vector<8x16xf32>
    %1259 = math.absf %1258 : vector<8x16xf32>
    %1260 = arith.addf %1257, %1259 : vector<8x16xf32>
    %1261 = arith.mulf %1260, %1224 : vector<8x16xf32>
    %1262 = arith.addf %1170, %1261 : vector<8x16xf32>
    %c0_961 = arith.constant 0 : index
    %c0_962 = arith.constant 0 : index
    %c0_963 = arith.constant 0 : index
    %1263 = vector.load %arg24[%c0_961, %c0_962, %c0_963] : memref<2x32x32xf32, #tpu.memory_space<vmem>>, vector<1x32x32xf32>
    %1264 = vector.shape_cast %1263 : vector<1x32x32xf32> to vector<32x32xf32>
    %cst_964 = arith.constant dense<0.000000e+00> : vector<8x32xf32>
    %1265 = tpu.matmul %1229, %1264, %cst_964 {dimension_numbers = #tpu.dot_dimension_numbers<[1], [0], [0], [1], [0, 0, 1, 1], [], []>} : vector<8x32xf32>, vector<32x32xf32>, vector<8x32xf32> -> vector<8x32xf32>
    %c0_965 = arith.constant 0 : index
    %c0_966 = arith.constant 0 : index
    %c0_967 = arith.constant 0 : index
    %1266 = vector.load %arg25[%c0_965, %c0_966, %c0_967] : memref<2x32x32xf32, #tpu.memory_space<vmem>>, vector<1x32x32xf32>
    %1267 = vector.shape_cast %1266 : vector<1x32x32xf32> to vector<32x32xf32>
    %cst_968 = arith.constant dense<0.000000e+00> : vector<8x32xf32>
    %1268 = tpu.matmul %1229, %1267, %cst_968 {dimension_numbers = #tpu.dot_dimension_numbers<[1], [0], [0], [1], [0, 0, 1, 1], [], []>} : vector<8x32xf32>, vector<32x32xf32>, vector<8x32xf32> -> vector<8x32xf32>
    %c0_969 = arith.constant 0 : index
    %c0_970 = arith.constant 0 : index
    %c0_971 = arith.constant 0 : index
    %1269 = vector.load %arg26[%c0_969, %c0_970, %c0_971] : memref<2x32x32xf32, #tpu.memory_space<vmem>>, vector<1x32x32xf32>
    %1270 = vector.shape_cast %1269 : vector<1x32x32xf32> to vector<32x32xf32>
    %cst_972 = arith.constant dense<0.000000e+00> : vector<8x32xf32>
    %1271 = tpu.matmul %1229, %1270, %cst_972 {dimension_numbers = #tpu.dot_dimension_numbers<[1], [0], [0], [1], [0, 0, 1, 1], [], []>} : vector<8x32xf32>, vector<32x32xf32>, vector<8x32xf32> -> vector<8x32xf32>
    %1272 = arith.addf %1271, %291 : vector<8x32xf32>
    %c0_973 = arith.constant 0 : index
    %c0_974 = arith.constant 0 : index
    %c0_975 = arith.constant 0 : index
    %1273 = vector.load %arg14[%c0_973, %c0_974, %c0_975] : memref<2x16x32xf32, #tpu.memory_space<vmem>>, vector<1x16x32xf32>
    %1274 = vector.shape_cast %1273 : vector<1x16x32xf32> to vector<16x32xf32>
    %cst_976 = arith.constant dense<0.000000e+00> : vector<8x32xf32>
    %1275 = tpu.matmul %1249, %1274, %cst_976 {dimension_numbers = #tpu.dot_dimension_numbers<[1], [0], [0], [1], [0, 0, 1, 1], [], []>} : vector<8x16xf32>, vector<16x32xf32>, vector<8x32xf32> -> vector<8x32xf32>
    %c0_977 = arith.constant 0 : index
    %c5_978 = arith.constant 5 : index
    %c0_979 = arith.constant 0 : index
    %c0_980 = arith.constant 0 : index
    %1276 = vector.load %arg31[%c0_977, %c5_978, %c0_979, %c0_980] : memref<2x8x8x32xf32, #tpu.memory_space<vmem>>, vector<1x1x8x32xf32>
    %1277 = vector.shape_cast %1276 : vector<1x1x8x32xf32> to vector<8x32xf32>
    %1278 = arith.addf %1275, %1277 : vector<8x32xf32>
    %c0_981 = arith.constant 0 : index
    %c0_982 = arith.constant 0 : index
    %c0_983 = arith.constant 0 : index
    %1279 = vector.load %arg15[%c0_981, %c0_982, %c0_983] : memref<2x16x32xf32, #tpu.memory_space<vmem>>, vector<1x16x32xf32>
    %1280 = vector.shape_cast %1279 : vector<1x16x32xf32> to vector<16x32xf32>
    %cst_984 = arith.constant dense<0.000000e+00> : vector<8x32xf32>
    %1281 = tpu.matmul %1249, %1280, %cst_984 {dimension_numbers = #tpu.dot_dimension_numbers<[1], [0], [0], [1], [0, 0, 1, 1], [], []>} : vector<8x16xf32>, vector<16x32xf32>, vector<8x32xf32> -> vector<8x32xf32>
    %c0_985 = arith.constant 0 : index
    %c5_986 = arith.constant 5 : index
    %c0_987 = arith.constant 0 : index
    %c0_988 = arith.constant 0 : index
    %1282 = vector.load %arg32[%c0_985, %c5_986, %c0_987, %c0_988] : memref<2x8x8x32xf32, #tpu.memory_space<vmem>>, vector<1x1x8x32xf32>
    %1283 = vector.shape_cast %1282 : vector<1x1x8x32xf32> to vector<8x32xf32>
    %1284 = arith.addf %1281, %1283 : vector<8x32xf32>
    %c0_989 = arith.constant 0 : index
    %c0_990 = arith.constant 0 : index
    %c0_991 = arith.constant 0 : index
    %1285 = vector.load %arg16[%c0_989, %c0_990, %c0_991] : memref<2x16x32xf32, #tpu.memory_space<vmem>>, vector<1x16x32xf32>
    %1286 = vector.shape_cast %1285 : vector<1x16x32xf32> to vector<16x32xf32>
    %cst_992 = arith.constant dense<0.000000e+00> : vector<8x32xf32>
    %1287 = tpu.matmul %1249, %1286, %cst_992 {dimension_numbers = #tpu.dot_dimension_numbers<[1], [0], [0], [1], [0, 0, 1, 1], [], []>} : vector<8x16xf32>, vector<16x32xf32>, vector<8x32xf32> -> vector<8x32xf32>
    %c0_993 = arith.constant 0 : index
    %c5_994 = arith.constant 5 : index
    %c0_995 = arith.constant 0 : index
    %c0_996 = arith.constant 0 : index
    %1288 = vector.load %arg33[%c0_993, %c5_994, %c0_995, %c0_996] : memref<2x8x8x32xf32, #tpu.memory_space<vmem>>, vector<1x1x8x32xf32>
    %1289 = vector.shape_cast %1288 : vector<1x1x8x32xf32> to vector<8x32xf32>
    %1290 = arith.addf %1287, %1289 : vector<8x32xf32>
    %1291 = arith.addf %1278, %1265 : vector<8x32xf32>
    %1292 = arith.negf %1291 : vector<8x32xf32>
    %1293 = math.exp %1292 : vector<8x32xf32>
    %cst_997 = arith.constant 1.000000e+00 : f32
    %1294 = vector.broadcast %cst_997 : f32 to vector<8x32xf32>
    %1295 = arith.addf %1294, %1293 : vector<8x32xf32>
    %1296 = arith.divf %1294, %1295 : vector<8x32xf32>
    %1297 = arith.addf %1284, %1268 : vector<8x32xf32>
    %1298 = arith.negf %1297 : vector<8x32xf32>
    %1299 = math.exp %1298 : vector<8x32xf32>
    %cst_998 = arith.constant 1.000000e+00 : f32
    %1300 = vector.broadcast %cst_998 : f32 to vector<8x32xf32>
    %1301 = arith.addf %1300, %1299 : vector<8x32xf32>
    %1302 = arith.divf %1300, %1301 : vector<8x32xf32>
    %1303 = arith.mulf %1296, %1272 : vector<8x32xf32>
    %1304 = arith.addf %1290, %1303 : vector<8x32xf32>
    %1305 = math.tanh %1304 : vector<8x32xf32>
    %cst_999 = arith.constant 1.000000e+00 : f32
    %1306 = vector.broadcast %cst_999 : f32 to vector<8x32xf32>
    %1307 = arith.subf %1306, %1302 : vector<8x32xf32>
    %1308 = arith.mulf %1307, %1305 : vector<8x32xf32>
    %1309 = arith.mulf %1302, %1229 : vector<8x32xf32>
    %1310 = arith.addf %1308, %1309 : vector<8x32xf32>
    %c2_1000 = arith.constant 2 : index
    %c0_1001 = arith.constant 0 : index
    %c0_1002 = arith.constant 0 : index
    %1311 = vector.load %arg0[%c2_1000, %c0_1001, %c0_1002] : memref<8x8x16xf32, #tpu.memory_space<vmem>>, vector<1x8x16xf32>
    %1312 = vector.shape_cast %1311 : vector<1x8x16xf32> to vector<8x16xf32>
    %c2_1003 = arith.constant 2 : index
    %c0_1004 = arith.constant 0 : index
    %c0_1005 = arith.constant 0 : index
    %1313 = vector.load %arg1[%c2_1003, %c0_1004, %c0_1005] : memref<8x8x16xf32, #tpu.memory_space<vmem>>, vector<1x8x16xf32>
    %1314 = vector.shape_cast %1313 : vector<1x8x16xf32> to vector<8x16xf32>
    %c2_1006 = arith.constant 2 : index
    %c0_1007 = arith.constant 0 : index
    %c0_1008 = arith.constant 0 : index
    %1315 = vector.load %arg34[%c2_1006, %c0_1007, %c0_1008] : memref<8x8x16xf32, #tpu.memory_space<vmem>>, vector<1x8x16xf32>
    %1316 = vector.shape_cast %1315 : vector<1x8x16xf32> to vector<8x16xf32>
    %c1_1009 = arith.constant 1 : index
    %c2_1010 = arith.constant 2 : index
    %c0_1011 = arith.constant 0 : index
    %c0_1012 = arith.constant 0 : index
    %1317 = vector.load %arg29[%c1_1009, %c2_1010, %c0_1011, %c0_1012] : memref<2x8x8x32xf32, #tpu.memory_space<vmem>>, vector<1x1x8x32xf32>
    %1318 = vector.shape_cast %1317 : vector<1x1x8x32xf32> to vector<8x32xf32>
    %c1_1013 = arith.constant 1 : index
    %c2_1014 = arith.constant 2 : index
    %c0_1015 = arith.constant 0 : index
    %c0_1016 = arith.constant 0 : index
    %1319 = vector.load %arg30[%c1_1013, %c2_1014, %c0_1015, %c0_1016] : memref<2x8x8x16xf32, #tpu.memory_space<vmem>>, vector<1x1x8x16xf32>
    %1320 = vector.shape_cast %1319 : vector<1x1x8x16xf32> to vector<8x16xf32>
    %1321 = arith.mulf %1218, %1318 : vector<8x32xf32>
    %c1_1017 = arith.constant 1 : index
    %c0_1018 = arith.constant 0 : index
    %c0_1019 = arith.constant 0 : index
    %1322 = vector.load %arg7[%c1_1017, %c0_1018, %c0_1019] : memref<2x32x16xf32, #tpu.memory_space<vmem>>, vector<1x32x16xf32>
    %1323 = vector.shape_cast %1322 : vector<1x32x16xf32> to vector<32x16xf32>
    %cst_1020 = arith.constant dense<0.000000e+00> : vector<8x16xf32>
    %1324 = tpu.matmul %1321, %1323, %cst_1020 {dimension_numbers = #tpu.dot_dimension_numbers<[1], [0], [0], [1], [0, 0, 1, 1], [], []>} : vector<8x32xf32>, vector<32x16xf32>, vector<8x16xf32> -> vector<8x16xf32>
    %1325 = arith.addf %1324, %279 : vector<8x16xf32>
    %1326 = arith.mulf %1314, %1312 : vector<8x16xf32>
    %cst_1021 = arith.constant 1.000000e+00 : f32
    %1327 = vector.broadcast %cst_1021 : f32 to vector<8x16xf32>
    %1328 = arith.subf %1327, %1314 : vector<8x16xf32>
    %1329 = arith.mulf %1328, %1325 : vector<8x16xf32>
    %1330 = arith.addf %1326, %1329 : vector<8x16xf32>
    %c1_1022 = arith.constant 1 : index
    %c0_1023 = arith.constant 0 : index
    %c0_1024 = arith.constant 0 : index
    %1331 = vector.load %arg9[%c1_1022, %c0_1023, %c0_1024] : memref<2x16x16xf32, #tpu.memory_space<vmem>>, vector<1x16x16xf32>
    %1332 = vector.shape_cast %1331 : vector<1x16x16xf32> to vector<16x16xf32>
    %cst_1025 = arith.constant dense<0.000000e+00> : vector<8x16xf32>
    %1333 = tpu.matmul %1330, %1332, %cst_1025 {dimension_numbers = #tpu.dot_dimension_numbers<[1], [0], [0], [1], [0, 0, 1, 1], [], []>} : vector<8x16xf32>, vector<16x16xf32>, vector<8x16xf32> -> vector<8x16xf32>
    %1334 = arith.addf %1333, %287 : vector<8x16xf32>
    %1335 = arith.mulf %1320, %1334 : vector<8x16xf32>
    %cst_1026 = arith.constant 1.000000e+00 : f32
    %1336 = vector.broadcast %cst_1026 : f32 to vector<8x16xf32>
    %1337 = arith.subf %1336, %1320 : vector<8x16xf32>
    %1338 = arith.mulf %1337, %1325 : vector<8x16xf32>
    %1339 = arith.addf %1335, %1338 : vector<8x16xf32>
    %1340 = arith.mulf %1328, %1339 : vector<8x16xf32>
    %1341 = arith.addf %1326, %1340 : vector<8x16xf32>
    %c1_1027 = arith.constant 1 : index
    %c2_1028 = arith.constant 2 : index
    %c0_1029 = arith.constant 0 : index
    %c0_1030 = arith.constant 0 : index
    %1342 = vector.load %arg35[%c1_1027, %c2_1028, %c0_1029, %c0_1030] : memref<2x8x8x16xf32, #tpu.memory_space<vmem>>, vector<1x1x8x16xf32>
    %1343 = vector.shape_cast %1342 : vector<1x1x8x16xf32> to vector<8x16xf32>
    %1344 = vector.shape_cast %1341 : vector<8x16xf32> to vector<1x1x8x16xf32>
    tpu.vector_store %arg35[%c1_1027, %c2_1028, %c0_1029, %c0_1030], %1344 {strides = array<i32>} : memref<2x8x8x16xf32, #tpu.memory_space<vmem>>, vector<1x1x8x16xf32>,
    %1345 = arith.subf %1312, %1325 : vector<8x16xf32>
    %1346 = math.absf %1345 : vector<8x16xf32>
    %1347 = arith.subf %1312, %1334 : vector<8x16xf32>
    %1348 = math.absf %1347 : vector<8x16xf32>
    %1349 = arith.addf %1346, %1348 : vector<8x16xf32>
    %1350 = arith.subf %1312, %1339 : vector<8x16xf32>
    %1351 = math.absf %1350 : vector<8x16xf32>
    %1352 = arith.addf %1349, %1351 : vector<8x16xf32>
    %1353 = arith.mulf %1352, %1316 : vector<8x16xf32>
    %1354 = arith.addf %1262, %1353 : vector<8x16xf32>
    %c1_1031 = arith.constant 1 : index
    %c0_1032 = arith.constant 0 : index
    %c0_1033 = arith.constant 0 : index
    %1355 = vector.load %arg24[%c1_1031, %c0_1032, %c0_1033] : memref<2x32x32xf32, #tpu.memory_space<vmem>>, vector<1x32x32xf32>
    %1356 = vector.shape_cast %1355 : vector<1x32x32xf32> to vector<32x32xf32>
    %cst_1034 = arith.constant dense<0.000000e+00> : vector<8x32xf32>
    %1357 = tpu.matmul %1321, %1356, %cst_1034 {dimension_numbers = #tpu.dot_dimension_numbers<[1], [0], [0], [1], [0, 0, 1, 1], [], []>} : vector<8x32xf32>, vector<32x32xf32>, vector<8x32xf32> -> vector<8x32xf32>
    %c1_1035 = arith.constant 1 : index
    %c0_1036 = arith.constant 0 : index
    %c0_1037 = arith.constant 0 : index
    %1358 = vector.load %arg25[%c1_1035, %c0_1036, %c0_1037] : memref<2x32x32xf32, #tpu.memory_space<vmem>>, vector<1x32x32xf32>
    %1359 = vector.shape_cast %1358 : vector<1x32x32xf32> to vector<32x32xf32>
    %cst_1038 = arith.constant dense<0.000000e+00> : vector<8x32xf32>
    %1360 = tpu.matmul %1321, %1359, %cst_1038 {dimension_numbers = #tpu.dot_dimension_numbers<[1], [0], [0], [1], [0, 0, 1, 1], [], []>} : vector<8x32xf32>, vector<32x32xf32>, vector<8x32xf32> -> vector<8x32xf32>
    %c1_1039 = arith.constant 1 : index
    %c0_1040 = arith.constant 0 : index
    %c0_1041 = arith.constant 0 : index
    %1361 = vector.load %arg26[%c1_1039, %c0_1040, %c0_1041] : memref<2x32x32xf32, #tpu.memory_space<vmem>>, vector<1x32x32xf32>
    %1362 = vector.shape_cast %1361 : vector<1x32x32xf32> to vector<32x32xf32>
    %cst_1042 = arith.constant dense<0.000000e+00> : vector<8x32xf32>
    %1363 = tpu.matmul %1321, %1362, %cst_1042 {dimension_numbers = #tpu.dot_dimension_numbers<[1], [0], [0], [1], [0, 0, 1, 1], [], []>} : vector<8x32xf32>, vector<32x32xf32>, vector<8x32xf32> -> vector<8x32xf32>
    %1364 = arith.addf %1363, %295 : vector<8x32xf32>
    %c1_1043 = arith.constant 1 : index
    %c0_1044 = arith.constant 0 : index
    %c0_1045 = arith.constant 0 : index
    %1365 = vector.load %arg14[%c1_1043, %c0_1044, %c0_1045] : memref<2x16x32xf32, #tpu.memory_space<vmem>>, vector<1x16x32xf32>
    %1366 = vector.shape_cast %1365 : vector<1x16x32xf32> to vector<16x32xf32>
    %cst_1046 = arith.constant dense<0.000000e+00> : vector<8x32xf32>
    %1367 = tpu.matmul %1341, %1366, %cst_1046 {dimension_numbers = #tpu.dot_dimension_numbers<[1], [0], [0], [1], [0, 0, 1, 1], [], []>} : vector<8x16xf32>, vector<16x32xf32>, vector<8x32xf32> -> vector<8x32xf32>
    %c1_1047 = arith.constant 1 : index
    %c2_1048 = arith.constant 2 : index
    %c0_1049 = arith.constant 0 : index
    %c0_1050 = arith.constant 0 : index
    %1368 = vector.load %arg31[%c1_1047, %c2_1048, %c0_1049, %c0_1050] : memref<2x8x8x32xf32, #tpu.memory_space<vmem>>, vector<1x1x8x32xf32>
    %1369 = vector.shape_cast %1368 : vector<1x1x8x32xf32> to vector<8x32xf32>
    %1370 = arith.addf %1367, %1369 : vector<8x32xf32>
    %c1_1051 = arith.constant 1 : index
    %c0_1052 = arith.constant 0 : index
    %c0_1053 = arith.constant 0 : index
    %1371 = vector.load %arg15[%c1_1051, %c0_1052, %c0_1053] : memref<2x16x32xf32, #tpu.memory_space<vmem>>, vector<1x16x32xf32>
    %1372 = vector.shape_cast %1371 : vector<1x16x32xf32> to vector<16x32xf32>
    %cst_1054 = arith.constant dense<0.000000e+00> : vector<8x32xf32>
    %1373 = tpu.matmul %1341, %1372, %cst_1054 {dimension_numbers = #tpu.dot_dimension_numbers<[1], [0], [0], [1], [0, 0, 1, 1], [], []>} : vector<8x16xf32>, vector<16x32xf32>, vector<8x32xf32> -> vector<8x32xf32>
    %c1_1055 = arith.constant 1 : index
    %c2_1056 = arith.constant 2 : index
    %c0_1057 = arith.constant 0 : index
    %c0_1058 = arith.constant 0 : index
    %1374 = vector.load %arg32[%c1_1055, %c2_1056, %c0_1057, %c0_1058] : memref<2x8x8x32xf32, #tpu.memory_space<vmem>>, vector<1x1x8x32xf32>
    %1375 = vector.shape_cast %1374 : vector<1x1x8x32xf32> to vector<8x32xf32>
    %1376 = arith.addf %1373, %1375 : vector<8x32xf32>
    %c1_1059 = arith.constant 1 : index
    %c0_1060 = arith.constant 0 : index
    %c0_1061 = arith.constant 0 : index
    %1377 = vector.load %arg16[%c1_1059, %c0_1060, %c0_1061] : memref<2x16x32xf32, #tpu.memory_space<vmem>>, vector<1x16x32xf32>
    %1378 = vector.shape_cast %1377 : vector<1x16x32xf32> to vector<16x32xf32>
    %cst_1062 = arith.constant dense<0.000000e+00> : vector<8x32xf32>
    %1379 = tpu.matmul %1341, %1378, %cst_1062 {dimension_numbers = #tpu.dot_dimension_numbers<[1], [0], [0], [1], [0, 0, 1, 1], [], []>} : vector<8x16xf32>, vector<16x32xf32>, vector<8x32xf32> -> vector<8x32xf32>
    %c1_1063 = arith.constant 1 : index
    %c2_1064 = arith.constant 2 : index
    %c0_1065 = arith.constant 0 : index
    %c0_1066 = arith.constant 0 : index
    %1380 = vector.load %arg33[%c1_1063, %c2_1064, %c0_1065, %c0_1066] : memref<2x8x8x32xf32, #tpu.memory_space<vmem>>, vector<1x1x8x32xf32>
    %1381 = vector.shape_cast %1380 : vector<1x1x8x32xf32> to vector<8x32xf32>
    %1382 = arith.addf %1379, %1381 : vector<8x32xf32>
    %1383 = arith.addf %1370, %1357 : vector<8x32xf32>
    %1384 = arith.negf %1383 : vector<8x32xf32>
    %1385 = math.exp %1384 : vector<8x32xf32>
    %cst_1067 = arith.constant 1.000000e+00 : f32
    %1386 = vector.broadcast %cst_1067 : f32 to vector<8x32xf32>
    %1387 = arith.addf %1386, %1385 : vector<8x32xf32>
    %1388 = arith.divf %1386, %1387 : vector<8x32xf32>
    %1389 = arith.addf %1376, %1360 : vector<8x32xf32>
    %1390 = arith.negf %1389 : vector<8x32xf32>
    %1391 = math.exp %1390 : vector<8x32xf32>
    %cst_1068 = arith.constant 1.000000e+00 : f32
    %1392 = vector.broadcast %cst_1068 : f32 to vector<8x32xf32>
    %1393 = arith.addf %1392, %1391 : vector<8x32xf32>
    %1394 = arith.divf %1392, %1393 : vector<8x32xf32>
    %1395 = arith.mulf %1388, %1364 : vector<8x32xf32>
    %1396 = arith.addf %1382, %1395 : vector<8x32xf32>
    %1397 = math.tanh %1396 : vector<8x32xf32>
    %cst_1069 = arith.constant 1.000000e+00 : f32
    %1398 = vector.broadcast %cst_1069 : f32 to vector<8x32xf32>
    %1399 = arith.subf %1398, %1394 : vector<8x32xf32>
    %1400 = arith.mulf %1399, %1397 : vector<8x32xf32>
    %1401 = arith.mulf %1394, %1321 : vector<8x32xf32>
    %1402 = arith.addf %1400, %1401 : vector<8x32xf32>
    %c6_1070 = arith.constant 6 : index
    %c0_1071 = arith.constant 0 : index
    %c0_1072 = arith.constant 0 : index
    %1403 = vector.load %arg0[%c6_1070, %c0_1071, %c0_1072] : memref<8x8x16xf32, #tpu.memory_space<vmem>>, vector<1x8x16xf32>
    %1404 = vector.shape_cast %1403 : vector<1x8x16xf32> to vector<8x16xf32>
    %c6_1073 = arith.constant 6 : index
    %c0_1074 = arith.constant 0 : index
    %c0_1075 = arith.constant 0 : index
    %1405 = vector.load %arg1[%c6_1073, %c0_1074, %c0_1075] : memref<8x8x16xf32, #tpu.memory_space<vmem>>, vector<1x8x16xf32>
    %1406 = vector.shape_cast %1405 : vector<1x8x16xf32> to vector<8x16xf32>
    %c6_1076 = arith.constant 6 : index
    %c0_1077 = arith.constant 0 : index
    %c0_1078 = arith.constant 0 : index
    %1407 = vector.load %arg34[%c6_1076, %c0_1077, %c0_1078] : memref<8x8x16xf32, #tpu.memory_space<vmem>>, vector<1x8x16xf32>
    %1408 = vector.shape_cast %1407 : vector<1x8x16xf32> to vector<8x16xf32>
    %c0_1079 = arith.constant 0 : index
    %c6_1080 = arith.constant 6 : index
    %c0_1081 = arith.constant 0 : index
    %c0_1082 = arith.constant 0 : index
    %1409 = vector.load %arg29[%c0_1079, %c6_1080, %c0_1081, %c0_1082] : memref<2x8x8x32xf32, #tpu.memory_space<vmem>>, vector<1x1x8x32xf32>
    %1410 = vector.shape_cast %1409 : vector<1x1x8x32xf32> to vector<8x32xf32>
    %c0_1083 = arith.constant 0 : index
    %c6_1084 = arith.constant 6 : index
    %c0_1085 = arith.constant 0 : index
    %c0_1086 = arith.constant 0 : index
    %1411 = vector.load %arg30[%c0_1083, %c6_1084, %c0_1085, %c0_1086] : memref<2x8x8x16xf32, #tpu.memory_space<vmem>>, vector<1x1x8x16xf32>
    %1412 = vector.shape_cast %1411 : vector<1x1x8x16xf32> to vector<8x16xf32>
    %1413 = arith.mulf %1310, %1410 : vector<8x32xf32>
    %c0_1087 = arith.constant 0 : index
    %c0_1088 = arith.constant 0 : index
    %c0_1089 = arith.constant 0 : index
    %1414 = vector.load %arg7[%c0_1087, %c0_1088, %c0_1089] : memref<2x32x16xf32, #tpu.memory_space<vmem>>, vector<1x32x16xf32>
    %1415 = vector.shape_cast %1414 : vector<1x32x16xf32> to vector<32x16xf32>
    %cst_1090 = arith.constant dense<0.000000e+00> : vector<8x16xf32>
    %1416 = tpu.matmul %1413, %1415, %cst_1090 {dimension_numbers = #tpu.dot_dimension_numbers<[1], [0], [0], [1], [0, 0, 1, 1], [], []>} : vector<8x32xf32>, vector<32x16xf32>, vector<8x16xf32> -> vector<8x16xf32>
    %1417 = arith.addf %1416, %275 : vector<8x16xf32>
    %1418 = arith.mulf %1406, %1404 : vector<8x16xf32>
    %cst_1091 = arith.constant 1.000000e+00 : f32
    %1419 = vector.broadcast %cst_1091 : f32 to vector<8x16xf32>
    %1420 = arith.subf %1419, %1406 : vector<8x16xf32>
    %1421 = arith.mulf %1420, %1417 : vector<8x16xf32>
    %1422 = arith.addf %1418, %1421 : vector<8x16xf32>
    %c0_1092 = arith.constant 0 : index
    %c0_1093 = arith.constant 0 : index
    %c0_1094 = arith.constant 0 : index
    %1423 = vector.load %arg9[%c0_1092, %c0_1093, %c0_1094] : memref<2x16x16xf32, #tpu.memory_space<vmem>>, vector<1x16x16xf32>
    %1424 = vector.shape_cast %1423 : vector<1x16x16xf32> to vector<16x16xf32>
    %cst_1095 = arith.constant dense<0.000000e+00> : vector<8x16xf32>
    %1425 = tpu.matmul %1422, %1424, %cst_1095 {dimension_numbers = #tpu.dot_dimension_numbers<[1], [0], [0], [1], [0, 0, 1, 1], [], []>} : vector<8x16xf32>, vector<16x16xf32>, vector<8x16xf32> -> vector<8x16xf32>
    %1426 = arith.addf %1425, %283 : vector<8x16xf32>
    %1427 = arith.mulf %1412, %1426 : vector<8x16xf32>
    %cst_1096 = arith.constant 1.000000e+00 : f32
    %1428 = vector.broadcast %cst_1096 : f32 to vector<8x16xf32>
    %1429 = arith.subf %1428, %1412 : vector<8x16xf32>
    %1430 = arith.mulf %1429, %1417 : vector<8x16xf32>
    %1431 = arith.addf %1427, %1430 : vector<8x16xf32>
    %1432 = arith.mulf %1420, %1431 : vector<8x16xf32>
    %1433 = arith.addf %1418, %1432 : vector<8x16xf32>
    %c0_1097 = arith.constant 0 : index
    %c6_1098 = arith.constant 6 : index
    %c0_1099 = arith.constant 0 : index
    %c0_1100 = arith.constant 0 : index
    %1434 = vector.load %arg35[%c0_1097, %c6_1098, %c0_1099, %c0_1100] : memref<2x8x8x16xf32, #tpu.memory_space<vmem>>, vector<1x1x8x16xf32>
    %1435 = vector.shape_cast %1434 : vector<1x1x8x16xf32> to vector<8x16xf32>
    %1436 = vector.shape_cast %1433 : vector<8x16xf32> to vector<1x1x8x16xf32>
    tpu.vector_store %arg35[%c0_1097, %c6_1098, %c0_1099, %c0_1100], %1436 {strides = array<i32>} : memref<2x8x8x16xf32, #tpu.memory_space<vmem>>, vector<1x1x8x16xf32>,
    %1437 = arith.subf %1404, %1417 : vector<8x16xf32>
    %1438 = math.absf %1437 : vector<8x16xf32>
    %1439 = arith.subf %1404, %1426 : vector<8x16xf32>
    %1440 = math.absf %1439 : vector<8x16xf32>
    %1441 = arith.addf %1438, %1440 : vector<8x16xf32>
    %1442 = arith.subf %1404, %1431 : vector<8x16xf32>
    %1443 = math.absf %1442 : vector<8x16xf32>
    %1444 = arith.addf %1441, %1443 : vector<8x16xf32>
    %1445 = arith.mulf %1444, %1408 : vector<8x16xf32>
    %1446 = arith.addf %1354, %1445 : vector<8x16xf32>
    %c0_1101 = arith.constant 0 : index
    %c0_1102 = arith.constant 0 : index
    %c0_1103 = arith.constant 0 : index
    %1447 = vector.load %arg24[%c0_1101, %c0_1102, %c0_1103] : memref<2x32x32xf32, #tpu.memory_space<vmem>>, vector<1x32x32xf32>
    %1448 = vector.shape_cast %1447 : vector<1x32x32xf32> to vector<32x32xf32>
    %cst_1104 = arith.constant dense<0.000000e+00> : vector<8x32xf32>
    %1449 = tpu.matmul %1413, %1448, %cst_1104 {dimension_numbers = #tpu.dot_dimension_numbers<[1], [0], [0], [1], [0, 0, 1, 1], [], []>} : vector<8x32xf32>, vector<32x32xf32>, vector<8x32xf32> -> vector<8x32xf32>
    %c0_1105 = arith.constant 0 : index
    %c0_1106 = arith.constant 0 : index
    %c0_1107 = arith.constant 0 : index
    %1450 = vector.load %arg25[%c0_1105, %c0_1106, %c0_1107] : memref<2x32x32xf32, #tpu.memory_space<vmem>>, vector<1x32x32xf32>
    %1451 = vector.shape_cast %1450 : vector<1x32x32xf32> to vector<32x32xf32>
    %cst_1108 = arith.constant dense<0.000000e+00> : vector<8x32xf32>
    %1452 = tpu.matmul %1413, %1451, %cst_1108 {dimension_numbers = #tpu.dot_dimension_numbers<[1], [0], [0], [1], [0, 0, 1, 1], [], []>} : vector<8x32xf32>, vector<32x32xf32>, vector<8x32xf32> -> vector<8x32xf32>
    %c0_1109 = arith.constant 0 : index
    %c0_1110 = arith.constant 0 : index
    %c0_1111 = arith.constant 0 : index
    %1453 = vector.load %arg26[%c0_1109, %c0_1110, %c0_1111] : memref<2x32x32xf32, #tpu.memory_space<vmem>>, vector<1x32x32xf32>
    %1454 = vector.shape_cast %1453 : vector<1x32x32xf32> to vector<32x32xf32>
    %cst_1112 = arith.constant dense<0.000000e+00> : vector<8x32xf32>
    %1455 = tpu.matmul %1413, %1454, %cst_1112 {dimension_numbers = #tpu.dot_dimension_numbers<[1], [0], [0], [1], [0, 0, 1, 1], [], []>} : vector<8x32xf32>, vector<32x32xf32>, vector<8x32xf32> -> vector<8x32xf32>
    %1456 = arith.addf %1455, %291 : vector<8x32xf32>
    %c0_1113 = arith.constant 0 : index
    %c0_1114 = arith.constant 0 : index
    %c0_1115 = arith.constant 0 : index
    %1457 = vector.load %arg14[%c0_1113, %c0_1114, %c0_1115] : memref<2x16x32xf32, #tpu.memory_space<vmem>>, vector<1x16x32xf32>
    %1458 = vector.shape_cast %1457 : vector<1x16x32xf32> to vector<16x32xf32>
    %cst_1116 = arith.constant dense<0.000000e+00> : vector<8x32xf32>
    %1459 = tpu.matmul %1433, %1458, %cst_1116 {dimension_numbers = #tpu.dot_dimension_numbers<[1], [0], [0], [1], [0, 0, 1, 1], [], []>} : vector<8x16xf32>, vector<16x32xf32>, vector<8x32xf32> -> vector<8x32xf32>
    %c0_1117 = arith.constant 0 : index
    %c6_1118 = arith.constant 6 : index
    %c0_1119 = arith.constant 0 : index
    %c0_1120 = arith.constant 0 : index
    %1460 = vector.load %arg31[%c0_1117, %c6_1118, %c0_1119, %c0_1120] : memref<2x8x8x32xf32, #tpu.memory_space<vmem>>, vector<1x1x8x32xf32>
    %1461 = vector.shape_cast %1460 : vector<1x1x8x32xf32> to vector<8x32xf32>
    %1462 = arith.addf %1459, %1461 : vector<8x32xf32>
    %c0_1121 = arith.constant 0 : index
    %c0_1122 = arith.constant 0 : index
    %c0_1123 = arith.constant 0 : index
    %1463 = vector.load %arg15[%c0_1121, %c0_1122, %c0_1123] : memref<2x16x32xf32, #tpu.memory_space<vmem>>, vector<1x16x32xf32>
    %1464 = vector.shape_cast %1463 : vector<1x16x32xf32> to vector<16x32xf32>
    %cst_1124 = arith.constant dense<0.000000e+00> : vector<8x32xf32>
    %1465 = tpu.matmul %1433, %1464, %cst_1124 {dimension_numbers = #tpu.dot_dimension_numbers<[1], [0], [0], [1], [0, 0, 1, 1], [], []>} : vector<8x16xf32>, vector<16x32xf32>, vector<8x32xf32> -> vector<8x32xf32>
    %c0_1125 = arith.constant 0 : index
    %c6_1126 = arith.constant 6 : index
    %c0_1127 = arith.constant 0 : index
    %c0_1128 = arith.constant 0 : index
    %1466 = vector.load %arg32[%c0_1125, %c6_1126, %c0_1127, %c0_1128] : memref<2x8x8x32xf32, #tpu.memory_space<vmem>>, vector<1x1x8x32xf32>
    %1467 = vector.shape_cast %1466 : vector<1x1x8x32xf32> to vector<8x32xf32>
    %1468 = arith.addf %1465, %1467 : vector<8x32xf32>
    %c0_1129 = arith.constant 0 : index
    %c0_1130 = arith.constant 0 : index
    %c0_1131 = arith.constant 0 : index
    %1469 = vector.load %arg16[%c0_1129, %c0_1130, %c0_1131] : memref<2x16x32xf32, #tpu.memory_space<vmem>>, vector<1x16x32xf32>
    %1470 = vector.shape_cast %1469 : vector<1x16x32xf32> to vector<16x32xf32>
    %cst_1132 = arith.constant dense<0.000000e+00> : vector<8x32xf32>
    %1471 = tpu.matmul %1433, %1470, %cst_1132 {dimension_numbers = #tpu.dot_dimension_numbers<[1], [0], [0], [1], [0, 0, 1, 1], [], []>} : vector<8x16xf32>, vector<16x32xf32>, vector<8x32xf32> -> vector<8x32xf32>
    %c0_1133 = arith.constant 0 : index
    %c6_1134 = arith.constant 6 : index
    %c0_1135 = arith.constant 0 : index
    %c0_1136 = arith.constant 0 : index
    %1472 = vector.load %arg33[%c0_1133, %c6_1134, %c0_1135, %c0_1136] : memref<2x8x8x32xf32, #tpu.memory_space<vmem>>, vector<1x1x8x32xf32>
    %1473 = vector.shape_cast %1472 : vector<1x1x8x32xf32> to vector<8x32xf32>
    %1474 = arith.addf %1471, %1473 : vector<8x32xf32>
    %1475 = arith.addf %1462, %1449 : vector<8x32xf32>
    %1476 = arith.negf %1475 : vector<8x32xf32>
    %1477 = math.exp %1476 : vector<8x32xf32>
    %cst_1137 = arith.constant 1.000000e+00 : f32
    %1478 = vector.broadcast %cst_1137 : f32 to vector<8x32xf32>
    %1479 = arith.addf %1478, %1477 : vector<8x32xf32>
    %1480 = arith.divf %1478, %1479 : vector<8x32xf32>
    %1481 = arith.addf %1468, %1452 : vector<8x32xf32>
    %1482 = arith.negf %1481 : vector<8x32xf32>
    %1483 = math.exp %1482 : vector<8x32xf32>
    %cst_1138 = arith.constant 1.000000e+00 : f32
    %1484 = vector.broadcast %cst_1138 : f32 to vector<8x32xf32>
    %1485 = arith.addf %1484, %1483 : vector<8x32xf32>
    %1486 = arith.divf %1484, %1485 : vector<8x32xf32>
    %1487 = arith.mulf %1480, %1456 : vector<8x32xf32>
    %1488 = arith.addf %1474, %1487 : vector<8x32xf32>
    %1489 = math.tanh %1488 : vector<8x32xf32>
    %cst_1139 = arith.constant 1.000000e+00 : f32
    %1490 = vector.broadcast %cst_1139 : f32 to vector<8x32xf32>
    %1491 = arith.subf %1490, %1486 : vector<8x32xf32>
    %1492 = arith.mulf %1491, %1489 : vector<8x32xf32>
    %1493 = arith.mulf %1486, %1413 : vector<8x32xf32>
    %1494 = arith.addf %1492, %1493 : vector<8x32xf32>
    %c1_1140 = arith.constant 1 : index
    %c0_1141 = arith.constant 0 : index
    %c0_1142 = arith.constant 0 : index
    %1495 = vector.load %arg0[%c1_1140, %c0_1141, %c0_1142] : memref<8x8x16xf32, #tpu.memory_space<vmem>>, vector<1x8x16xf32>
    %1496 = vector.shape_cast %1495 : vector<1x8x16xf32> to vector<8x16xf32>
    %c1_1143 = arith.constant 1 : index
    %c0_1144 = arith.constant 0 : index
    %c0_1145 = arith.constant 0 : index
    %1497 = vector.load %arg1[%c1_1143, %c0_1144, %c0_1145] : memref<8x8x16xf32, #tpu.memory_space<vmem>>, vector<1x8x16xf32>
    %1498 = vector.shape_cast %1497 : vector<1x8x16xf32> to vector<8x16xf32>
    %c1_1146 = arith.constant 1 : index
    %c0_1147 = arith.constant 0 : index
    %c0_1148 = arith.constant 0 : index
    %1499 = vector.load %arg34[%c1_1146, %c0_1147, %c0_1148] : memref<8x8x16xf32, #tpu.memory_space<vmem>>, vector<1x8x16xf32>
    %1500 = vector.shape_cast %1499 : vector<1x8x16xf32> to vector<8x16xf32>
    %c1_1149 = arith.constant 1 : index
    %c1_1150 = arith.constant 1 : index
    %c0_1151 = arith.constant 0 : index
    %c0_1152 = arith.constant 0 : index
    %1501 = vector.load %arg29[%c1_1149, %c1_1150, %c0_1151, %c0_1152] : memref<2x8x8x32xf32, #tpu.memory_space<vmem>>, vector<1x1x8x32xf32>
    %1502 = vector.shape_cast %1501 : vector<1x1x8x32xf32> to vector<8x32xf32>
    %c1_1153 = arith.constant 1 : index
    %c1_1154 = arith.constant 1 : index
    %c0_1155 = arith.constant 0 : index
    %c0_1156 = arith.constant 0 : index
    %1503 = vector.load %arg30[%c1_1153, %c1_1154, %c0_1155, %c0_1156] : memref<2x8x8x16xf32, #tpu.memory_space<vmem>>, vector<1x1x8x16xf32>
    %1504 = vector.shape_cast %1503 : vector<1x1x8x16xf32> to vector<8x16xf32>
    %1505 = arith.mulf %1402, %1502 : vector<8x32xf32>
    %c1_1157 = arith.constant 1 : index
    %c0_1158 = arith.constant 0 : index
    %c0_1159 = arith.constant 0 : index
    %1506 = vector.load %arg7[%c1_1157, %c0_1158, %c0_1159] : memref<2x32x16xf32, #tpu.memory_space<vmem>>, vector<1x32x16xf32>
    %1507 = vector.shape_cast %1506 : vector<1x32x16xf32> to vector<32x16xf32>
    %cst_1160 = arith.constant dense<0.000000e+00> : vector<8x16xf32>
    %1508 = tpu.matmul %1505, %1507, %cst_1160 {dimension_numbers = #tpu.dot_dimension_numbers<[1], [0], [0], [1], [0, 0, 1, 1], [], []>} : vector<8x32xf32>, vector<32x16xf32>, vector<8x16xf32> -> vector<8x16xf32>
    %1509 = arith.addf %1508, %279 : vector<8x16xf32>
    %1510 = arith.mulf %1498, %1496 : vector<8x16xf32>
    %cst_1161 = arith.constant 1.000000e+00 : f32
    %1511 = vector.broadcast %cst_1161 : f32 to vector<8x16xf32>
    %1512 = arith.subf %1511, %1498 : vector<8x16xf32>
    %1513 = arith.mulf %1512, %1509 : vector<8x16xf32>
    %1514 = arith.addf %1510, %1513 : vector<8x16xf32>
    %c1_1162 = arith.constant 1 : index
    %c0_1163 = arith.constant 0 : index
    %c0_1164 = arith.constant 0 : index
    %1515 = vector.load %arg9[%c1_1162, %c0_1163, %c0_1164] : memref<2x16x16xf32, #tpu.memory_space<vmem>>, vector<1x16x16xf32>
    %1516 = vector.shape_cast %1515 : vector<1x16x16xf32> to vector<16x16xf32>
    %cst_1165 = arith.constant dense<0.000000e+00> : vector<8x16xf32>
    %1517 = tpu.matmul %1514, %1516, %cst_1165 {dimension_numbers = #tpu.dot_dimension_numbers<[1], [0], [0], [1], [0, 0, 1, 1], [], []>} : vector<8x16xf32>, vector<16x16xf32>, vector<8x16xf32> -> vector<8x16xf32>
    %1518 = arith.addf %1517, %287 : vector<8x16xf32>
    %1519 = arith.mulf %1504, %1518 : vector<8x16xf32>
    %cst_1166 = arith.constant 1.000000e+00 : f32
    %1520 = vector.broadcast %cst_1166 : f32 to vector<8x16xf32>
    %1521 = arith.subf %1520, %1504 : vector<8x16xf32>
    %1522 = arith.mulf %1521, %1509 : vector<8x16xf32>
    %1523 = arith.addf %1519, %1522 : vector<8x16xf32>
    %1524 = arith.mulf %1512, %1523 : vector<8x16xf32>
    %1525 = arith.addf %1510, %1524 : vector<8x16xf32>
    %c1_1167 = arith.constant 1 : index
    %c1_1168 = arith.constant 1 : index
    %c0_1169 = arith.constant 0 : index
    %c0_1170 = arith.constant 0 : index
    %1526 = vector.load %arg35[%c1_1167, %c1_1168, %c0_1169, %c0_1170] : memref<2x8x8x16xf32, #tpu.memory_space<vmem>>, vector<1x1x8x16xf32>
    %1527 = vector.shape_cast %1526 : vector<1x1x8x16xf32> to vector<8x16xf32>
    %1528 = vector.shape_cast %1525 : vector<8x16xf32> to vector<1x1x8x16xf32>
    tpu.vector_store %arg35[%c1_1167, %c1_1168, %c0_1169, %c0_1170], %1528 {strides = array<i32>} : memref<2x8x8x16xf32, #tpu.memory_space<vmem>>, vector<1x1x8x16xf32>,
    %1529 = arith.subf %1496, %1509 : vector<8x16xf32>
    %1530 = math.absf %1529 : vector<8x16xf32>
    %1531 = arith.subf %1496, %1518 : vector<8x16xf32>
    %1532 = math.absf %1531 : vector<8x16xf32>
    %1533 = arith.addf %1530, %1532 : vector<8x16xf32>
    %1534 = arith.subf %1496, %1523 : vector<8x16xf32>
    %1535 = math.absf %1534 : vector<8x16xf32>
    %1536 = arith.addf %1533, %1535 : vector<8x16xf32>
    %1537 = arith.mulf %1536, %1500 : vector<8x16xf32>
    %1538 = arith.addf %1446, %1537 : vector<8x16xf32>
    %c1_1171 = arith.constant 1 : index
    %c0_1172 = arith.constant 0 : index
    %c0_1173 = arith.constant 0 : index
    %1539 = vector.load %arg24[%c1_1171, %c0_1172, %c0_1173] : memref<2x32x32xf32, #tpu.memory_space<vmem>>, vector<1x32x32xf32>
    %1540 = vector.shape_cast %1539 : vector<1x32x32xf32> to vector<32x32xf32>
    %cst_1174 = arith.constant dense<0.000000e+00> : vector<8x32xf32>
    %1541 = tpu.matmul %1505, %1540, %cst_1174 {dimension_numbers = #tpu.dot_dimension_numbers<[1], [0], [0], [1], [0, 0, 1, 1], [], []>} : vector<8x32xf32>, vector<32x32xf32>, vector<8x32xf32> -> vector<8x32xf32>
    %c1_1175 = arith.constant 1 : index
    %c0_1176 = arith.constant 0 : index
    %c0_1177 = arith.constant 0 : index
    %1542 = vector.load %arg25[%c1_1175, %c0_1176, %c0_1177] : memref<2x32x32xf32, #tpu.memory_space<vmem>>, vector<1x32x32xf32>
    %1543 = vector.shape_cast %1542 : vector<1x32x32xf32> to vector<32x32xf32>
    %cst_1178 = arith.constant dense<0.000000e+00> : vector<8x32xf32>
    %1544 = tpu.matmul %1505, %1543, %cst_1178 {dimension_numbers = #tpu.dot_dimension_numbers<[1], [0], [0], [1], [0, 0, 1, 1], [], []>} : vector<8x32xf32>, vector<32x32xf32>, vector<8x32xf32> -> vector<8x32xf32>
    %c1_1179 = arith.constant 1 : index
    %c0_1180 = arith.constant 0 : index
    %c0_1181 = arith.constant 0 : index
    %1545 = vector.load %arg26[%c1_1179, %c0_1180, %c0_1181] : memref<2x32x32xf32, #tpu.memory_space<vmem>>, vector<1x32x32xf32>
    %1546 = vector.shape_cast %1545 : vector<1x32x32xf32> to vector<32x32xf32>
    %cst_1182 = arith.constant dense<0.000000e+00> : vector<8x32xf32>
    %1547 = tpu.matmul %1505, %1546, %cst_1182 {dimension_numbers = #tpu.dot_dimension_numbers<[1], [0], [0], [1], [0, 0, 1, 1], [], []>} : vector<8x32xf32>, vector<32x32xf32>, vector<8x32xf32> -> vector<8x32xf32>
    %1548 = arith.addf %1547, %295 : vector<8x32xf32>
    %c1_1183 = arith.constant 1 : index
    %c0_1184 = arith.constant 0 : index
    %c0_1185 = arith.constant 0 : index
    %1549 = vector.load %arg14[%c1_1183, %c0_1184, %c0_1185] : memref<2x16x32xf32, #tpu.memory_space<vmem>>, vector<1x16x32xf32>
    %1550 = vector.shape_cast %1549 : vector<1x16x32xf32> to vector<16x32xf32>
    %cst_1186 = arith.constant dense<0.000000e+00> : vector<8x32xf32>
    %1551 = tpu.matmul %1525, %1550, %cst_1186 {dimension_numbers = #tpu.dot_dimension_numbers<[1], [0], [0], [1], [0, 0, 1, 1], [], []>} : vector<8x16xf32>, vector<16x32xf32>, vector<8x32xf32> -> vector<8x32xf32>
    %c1_1187 = arith.constant 1 : index
    %c1_1188 = arith.constant 1 : index
    %c0_1189 = arith.constant 0 : index
    %c0_1190 = arith.constant 0 : index
    %1552 = vector.load %arg31[%c1_1187, %c1_1188, %c0_1189, %c0_1190] : memref<2x8x8x32xf32, #tpu.memory_space<vmem>>, vector<1x1x8x32xf32>
    %1553 = vector.shape_cast %1552 : vector<1x1x8x32xf32> to vector<8x32xf32>
    %1554 = arith.addf %1551, %1553 : vector<8x32xf32>
    %c1_1191 = arith.constant 1 : index
    %c0_1192 = arith.constant 0 : index
    %c0_1193 = arith.constant 0 : index
    %1555 = vector.load %arg15[%c1_1191, %c0_1192, %c0_1193] : memref<2x16x32xf32, #tpu.memory_space<vmem>>, vector<1x16x32xf32>
    %1556 = vector.shape_cast %1555 : vector<1x16x32xf32> to vector<16x32xf32>
    %cst_1194 = arith.constant dense<0.000000e+00> : vector<8x32xf32>
    %1557 = tpu.matmul %1525, %1556, %cst_1194 {dimension_numbers = #tpu.dot_dimension_numbers<[1], [0], [0], [1], [0, 0, 1, 1], [], []>} : vector<8x16xf32>, vector<16x32xf32>, vector<8x32xf32> -> vector<8x32xf32>
    %c1_1195 = arith.constant 1 : index
    %c1_1196 = arith.constant 1 : index
    %c0_1197 = arith.constant 0 : index
    %c0_1198 = arith.constant 0 : index
    %1558 = vector.load %arg32[%c1_1195, %c1_1196, %c0_1197, %c0_1198] : memref<2x8x8x32xf32, #tpu.memory_space<vmem>>, vector<1x1x8x32xf32>
    %1559 = vector.shape_cast %1558 : vector<1x1x8x32xf32> to vector<8x32xf32>
    %1560 = arith.addf %1557, %1559 : vector<8x32xf32>
    %c1_1199 = arith.constant 1 : index
    %c0_1200 = arith.constant 0 : index
    %c0_1201 = arith.constant 0 : index
    %1561 = vector.load %arg16[%c1_1199, %c0_1200, %c0_1201] : memref<2x16x32xf32, #tpu.memory_space<vmem>>, vector<1x16x32xf32>
    %1562 = vector.shape_cast %1561 : vector<1x16x32xf32> to vector<16x32xf32>
    %cst_1202 = arith.constant dense<0.000000e+00> : vector<8x32xf32>
    %1563 = tpu.matmul %1525, %1562, %cst_1202 {dimension_numbers = #tpu.dot_dimension_numbers<[1], [0], [0], [1], [0, 0, 1, 1], [], []>} : vector<8x16xf32>, vector<16x32xf32>, vector<8x32xf32> -> vector<8x32xf32>
    %c1_1203 = arith.constant 1 : index
    %c1_1204 = arith.constant 1 : index
    %c0_1205 = arith.constant 0 : index
    %c0_1206 = arith.constant 0 : index
    %1564 = vector.load %arg33[%c1_1203, %c1_1204, %c0_1205, %c0_1206] : memref<2x8x8x32xf32, #tpu.memory_space<vmem>>, vector<1x1x8x32xf32>
    %1565 = vector.shape_cast %1564 : vector<1x1x8x32xf32> to vector<8x32xf32>
    %1566 = arith.addf %1563, %1565 : vector<8x32xf32>
    %1567 = arith.addf %1554, %1541 : vector<8x32xf32>
    %1568 = arith.negf %1567 : vector<8x32xf32>
    %1569 = math.exp %1568 : vector<8x32xf32>
    %cst_1207 = arith.constant 1.000000e+00 : f32
    %1570 = vector.broadcast %cst_1207 : f32 to vector<8x32xf32>
    %1571 = arith.addf %1570, %1569 : vector<8x32xf32>
    %1572 = arith.divf %1570, %1571 : vector<8x32xf32>
    %1573 = arith.addf %1560, %1544 : vector<8x32xf32>
    %1574 = arith.negf %1573 : vector<8x32xf32>
    %1575 = math.exp %1574 : vector<8x32xf32>
    %cst_1208 = arith.constant 1.000000e+00 : f32
    %1576 = vector.broadcast %cst_1208 : f32 to vector<8x32xf32>
    %1577 = arith.addf %1576, %1575 : vector<8x32xf32>
    %1578 = arith.divf %1576, %1577 : vector<8x32xf32>
    %1579 = arith.mulf %1572, %1548 : vector<8x32xf32>
    %1580 = arith.addf %1566, %1579 : vector<8x32xf32>
    %1581 = math.tanh %1580 : vector<8x32xf32>
    %cst_1209 = arith.constant 1.000000e+00 : f32
    %1582 = vector.broadcast %cst_1209 : f32 to vector<8x32xf32>
    %1583 = arith.subf %1582, %1578 : vector<8x32xf32>
    %1584 = arith.mulf %1583, %1581 : vector<8x32xf32>
    %1585 = arith.mulf %1578, %1505 : vector<8x32xf32>
    %1586 = arith.addf %1584, %1585 : vector<8x32xf32>
    %c7_1210 = arith.constant 7 : index
    %c0_1211 = arith.constant 0 : index
    %c0_1212 = arith.constant 0 : index
    %1587 = vector.load %arg0[%c7_1210, %c0_1211, %c0_1212] : memref<8x8x16xf32, #tpu.memory_space<vmem>>, vector<1x8x16xf32>
    %1588 = vector.shape_cast %1587 : vector<1x8x16xf32> to vector<8x16xf32>
    %c7_1213 = arith.constant 7 : index
    %c0_1214 = arith.constant 0 : index
    %c0_1215 = arith.constant 0 : index
    %1589 = vector.load %arg1[%c7_1213, %c0_1214, %c0_1215] : memref<8x8x16xf32, #tpu.memory_space<vmem>>, vector<1x8x16xf32>
    %1590 = vector.shape_cast %1589 : vector<1x8x16xf32> to vector<8x16xf32>
    %c7_1216 = arith.constant 7 : index
    %c0_1217 = arith.constant 0 : index
    %c0_1218 = arith.constant 0 : index
    %1591 = vector.load %arg34[%c7_1216, %c0_1217, %c0_1218] : memref<8x8x16xf32, #tpu.memory_space<vmem>>, vector<1x8x16xf32>
    %1592 = vector.shape_cast %1591 : vector<1x8x16xf32> to vector<8x16xf32>
    %c0_1219 = arith.constant 0 : index
    %c7_1220 = arith.constant 7 : index
    %c0_1221 = arith.constant 0 : index
    %c0_1222 = arith.constant 0 : index
    %1593 = vector.load %arg29[%c0_1219, %c7_1220, %c0_1221, %c0_1222] : memref<2x8x8x32xf32, #tpu.memory_space<vmem>>, vector<1x1x8x32xf32>
    %1594 = vector.shape_cast %1593 : vector<1x1x8x32xf32> to vector<8x32xf32>
    %c0_1223 = arith.constant 0 : index
    %c7_1224 = arith.constant 7 : index
    %c0_1225 = arith.constant 0 : index
    %c0_1226 = arith.constant 0 : index
    %1595 = vector.load %arg30[%c0_1223, %c7_1224, %c0_1225, %c0_1226] : memref<2x8x8x16xf32, #tpu.memory_space<vmem>>, vector<1x1x8x16xf32>
    %1596 = vector.shape_cast %1595 : vector<1x1x8x16xf32> to vector<8x16xf32>
    %1597 = arith.mulf %1494, %1594 : vector<8x32xf32>
    %c0_1227 = arith.constant 0 : index
    %c0_1228 = arith.constant 0 : index
    %c0_1229 = arith.constant 0 : index
    %1598 = vector.load %arg7[%c0_1227, %c0_1228, %c0_1229] : memref<2x32x16xf32, #tpu.memory_space<vmem>>, vector<1x32x16xf32>
    %1599 = vector.shape_cast %1598 : vector<1x32x16xf32> to vector<32x16xf32>
    %cst_1230 = arith.constant dense<0.000000e+00> : vector<8x16xf32>
    %1600 = tpu.matmul %1597, %1599, %cst_1230 {dimension_numbers = #tpu.dot_dimension_numbers<[1], [0], [0], [1], [0, 0, 1, 1], [], []>} : vector<8x32xf32>, vector<32x16xf32>, vector<8x16xf32> -> vector<8x16xf32>
    %1601 = arith.addf %1600, %275 : vector<8x16xf32>
    %1602 = arith.mulf %1590, %1588 : vector<8x16xf32>
    %cst_1231 = arith.constant 1.000000e+00 : f32
    %1603 = vector.broadcast %cst_1231 : f32 to vector<8x16xf32>
    %1604 = arith.subf %1603, %1590 : vector<8x16xf32>
    %1605 = arith.mulf %1604, %1601 : vector<8x16xf32>
    %1606 = arith.addf %1602, %1605 : vector<8x16xf32>
    %c0_1232 = arith.constant 0 : index
    %c0_1233 = arith.constant 0 : index
    %c0_1234 = arith.constant 0 : index
    %1607 = vector.load %arg9[%c0_1232, %c0_1233, %c0_1234] : memref<2x16x16xf32, #tpu.memory_space<vmem>>, vector<1x16x16xf32>
    %1608 = vector.shape_cast %1607 : vector<1x16x16xf32> to vector<16x16xf32>
    %cst_1235 = arith.constant dense<0.000000e+00> : vector<8x16xf32>
    %1609 = tpu.matmul %1606, %1608, %cst_1235 {dimension_numbers = #tpu.dot_dimension_numbers<[1], [0], [0], [1], [0, 0, 1, 1], [], []>} : vector<8x16xf32>, vector<16x16xf32>, vector<8x16xf32> -> vector<8x16xf32>
    %1610 = arith.addf %1609, %283 : vector<8x16xf32>
    %1611 = arith.mulf %1596, %1610 : vector<8x16xf32>
    %cst_1236 = arith.constant 1.000000e+00 : f32
    %1612 = vector.broadcast %cst_1236 : f32 to vector<8x16xf32>
    %1613 = arith.subf %1612, %1596 : vector<8x16xf32>
    %1614 = arith.mulf %1613, %1601 : vector<8x16xf32>
    %1615 = arith.addf %1611, %1614 : vector<8x16xf32>
    %1616 = arith.mulf %1604, %1615 : vector<8x16xf32>
    %1617 = arith.addf %1602, %1616 : vector<8x16xf32>
    %c0_1237 = arith.constant 0 : index
    %c7_1238 = arith.constant 7 : index
    %c0_1239 = arith.constant 0 : index
    %c0_1240 = arith.constant 0 : index
    %1618 = vector.load %arg35[%c0_1237, %c7_1238, %c0_1239, %c0_1240] : memref<2x8x8x16xf32, #tpu.memory_space<vmem>>, vector<1x1x8x16xf32>
    %1619 = vector.shape_cast %1618 : vector<1x1x8x16xf32> to vector<8x16xf32>
    %1620 = vector.shape_cast %1617 : vector<8x16xf32> to vector<1x1x8x16xf32>
    tpu.vector_store %arg35[%c0_1237, %c7_1238, %c0_1239, %c0_1240], %1620 {strides = array<i32>} : memref<2x8x8x16xf32, #tpu.memory_space<vmem>>, vector<1x1x8x16xf32>,
    %1621 = arith.subf %1588, %1601 : vector<8x16xf32>
    %1622 = math.absf %1621 : vector<8x16xf32>
    %1623 = arith.subf %1588, %1610 : vector<8x16xf32>
    %1624 = math.absf %1623 : vector<8x16xf32>
    %1625 = arith.addf %1622, %1624 : vector<8x16xf32>
    %1626 = arith.subf %1588, %1615 : vector<8x16xf32>
    %1627 = math.absf %1626 : vector<8x16xf32>
    %1628 = arith.addf %1625, %1627 : vector<8x16xf32>
    %1629 = arith.mulf %1628, %1592 : vector<8x16xf32>
    %1630 = arith.addf %1538, %1629 : vector<8x16xf32>
    %c0_1241 = arith.constant 0 : index
    %c0_1242 = arith.constant 0 : index
    %c0_1243 = arith.constant 0 : index
    %1631 = vector.load %arg0[%c0_1241, %c0_1242, %c0_1243] : memref<8x8x16xf32, #tpu.memory_space<vmem>>, vector<1x8x16xf32>
    %1632 = vector.shape_cast %1631 : vector<1x8x16xf32> to vector<8x16xf32>
    %c0_1244 = arith.constant 0 : index
    %c0_1245 = arith.constant 0 : index
    %c0_1246 = arith.constant 0 : index
    %1633 = vector.load %arg1[%c0_1244, %c0_1245, %c0_1246] : memref<8x8x16xf32, #tpu.memory_space<vmem>>, vector<1x8x16xf32>
    %1634 = vector.shape_cast %1633 : vector<1x8x16xf32> to vector<8x16xf32>
    %c0_1247 = arith.constant 0 : index
    %c0_1248 = arith.constant 0 : index
    %c0_1249 = arith.constant 0 : index
    %1635 = vector.load %arg34[%c0_1247, %c0_1248, %c0_1249] : memref<8x8x16xf32, #tpu.memory_space<vmem>>, vector<1x8x16xf32>
    %1636 = vector.shape_cast %1635 : vector<1x8x16xf32> to vector<8x16xf32>
    %c1_1250 = arith.constant 1 : index
    %c0_1251 = arith.constant 0 : index
    %c0_1252 = arith.constant 0 : index
    %c0_1253 = arith.constant 0 : index
    %1637 = vector.load %arg29[%c1_1250, %c0_1251, %c0_1252, %c0_1253] : memref<2x8x8x32xf32, #tpu.memory_space<vmem>>, vector<1x1x8x32xf32>
    %1638 = vector.shape_cast %1637 : vector<1x1x8x32xf32> to vector<8x32xf32>
    %c1_1254 = arith.constant 1 : index
    %c0_1255 = arith.constant 0 : index
    %c0_1256 = arith.constant 0 : index
    %c0_1257 = arith.constant 0 : index
    %1639 = vector.load %arg30[%c1_1254, %c0_1255, %c0_1256, %c0_1257] : memref<2x8x8x16xf32, #tpu.memory_space<vmem>>, vector<1x1x8x16xf32>
    %1640 = vector.shape_cast %1639 : vector<1x1x8x16xf32> to vector<8x16xf32>
    %1641 = arith.mulf %1586, %1638 : vector<8x32xf32>
    %c1_1258 = arith.constant 1 : index
    %c0_1259 = arith.constant 0 : index
    %c0_1260 = arith.constant 0 : index
    %1642 = vector.load %arg7[%c1_1258, %c0_1259, %c0_1260] : memref<2x32x16xf32, #tpu.memory_space<vmem>>, vector<1x32x16xf32>
    %1643 = vector.shape_cast %1642 : vector<1x32x16xf32> to vector<32x16xf32>
    %cst_1261 = arith.constant dense<0.000000e+00> : vector<8x16xf32>
    %1644 = tpu.matmul %1641, %1643, %cst_1261 {dimension_numbers = #tpu.dot_dimension_numbers<[1], [0], [0], [1], [0, 0, 1, 1], [], []>} : vector<8x32xf32>, vector<32x16xf32>, vector<8x16xf32> -> vector<8x16xf32>
    %1645 = arith.addf %1644, %279 : vector<8x16xf32>
    %1646 = arith.mulf %1634, %1632 : vector<8x16xf32>
    %cst_1262 = arith.constant 1.000000e+00 : f32
    %1647 = vector.broadcast %cst_1262 : f32 to vector<8x16xf32>
    %1648 = arith.subf %1647, %1634 : vector<8x16xf32>
    %1649 = arith.mulf %1648, %1645 : vector<8x16xf32>
    %1650 = arith.addf %1646, %1649 : vector<8x16xf32>
    %c1_1263 = arith.constant 1 : index
    %c0_1264 = arith.constant 0 : index
    %c0_1265 = arith.constant 0 : index
    %1651 = vector.load %arg9[%c1_1263, %c0_1264, %c0_1265] : memref<2x16x16xf32, #tpu.memory_space<vmem>>, vector<1x16x16xf32>
    %1652 = vector.shape_cast %1651 : vector<1x16x16xf32> to vector<16x16xf32>
    %cst_1266 = arith.constant dense<0.000000e+00> : vector<8x16xf32>
    %1653 = tpu.matmul %1650, %1652, %cst_1266 {dimension_numbers = #tpu.dot_dimension_numbers<[1], [0], [0], [1], [0, 0, 1, 1], [], []>} : vector<8x16xf32>, vector<16x16xf32>, vector<8x16xf32> -> vector<8x16xf32>
    %1654 = arith.addf %1653, %287 : vector<8x16xf32>
    %1655 = arith.mulf %1640, %1654 : vector<8x16xf32>
    %cst_1267 = arith.constant 1.000000e+00 : f32
    %1656 = vector.broadcast %cst_1267 : f32 to vector<8x16xf32>
    %1657 = arith.subf %1656, %1640 : vector<8x16xf32>
    %1658 = arith.mulf %1657, %1645 : vector<8x16xf32>
    %1659 = arith.addf %1655, %1658 : vector<8x16xf32>
    %1660 = arith.mulf %1648, %1659 : vector<8x16xf32>
    %1661 = arith.addf %1646, %1660 : vector<8x16xf32>
    %c1_1268 = arith.constant 1 : index
    %c0_1269 = arith.constant 0 : index
    %c0_1270 = arith.constant 0 : index
    %c0_1271 = arith.constant 0 : index
    %1662 = vector.load %arg35[%c1_1268, %c0_1269, %c0_1270, %c0_1271] : memref<2x8x8x16xf32, #tpu.memory_space<vmem>>, vector<1x1x8x16xf32>
    %1663 = vector.shape_cast %1662 : vector<1x1x8x16xf32> to vector<8x16xf32>
    %1664 = vector.shape_cast %1661 : vector<8x16xf32> to vector<1x1x8x16xf32>
    tpu.vector_store %arg35[%c1_1268, %c0_1269, %c0_1270, %c0_1271], %1664 {strides = array<i32>} : memref<2x8x8x16xf32, #tpu.memory_space<vmem>>, vector<1x1x8x16xf32>,
    %1665 = arith.subf %1632, %1645 : vector<8x16xf32>
    %1666 = math.absf %1665 : vector<8x16xf32>
    %1667 = arith.subf %1632, %1654 : vector<8x16xf32>
    %1668 = math.absf %1667 : vector<8x16xf32>
    %1669 = arith.addf %1666, %1668 : vector<8x16xf32>
    %1670 = arith.subf %1632, %1659 : vector<8x16xf32>
    %1671 = math.absf %1670 : vector<8x16xf32>
    %1672 = arith.addf %1669, %1671 : vector<8x16xf32>
    %1673 = arith.mulf %1672, %1636 : vector<8x16xf32>
    %1674 = arith.addf %1630, %1673 : vector<8x16xf32>
    %c0_1272 = arith.constant 0 : index
    %c0_1273 = arith.constant 0 : index
    %c0_1274 = arith.constant 0 : index
    %c0_1275 = arith.constant 0 : index
    %1675 = vector.load %arg35[%c0_1272, %c0_1273, %c0_1274, %c0_1275] : memref<2x8x8x16xf32, #tpu.memory_space<vmem>>, vector<1x8x8x16xf32>
    %1676 = vector.shape_cast %1675 : vector<1x8x8x16xf32> to vector<8x8x16xf32>
    %c1_1276 = arith.constant 1 : index
    %c0_1277 = arith.constant 0 : index
    %c0_1278 = arith.constant 0 : index
    %c0_1279 = arith.constant 0 : index
    %1677 = vector.load %arg35[%c1_1276, %c0_1277, %c0_1278, %c0_1279] : memref<2x8x8x16xf32, #tpu.memory_space<vmem>>, vector<1x8x8x16xf32>
    %1678 = vector.shape_cast %1677 : vector<1x8x8x16xf32> to vector<8x8x16xf32>
    %1679 = arith.addf %1676, %1678 : vector<8x8x16xf32>
    %cst_1280 = arith.constant 5.000000e-01 : f32
    %1680 = vector.broadcast %cst_1280 : f32 to vector<8x8x16xf32>
    %1681 = arith.mulf %1679, %1680 : vector<8x8x16xf32>
    %c0_1281 = arith.constant 0 : index
    %c0_1282 = arith.constant 0 : index
    %c0_1283 = arith.constant 0 : index
    %1682 = vector.load %arg27[%c0_1281, %c0_1282, %c0_1283] : memref<8x8x16xf32, #tpu.memory_space<vmem>>, vector<8x8x16xf32>
    tpu.vector_store %arg27[%c0_1281, %c0_1282, %c0_1283], %1681 {strides = array<i32>} : memref<8x8x16xf32, #tpu.memory_space<vmem>>, vector<8x8x16xf32>,
    %1683 = arith.subf %1676, %1678 : vector<8x8x16xf32>
    %1684 = math.absf %1683 : vector<8x8x16xf32>
    %1685 = vector.shape_cast %1684 : vector<8x8x16xf32> to vector<1x8x8x16xf32>
    %cst_1284 = arith.constant dense<0.000000e+00> : vector<1xf32>
    %1686 = vector.multi_reduction <add>, %1685, %cst_1284 [1, 2, 3] : vector<1x8x8x16xf32> to vector<1xf32>
    %1687 = vector.shape_cast %1686 : vector<1xf32> to vector<1x1x1x1xf32>
    %1688 = vector.extract %1687[0, 0, 0, 0] : f32 from vector<1x1x1x1xf32>
    %cst_1285 = arith.constant 9.76562514E-5 : f32
    %1689 = arith.mulf %1688, %cst_1285 : f32
    %1690 = vector.shape_cast %1674 : vector<8x16xf32> to vector<1x8x16xf32>
    %cst_1286 = arith.constant dense<0.000000e+00> : vector<1xf32>
    %1691 = vector.multi_reduction <add>, %1690, %cst_1286 [1, 2] : vector<1x8x16xf32> to vector<1xf32>
    %1692 = vector.shape_cast %1691 : vector<1xf32> to vector<1x1x1xf32>
    %1693 = vector.extract %1692[0, 0, 0] : f32 from vector<1x1x1xf32>
    %1694 = arith.addf %1693, %1689 : f32
    %1695 = vector.broadcast %1694 : f32 to vector<1x1xf32>
    %c0_1287 = arith.constant 0 : index
    %c0_1288 = arith.constant 0 : index
    %1696 = vector.load %arg28[%c0_1287, %c0_1288] : memref<1x1xf32, #tpu.memory_space<vmem>>, vector<1x1xf32>
    tpu.vector_store %arg28[%c0_1287, %c0_1288], %1695 {strides = array<i32>} : memref<1x1xf32, #tpu.memory_space<vmem>>, vector<1x1xf32>,
    return
  }
}

</mosaic_0001>

<bundles_post_ra>
// kernel: brits_forward.1
= control target key start
LH: loop header
LB: loop body
LE: loop exit
PB: predicated region body
PF: predicated region fallthrough
CT: control target
= control target key end

     0   :  { %s18031_s0 = inlined_call_operand.vmem [shape: f32[8,8,16], index: 0, kind: input, shape index: {}]   ;;  %s18032_s1 = inlined_call_operand.vmem [shape: f32[8,8,16], index: 1, kind: input, shape index: {}]   ;;  %s18033_s2 = inlined_call_operand.vmem [shape: f32[8,8,16], index: 2, kind: input, shape index: {}]   ;;  %s18034_s3 = inlined_call_operand.vmem [shape: f32[2,16,32], index: 3, kind: input, shape index: {}]   ;;  %s18035_s4 = inlined_call_operand.vmem [shape: f32[2,1,32], index: 4, kind: input, shape index: {}]   ;;  %s18036_s5 = inlined_call_operand.vmem [shape: f32[2,1,16], index: 5, kind: input, shape index: {}]   ;;  %s18037_s6 = inlined_call_operand.vmem [shape: f32[2,1,16], index: 6, kind: input, shape index: {}]   ;;  %s18038_s7 = inlined_call_operand.vmem [shape: f32[2,32,16], index: 7, kind: input, shape index: {}]   ;;  %s18039_s8 = inlined_call_operand.vmem [shape: f32[2,1,16], index: 8, kind: input, shape index: {}]   ;;  %s18040_s9 = inlined_call_operand.vmem [shape: f32[2,16,16], index: 9, kind: input, shape index: {}]   ;;  %s18041_s10 = inlined_call_operand.vmem [shape: f32[2,1,16], index: 10, kind: input, shape index: {}]   ;;  %s18042_s11 = inlined_call_operand.vmem [shape: f32[2,16,16], index: 11, kind: input, shape index: {}]   ;;  %s18043_s12 = inlined_call_operand.vmem [shape: f32[2,16,16], index: 12, kind: input, shape index: {}]   ;;  %s18044_s13 = inlined_call_operand.vmem [shape: f32[2,1,16], index: 13, kind: input, shape index: {}]   ;;  %s18045_s14 = inlined_call_operand.vmem [shape: f32[2,16,32], index: 14, kind: input, shape index: {}]   ;;  %s18046_s15 = inlined_call_operand.vmem [shape: f32[2,16,32], index: 15, kind: input, shape index: {}]   ;;  %s18047_s16 = inlined_call_operand.vmem [shape: f32[2,16,32], index: 16, kind: input, shape index: {}]   ;;  %s18048_s17 = inlined_call_operand.vmem [shape: f32[2,16,32], index: 17, kind: input, shape index: {}]   ;;  %s18049_s18 = inlined_call_operand.vmem [shape: f32[2,16,32], index: 18, kind: input, shape index: {}]   ;;  %s18050_s19 = inlined_call_operand.vmem [shape: f32[2,16,32], index: 19, kind: input, shape index: {}]   ;;  %s18051_s20 = inlined_call_operand.vmem [shape: f32[2,1,32], index: 20, kind: input, shape index: {}]   ;;  %s18052_s21 = inlined_call_operand.vmem [shape: f32[2,1,32], index: 21, kind: input, shape index: {}]   ;;  %s18053_s22 = inlined_call_operand.vmem [shape: f32[2,1,32], index: 22, kind: input, shape index: {}]   ;;  %s18054_s23 = inlined_call_operand.vmem [shape: f32[2,1,32], index: 23, kind: input, shape index: {}]   ;;  %s18055_s24 = inlined_call_operand.vmem [shape: f32[2,32,32], index: 24, kind: input, shape index: {}]   ;;  %s18056_s25 = inlined_call_operand.vmem [shape: f32[2,32,32], index: 25, kind: input, shape index: {}]   ;;  %s18057_s26 = inlined_call_operand.vmem [shape: f32[2,32,32], index: 26, kind: input, shape index: {}]   ;;  %s18058_s27 = inlined_call_operand.vmem [shape: f32[8,8,16], index: 27, kind: output, shape index: {0}]   ;;  %s18059_s28 = inlined_call_operand.hbm [shape: f32[1,1], index: 28, kind: output, shape index: {1}]  }
   0x1   :  { %18105 = sst [smem:[#allocation23_spill]] %s18031_s0 }
   0x2   :  { %18106 = sst [smem:[#allocation24_spill]] %s18032_s1 }
   0x3   :  { %18107 = sst [smem:[#allocation25_spill]] %s18033_s2 }
   0x4   :  { %18108 = sst [smem:[#allocation26_spill]] %s18034_s3 }
   0x5   :  { %18109 = sst [smem:[#allocation27_spill]] %s18035_s4 }
   0x6   :  { %18110 = sst [smem:[#allocation28_spill]] %s18036_s5 }
   0x7   :  { %18111 = sst [smem:[#allocation29_spill]] %s18037_s6 }
   0x8   :  { %18112 = sst [smem:[#allocation30_spill]] %s18038_s7 }
   0x9   :  { %18113 = sst [smem:[#allocation31_spill]] %s18039_s8 }
   0xa   :  { %18114 = sst [smem:[#allocation32_spill]] %s18040_s9 }
   0xb   :  { %18115 = sst [smem:[#allocation33_spill]] %s18041_s10 }
   0xc   :  { %18116 = sst [smem:[#allocation34_spill]] %s18042_s11 }
   0xd   :  { %18117 = sst [smem:[#allocation35_spill]] %s18043_s12 }
   0xe   :  { %s18118_s9 = sld [smem:[#allocation26_spill]]  ;;  %vm114_vm0 = vcmask 130048   ;;  %v14657_v25 = vld [vmem:[%s18049_s18 + $0x8] sm:$0xff]  ;;  %v663_v40 = vld [vmem:[%s18048_s17] sm:$0xff] }
   0xf   :  { %s18119_s0 = sld [smem:[#allocation25_spill]]  ;;  %v664_v30 = vld [vmem:[%s18048_s17 + $0x8] sm:$0xff] }
  0x10   :  { %s18120_s2 = sld [smem:[#allocation28_spill]] }
  0x11   :  { %s18121_s1 = sld [smem:[#allocation29_spill]] }
  0x12   :  { %s18122_s3 = sld [smem:[#allocation34_spill]] }
  0x13   :  { %s18123_s5 = sld [smem:[#allocation35_spill]] }
  0x14   :  { %v106_v0 = vld [vmem:[%s18118_s9 + $0x8] sm:$0xff]  ;;  %v105_v1 = vld [vmem:[%s18118_s9] sm:$0xff]  ;;  %s18124_s29 = sld [smem:[#allocation24_spill]] }
  0x15   :  { %v14592_v2 = vld [vmem:[%s18119_s0] sm:$0xff]  ;;  %12833 = vmatprep.subr.mxu0 %v106_v0  ;;  %v14611_v6 = vld [vmem:[%s18119_s0 + $0x8] sm:$0xff]  ;;  %v14621_v9 = vld [vmem:[%s18119_s0 + $0x10] sm:$0xff] }
  0x16   :  { %12837 = vmatprep.mubr.msk.f32.mxu0 %vm114_vm0, %v14592_v2  ;;  %v14599_v3 = vld [vmem:[%s18120_s2] ss:$0 sm:$0xff]  ;;  %12834 = vmatpush3.msra.mxu0 %v106_v0  ;;  %v14626_v10 = vld [vmem:[%s18119_s0 + $0x18] sm:$0xff]  ;;  %v14684_v36 = vld [vmem:[%s18119_s0 + $0x28] sm:$0xff] }
  0x17   :  { %v14604_v4 = vld [vmem:[%s18121_s1] ss:$0 sm:$0xff]  ;;  %v283_v5 = vmul.f32 %v14599_v3, %v14592_v2  ;;  %12835 = vmatprep.subr.mxu0 %v105_v1  ;;  %v284_v8 = vmul.f32 %v14599_v3, %v14611_v6  ;;  %v285_v12 = vmul.f32 %v14599_v3, %v14621_v9  ;;  %v286_v15 = vmul.f32 %v14599_v3, %v14626_v10  ;;  %v14694_v39 = vld [vmem:[%s18119_s0 + $0x30] sm:$0xff] }
  0x18   :  { %v339_v7 = vld [vmem:[%s18122_s3 + $0x8] sm:$0xff]  ;;  %12836 = vmatpush3.msra.mxu0 %v105_v1  ;;  %v338_v13 = vld [vmem:[%s18122_s3] sm:$0xff]  ;;  %v288_v44 = vmul.f32 %v14599_v3, %v14684_v36  ;;  %v289_v46 = vmul.f32 %v14599_v3, %v14694_v39 }
  0x19   :  { %v298_v11 = vadd.f32 %v14604_v4, %v283_v5  ;;  %12838 = vmatmul.mubr.msk.f32.vlgmr.msra.gmra.mxu0 %vm114_vm0, %v14611_v6  ;;  %v299_v14 = vadd.f32 %v14604_v4, %v284_v8  ;;  %12865 = vmatprep.subr.mxu0 %v339_v7  ;;  %v341_v16 = vld [vmem:[%s18123_s5 + $0x8] sm:$0xff]  ;;  %v300_v18 = vadd.f32 %v14604_v4, %v285_v12  ;;  %v340_v19 = vld [vmem:[%s18123_s5] sm:$0xff] }
  0x1a   :  { %12866 = vmatpush3.msra.mxu0 %v339_v7  ;;  %12840 = vmatprep.mubr.msk.f32.mxu0 %vm114_vm0, %v14621_v9  ;;  %v301_v21 = vadd.f32 %v14604_v4, %v286_v15  ;;  %v14652_v24 = vld [vmem:[%s18124_s29] sm:$0xff]  ;;  %v14669_v29 = vld [vmem:[%s18124_s29 + $0x8] sm:$0xff]  ;;  %v14679_v33 = vld [vmem:[%s18124_s29 + $0x10] sm:$0xff] }
  0x1b   :  { %v306_v17 = vmax.f32 %v298_v11, 0.0  ;;  %v307_v20 = vmax.f32 %v299_v14, 0.0  ;;  %12867 = vmatprep.subr.mxu0 %v338_v13  ;;  %12849 = vmatprep.subr.mxu1 %v341_v16  ;;  %v308_v23 = vmax.f32 %v300_v18, 0.0  ;;  %v14664_v28 = vld [vmem:[%s18119_s0 + $0x20] sm:$0xff]  ;;  %v14708_v41 = vld [vmem:[%s18124_s29 + $0x18] sm:$0xff] }
  0x1c   :  { %12868 = vmatpush3.msra.mxu0 %v338_v13  ;;  %12850 = vmatpush3.msra.mxu1 %v341_v16  ;;  %v309_v27 = vmax.f32 %v301_v21, 0.0  ;;  %v287_v38 = vmul.f32 %v14599_v3, %v14664_v28  ;;  %v14718_v45 = vld [vmem:[%s18124_s29 + $0x20] sm:$0xff] }
  0x1d   :  { %v314_v22 = vsub.f32 0.0, %v306_v17  ;;  %v315_v26 = vsub.f32 0.0, %v307_v20  ;;  %12841 = vmatmul.mubr.msk.f32.gmra.mxu0 %vm114_vm0, %v14626_v10  ;;  %12851 = vmatprep.subr.mxu1 %v340_v19  ;;  %v316_v32 = vsub.f32 0.0, %v308_v23 }
  0x1e   :  { %12843 = vmatprep.mubr.msk.f32.mxu0 %vm114_vm0, %v14664_v28  ;;  %12852 = vmatpush3.msra.mxu1 %v340_v19  ;;  %v317_v35 = vsub.f32 0.0, %v309_v27  ;;  %v302_v43 = vadd.f32 %v14604_v4, %v287_v38 }
  0x1f   :  { %v322_v31 = vmul.f32 1.442695, %v314_v22  ;;  %v324_v34 = vmul.f32 1.442695, %v315_v26  ;;  %12853 = vmatprep.mubr.msk.f32.mxu1 %vm114_vm0, %v14652_v24  ;;  %12897 = vmatprep.subr.mxu0 %v14657_v25  ;;  %v326_v37 = vmul.f32 1.442695, %v316_v32 }
  0x20   :  { %12854 = vmatmul.mubr.msk.f32.vlgmr.msra.gmra.mxu1 %vm114_vm0, %v14669_v29  ;;  %12881 = vmatprep.subr.mxu1 %v664_v30  ;;  %v328_v42 = vmul.f32 1.442695, %v317_v35 }
  0x21   :  { %14108 = vpow2.f32 %v322_v31  ;;  %12844 = vmatmul.mubr.msk.f32.gmra.mxu0 %vm114_vm0, %v14684_v36  ;;  %12856 = vmatprep.mubr.msk.f32.mxu1 %vm114_vm0, %v14679_v33 }
  0x22   :  { %14110 = vpow2.f32 %v324_v34  ;;  %12846 = vmatprep.mubr.msk.f32.mxu0 %vm114_vm0, %v14694_v39  ;;  %12882 = vmatpush3.msra.mxu1 %v664_v30 }
  0x23   :  { %12883 = vmatprep.subr.mxu1 %v663_v40 }
  0x24   :  { %34 = vsyncpa [#allocation10], 0  ;;  %14112 = vpow2.f32 %v326_v37  ;;  %v310_v47 = vmax.f32 %v302_v43, 0.0  ;;  %v303_v48 = vadd.f32 %v14604_v4, %v288_v44  ;;  %v14726_v49 = vld [vmem:[%s18119_s0 + $0x38] sm:$0xff]  ;;  %12857 = vmatmul.mubr.msk.f32.gmra.mxu1 %vm114_vm0, %v14708_v41  ;;  %v892_v50 = vld [vmem:[%s18050_s19 + $0x8] sm:$0xff]  ;;  %v304_v51 = vadd.f32 %v14604_v4, %v289_v46  ;;  %s18125_s11 = sld [smem:[#allocation30_spill]] }
  0x25   :  { %12847 = vmatmul.mubr.msk.f32.gmra.mxu0 %vm114_vm0, %v14726_v49  ;;  %12859 = vmatprep.mubr.msk.f32.mxu1 %vm114_vm0, %v14718_v45  ;;  %v14741_v52 = vld [vmem:[%s18124_s29 + $0x28] sm:$0xff]  ;;  %14114 = vpow2.f32 %v328_v42  ;;  %v14746_v55 = vld [vmem:[%s18124_s29 + $0x30] sm:$0xff]  ;;  %v290_v59 = vmul.f32 %v14599_v3, %v14726_v49  ;;  %v14757_v61 = vld [vmem:[%s18124_s29 + $0x38] sm:$0xff]  ;;  %vm14436_vm1 = vmmov 0   ;;  %vm1005_vm2 = vcmask 261120   ;;  %s18130_s8 = sld [smem:[#allocation33_spill]] }
  0x26   :  { %v318_v53 = vsub.f32 0.0, %v310_v47  ;;  %v311_v54 = vmax.f32 %v303_v48, 0.0  ;;  %12884 = vmatpush3.msra.mxu1 %v663_v40  ;;  %v312_v56 = vmax.f32 %v304_v51, 0.0  ;;  %v777_v8 = vld [vmem:[%s18049_s18] sm:$0xff]  ;;  %v11806_v12 = vld [vmem:[%s18118_s9 + $0x18] sm:$0xff]  ;;  %v11805_v30 = vld [vmem:[%s18118_s9 + $0x10] sm:$0xff] }
  0x27   :  { %12913 = vmatprep.subr.mxu1 %v892_v50  ;;  %v305_v63 = vadd.f32 %v14604_v4, %v290_v59  ;;  %v891_v13 = vld [vmem:[%s18050_s19] sm:$0xff]  ;;  %v11824_v15 = vld [vmem:[%s18123_s5 + $0x18] sm:$0xff]  ;;  %vm11722_vm3 = vcmask 0  }
  0x28   :  { %v330_v57 = vmul.f32 1.442695, %v318_v53  ;;  %v319_v58 = vsub.f32 0.0, %v311_v54  ;;  %12860 = vmatmul.mubr.msk.f32.gmra.mxu1 %vm114_vm0, %v14741_v52  ;;  %v320_v60 = vsub.f32 0.0, %v312_v56  ;;  %v11818_v18 = vld [vmem:[%s18120_s2 + $0x1] ss:$0 sm:$0xff] }
  0x29   :  { %12862 = vmatprep.mubr.msk.f32.mxu1 %vm114_vm0, %v14746_v55  ;;  %v313_v1 = vmax.f32 %v305_v63, 0.0  ;;  %v1202_v20 = vmul.f32 %v11818_v18, %v14592_v2  ;;  %v11820_v21 = vld [vmem:[%s18121_s1 + $0x1] ss:$0 sm:$0xff]  ;;  %v1203_v23 = vmul.f32 %v11818_v18, %v14611_v6  ;;  %v1204_v27 = vmul.f32 %v11818_v18, %v14621_v9  ;;  %v11822_v38 = vld [vmem:[%s18122_s3 + $0x18] sm:$0xff] }
  0x2a   :  { %14116 = vpow2.f32 %v330_v57  ;;  %v332_v62 = vmul.f32 1.442695, %v319_v58  ;;  %v334_v0 = vmul.f32 1.442695, %v320_v60  ;;  %v1205_v32 = vmul.f32 %v11818_v18, %v14626_v10 }
  0x2b   :  { %v321_v5 = vsub.f32 0.0, %v313_v1  ;;  %v1218_v26 = vadd.f32 %v11820_v21, %v1202_v20  ;;  %v1219_v31 = vadd.f32 %v11820_v21, %v1203_v23  ;;  %v1220_v35 = vadd.f32 %v11820_v21, %v1204_v27  ;;  %v2167_v20 = vld [vmem:[%s18125_s11 + $0x18] sm:$0xff]  ;;  %v2165_v23 = vld [vmem:[%s18125_s11 + $0x8] sm:$0xff] }
  0x2c   :  { %14118 = vpow2.f32 %v332_v62  ;;  %12863 = vmatmul.mubr.msk.f32.gmra.mxu1 %vm114_vm0, %v14757_v61  ;;  %v1206_v37 = vmul.f32 %v11818_v18, %v14664_v28  ;;  %v1221_v42 = vadd.f32 %v11820_v21, %v1205_v32  ;;  %v1207_v43 = vmul.f32 %v11818_v18, %v14684_v36  ;;  %v11876_v32 = vld [vmem:[%s18050_s19 + $0x18] sm:$0xff] }
  0x2d   :  { %12885 = vmatprep.mubr.msk.f32.mxu1 %vm114_vm0, %v14652_v24  ;;  %14120 = vpow2.f32 %v334_v0  ;;  %v336_v4 = vmul.f32 1.442695, %v321_v5  ;;  %v1226_v34 = vmax.f32 %v1218_v26, 0.0  ;;  %v1227_v40 = vmax.f32 %v1219_v31, 0.0  ;;  %v11851_v31 = vld [vmem:[%s18048_s17 + $0x10] sm:$0xff] }
  0x2e   :  { %v14109_v3 = vpop.eup %14108  ;;  %v1228_v46 = vmax.f32 %v1220_v35, 0.0  ;;  %v1222_v47 = vadd.f32 %v11820_v21, %v1206_v37  ;;  %v1208_v48 = vmul.f32 %v11818_v18, %v14694_v39  ;;  %v1229_v51 = vmax.f32 %v1221_v42, 0.0  ;;  %v11875_v35 = vld [vmem:[%s18050_s19 + $0x10] sm:$0xff]  ;;  %s18128_s19 = sld [smem:[#allocation31_spill]] }
  0x2f   :  { %12869 = vmatprep.mubr.msk.f32.mxu0 %vm114_vm0, %v14109_v3  ;;  %v14111_v7 = vpop.eup %14110  ;;  %14122 = vpow2.f32 %v336_v4  ;;  %v1234_v44 = vsub.f32 0.0, %v1226_v34  ;;  %v1223_v53 = vadd.f32 %v11820_v21, %v1207_v43  ;;  %v1209_v54 = vmul.f32 %v11818_v18, %v14726_v49 }
  0x30   :  { %12870 = vmatmul.mubr.msk.f32.vlgmr.msra.gmra.mxu0 %vm114_vm0, %v14111_v7  ;;  %12886 = vmatmul.mubr.msk.f32.vlgmr.msra.gmra.mxu1 %vm114_vm0, %v14669_v29  ;;  %v1236_v57 = vsub.f32 0.0, %v1228_v46  ;;  %v1230_v58 = vmax.f32 %v1222_v47, 0.0  ;;  %v1224_v59 = vadd.f32 %v11820_v21, %v1208_v48  ;;  %v1237_v62 = vsub.f32 0.0, %v1229_v51  ;;  %v11821_v7 = vld [vmem:[%s18122_s3 + $0x10] sm:$0xff] }
  0x31   :  { %v14113_v11 = vpop.eup %14112  ;;  %12898 = vmatpush3.msra.mxu0 %v14657_v25  ;;  %12888 = vmatprep.mubr.msk.f32.mxu1 %vm114_vm0, %v14679_v33  ;;  %v11823_v25 = vld [vmem:[%s18123_s5 + $0x10] sm:$0xff]  ;;  %v1242_v56 = vmul.f32 1.442695, %v1234_v44  ;;  %v1231_v63 = vmax.f32 %v1223_v53, 0.0  ;;  %v1225_v0 = vadd.f32 %v11820_v21, %v1209_v54  ;;  %v18073_v21 = vmov 0.0   ;;  %s18127_s5 = sld [smem:[#allocation32_spill]] }
  0x32   :  { %12872 = vmatprep.mubr.msk.f32.mxu0 %vm114_vm0, %v14113_v11  ;;  %12899 = vmatprep.subr.mxu0 %v777_v8  ;;  %v14115_v14 = vpop.eup %14114  ;;  %v1246_v1 = vmul.f32 1.442695, %v1236_v57  ;;  %v1238_v3 = vsub.f32 0.0, %v1230_v58  ;;  %v1232_v5 = vmax.f32 %v1224_v59, 0.0  ;;  %v1956_v26 = vsel %vm114_vm0, %v14652_v24, 0.0 }
  0x33   :  { %12900 = vmatpush3.msra.mxu0 %v777_v8  ;;  %12914 = vmatpush3.msra.mxu1 %v892_v50  ;;  %v1235_v50 = vsub.f32 0.0, %v1227_v40  ;;  %14124 = vpow2.f32 %v1242_v56  ;;  %v1248_v8 = vmul.f32 1.442695, %v1237_v62  ;;  %v1239_v4 = vsub.f32 0.0, %v1231_v63 }
  0x34   :  { %12873 = vmatmul.mubr.msk.f32.gmra.mxu0 %vm114_vm0, %v14115_v14  ;;  %12929 = vmatprep.subr.mxu0 %v11806_v12  ;;  %v1233_v11 = vmax.f32 %v1225_v0, 0.0  ;;  %v1975_v27 = vsel %vm114_vm0, %v14669_v29, 0.0 }
  0x35   :  { %12889 = vmatmul.mubr.msk.f32.gmra.mxu1 %vm114_vm0, %v14708_v41  ;;  %12915 = vmatprep.subr.mxu1 %v891_v13  ;;  %v1244_v60 = vmul.f32 1.442695, %v1235_v50 }
  0x36   :  { %12891 = vmatprep.mubr.msk.f32.mxu1 %vm114_vm0, %v14718_v45  ;;  %12916 = vmatpush3.msra.mxu1 %v891_v13  ;;  %v1252_v13 = vmul.f32 1.442695, %v1239_v4  ;;  %v1241_v14 = vsub.f32 0.0, %v1233_v11 }
  0x37   :  { %v14117_v16 = vpop.eup %14116  ;;  %12945 = vmatprep.subr.mxu1 %v11824_v15  ;;  %14126 = vpow2.f32 %v1244_v60  ;;  %1957 = vadd.xlane.f32.xlu0 %v1956_v26  ;;  %v2246_v44 = vld [vmem:[%s18127_s5 + $0x8] sm:$0xff]  ;;  %v2245_v51 = vld [vmem:[%s18127_s5] sm:$0xff] }
  0x38   :  { %12875 = vmatprep.mubr.msk.f32.mxu0 %vm114_vm0, %v14117_v16  ;;  %14128 = vpow2.f32 %v1246_v1 }
  0x39   :  { %v14119_v17 = vpop.eup %14118  ;;  %12892 = vmatmul.mubr.msk.f32.gmra.mxu1 %vm114_vm0, %v14741_v52  ;;  %14130 = vpow2.f32 %v1248_v8 }
  0x3a   :  { %12876 = vmatmul.mubr.msk.f32.gmra.mxu0 %vm114_vm0, %v14119_v17  ;;  %12894 = vmatprep.mubr.msk.f32.mxu1 %vm114_vm0, %v14746_v55  ;;  %v14121_v19 = vpop.eup %14120 }
  0x3b   :  { %12878 = vmatprep.mubr.msk.f32.mxu0 %vm114_vm0, %v14121_v19  ;;  %1976 = vadd.xlane.f32.xlu0 %v1975_v27 }
  0x3c   :  { %v14123_v22 = vpop.eup %14122 }
  0x3d   :  { %12895 = vmatmul.mubr.msk.f32.gmra.mxu1 %vm114_vm0, %v14757_v61 }
  0x3e   :  { %12917 = vmatprep.mubr.msk.f32.mxu1 %vm114_vm0, %v14652_v24  ;;  %12879 = vmatmul.mubr.msk.f32.gmra.mxu0 %vm114_vm0, %v14123_v22  ;;  %v2166_v22 = vld [vmem:[%s18125_s11 + $0x10] sm:$0xff] }
  0x3f   :  { %12901 = vmatprep.mubr.msk.f32.mxu0 %vm114_vm0, %v14652_v24 }
  0x41   :  { %12918 = vmatmul.mubr.msk.f32.vlgmr.msra.gmra.mxu1 %vm114_vm0, %v14669_v29 }
  0x42   :  { %12920 = vmatprep.mubr.msk.f32.mxu1 %vm114_vm0, %v14679_v33  ;;  %12946 = vmatpush3.msra.mxu1 %v11824_v15 }
  0x43   :  { %12947 = vmatprep.subr.mxu1 %v11823_v25  ;;  %12902 = vmatmul.mubr.msk.f32.vlgmr.msra.gmra.mxu0 %vm114_vm0, %v14669_v29 }
  0x44   :  { %12948 = vmatpush3.msra.mxu1 %v11823_v25  ;;  %12930 = vmatpush3.msra.mxu0 %v11806_v12  ;;  %v1250_v12 = vmul.f32 1.442695, %v1238_v3  ;;  %v2164_v25 = vld [vmem:[%s18125_s11] sm:$0xff] }
  0x45   :  { %12904 = vmatprep.mubr.msk.f32.mxu0 %vm114_vm0, %v14679_v33  ;;  %12931 = vmatprep.subr.mxu0 %v11805_v30 }
  0x46   :  { %12921 = vmatmul.mubr.msk.f32.gmra.mxu1 %vm114_vm0, %v14708_v41  ;;  %12932 = vmatpush3.msra.mxu0 %v11805_v30  ;;  %14132 = vpow2.f32 %v1250_v12  ;;  %v11852_v30 = vld [vmem:[%s18048_s17 + $0x18] sm:$0xff] }
  0x47   :  { %12923 = vmatprep.mubr.msk.f32.mxu1 %vm114_vm0, %v14718_v45  ;;  %12905 = vmatmul.mubr.msk.f32.gmra.mxu0 %vm114_vm0, %v14708_v41  ;;  %14134 = vpow2.f32 %v1252_v13 }
  0x48   :  { %12961 = vmatprep.subr.mxu0 %v11822_v38  ;;  %12907 = vmatprep.mubr.msk.f32.mxu0 %vm114_vm0, %v14718_v45 }
  0x49   :  { %12977 = vmatprep.subr.mxu1 %v11852_v30 }
  0x4a   :  { %12924 = vmatmul.mubr.msk.f32.gmra.mxu1 %vm114_vm0, %v14741_v52 }
  0x4b   :  { %12926 = vmatprep.mubr.msk.f32.mxu1 %vm114_vm0, %v14746_v55  ;;  %12908 = vmatmul.mubr.msk.f32.gmra.mxu0 %vm114_vm0, %v14741_v52 }
  0x4c   :  { %12910 = vmatprep.mubr.msk.f32.mxu0 %vm114_vm0, %v14746_v55 }
  0x4e   :  { %12927 = vmatmul.mubr.msk.f32.gmra.mxu1 %vm114_vm0, %v14757_v61 }
  0x4f   :  { %12949 = vmatprep.mubr.msk.f32.mxu1 %vm114_vm0, %v14652_v24  ;;  %12911 = vmatmul.mubr.msk.f32.gmra.mxu0 %vm114_vm0, %v14757_v61 }
  0x50   :  { %12933 = vmatprep.mubr.msk.f32.mxu0 %vm114_vm0, %v14592_v2  ;;  %v1240_v2 = vsub.f32 0.0, %v1232_v5 }
  0x52   :  { %12950 = vmatmul.mubr.msk.f32.vlgmr.msra.gmra.mxu1 %vm114_vm0, %v14669_v29 }
  0x53   :  { %12952 = vmatprep.mubr.msk.f32.mxu1 %vm114_vm0, %v14679_v33  ;;  %12934 = vmatmul.mubr.msk.f32.vlgmr.msra.gmra.mxu0 %vm114_vm0, %v14611_v6  ;;  %v1254_v6 = vmul.f32 1.442695, %v1240_v2 }
  0x54   :  { %12962 = vmatpush3.msra.mxu0 %v11822_v38  ;;  %12936 = vmatprep.mubr.msk.f32.mxu0 %vm114_vm0, %v14621_v9  ;;  %v1256_v9 = vmul.f32 1.442695, %v1241_v14 }
  0x55   :  { %12963 = vmatprep.subr.mxu0 %v11821_v7  ;;  %14136 = vpow2.f32 %v1254_v6  ;;  %12978 = vmatpush3.msra.mxu1 %v11852_v30 }
  0x56   :  { %12953 = vmatmul.mubr.msk.f32.gmra.mxu1 %vm114_vm0, %v14708_v41  ;;  %12964 = vmatpush3.msra.mxu0 %v11821_v7  ;;  %14138 = vpow2.f32 %v1256_v9 }
  0x57   :  { %12955 = vmatprep.mubr.msk.f32.mxu1 %vm114_vm0, %v14718_v45  ;;  %12937 = vmatmul.mubr.msk.f32.gmra.mxu0 %vm114_vm0, %v14626_v10  ;;  %v14125_v10 = vpop.eup %14124 }
  0x58   :  { %12939 = vmatprep.mubr.msk.f32.mxu0 %vm114_vm0, %v14664_v28  ;;  %v14127_v28 = vpop.eup %14126  ;;  %12979 = vmatprep.subr.mxu1 %v11851_v31 }
  0x59   :  { %v14129_v15 = vpop.eup %14128  ;;  %12980 = vmatpush3.msra.mxu1 %v11851_v31 }
  0x5a   :  { %12956 = vmatmul.mubr.msk.f32.gmra.mxu1 %vm114_vm0, %v14741_v52  ;;  %13009 = vmatprep.subr.mxu1 %v11876_v32 }
  0x5b   :  { %12958 = vmatprep.mubr.msk.f32.mxu1 %vm114_vm0, %v14746_v55  ;;  %12940 = vmatmul.mubr.msk.f32.gmra.mxu0 %vm114_vm0, %v14684_v36  ;;  %v14131_v36 = vpop.eup %14130 }
  0x5c   :  { %12942 = vmatprep.mubr.msk.f32.mxu0 %vm114_vm0, %v14694_v39  ;;  %v11864_v39 = vld [vmem:[%s18049_s18 + $0x18] sm:$0xff]  ;;  %v14133_v16 = vpop.eup %14132 }
  0x5d   :  { %12993 = vmatprep.subr.mxu0 %v11864_v39  ;;  %v14135_v17 = vpop.eup %14134 }
  0x5e   :  { %12959 = vmatmul.mubr.msk.f32.gmra.mxu1 %vm114_vm0, %v14757_v61 }
  0x5f   :  { %12981 = vmatprep.mubr.msk.f32.mxu1 %vm114_vm0, %v14652_v24  ;;  %12943 = vmatmul.mubr.msk.f32.gmra.mxu0 %vm114_vm0, %v14726_v49  ;;  %v11863_v49 = vld [vmem:[%s18049_s18 + $0x10] sm:$0xff]  ;;  %s18126_s18 = sld [smem:[#allocation27_spill]] }
  0x60   :  { %12965 = vmatprep.mubr.msk.f32.mxu0 %vm114_vm0, %v14125_v10 }
  0x62   :  { %v14137_v18 = vpop.eup %14136  ;;  %12982 = vmatmul.mubr.msk.f32.vlgmr.msra.gmra.mxu1 %vm114_vm0, %v14669_v29 }
  0x63   :  { %12966 = vmatmul.mubr.msk.f32.vlgmr.msra.gmra.mxu0 %vm114_vm0, %v14127_v28  ;;  %v14139_v19 = vpop.eup %14138  ;;  %12984 = vmatprep.mubr.msk.f32.mxu1 %vm114_vm0, %v14679_v33 }
  0x64   :  { %12968 = vmatprep.mubr.msk.f32.mxu0 %vm114_vm0, %v14129_v15  ;;  %12994 = vmatpush3.msra.mxu0 %v11864_v39 }
  0x65   :  { %12995 = vmatprep.subr.mxu0 %v11863_v49  ;;  %13010 = vmatpush3.msra.mxu1 %v11876_v32  ;;  %v11742_v34 = vld [vmem:[%s18126_s18] ss:$0 sm:$0xff] }
  0x66   :  { %12996 = vmatpush3.msra.mxu0 %v11863_v49  ;;  %12985 = vmatmul.mubr.msk.f32.gmra.mxu1 %vm114_vm0, %v14708_v41 }
  0x67   :  { %12969 = vmatmul.mubr.msk.f32.gmra.mxu0 %vm114_vm0, %v14131_v36  ;;  %13025 = vmatprep.subr.mxu0 %v18073_v21 }
  0x68   :  { %12971 = vmatprep.mubr.msk.f32.mxu0 %vm114_vm0, %v14133_v16  ;;  %12987 = vmatprep.mubr.msk.f32.mxu1 %vm114_vm0, %v14718_v45 }
  0x69   :  { %13011 = vmatprep.subr.mxu1 %v11875_v35 }
  0x6a   :  { %12988 = vmatmul.mubr.msk.f32.gmra.mxu1 %vm114_vm0, %v14741_v52 }
  0x6b   :  { %12972 = vmatmul.mubr.msk.f32.gmra.mxu0 %vm114_vm0, %v14135_v17  ;;  %12990 = vmatprep.mubr.msk.f32.mxu1 %vm114_vm0, %v14746_v55 }
  0x6c   :  { %12974 = vmatprep.mubr.msk.f32.mxu0 %vm114_vm0, %v14137_v18  ;;  %13012 = vmatpush3.msra.mxu1 %v11875_v35 }
  0x6d   :  { %13036 = vmatprep.subr.mxu1 %v18073_v21 }
  0x6e   :  { %12991 = vmatmul.mubr.msk.f32.gmra.mxu1 %vm114_vm0, %v14757_v61 }
  0x6f   :  { %12975 = vmatmul.mubr.msk.f32.gmra.mxu0 %vm114_vm0, %v14139_v19  ;;  %13013 = vmatprep.mubr.msk.f32.mxu1 %vm114_vm0, %v14652_v24  ;;  %v15011_v19 = vld [vmem:[%s18051_s20] ss:$0 sm:$0xff] }
  0x70   :  { %12997 = vmatprep.mubr.msk.f32.mxu0 %vm114_vm0, %v14652_v24 }
  0x72   :  { %13014 = vmatmul.mubr.msk.f32.vlgmr.msra.gmra.mxu1 %vm114_vm0, %v14669_v29 }
  0x73   :  { %12998 = vmatmul.mubr.msk.f32.vlgmr.msra.gmra.mxu0 %vm114_vm0, %v14669_v29  ;;  %13037 = vmatpush3.msra.mxu1 %v2246_v44 }
  0x74   :  { %13026 = vmatpush3.msra.mxu0 %v2167_v20  ;;  %13000 = vmatprep.mubr.msk.f32.mxu0 %vm114_vm0, %v14679_v33 }
  0x75   :  { %13027 = vmatprep.subr.mxu0 %v18073_v21  ;;  %13016 = vmatprep.mubr.msk.f32.mxu1 %vm114_vm0, %v14679_v33 }
  0x76   :  { %13028 = vmatpush3.msra.mxu0 %v2166_v22  ;;  %13038 = vmatprep.subr.mxu1 %v18073_v21  ;;  %v15017_v22 = vld [vmem:[%s18044_s13] ss:$0 sm:$0xff] }
  0x77   :  { %13001 = vmatmul.mubr.msk.f32.gmra.mxu0 %vm114_vm0, %v14708_v41  ;;  %13029 = vmatprep.subr.mxu0 %v18073_v21 }
  0x78   :  { %13003 = vmatprep.mubr.msk.f32.mxu0 %vm114_vm0, %v14718_v45  ;;  %13030 = vmatpush3.msra.mxu0 %v2165_v23 }
  0x79   :  { %13031 = vmatprep.subr.mxu0 %v18073_v21  ;;  %13039 = vmatpush3.msra.mxu1 %v2245_v51 }
  0x7a   :  { %13032 = vmatpush3.msra.mxu0 %v2164_v25  ;;  %13017 = vmatmul.mubr.msk.f32.gmra.mxu1 %vm114_vm0, %v14708_v41 }
  0x7b   :  { %13004 = vmatmul.mubr.msk.f32.gmra.mxu0 %vm114_vm0, %v14741_v52  ;;  %13043 = vmatprep.subr.mxu0 %v18073_v21 }
  0x7c   :  { %13006 = vmatprep.mubr.msk.f32.mxu0 %vm114_vm0, %v14746_v55  ;;  %13054 = vmatprep.subr.mxu1 %v18073_v21 }
  0x7d   :  { %13019 = vmatprep.mubr.msk.f32.mxu1 %vm114_vm0, %v14718_v45 }
  0x7e   :  { %13020 = vmatmul.mubr.msk.f32.gmra.mxu1 %vm114_vm0, %v14741_v52 }
  0x7f   :  { %13007 = vmatmul.mubr.msk.f32.gmra.mxu0 %vm114_vm0, %v14757_v61  ;;  %13022 = vmatprep.mubr.msk.f32.mxu1 %vm114_vm0, %v14746_v55 }
  0x80   :  { %13033 = vmatprep.mubr.msk.f32.mxu0 %vm14436_vm1, %v18073_v21 }
  0x82   :  { %13023 = vmatmul.mubr.msk.f32.gmra.mxu1 %vm114_vm0, %v14757_v61 }
  0x83   :  { %13040 = vmatprep.mubr.msk.f32.mxu1 %vm14436_vm1, %v18073_v21 }
  0xd9   :  { %v12839_v37 = vpop.f32.mrf.mxu0 }
  0xda   :  { %v211_v38 = vadd.f32 %v12839_v37, %v11742_v34 }
  0xdb   :  { %v205_v40 = vpop.f32.mrf.mxu0 }
  0xdc   :  { %v245_v42 = vmax.f32 %v211_v38, 0.0  ;;  %v206_v43 = vadd.f32 %v11742_v34, %v205_v40 }
  0xdd   :  { %v12842_v46 = vpop.f32.mrf.mxu0 }
  0xde   :  { %v253_v47 = vsub.f32 0.0, %v245_v42  ;;  %v244_v48 = vmax.f32 %v206_v43, 0.0  ;;  %v221_v50 = vadd.f32 %v12842_v46, %v11742_v34 }
  0xdf   :  { %v215_v53 = vpop.f32.mrf.mxu0 }
  0xe0   :  { %v262_v24 = vmul.f32 1.442695, %v253_v47  ;;  %v252_v54 = vsub.f32 0.0, %v244_v48  ;;  %v247_v56 = vmax.f32 %v221_v50, 0.0  ;;  %v216_v57 = vadd.f32 %v11742_v34, %v215_v53  ;;  %v12855_v58 = vpop.f32.mrf.mxu1 }
  0xe1   :  { %v12845_v59 = vpop.f32.mrf.mxu0 }
  0xe2   :  { %14140 = vpow2.f32 %v262_v24  ;;  %v260_v29 = vmul.f32 1.442695, %v252_v54  ;;  %v255_v60 = vsub.f32 0.0, %v247_v56  ;;  %v246_v62 = vmax.f32 %v216_v57, 0.0  ;;  %v432_v63 = vpop.f32.mrf.mxu1 }
  0xe3   :  { %v231_v33 = vadd.f32 %v12845_v59, %v11742_v34  ;;  %v225_v0 = vpop.f32.mrf.mxu0 }
  0xe4   :  { %14142 = vpow2.f32 %v260_v29  ;;  %v266_v1 = vmul.f32 1.442695, %v255_v60  ;;  %v254_v3 = vsub.f32 0.0, %v246_v62  ;;  %v226_v5 = vadd.f32 %v11742_v34, %v225_v0  ;;  %v12858_v7 = vpop.f32.mrf.mxu1 }
  0xe5   :  { %v249_v8 = vmax.f32 %v231_v33, 0.0  ;;  %v12848_v4 = vpop.f32.mrf.mxu0 }
  0xe6   :  { %14144 = vpow2.f32 %v266_v1  ;;  %v264_v11 = vmul.f32 1.442695, %v254_v3  ;;  %v248_v12 = vmax.f32 %v226_v5, 0.0  ;;  %v241_v2 = vadd.f32 %v12848_v4, %v11742_v34  ;;  %v442_v13 = vpop.f32.mrf.mxu1 }
  0xe7   :  { %v257_v41 = vsub.f32 0.0, %v249_v8  ;;  %v235_v14 = vpop.f32.mrf.mxu0  ;;  %v2339_v8 = vld [vmem:[%s18055_s24 + $0x10] sm:$0xff] }
  0xe8   :  { %14146 = vpow2.f32 %v264_v11  ;;  %v256_v45 = vsub.f32 0.0, %v248_v12  ;;  %v251_v6 = vmax.f32 %v241_v2, 0.0  ;;  %v236_v9 = vadd.f32 %v11742_v34, %v235_v14  ;;  %v14996_v10 = vpop.f32.mrf.mxu1  ;;  %v2338_v14 = vld [vmem:[%s18055_s24 + $0x8] sm:$0xff] }
  0xe9   :  { %v270_v28 = vmul.f32 1.442695, %v257_v41 }
  0xea   :  { %v268_v15 = vmul.f32 1.442695, %v256_v45  ;;  %v259_v36 = vsub.f32 0.0, %v251_v6  ;;  %v250_v39 = vmax.f32 %v236_v9, 0.0  ;;  %v14998_v16 = vpop.f32.mrf.mxu1 }
  0xeb   :  { %14148 = vpow2.f32 %v270_v28  ;;  %v2337_v28 = vld [vmem:[%s18055_s24] sm:$0xff] }
  0xec   :  { %14150 = vpow2.f32 %v268_v15  ;;  %v274_v52 = vmul.f32 1.442695, %v259_v36  ;;  %v258_v55 = vsub.f32 0.0, %v250_v39  ;;  %v15004_v49 = vpop.f32.mrf.mxu1 }
  0xee   :  { %14152 = vpow2.f32 %v274_v52  ;;  %v272_v17 = vmul.f32 1.442695, %v258_v55  ;;  %v15006_v18 = vpop.f32.mrf.mxu1  ;;  %v2488_v55 = vld [vmem:[%s18057_s26 + $0x18] sm:$0xff] }
  0xef   :  { %v14141_v61 = vpop.eup %14140 }
  0xf0   :  { %1007 = vst.msk [vmem:[#allocation2 + $0x8] sm:$0xff] %vm1005_vm2, %v14141_v61  ;;  %14154 = vpow2.f32 %v272_v17  ;;  %v12871_v20 = vpop.f32.mrf.mxu0  ;;  %v12887_v23 = vpop.f32.mrf.mxu1  ;;  %v15080_v61 = vld [vmem:[%s18052_s21] ss:$0 sm:$0xff] }
  0xf1   :  { %v14143_v25 = vpop.eup %14142  ;;  %v567_v26 = vadd.f32 %v12871_v20, %v12855_v58  ;;  %v744_v27 = vadd.f32 %v12887_v23, %v15011_v19 }
  0xf2   :  { %1006 = vst.msk [vmem:[#allocation2] sm:$0xff] %vm1005_vm2, %v14143_v25  ;;  %v561_v30 = vpop.f32.mrf.mxu0  ;;  %v738_v31 = vpop.f32.mrf.mxu1 }
  0xf3   :  { %v14145_v32 = vpop.eup %14144  ;;  %v608_v34 = vadd.f32 %v15017_v22, %v567_v26  ;;  %v562_v35 = vadd.f32 %v561_v30, %v432_v63  ;;  %1023 = vst.msk [vmem:[#allocation4 + $0x8] sm:$0xff] %vm1005_vm2, %v744_v27  ;;  %v739_v37 = vadd.f32 %v15011_v19, %v738_v31  ;;  %v2340_v63 = vld [vmem:[%s18055_s24 + $0x18] sm:$0xff]  ;;  %v2487_v26 = vld [vmem:[%s18057_s26 + $0x10] sm:$0xff] }
  0xf4   :  { %1009 = vst.msk [vmem:[#allocation2 + $0x18] sm:$0xff] %vm1005_vm2, %v14145_v32  ;;  %v12874_v38 = vpop.f32.mrf.mxu0 }
  0xf5   :  { %v14147_v40 = vpop.eup %14146  ;;  %v11771_v42 = vmul.f32 -1.442695, %v608_v34  ;;  %v607_v43 = vadd.f32 %v15017_v22, %v562_v35  ;;  %v577_v44 = vadd.f32 %v12874_v38, %v12858_v7  ;;  %1022 = vst.msk [vmem:[#allocation4] sm:$0xff] %vm1005_vm2, %v739_v37  ;;  %v12890_v46 = vpop.f32.mrf.mxu1  ;;  %v2486_v37 = vld [vmem:[%s18057_s26 + $0x8] sm:$0xff] }
  0xf6   :  { %1008 = vst.msk [vmem:[#allocation2 + $0x10] sm:$0xff] %vm1005_vm2, %v14147_v40  ;;  %v571_v47 = vpop.f32.mrf.mxu0  ;;  %v754_v48 = vadd.f32 %v12890_v46, %v15011_v19  ;;  %v2485_v46 = vld [vmem:[%s18057_s26] sm:$0xff] }
  0xf7   :  { %14156 = vpow2.f32 %v11771_v42  ;;  %v11770_v50 = vmul.f32 -1.442695, %v607_v43  ;;  %v610_v51 = vadd.f32 %v15017_v22, %v577_v44  ;;  %v572_v53 = vadd.f32 %v571_v47, %v442_v13  ;;  %v748_v24 = vpop.f32.mrf.mxu1 }
  0xf8   :  { %v14149_v54 = vpop.eup %14148  ;;  %1025 = vst.msk [vmem:[#allocation4 + $0x18] sm:$0xff] %vm1005_vm2, %v754_v48  ;;  %v749_v56 = vadd.f32 %v15011_v19, %v748_v24 }
  0xf9   :  { %v14151_v57 = vpop.eup %14150  ;;  %v2161_v58 = vld [vmem:[#allocation2] sm:$0xff]  ;;  %1011 = vst.msk [vmem:[#allocation2 + $0x28] sm:$0xff] %vm1005_vm2, %v14149_v54  ;;  %14158 = vpow2.f32 %v11770_v50  ;;  %v11773_v59 = vmul.f32 -1.442695, %v610_v51  ;;  %v609_v29 = vadd.f32 %v15017_v22, %v572_v53  ;;  %v12893_v60 = vpop.f32.mrf.mxu1 }
  0xfa   :  { %v15034_v62 = vmul.f32 0.0, %v2161_v58  ;;  %1010 = vst.msk [vmem:[#allocation2 + $0x20] sm:$0xff] %vm1005_vm2, %v14151_v57  ;;  %v12877_v33 = vpop.f32.mrf.mxu0  ;;  %1024 = vst.msk [vmem:[#allocation4 + $0x10] sm:$0xff] %vm1005_vm2, %v749_v56  ;;  %v764_v0 = vadd.f32 %v12893_v60, %v15011_v19 }
  0xfb   :  { %v14153_v1 = vpop.eup %14152  ;;  %14160 = vpow2.f32 %v11773_v59  ;;  %v11772_v3 = vmul.f32 -1.442695, %v609_v29  ;;  %v587_v5 = vadd.f32 %v12877_v33, %v14996_v10  ;;  %v758_v7 = vpop.f32.mrf.mxu1  ;;  %v15065_v10 = vld [vmem:[%s18053_s22] ss:$0 sm:$0xff] }
  0xfc   :  { %13034 = vmatmul.mubr.msk.f32.vlgmr.msra.gmra.mxu0 %vm1005_vm2, %v15034_v62  ;;  %1013 = vst.msk [vmem:[#allocation2 + $0x38] sm:$0xff] %vm1005_vm2, %v14153_v1  ;;  %v581_v4 = vpop.f32.mrf.mxu0  ;;  %1027 = vst.msk [vmem:[#allocation4 + $0x28] sm:$0xff] %vm1005_vm2, %v764_v0  ;;  %v759_v11 = vadd.f32 %v15011_v19, %v758_v7 }
  0xfd   :  { %v14155_v12 = vpop.eup %14154  ;;  %13044 = vmatpush3.msra.mxu0 %v2340_v63  ;;  %13051 = vmatprep.mubr.msk.f32.mxu0 %vm14436_vm1, %v18073_v21  ;;  %14162 = vpow2.f32 %v11772_v3  ;;  %v612_v2 = vadd.f32 %v15017_v22, %v587_v5  ;;  %v582_v13 = vadd.f32 %v581_v4, %v14998_v16  ;;  %v12896_v41 = vpop.f32.mrf.mxu1 }
  0xfe   :  { %13045 = vmatprep.subr.mxu0 %v18073_v21  ;;  %1012 = vst.msk [vmem:[#allocation2 + $0x30] sm:$0xff] %vm1005_vm2, %v14155_v12  ;;  %1026 = vst.msk [vmem:[#allocation4 + $0x20] sm:$0xff] %vm1005_vm2, %v759_v11  ;;  %v12880_v15 = vpop.f32.mrf.mxu0 }
  0xff   :  { %13046 = vmatpush3.msra.mxu0 %v2339_v8  ;;  %v11775_v45 = vmul.f32 -1.442695, %v612_v2  ;;  %v611_v6 = vadd.f32 %v15017_v22, %v582_v13  ;;  %v768_v9 = vpop.f32.mrf.mxu1  ;;  %v597_v16 = vadd.f32 %v12880_v15, %v15004_v49 }
 0x100   :  { %13047 = vmatprep.subr.mxu0 %v18073_v21  ;;  %v769_v36 = vadd.f32 %v15011_v19, %v768_v9  ;;  %v591_v17 = vpop.f32.mrf.mxu0 }
 0x101   :  { %13048 = vmatpush3.msra.mxu0 %v2338_v14  ;;  %14164 = vpow2.f32 %v11775_v45  ;;  %v11774_v39 = vmul.f32 -1.442695, %v611_v6  ;;  %v12919_v52 = vpop.f32.mrf.mxu1  ;;  %v614_v49 = vadd.f32 %v15017_v22, %v597_v16  ;;  %v592_v20 = vadd.f32 %v591_v17, %v15006_v18  ;;  %v15136_v14 = vld [vmem:[%s18126_s18 + $0x1] ss:$0 sm:$0xff] }
 0x102   :  { %13049 = vmatprep.subr.mxu0 %v18073_v21  ;;  %1028 = vst.msk [vmem:[#allocation4 + $0x30] sm:$0xff] %vm1005_vm2, %v769_v36  ;;  %v972_v19 = vadd.f32 %v12919_v52, %v15065_v10 }
 0x103   :  { %13050 = vmatpush3.msra.mxu0 %v2337_v28  ;;  %14166 = vpow2.f32 %v11774_v39  ;;  %v966_v23 = vpop.f32.mrf.mxu1  ;;  %v12903_v27 = vpop.f32.mrf.mxu0  ;;  %v11777_v31 = vmul.f32 -1.442695, %v614_v49  ;;  %v613_v32 = vadd.f32 %v15017_v22, %v592_v20 }
 0x104   :  { %v14157_v25 = vpop.eup %14156  ;;  %13052 = vmatmul.mubr.msk.f32.vlgmr.msra.gmra.mxu0 %vm1005_vm2, %v15034_v62  ;;  %13065 = vmatprep.subr.mxu0 %v18073_v21  ;;  %1039 = vst.msk [vmem:[#allocation6 + $0x8] sm:$0xff] %vm1005_vm2, %v972_v19  ;;  %v967_v30 = vadd.f32 %v15065_v10, %v966_v23  ;;  %v858_v34 = vadd.f32 %v12903_v27, %v15080_v61 }
 0x105   :  { %13066 = vmatpush3.msra.mxu0 %v2488_v55  ;;  %13073 = vmatprep.mubr.msk.f32.mxu0 %vm14436_vm1, %v18073_v21  ;;  %v640_v18 = vadd.f32 1.0, %v14157_v25  ;;  %v852_v38 = vpop.f32.mrf.mxu0  ;;  %v11776_v43 = vmul.f32 -1.442695, %v613_v32 }
 0x106   :  { %v14159_v35 = vpop.eup %14158  ;;  %13067 = vmatprep.subr.mxu0 %v18073_v21  ;;  %1038 = vst.msk [vmem:[#allocation6] sm:$0xff] %vm1005_vm2, %v967_v30  ;;  %v12922_v40 = vpop.f32.mrf.mxu1  ;;  %1031 = vst.msk [vmem:[#allocation5 + $0x8] sm:$0xff] %vm1005_vm2, %v858_v34  ;;  %v853_v22 = vadd.f32 %v15080_v61, %v852_v38 }
 0x107   :  { %13068 = vmatpush3.msra.mxu0 %v2487_v26  ;;  %14168 = vrcp.f32 %v640_v18  ;;  %v639_v42 = vadd.f32 1.0, %v14159_v35  ;;  %v12906_v47 = vpop.f32.mrf.mxu0  ;;  %v982_v48 = vadd.f32 %v12922_v40, %v15065_v10 }
 0x108   :  { %v14161_v44 = vpop.eup %14160  ;;  %13069 = vmatprep.subr.mxu0 %v18073_v21  ;;  %14170 = vpow2.f32 %v11777_v31  ;;  %v976_v50 = vpop.f32.mrf.mxu1  ;;  %1030 = vst.msk [vmem:[#allocation5] sm:$0xff] %vm1005_vm2, %v853_v22  ;;  %v868_v53 = vadd.f32 %v12906_v47, %v15080_v61 }
 0x109   :  { %13070 = vmatpush3.msra.mxu0 %v2486_v37  ;;  %14172 = vrcp.f32 %v639_v42  ;;  %v642_v51 = vadd.f32 1.0, %v14161_v44  ;;  %v977_v24 = vadd.f32 %v15065_v10, %v976_v50  ;;  %v862_v56 = vpop.f32.mrf.mxu0  ;;  %1041 = vst.msk [vmem:[#allocation6 + $0x18] sm:$0xff] %vm1005_vm2, %v982_v48 }
 0x10a   :  { %v14163_v54 = vpop.eup %14162  ;;  %13071 = vmatprep.subr.mxu0 %v18073_v21  ;;  %14174 = vpow2.f32 %v11776_v43  ;;  %v12925_v57 = vpop.f32.mrf.mxu1  ;;  %1033 = vst.msk [vmem:[#allocation5 + $0x18] sm:$0xff] %vm1005_vm2, %v868_v53  ;;  %v863_v59 = vadd.f32 %v15080_v61, %v862_v56 }
 0x10b   :  { %13072 = vmatpush3.msra.mxu0 %v2485_v46  ;;  %14176 = vrcp.f32 %v642_v51  ;;  %v641_v58 = vadd.f32 1.0, %v14163_v54  ;;  %1040 = vst.msk [vmem:[#allocation6 + $0x10] sm:$0xff] %vm1005_vm2, %v977_v24  ;;  %v992_v29 = vadd.f32 %v12925_v57, %v15065_v10  ;;  %v12909_v60 = vpop.f32.mrf.mxu0 }
 0x10c   :  { %13074 = vmatmul.mubr.msk.f32.vlgmr.msra.gmra.mxu0 %vm1005_vm2, %v15034_v62  ;;  %v986_v63 = vpop.f32.mrf.mxu1  ;;  %13090 = vmatprep.subr.mxu0 %v18073_v21  ;;  %1032 = vst.msk [vmem:[#allocation5 + $0x10] sm:$0xff] %vm1005_vm2, %v863_v59  ;;  %v878_v33 = vadd.f32 %v12909_v60, %v15080_v61 }
 0x10d   :  { %14178 = vrcp.f32 %v641_v58  ;;  %1043 = vst.msk [vmem:[#allocation6 + $0x28] sm:$0xff] %vm1005_vm2, %v992_v29  ;;  %v987_v0 = vadd.f32 %v15065_v10, %v986_v63  ;;  %13094 = vmatprep.mubr.msk.f32.mxu0 %vm14436_vm1, %v18073_v21  ;;  %v872_v3 = vpop.f32.mrf.mxu0 }
 0x10e   :  { %v14165_v1 = vpop.eup %14164  ;;  %v12928_v5 = vpop.f32.mrf.mxu1  ;;  %1035 = vst.msk [vmem:[#allocation5 + $0x28] sm:$0xff] %vm1005_vm2, %v878_v33  ;;  %v873_v8 = vadd.f32 %v15080_v61, %v872_v3 }
 0x10f   :  { %v644_v7 = vadd.f32 1.0, %v14165_v1  ;;  %1042 = vst.msk [vmem:[#allocation6 + $0x20] sm:$0xff] %vm1005_vm2, %v987_v0  ;;  %v12912_v11 = vpop.f32.mrf.mxu0  ;;  %v15160_v1 = vld [vmem:[%s18044_s13 + $0x1] ss:$0 sm:$0xff] }
 0x110   :  { %v14167_v4 = vpop.eup %14166  ;;  %v996_v12 = vpop.f32.mrf.mxu1  ;;  %1034 = vst.msk [vmem:[#allocation5 + $0x20] sm:$0xff] %vm1005_vm2, %v873_v8 }
 0x111   :  { %14180 = vrcp.f32 %v644_v7  ;;  %v643_v2 = vadd.f32 1.0, %v14167_v4  ;;  %v997_v13 = vadd.f32 %v15065_v10, %v996_v12  ;;  %v882_v41 = vpop.f32.mrf.mxu0 }
 0x112   :  { %v883_v45 = vadd.f32 %v15080_v61, %v882_v41  ;;  %v15140_v28 = vpop.f32.mrf.mxu1 }
 0x113   :  { %14182 = vrcp.f32 %v643_v2  ;;  %1044 = vst.msk [vmem:[#allocation6 + $0x30] sm:$0xff] %vm1005_vm2, %v997_v13  ;;  %v12935_v9 = vpop.f32.mrf.mxu0 }
 0x114   :  { %v14169_v6 = vpop.eup %14168  ;;  %1036 = vst.msk [vmem:[#allocation5 + $0x30] sm:$0xff] %vm1005_vm2, %v883_v45  ;;  %v1129_v10 = vadd.f32 %v12935_v9, %v15136_v14  ;;  %v1330_v20 = vpop.f32.mrf.mxu1 }
 0x115   :  { %v14171_v15 = vpop.eup %14170  ;;  %1015 = vst.msk [vmem:[#allocation3 + $0x8] sm:$0xff] %vm114_vm0, %v14169_v6  ;;  %v1123_v16 = vpop.f32.mrf.mxu0 }
 0x116   :  { %v14173_v36 = vpop.eup %14172  ;;  %v646_v39 = vadd.f32 1.0, %v14171_v15  ;;  %v1163_v55 = vmax.f32 %v1129_v10, 0.0  ;;  %v1124_v17 = vadd.f32 %v15136_v14, %v1123_v16  ;;  %v12954_v37 = vpop.f32.mrf.mxu1 }
 0x117   :  { %v14175_v52 = vpop.eup %14174  ;;  %1014 = vst.msk [vmem:[#allocation3] sm:$0xff] %vm114_vm0, %v14173_v36  ;;  %v12938_v49 = vpop.f32.mrf.mxu0 }
 0x118   :  { %v14177_v61 = vpop.eup %14176  ;;  %14184 = vrcp.f32 %v646_v39  ;;  %v645_v19 = vadd.f32 1.0, %v14175_v52  ;;  %v1171_v23 = vsub.f32 0.0, %v1163_v55  ;;  %v1162_v25 = vmax.f32 %v1124_v17, 0.0  ;;  %v1340_v24 = vpop.f32.mrf.mxu1 }
 0x119   :  { %1017 = vst.msk [vmem:[#allocation3 + $0x18] sm:$0xff] %vm114_vm0, %v14177_v61  ;;  %v1139_v26 = vadd.f32 %v12938_v49, %v15136_v14  ;;  %v1133_v30 = vpop.f32.mrf.mxu0 }
 0x11a   :  { %v14179_v27 = vpop.eup %14178  ;;  %14186 = vrcp.f32 %v645_v19  ;;  %v1180_v18 = vmul.f32 1.442695, %v1171_v23  ;;  %v1170_v31 = vsub.f32 0.0, %v1162_v25  ;;  %v1134_v34 = vadd.f32 %v15136_v14, %v1133_v30  ;;  %v12957_v3 = vpop.f32.mrf.mxu1 }
 0x11b   :  { %1016 = vst.msk [vmem:[#allocation3 + $0x10] sm:$0xff] %vm114_vm0, %v14179_v27  ;;  %v1165_v32 = vmax.f32 %v1139_v26, 0.0  ;;  %v12941_v35 = vpop.f32.mrf.mxu0 }
 0x11c   :  { %14188 = vpow2.f32 %v1180_v18  ;;  %v1178_v38 = vmul.f32 1.442695, %v1170_v31  ;;  %v1164_v42 = vmax.f32 %v1134_v34, 0.0  ;;  %v1149_v22 = vadd.f32 %v12941_v35, %v15136_v14  ;;  %v1350_v9 = vpop.f32.mrf.mxu1 }
 0x11d   :  { %v1173_v40 = vsub.f32 0.0, %v1165_v32  ;;  %v1143_v44 = vpop.f32.mrf.mxu0 }
 0x11e   :  { %v14181_v43 = vpop.eup %14180  ;;  %14190 = vpow2.f32 %v1178_v38  ;;  %v1172_v47 = vsub.f32 0.0, %v1164_v42  ;;  %v1144_v48 = vadd.f32 %v15136_v14, %v1143_v44  ;;  %v1167_v51 = vmax.f32 %v1149_v22, 0.0  ;;  %v12960_v49 = vpop.f32.mrf.mxu1 }
 0x11f   :  { %1019 = vst.msk [vmem:[#allocation3 + $0x28] sm:$0xff] %vm114_vm0, %v14181_v43  ;;  %v1184_v46 = vmul.f32 1.442695, %v1173_v40  ;;  %v12944_v53 = vpop.f32.mrf.mxu0  ;;  %v11866_v43 = vld [vmem:[%s18052_s21 + $0x1] ss:$0 sm:$0xff]  ;;  %s18129_s21 = sld [smem:[#allocation23_spill]] }
 0x120   :  { %v14183_v50 = vpop.eup %14182  ;;  %v1182_v54 = vmul.f32 1.442695, %v1172_v47  ;;  %v1166_v56 = vmax.f32 %v1144_v48, 0.0  ;;  %v1159_v57 = vadd.f32 %v12944_v53, %v15136_v14  ;;  %v1175_v58 = vsub.f32 0.0, %v1167_v51  ;;  %v1360_v35 = vpop.f32.mrf.mxu1 }
 0x121   :  { %1018 = vst.msk [vmem:[#allocation3 + $0x20] sm:$0xff] %vm114_vm0, %v14183_v50  ;;  %14192 = vpow2.f32 %v1184_v46  ;;  %v1153_v59 = vpop.f32.mrf.mxu0 }
 0x122   :  { %14194 = vpow2.f32 %v1182_v54  ;;  %v1174_v29 = vsub.f32 0.0, %v1166_v56  ;;  %v1169_v60 = vmax.f32 %v1159_v57, 0.0  ;;  %v1154_v63 = vadd.f32 %v15136_v14, %v1153_v59 }
 0x123   :  { %v1188_v33 = vmul.f32 1.442695, %v1175_v58  ;;  %v12967_v0 = vpop.f32.mrf.mxu0 }
 0x124   :  { %v1186_v7 = vmul.f32 1.442695, %v1174_v29  ;;  %v1177_v8 = vsub.f32 0.0, %v1169_v60  ;;  %v1168_v4 = vmax.f32 %v1154_v63, 0.0  ;;  %v1465_v11 = vadd.f32 %v12967_v0, %v15140_v28 }
 0x125   :  { %v14185_v5 = vpop.eup %14184  ;;  %14196 = vpow2.f32 %v1188_v33  ;;  %v1459_v12 = vpop.f32.mrf.mxu0 }
 0x126   :  { %1021 = vst.msk [vmem:[#allocation3 + $0x38] sm:$0xff] %vm114_vm0, %v14185_v5  ;;  %14198 = vpow2.f32 %v1186_v7  ;;  %v1192_v13 = vmul.f32 1.442695, %v1177_v8  ;;  %v1176_v41 = vsub.f32 0.0, %v1168_v4  ;;  %v1507_v14 = vadd.f32 %v15160_v1, %v1465_v11 }
 0x127   :  { %v14187_v2 = vpop.eup %14186  ;;  %v1460_v45 = vadd.f32 %v1459_v12, %v1330_v20  ;;  %v12970_v6 = vpop.f32.mrf.mxu0 }
 0x128   :  { %1020 = vst.msk [vmem:[#allocation3 + $0x30] sm:$0xff] %vm114_vm0, %v14187_v2  ;;  %14200 = vpow2.f32 %v1192_v13  ;;  %v1190_v15 = vmul.f32 1.442695, %v1176_v41  ;;  %v11844_v10 = vmul.f32 -1.442695, %v1507_v14  ;;  %v1475_v36 = vadd.f32 %v12970_v6, %v12954_v37 }
 0x129   :  { %v14189_v28 = vpop.eup %14188  ;;  %v1506_v39 = vadd.f32 %v15160_v1, %v1460_v45  ;;  %v1469_v16 = vpop.f32.mrf.mxu0 }
 0x12a   :  { %1912 = vst.msk [vmem:[#allocation2 + $0x48] sm:$0xff] %vm1005_vm2, %v14189_v28  ;;  %14202 = vpow2.f32 %v1190_v15  ;;  %v1509_v52 = vadd.f32 %v15160_v1, %v1475_v36  ;;  %v1470_v55 = vadd.f32 %v1469_v16, %v1340_v24 }
 0x12b   :  { %v14191_v17 = vpop.eup %14190  ;;  %14204 = vpow2.f32 %v11844_v10  ;;  %v11843_v61 = vmul.f32 -1.442695, %v1506_v39  ;;  %v12973_v19 = vpop.f32.mrf.mxu0 }
 0x12c   :  { %1911 = vst.msk [vmem:[#allocation2 + $0x40] sm:$0xff] %vm1005_vm2, %v14191_v17  ;;  %v11846_v20 = vmul.f32 -1.442695, %v1509_v52  ;;  %v1508_v23 = vadd.f32 %v15160_v1, %v1470_v55  ;;  %v1485_v25 = vadd.f32 %v12973_v19, %v12957_v3  ;;  %v15194_v55 = vld [vmem:[%s18124_s29 + $0x10] sm:$0xff] }
 0x12d   :  { %14206 = vpow2.f32 %v11843_v61  ;;  %v1479_v27 = vpop.f32.mrf.mxu0  ;;  %v1995_v17 = vsel %vm114_vm0, %v15194_v55, 0.0 }
 0x12e   :  { %v14193_v26 = vpop.eup %14192  ;;  %14208 = vpow2.f32 %v11846_v20  ;;  %v11845_v30 = vmul.f32 -1.442695, %v1508_v23  ;;  %v1511_v18 = vadd.f32 %v15160_v1, %v1485_v25  ;;  %v1480_v31 = vadd.f32 %v1479_v27, %v1350_v9  ;;  %1996 = vadd.xlane.f32.xlu1 %v1995_v17  ;;  %v15204_v27 = vld [vmem:[%s18124_s29 + $0x18] sm:$0xff]  ;;  %v15243_v17 = vld [vmem:[%s18124_s29] sm:$0xff] }
 0x12f   :  { %1914 = vst.msk [vmem:[#allocation2 + $0x58] sm:$0xff] %vm1005_vm2, %v14193_v26  ;;  %v14195_v32 = vpop.eup %14194  ;;  %v12976_v34 = vpop.f32.mrf.mxu0 }
 0x130   :  { %1913 = vst.msk [vmem:[#allocation2 + $0x50] sm:$0xff] %vm1005_vm2, %v14195_v32  ;;  %14210 = vpow2.f32 %v11845_v30  ;;  %v11848_v37 = vmul.f32 -1.442695, %v1511_v18  ;;  %v1510_v38 = vadd.f32 %v15160_v1, %v1480_v31  ;;  %v1495_v40 = vadd.f32 %v12976_v34, %v12960_v49  ;;  %v1958_v49 = vpop.xlane.xlu0 %1957  ;;  %v15213_v32 = vld [vmem:[%s18124_s29 + $0x20] sm:$0xff] }
 0x131   :  { %v1489_v42 = vpop.f32.mrf.mxu0  ;;  %v1959_v23 = vrot.slane %v1958_v49, 4  ;;  %v2015_v30 = vsel %vm114_vm0, %v15204_v27, 0.0 }
 0x132   :  { %v14197_v22 = vpop.eup %14196  ;;  %14212 = vpow2.f32 %v11848_v37  ;;  %v11847_v44 = vmul.f32 -1.442695, %v1510_v38  ;;  %v1513_v46 = vadd.f32 %v15160_v1, %v1495_v40  ;;  %v1490_v47 = vadd.f32 %v1489_v42, %v1360_v35  ;;  %2016 = vadd.xlane.f32.xlu1 %v2015_v30 }
 0x133   :  { %v14199_v48 = vpop.eup %14198  ;;  %1916 = vst.msk [vmem:[#allocation2 + $0x68] sm:$0xff] %vm1005_vm2, %v14197_v22  ;;  %v12999_v50 = vpop.f32.mrf.mxu0  ;;  %v1960_v26 = vadd.f32 %v1959_v23, %v1958_v49  ;;  %v2035_v37 = vsel %vm114_vm0, %v15213_v32, 0.0  ;;  %v2242_v49 = vsub.f32 1.0, %v15243_v17 }
 0x134   :  { %1915 = vst.msk [vmem:[#allocation2 + $0x60] sm:$0xff] %vm1005_vm2, %v14199_v48  ;;  %14214 = vpow2.f32 %v11847_v44  ;;  %v11850_v51 = vmul.f32 -1.442695, %v1513_v46  ;;  %v1512_v53 = vadd.f32 %v15160_v1, %v1490_v47  ;;  %v1761_v24 = vadd.f32 %v12999_v50, %v11866_v43  ;;  %2036 = vadd.xlane.f32.xlu0 %v2035_v37  ;;  %v1977_v22 = vpop.xlane.xlu0 %1976  ;;  %v11854_v47 = vld [vmem:[%s18051_s20 + $0x1] ss:$0 sm:$0xff]  ;;  %v15287_v37 = vld [vmem:[%s18056_s25 + $0x8] sm:$0xff] }
 0x135   :  { %v14201_v54 = vpop.eup %14200  ;;  %v1755_v56 = vpop.f32.mrf.mxu0  ;;  %v1961_v31 = vrot.slane %v1960_v26, 2  ;;  %v1978_v44 = vrot.slane %v1977_v22, 4 }
 0x136   :  { %1918 = vst.msk [vmem:[#allocation2 + $0x78] sm:$0xff] %vm1005_vm2, %v14201_v54  ;;  %14216 = vpow2.f32 %v11850_v51  ;;  %v11849_v57 = vmul.f32 -1.442695, %v1512_v53  ;;  %1939 = vst.msk [vmem:[#allocation5 + $0x48] sm:$0xff] %vm1005_vm2, %v1761_v24  ;;  %v12983_v51 = vpop.f32.mrf.mxu1 }
 0x137   :  { %v14203_v58 = vpop.eup %14202  ;;  %v13002_v59 = vpop.f32.mrf.mxu0  ;;  %v1962_v35 = vadd.f32 %v1961_v31, %v1960_v26  ;;  %v1979_v46 = vadd.f32 %v1978_v44, %v1977_v22  ;;  %v1645_v53 = vadd.f32 %v12983_v51, %v11854_v47  ;;  %v15270_v31 = vld [vmem:[%s18056_s25 + $0x18] sm:$0xff]  ;;  %v14392_v44 = vld [vmem:[%s18124_s29] sm:$0xff] }
 0x138   :  { %v14205_v29 = vpop.eup %14204  ;;  %1917 = vst.msk [vmem:[#allocation2 + $0x70] sm:$0xff] %vm1005_vm2, %v14203_v58  ;;  %14218 = vpow2.f32 %v11849_v57  ;;  %v1771_v60 = vadd.f32 %v13002_v59, %v11866_v43  ;;  %v1639_v24 = vpop.f32.mrf.mxu1 }
 0x139   :  { %v1539_v63 = vadd.f32 1.0, %v14205_v29  ;;  %v1765_v33 = vpop.f32.mrf.mxu0  ;;  %v1963_v40 = vrot.slane %v1962_v35, 1  ;;  %v1980_v50 = vrot.slane %v1979_v46, 2  ;;  %1930 = vst.msk [vmem:[#allocation4 + $0x48] sm:$0xff] %vm1005_vm2, %v1645_v53 }
 0x13a   :  { %v14207_v0 = vpop.eup %14206  ;;  %1941 = vst.msk [vmem:[#allocation5 + $0x58] sm:$0xff] %vm1005_vm2, %v1771_v60  ;;  %v1766_v1 = vadd.f32 %v11866_v43, %v1765_v33  ;;  %v12986_v56 = vpop.f32.mrf.mxu1 }
 0x13b   :  { %v14209_v3 = vpop.eup %14208  ;;  %14220 = vrcp.f32 %v1539_v63  ;;  %v1538_v5 = vadd.f32 1.0, %v14207_v0  ;;  %v13005_v7 = vpop.f32.mrf.mxu0  ;;  %v1981_v54 = vadd.f32 %v1980_v50, %v1979_v46  ;;  %v1655_v57 = vadd.f32 %v12986_v56, %v11854_v47 }
 0x13c   :  { %v1541_v8 = vadd.f32 1.0, %v14209_v3  ;;  %1940 = vst.msk [vmem:[#allocation5 + $0x50] sm:$0xff] %vm1005_vm2, %v1766_v1  ;;  %v1781_v4 = vadd.f32 %v13005_v7, %v11866_v43  ;;  %v1649_v58 = vpop.f32.mrf.mxu1 }
 0x13d   :  { %v14211_v11 = vpop.eup %14210  ;;  %14222 = vrcp.f32 %v1538_v5  ;;  %v1775_v12 = vpop.f32.mrf.mxu0  ;;  %v1982_v59 = vrot.slane %v1981_v54, 1  ;;  %1932 = vst.msk [vmem:[#allocation4 + $0x58] sm:$0xff] %vm1005_vm2, %v1655_v57  ;;  %v1650_v29 = vadd.f32 %v11854_v47, %v1649_v58  ;;  %v15313_v58 = vld [vmem:[%s18045_s14 + $0x8] sm:$0xff] }
 0x13e   :  { %14224 = vrcp.f32 %v1541_v8  ;;  %v1540_v2 = vadd.f32 1.0, %v14211_v11  ;;  %1943 = vst.msk [vmem:[#allocation5 + $0x68] sm:$0xff] %vm1005_vm2, %v1781_v4  ;;  %v1776_v13 = vadd.f32 %v11866_v43, %v1775_v12  ;;  %v12989_v60 = vpop.f32.mrf.mxu1  ;;  %v11878_v4 = vld [vmem:[%s18053_s22 + $0x1] ss:$0 sm:$0xff] }
 0x13f   :  { %v14213_v41 = vpop.eup %14212  ;;  %v13008_v14 = vpop.f32.mrf.mxu0  ;;  %1931 = vst.msk [vmem:[#allocation4 + $0x50] sm:$0xff] %vm1005_vm2, %v1650_v29  ;;  %v1665_v63 = vadd.f32 %v12989_v60, %v11854_v47  ;;  %v1983_v0 = vadd.f32 %v1982_v59, %v1981_v54  ;;  %v15319_v59 = vld [vmem:[%s18047_s16 + $0x8] sm:$0xff]  ;;  %v15326_v29 = vld [vmem:[%s18045_s14] sm:$0xff] }
 0x140   :  { %14226 = vrcp.f32 %v1540_v2  ;;  %v1543_v45 = vadd.f32 1.0, %v14213_v41  ;;  %1942 = vst.msk [vmem:[#allocation5 + $0x60] sm:$0xff] %vm1005_vm2, %v1776_v13  ;;  %v1791_v6 = vadd.f32 %v13008_v14, %v11866_v43  ;;  %v1659_v33 = vpop.f32.mrf.mxu1  ;;  %13091 = vmatpush3.msra.mxu0 %v15319_v59  ;;  %v15333_v60 = vld [vmem:[%s18047_s16] sm:$0xff] }
 0x141   :  { %v14215_v9 = vpop.eup %14214  ;;  %v1785_v15 = vpop.f32.mrf.mxu0  ;;  %1934 = vst.msk [vmem:[#allocation4 + $0x68] sm:$0xff] %vm1005_vm2, %v1665_v63  ;;  %v1660_v1 = vadd.f32 %v11854_v47, %v1659_v33  ;;  %13092 = vmatprep.subr.mxu0 %v18073_v21  ;;  %v15341_v63 = vld [vmem:[%s18124_s29 + $0x28] sm:$0xff] }
 0x142   :  { %14228 = vrcp.f32 %v1543_v45  ;;  %v1542_v10 = vadd.f32 1.0, %v14215_v9  ;;  %1945 = vst.msk [vmem:[#allocation5 + $0x78] sm:$0xff] %vm1005_vm2, %v1791_v6  ;;  %v1786_v36 = vadd.f32 %v11866_v43, %v1785_v15  ;;  %v1964_v43 = vadd.f32 %v1963_v40, %v1962_v35  ;;  %v12992_v5 = vpop.f32.mrf.mxu1  ;;  %v15294_v40 = vld [vmem:[%s18056_s25] sm:$0xff]  ;;  %13093 = vmatpush3.msra.mxu0 %v15333_v60 }
 0x143   :  { %v14217_v28 = vpop.eup %14216  ;;  %1933 = vst.msk [vmem:[#allocation4 + $0x60] sm:$0xff] %vm1005_vm2, %v1660_v1  ;;  %v1675_v7 = vadd.f32 %v12992_v5, %v11854_v47  ;;  %13108 = vmatprep.subr.mxu0 %v18073_v21  ;;  %v14393_v1 = vld [vmem:[%s18124_s29 + $0x8] sm:$0xff] }
 0x144   :  { %14230 = vrcp.f32 %v1542_v10  ;;  %v1545_v39 = vadd.f32 1.0, %v14217_v28  ;;  %1944 = vst.msk [vmem:[#allocation5 + $0x70] sm:$0xff] %vm1005_vm2, %v1786_v36  ;;  %v1669_v8 = vpop.f32.mrf.mxu1 }
 0x145   :  { %v14219_v16 = vpop.eup %14218  ;;  %14069 = vpush %v1964_v43  ;;  %v1670_v11 = vadd.f32 %v11854_v47, %v1669_v8 }
 0x146   :  { %14232 = vrcp.f32 %v1545_v39  ;;  %v1544_v52 = vadd.f32 1.0, %v14219_v16  ;;  %1936 = vst.msk [vmem:[#allocation4 + $0x78] sm:$0xff] %vm1005_vm2, %v1675_v7  ;;  %v13015_v12 = vpop.f32.mrf.mxu1 }
 0x147   :  { %1935 = vst.msk [vmem:[#allocation4 + $0x70] sm:$0xff] %vm1005_vm2, %v1670_v11  ;;  %v1877_v2 = vadd.f32 %v13015_v12, %v11878_v4 }
 0x148   :  { %v14221_v61 = vpop.eup %14220  ;;  %14234 = vrcp.f32 %v1544_v52  ;;  %v1871_v13 = vpop.f32.mrf.mxu1 }
 0x149   :  { %1921 = vst.msk [vmem:[#allocation3 + $0x48] sm:$0xff] %vm114_vm0, %v14221_v61  ;;  %v15248_v61 = vld [vmem:[%s18128_s19] ss:$0 sm:$0xff] }
 0x14a   :  { %v14223_v19 = vpop.eup %14222  ;;  %1948 = vst.msk [vmem:[#allocation6 + $0x48] sm:$0xff] %vm1005_vm2, %v1877_v2  ;;  %v13018_v41 = vpop.f32.mrf.mxu1 }
 0x14b   :  { %v14225_v20 = vpop.eup %14224  ;;  %1920 = vst.msk [vmem:[#allocation3 + $0x40] sm:$0xff] %vm114_vm0, %v14223_v19  ;;  %v1887_v14 = vadd.f32 %v13018_v41, %v11878_v4  ;;  %v15253_v19 = vld [vmem:[%s18129_s21] sm:$0xff] }
 0x14c   :  { %1923 = vst.msk [vmem:[#allocation3 + $0x58] sm:$0xff] %vm114_vm0, %v14225_v20  ;;  %v1881_v45 = vpop.f32.mrf.mxu1 }
 0x14d   :  { %v14227_v25 = vpop.eup %14226  ;;  %1950 = vst.msk [vmem:[#allocation6 + $0x58] sm:$0xff] %vm1005_vm2, %v1887_v14  ;;  %v1882_v6 = vadd.f32 %v11878_v4, %v1881_v45  ;;  %v15352_v14 = vld [vmem:[%s18124_s29 + $0x30] sm:$0xff]  ;;  %v15357_v45 = vld [vmem:[%s18124_s29 + $0x38] sm:$0xff] }
 0x14e   :  { %1922 = vst.msk [vmem:[#allocation3 + $0x50] sm:$0xff] %vm114_vm0, %v14227_v25  ;;  %v13021_v9 = vpop.f32.mrf.mxu1  ;;  %v15261_v25 = vmul.f32 %v15243_v17, %v15253_v19  ;;  %v15394_v17 = vld [vmem:[%s18046_s15] sm:$0xff] }
 0x14f   :  { %v14229_v18 = vpop.eup %14228  ;;  %1949 = vst.msk [vmem:[#allocation6 + $0x50] sm:$0xff] %vm1005_vm2, %v1882_v6  ;;  %v1897_v15 = vadd.f32 %v13021_v9, %v11878_v4  ;;  %v2075_v6 = vsel %vm114_vm0, %v15352_v14, 0.0  ;;  %v2095_v9 = vsel %vm114_vm0, %v15357_v45, 0.0 }
 0x150   :  { %1925 = vst.msk [vmem:[#allocation3 + $0x68] sm:$0xff] %vm114_vm0, %v14229_v18  ;;  %v1891_v10 = vpop.f32.mrf.mxu1  ;;  %2076 = vadd.xlane.f32.xlu0 %v2075_v6 }
 0x151   :  { %v14231_v34 = vpop.eup %14230  ;;  %1952 = vst.msk [vmem:[#allocation6 + $0x68] sm:$0xff] %vm1005_vm2, %v1897_v15  ;;  %v1892_v36 = vadd.f32 %v11878_v4, %v1891_v10 }
 0x152   :  { %1924 = vst.msk [vmem:[#allocation3 + $0x60] sm:$0xff] %vm114_vm0, %v14231_v34  ;;  %v13024_v28 = vpop.f32.mrf.mxu1  ;;  %v15276_v34 = vld [vmem:[%s18056_s25 + $0x10] sm:$0xff] }
 0x153   :  { %v14233_v38 = vpop.eup %14232  ;;  %1951 = vst.msk [vmem:[#allocation6 + $0x60] sm:$0xff] %vm1005_vm2, %v1892_v36  ;;  %v1907_v39 = vadd.f32 %v13024_v28, %v11878_v4 }
 0x154   :  { %1927 = vst.msk [vmem:[#allocation3 + $0x78] sm:$0xff] %vm114_vm0, %v14233_v38  ;;  %v1901_v16 = vpop.f32.mrf.mxu1 }
 0x155   :  { %v14235_v42 = vpop.eup %14234  ;;  %1954 = vst.msk [vmem:[#allocation6 + $0x78] sm:$0xff] %vm1005_vm2, %v1907_v39  ;;  %v1902_v52 = vadd.f32 %v11878_v4, %v1901_v16 }
 0x156   :  { %1926 = vst.msk [vmem:[#allocation3 + $0x70] sm:$0xff] %vm114_vm0, %v14235_v42 }
 0x157   :  { %1953 = vst.msk [vmem:[#allocation6 + $0x70] sm:$0xff] %vm1005_vm2, %v1902_v52 }
 0x176   :  { %s14070_s6 = spop %14069 }
 0x177   :  { %s1966_s17 = sadd.f32 1e-05, %s14070_s6 }
 0x179   :  { %v1967_v48 = vstv %s1966_s17 }
 0x17a   :  { %14236 = vrcp.f32 %v1967_v48 }
 0x187   :  { %v14237_v3 = vpop.eup %14236 }
 0x188   :  { %14071 = vpush %v14237_v3 }
 0x189   :  { %14073 = vpush %v1983_v0  ;;  %v2055_v0 = vsel %vm114_vm0, %v15341_v63, 0.0 }
 0x18a   :  { %2056 = vadd.xlane.f32.xlu1 %v2055_v0 }
 0x18e   :  { %2096 = vadd.xlane.f32.xlu1 %v2095_v9  ;;  %v15457_v9 = vld [vmem:[%s18056_s25 + $0x28] sm:$0xff] }
 0x1b7   :  { %v1997_v48 = vpop.xlane.xlu1 %1996 }
 0x1b8   :  { %v1998_v50 = vrot.slane %v1997_v48, 4 }
 0x1b9   :  { %s14072_s2 = spop %14071 }
 0x1ba   :  { %v1970_v43 = vstv %s14072_s2  ;;  %s14074_s20 = spop %14073  ;;  %v1999_v51 = vadd.f32 %v1998_v50, %v1997_v48 }
 0x1bb   :  { %v1971_v46 = vmul.f32 %v14392_v44, %v1970_v43  ;;  %s1985_s1 = sadd.f32 1e-05, %s14074_s20  ;;  %v2017_v7 = vpop.xlane.xlu1 %2016  ;;  %v2162_v43 = vld [vmem:[#allocation3] sm:$0xff] }
 0x1bc   :  { %v2237_v20 = vpop.f32.mrf.mxu0  ;;  %v2000_v53 = vrot.slane %v1999_v51, 2  ;;  %v2018_v8 = vrot.slane %v2017_v7, 4 }
 0x1bd   :  { %v15257_v23 = vadd.f32 %v15248_v61, %v2237_v20  ;;  %1972 = vst.msk [vmem:[#allocation7] sm:$0xff] %vm114_vm0, %v1971_v46  ;;  %v1986_v47 = vstv %s1985_s1  ;;  %v2037_v15 = vpop.xlane.xlu0 %2036  ;;  %v2321_v46 = vsub.f32 1.0, %v2162_v43 }
 0x1be   :  { %v13035_v26 = vpop.f32.mrf.mxu0  ;;  %14238 = vrcp.f32 %v1986_v47  ;;  %v2001_v24 = vadd.f32 %v2000_v53, %v1999_v51  ;;  %v2019_v4 = vadd.f32 %v2018_v8, %v2017_v7  ;;  %v2038_v10 = vrot.slane %v2037_v15, 4  ;;  %v2807_v8 = vld [vmem:[#allocation2 + $0x78] sm:$0xff] }
 0x1bf   :  { %v2243_v30 = vmul.f32 %v2242_v49, %v15257_v23  ;;  %v2322_v50 = vmul.f32 %v2321_v46, %v15257_v23 }
 0x1c0   :  { %v2002_v54 = vrot.slane %v2001_v24, 1  ;;  %v2020_v11 = vrot.slane %v2019_v4, 2  ;;  %v2039_v36 = vadd.f32 %v2038_v10, %v2037_v15 }
 0x1c1   :  { %v2244_v18 = vadd.f32 %v2243_v30, %v15261_v25 }
 0x1c2   :  { %v2003_v56 = vadd.f32 %v2002_v54, %v2001_v24  ;;  %v2021_v12 = vadd.f32 %v2020_v11, %v2019_v4  ;;  %v2040_v52 = vrot.slane %v2039_v36, 2  ;;  %v15429_v4 = vld [vmem:[%s18125_s11 + $0x20] sm:$0xff]  ;;  %v15433_v11 = vmul.f32 0.0, %v2807_v8 }
 0x1c3   :  { %13041 = vmatmul.mubr.msk.f32.vlgmr.msra.gmra.mxu1 %vm114_vm0, %v2244_v18 }
 0x1c4   :  { %v15278_v35 = vpop.f32.mrf.mxu0  ;;  %13055 = vmatpush3.msra.mxu1 %v15270_v31  ;;  %13062 = vmatprep.mubr.msk.f32.mxu1 %vm14436_vm1, %v18073_v21  ;;  %v2022_v2 = vrot.slane %v2021_v12, 1  ;;  %v2041_v20 = vadd.f32 %v2040_v52, %v2039_v36 }
 0x1c5   :  { %13056 = vmatprep.subr.mxu1 %v18073_v21 }
 0x1c6   :  { %v13053_v38 = vpop.f32.mrf.mxu0  ;;  %13057 = vmatpush3.msra.mxu1 %v15276_v34  ;;  %v2023_v13 = vadd.f32 %v2022_v2, %v2021_v12  ;;  %v2042_v26 = vrot.slane %v2041_v20, 1  ;;  %v15438_v12 = vld [vmem:[%s18056_s25 + $0x38] sm:$0xff] }
 0x1c7   :  { %13058 = vmatprep.subr.mxu1 %v18073_v21  ;;  %v15368_v38 = vld [vmem:[%s18130_s8] ss:$0 sm:$0xff] }
 0x1c8   :  { %13059 = vmatpush3.msra.mxu1 %v15287_v37  ;;  %v2043_v30 = vadd.f32 %v2042_v26, %v2041_v20  ;;  %v15478_v26 = vld [vmem:[%s18127_s5 + $0x18] sm:$0xff] }
 0x1c9   :  { %13060 = vmatprep.subr.mxu1 %v18073_v21 }
 0x1ca   :  { %13061 = vmatpush3.msra.mxu1 %v15294_v40 }
 0x1cb   :  { %13063 = vmatmul.mubr.msk.f32.vlgmr.msra.gmra.mxu1 %vm1005_vm2, %v15034_v62  ;;  %13076 = vmatprep.subr.mxu1 %v18073_v21  ;;  %v14239_v57 = vpop.eup %14238 }
 0x1cc   :  { %v15302_v42 = vpop.f32.mrf.mxu0  ;;  %13080 = vmatprep.mubr.msk.f32.mxu1 %vm14436_vm1, %v18073_v21  ;;  %14075 = vpush %v14239_v57  ;;  %13077 = vmatpush3.msra.mxu1 %v15313_v58 }
 0x1cd   :  { %14077 = vpush %v2003_v56  ;;  %13078 = vmatprep.subr.mxu1 %v18073_v21 }
 0x1ce   :  { %v13075_v22 = vpop.f32.mrf.mxu0  ;;  %13079 = vmatpush3.msra.mxu1 %v15326_v29 }
 0x1cf   :  { %13083 = vmatprep.subr.mxu1 %v18073_v21 }
 0x1fd   :  { %s14076_s30 = spop %14075 }
 0x1fe   :  { %v1989_v33 = vstv %s14076_s30  ;;  %s14078_s10 = spop %14077 }
 0x1ff   :  { %v1990_v3 = vmul.f32 %v14393_v1, %v1989_v33  ;;  %s2005_s7 = sadd.f32 1e-05, %s14078_s10 }
 0x201   :  { %1992 = vst.msk [vmem:[#allocation7 + $0x8] sm:$0xff] %vm114_vm0, %v1990_v3  ;;  %v2006_v5 = vstv %s2005_s7  ;;  %s14437_s7 = smov [#allocation9]  }
 0x202   :  { %14240 = vrcp.f32 %v2006_v5 }
 0x20f   :  { %v14241_v41 = vpop.eup %14240 }
 0x210   :  { %14079 = vpush %v14241_v41 }
 0x211   :  { %14081 = vpush %v2023_v13  ;;  %v15447_v13 = vld [vmem:[%s18056_s25 + $0x30] sm:$0xff] }
 0x213   :  { %v2057_v6 = vpop.xlane.xlu1 %2056 }
 0x214   :  { %v2058_v10 = vrot.slane %v2057_v6, 4 }
 0x216   :  { %v2059_v36 = vadd.f32 %v2058_v10, %v2057_v6 }
 0x241   :  { %s14080_s13 = spop %14079 }
 0x242   :  { %v2009_v28 = vstv %s14080_s13  ;;  %s14082_s0 = spop %14081 }
 0x243   :  { %v2010_v39 = vmul.f32 %v15194_v55, %v2009_v28  ;;  %s2025_s9 = sadd.f32 1e-05, %s14082_s0  ;;  %v2327_v55 = vsub.f32 %v15253_v19, %v15257_v23  ;;  %v15384_v23 = vld [vmem:[%s18046_s15 + $0x8] sm:$0xff]  ;;  %v2060_v28 = vrot.slane %v2059_v36, 2 }
 0x245   :  { %2012 = vst.msk [vmem:[#allocation7 + $0x10] sm:$0xff] %vm114_vm0, %v2010_v39  ;;  %v2026_v16 = vstv %s2025_s9  ;;  %v2328_v53 = vand.u32 2147483647, %v2327_v55  ;;  %v2061_v39 = vadd.f32 %v2060_v28, %v2059_v36 }
 0x246   :  { %14242 = vrcp.f32 %v2026_v16 }
 0x247   :  { %v2062_v16 = vrot.slane %v2061_v39, 1 }
 0x249   :  { %v2063_v52 = vadd.f32 %v2062_v16, %v2061_v39  ;;  %v2637_v39 = vld [vmem:[#allocation5] sm:$0xff] }
 0x253   :  { %v14243_v18 = vpop.eup %14242 }
 0x254   :  { %14083 = vpush %v14243_v18  ;;  %v15485_v18 = vld [vmem:[%s18127_s5 + $0x10] sm:$0xff] }
 0x255   :  { %14085 = vpush %v2043_v30  ;;  %v2077_v30 = vpop.xlane.xlu0 %2076 }
 0x283   :  { %v2316_v22 = vpop.f32.mrf.mxu1 }
 0x284   :  { %v2317_v44 = vadd.f32 %v15368_v38, %v2316_v22 }
 0x285   :  { %v13042_v47 = vpop.f32.mrf.mxu1  ;;  %s14084_s4 = spop %14083 }
 0x286   :  { %v2320_v48 = vmul.f32 %v2317_v44, %v2162_v43  ;;  %v2329_v51 = vsub.f32 %v15253_v19, %v2317_v44  ;;  %v2029_v2 = vstv %s14084_s4  ;;  %s14086_s3 = spop %14085  ;;  %v2078_v43 = vrot.slane %v2077_v30, 4 }
 0x287   :  { %v2030_v41 = vmul.f32 %v15204_v27, %v2029_v2  ;;  %s2045_s17 = sadd.f32 1e-05, %s14086_s3  ;;  %v15465_v27 = vld [vmem:[%s18056_s25 + $0x20] sm:$0xff] }
 0x288   :  { %v2323_v24 = vadd.f32 %v2322_v50, %v2320_v48  ;;  %v2330_v54 = vand.u32 2147483647, %v2329_v51  ;;  %v2079_v55 = vadd.f32 %v2078_v43, %v2077_v30 }
 0x289   :  { %2032 = vst.msk [vmem:[#allocation7 + $0x18] sm:$0xff] %vm114_vm0, %v2030_v41  ;;  %v2046_v15 = vstv %s2045_s17  ;;  %v2561_v41 = vld [vmem:[#allocation4] sm:$0xff] }
 0x28a   :  { %v2324_v56 = vmul.f32 %v2323_v24, %v2242_v49  ;;  %v2331_v57 = vadd.f32 %v2330_v54, %v2328_v53  ;;  %v2332_v33 = vsub.f32 %v15253_v19, %v2323_v24  ;;  %v15403_v19 = vld [vmem:[%s18125_s11 + $0x38] sm:$0xff]  ;;  %v15413_v49 = vld [vmem:[%s18125_s11 + $0x30] sm:$0xff]  ;;  %14244 = vrcp.f32 %v2046_v15  ;;  %v2097_v24 = vpop.xlane.xlu1 %2096 }
 0x28b   :  { %v15378_v0 = vpop.f32.mrf.mxu1  ;;  %v2080_v44 = vrot.slane %v2079_v55, 2  ;;  %v2098_v54 = vrot.slane %v2097_v24, 4 }
 0x28c   :  { %v2325_v1 = vadd.f32 %v2324_v56, %v15261_v25  ;;  %v2333_v3 = vand.u32 2147483647, %v2332_v33  ;;  %v15422_v25 = vld [vmem:[%s18125_s11 + $0x28] sm:$0xff] }
 0x28d   :  { %v13064_v5 = vpop.f32.mrf.mxu1  ;;  %v2081_v46 = vadd.f32 %v2080_v44, %v2079_v55  ;;  %v2099_v56 = vadd.f32 %v2098_v54, %v2097_v24  ;;  %v15505_v55 = vld [vmem:[%s18129_s21 + $0x38] sm:$0xff]  ;;  %v15528_v24 = vld [vmem:[%s18055_s24 + $0x30] sm:$0xff] }
 0x28e   :  { %2326 = vst.msk [vmem:[#allocation8] sm:$0xff] %vm114_vm0, %v2325_v1  ;;  %v15387_v7 = vadd.f32 %v2333_v3, %v2331_v57  ;;  %13081 = vmatmul.mubr.msk.f32.vlgmr.msra.gmra.mxu1 %vm114_vm0, %v2325_v1  ;;  %13095 = vmatmul.mubr.msk.f32.vlgmr.msra.gmra.mxu0 %vm114_vm0, %v2325_v1 }
 0x28f   :  { %13084 = vmatpush3.msra.mxu1 %v15384_v23  ;;  %13087 = vmatprep.mubr.msk.f32.mxu1 %vm14436_vm1, %v18073_v21  ;;  %v2082_v47 = vrot.slane %v2081_v46, 1  ;;  %v2100_v3 = vrot.slane %v2099_v56, 2 }
 0x290   :  { %13085 = vmatprep.subr.mxu1 %v18073_v21  ;;  %13112 = vmatprep.mubr.msk.f32.mxu0 %vm14436_vm1, %v18073_v21 }
 0x291   :  { %13086 = vmatpush3.msra.mxu1 %v15394_v17  ;;  %13109 = vmatpush3.msra.mxu0 %v15478_v26  ;;  %v2083_v48 = vadd.f32 %v2082_v47, %v2081_v46  ;;  %v2101_v5 = vadd.f32 %v2100_v3, %v2099_v56  ;;  %v15546_v3 = vld [vmem:[%s18055_s24 + $0x20] sm:$0xff] }
 0x292   :  { %13097 = vmatprep.subr.mxu1 %v18073_v21  ;;  %13088 = vmatmul.mubr.msk.f32.vlgmr.msra.gmra.mxu1 %vm114_vm0, %v2325_v1 }
 0x293   :  { %13098 = vmatpush3.msra.mxu1 %v15403_v19  ;;  %13105 = vmatprep.mubr.msk.f32.mxu1 %vm14436_vm1, %v18073_v21  ;;  %v2102_v8 = vrot.slane %v2101_v5, 1 }
 0x294   :  { %13099 = vmatprep.subr.mxu1 %v18073_v21  ;;  %13110 = vmatprep.subr.mxu0 %v18073_v21 }
 0x295   :  { %13100 = vmatpush3.msra.mxu1 %v15413_v49  ;;  %13111 = vmatpush3.msra.mxu0 %v15485_v18  ;;  %v2103_v2 = vadd.f32 %v2102_v8, %v2101_v5 }
 0x296   :  { %13101 = vmatprep.subr.mxu1 %v18073_v21  ;;  %13115 = vmatprep.subr.mxu0 %v18073_v21 }
 0x297   :  { %13102 = vmatpush3.msra.mxu1 %v15422_v25  ;;  %v14245_v20 = vpop.eup %14244 }
 0x298   :  { %13103 = vmatprep.subr.mxu1 %v18073_v21  ;;  %14087 = vpush %v14245_v20 }
 0x299   :  { %13104 = vmatpush3.msra.mxu1 %v15429_v4  ;;  %14089 = vpush %v2063_v52 }
 0x29a   :  { %13106 = vmatmul.mubr.msk.f32.vlgmr.msra.gmra.mxu1 %vm1005_vm2, %v15433_v11  ;;  %13126 = vmatprep.subr.mxu1 %v18073_v21 }
 0x29b   :  { %13127 = vmatpush3.msra.mxu1 %v15438_v12  ;;  %13134 = vmatprep.mubr.msk.f32.mxu1 %vm14436_vm1, %v18073_v21 }
 0x29c   :  { %13128 = vmatprep.subr.mxu1 %v18073_v21 }
 0x29d   :  { %13129 = vmatpush3.msra.mxu1 %v15447_v13 }
 0x29e   :  { %13130 = vmatprep.subr.mxu1 %v18073_v21 }
 0x29f   :  { %13131 = vmatpush3.msra.mxu1 %v15457_v9 }
 0x2a0   :  { %13132 = vmatprep.subr.mxu1 %v18073_v21 }
 0x2a1   :  { %13133 = vmatpush3.msra.mxu1 %v15465_v27 }
 0x2a2   :  { %13135 = vmatmul.mubr.msk.f32.vlgmr.msra.gmra.mxu1 %vm1005_vm2, %v15433_v11  ;;  %13148 = vmatprep.subr.mxu1 %v18073_v21 }
 0x2a3   :  { %13152 = vmatprep.mubr.msk.f32.mxu1 %vm14436_vm1, %v18073_v21 }
 0x2c9   :  { %s14088_s22 = spop %14087 }
 0x2ca   :  { %s14090_s18 = spop %14089  ;;  %v2049_v51 = vstv %s14088_s22 }
 0x2cb   :  { %s2065_s13 = sadd.f32 1e-05, %s14090_s18  ;;  %v2050_v53 = vmul.f32 %v15213_v32, %v2049_v51 }
 0x2cd   :  { %v2066_v22 = vstv %s2065_s13  ;;  %2052 = vst.msk [vmem:[#allocation7 + $0x20] sm:$0xff] %vm114_vm0, %v2050_v53  ;;  %v15522_v53 = vld [vmem:[%s18055_s24 + $0x38] sm:$0xff] }
 0x2ce   :  { %14246 = vrcp.f32 %v2066_v22  ;;  %v15500_v22 = vld [vmem:[%s18128_s19 + $0x1] ss:$0 sm:$0xff] }
 0x2db   :  { %v14247_v50 = vpop.eup %14246 }
 0x2dc   :  { %14091 = vpush %v14247_v50 }
 0x2dd   :  { %14093 = vpush %v2083_v48 }
 0x30d   :  { %s14092_s4 = spop %14091 }
 0x30e   :  { %v2069_v57 = vstv %s14092_s4  ;;  %s14094_s3 = spop %14093 }
 0x30f   :  { %v2070_v33 = vmul.f32 %v15341_v63, %v2069_v57  ;;  %s2085_s30 = sadd.f32 1e-05, %s14094_s3 }
 0x311   :  { %2072 = vst.msk [vmem:[#allocation7 + $0x28] sm:$0xff] %vm114_vm0, %v2070_v33  ;;  %v2086_v1 = vstv %s2085_s30  ;;  %v15539_v33 = vld [vmem:[%s18055_s24 + $0x28] sm:$0xff] }
 0x312   :  { %14248 = vrcp.f32 %v2086_v1 }
 0x31f   :  { %v14249_v32 = vpop.eup %14248 }
 0x320   :  { %14095 = vpush %v14249_v32 }
 0x321   :  { %14097 = vpush %v2103_v2  ;;  %v15554_v2 = vld [vmem:[%s18057_s26 + $0x38] sm:$0xff] }
 0x34e   :  { %v2631_v6 = vpop.f32.mrf.mxu1  ;;  %v15493_v15 = vpop.f32.mrf.mxu0 }
 0x34f   :  { %v2632_v10 = vadd.f32 %v2631_v6, %v2561_v41  ;;  %v15564_v41 = vld [vmem:[%s18057_s26 + $0x30] sm:$0xff]  ;;  %v15573_v6 = vld [vmem:[%s18057_s26 + $0x28] sm:$0xff] }
 0x350   :  { %v13082_v36 = vpop.f32.mrf.mxu1  ;;  %v13096_v28 = vpop.f32.mrf.mxu0 }
 0x351   :  { %v2781_v63 = vadd.f32 %v2632_v10, %v15278_v35  ;;  %v2890_v35 = vsub.f32 1.0, %v15357_v45  ;;  %s14096_s13 = spop %14095  ;;  %v15580_v36 = vld [vmem:[%s18057_s26 + $0x20] sm:$0xff] }
 0x352   :  { %v2704_v16 = vpop.f32.mrf.mxu1  ;;  %v2089_v5 = vstv %s14096_s13  ;;  %s14098_s4 = spop %14097  ;;  %v15585_v28 = vld [vmem:[%s18054_s23] ss:$0 sm:$0xff] }
 0x353   :  { %v11911_v52 = vmul.f32 -1.442695, %v2781_v63  ;;  %v2705_v20 = vadd.f32 %v2704_v16, %v2637_v39  ;;  %v2090_v8 = vmul.f32 %v15352_v14, %v2089_v5  ;;  %s2105_s3 = sadd.f32 1e-05, %s14098_s4  ;;  %v2556_v39 = vadd.f32 %v15585_v28, %v15302_v42 }
 0x354   :  { %v13089_v30 = vpop.f32.mrf.mxu1 }
 0x355   :  { %14250 = vpow2.f32 %v11911_v52  ;;  %v2788_v43 = vadd.f32 %v2705_v20, %v15378_v0  ;;  %v15513_v0 = vmul.f32 %v15505_v55, %v15357_v45  ;;  %2092 = vst.msk [vmem:[#allocation7 + $0x30] sm:$0xff] %vm114_vm0, %v2090_v8  ;;  %v2106_v32 = vstv %s2105_s3  ;;  %v2710_v52 = vld [vmem:[#allocation6] sm:$0xff]  ;;  %v15625_v8 = vld [vmem:[%s18047_s16 + $0x10] sm:$0xff] }
 0x356   :  { %v2778_v20 = vadd.f32 %v15493_v15, %v2710_v52  ;;  %v15610_v15 = vld [vmem:[%s18047_s16 + $0x18] sm:$0xff] }
 0x357   :  { %v11912_v46 = vmul.f32 -1.442695, %v2788_v43 }
 0x359   :  { %14252 = vpow2.f32 %v11912_v46 }
 0x35a   :  { %v2885_v44 = vpop.f32.mrf.mxu1 }
 0x35b   :  { %v15509_v47 = vadd.f32 %v15500_v22, %v2885_v44 }
 0x35c   :  { %v13107_v48 = vpop.f32.mrf.mxu1 }
 0x35d   :  { %v2891_v50 = vmul.f32 %v2890_v35, %v15509_v47 }
 0x35f   :  { %v2892_v51 = vadd.f32 %v2891_v50, %v15513_v0 }
 0x361   :  { %13113 = vmatmul.mubr.msk.f32.vlgmr.msra.gmra.mxu0 %vm114_vm0, %v2892_v51 }
 0x362   :  { %v14251_v54 = vpop.eup %14250  ;;  %13116 = vmatpush3.msra.mxu0 %v15522_v53  ;;  %v15531_v56 = vpop.f32.mrf.mxu1  ;;  %13123 = vmatprep.mubr.msk.f32.mxu0 %vm14436_vm1, %v18073_v21 }
 0x363   :  { %v2785_v57 = vadd.f32 1.0, %v14251_v54  ;;  %13117 = vmatprep.subr.mxu0 %v18073_v21 }
 0x364   :  { %13118 = vmatpush3.msra.mxu0 %v15528_v24  ;;  %v13136_v1 = vpop.f32.mrf.mxu1 }
 0x365   :  { %14254 = vrcp.f32 %v2785_v57  ;;  %13119 = vmatprep.subr.mxu0 %v18073_v21  ;;  %v15604_v57 = vld [vmem:[%s18045_s14 + $0x18] sm:$0xff] }
 0x366   :  { %13120 = vmatpush3.msra.mxu0 %v15539_v33  ;;  %14256 = vrcp.f32 %v2106_v32  ;;  %v14253_v10 = vpop.eup %14252  ;;  %13149 = vmatpush3.msra.mxu1 %v15604_v57  ;;  %v15634_v32 = vld [vmem:[%s18130_s8 + $0x1] ss:$0 sm:$0xff] }
 0x367   :  { %13121 = vmatprep.subr.mxu0 %v18073_v21  ;;  %v2792_v63 = vadd.f32 1.0, %v14253_v10  ;;  %13150 = vmatprep.subr.mxu1 %v18073_v21  ;;  %v2809_v10 = vld [vmem:[#allocation3 + $0x78] sm:$0xff] }
 0x368   :  { %13122 = vmatpush3.msra.mxu0 %v15546_v3  ;;  %v2970_v52 = vsub.f32 1.0, %v2809_v10 }
 0x369   :  { %13124 = vmatmul.mubr.msk.f32.vlgmr.msra.gmra.mxu0 %vm1005_vm2, %v15433_v11  ;;  %13137 = vmatprep.subr.mxu0 %v18073_v21  ;;  %14258 = vrcp.f32 %v2792_v63 }
 0x36a   :  { %13138 = vmatpush3.msra.mxu0 %v15554_v2  ;;  %13145 = vmatprep.mubr.msk.f32.mxu0 %vm14436_vm1, %v18073_v21 }
 0x36b   :  { %13139 = vmatprep.subr.mxu0 %v18073_v21 }
 0x36c   :  { %13140 = vmatpush3.msra.mxu0 %v15564_v41 }
 0x36d   :  { %13141 = vmatprep.subr.mxu0 %v18073_v21 }
 0x36e   :  { %13142 = vmatpush3.msra.mxu0 %v15573_v6 }
 0x36f   :  { %13143 = vmatprep.subr.mxu0 %v18073_v21 }
 0x370   :  { %13144 = vmatpush3.msra.mxu0 %v15580_v36 }
 0x371   :  { %13146 = vmatmul.mubr.msk.f32.vlgmr.msra.gmra.mxu0 %vm1005_vm2, %v15433_v11  ;;  %13162 = vmatprep.subr.mxu0 %v18073_v21 }
 0x372   :  { %v14255_v16 = vpop.eup %14254  ;;  %13166 = vmatprep.mubr.msk.f32.mxu0 %vm14436_vm1, %v18073_v21  ;;  %13163 = vmatpush3.msra.mxu0 %v15610_v15 }
 0x373   :  { %v2795_v30 = vmul.f32 %v14255_v16, %v2556_v39  ;;  %v14257_v44 = vpop.eup %14256  ;;  %13164 = vmatprep.subr.mxu0 %v18073_v21  ;;  %v2977_v39 = vsub.f32 %v15505_v55, %v15509_v47 }
 0x374   :  { %14099 = vpush %v14257_v44  ;;  %13165 = vmatpush3.msra.mxu0 %v15625_v8 }
 0x375   :  { %v2796_v43 = vadd.f32 %v2795_v30, %v2778_v20  ;;  %13180 = vmatprep.subr.mxu0 %v18073_v21 }
 0x376   :  { %v14259_v46 = vpop.eup %14258 }
 0x377   :  { %14260 = vtanh.f32 %v2796_v43  ;;  %v2798_v42 = vsub.f32 1.0, %v14259_v46  ;;  %v2800_v51 = vmul.f32 %v14259_v46, %v15034_v62  ;;  %v15617_v62 = vld [vmem:[%s18045_s14 + $0x10] sm:$0xff]  ;;  %v2971_v43 = vmul.f32 %v2970_v52, %v15509_v47  ;;  %v15650_v47 = vld [vmem:[%s18046_s15 + $0x18] sm:$0xff] }
 0x378   :  { %13151 = vmatpush3.msra.mxu1 %v15617_v62  ;;  %v2978_v46 = vand.u32 2147483647, %v2977_v39 }
 0x379   :  { %13155 = vmatprep.subr.mxu1 %v18073_v21 }
 0x384   :  { %v14261_v48 = vpop.eup %14260 }
 0x385   :  { %v2799_v50 = vmul.f32 %v14261_v48, %v2798_v42 }
 0x387   :  { %v15599_v54 = vadd.f32 %v2800_v51, %v2799_v50 }
 0x3a5   :  { %s14100_s0 = spop %14099 }
 0x3a6   :  { %v2109_v1 = vstv %s14100_s0 }
 0x3a7   :  { %v2110_v5 = vmul.f32 %v15357_v45, %v2109_v1 }
 0x3a9   :  { %2112 = vst.msk [vmem:[#allocation7 + $0x38] sm:$0xff] %vm114_vm0, %v2110_v5 }
 0x421   :  { %v2965_v63 = vpop.f32.mrf.mxu0 }
 0x422   :  { %v2966_v16 = vadd.f32 %v15634_v32, %v2965_v63 }
 0x423   :  { %v13114_v20 = vpop.f32.mrf.mxu0 }
 0x424   :  { %v2969_v30 = vmul.f32 %v2966_v16, %v2809_v10  ;;  %v2979_v44 = vsub.f32 %v15505_v55, %v2966_v16  ;;  %v2160_v10 = vld [vmem:[#allocation7] sm:$0xff]  ;;  %v2805_v16 = vld [vmem:[#allocation7 + $0x38] sm:$0xff] }
 0x426   :  { %v2972_v42 = vadd.f32 %v2971_v43, %v2969_v30  ;;  %v2980_v48 = vand.u32 2147483647, %v2979_v44  ;;  %v15691_v43 = vld [vmem:[%s18125_s11 + $0x8] sm:$0xff] }
 0x428   :  { %v2973_v50 = vmul.f32 %v2972_v42, %v2890_v35  ;;  %v2981_v51 = vadd.f32 %v2980_v48, %v2978_v46  ;;  %v2982_v1 = vsub.f32 %v15505_v55, %v2972_v42  ;;  %v15658_v55 = vld [vmem:[%s18046_s15 + $0x10] sm:$0xff]  ;;  %v18131_v35 = vmov 0.0   ;;  %v15698_v46 = vld [vmem:[%s18125_s11] sm:$0xff]  ;;  %v3466_v42 = vld [vmem:[#allocation2 + $0x8] sm:$0xff] }
 0x429   :  { %v15644_v5 = vpop.f32.mrf.mxu0  ;;  %v15703_v48 = vmul.f32 %v3466_v42, %v15599_v54 }
 0x42a   :  { %v2974_v63 = vadd.f32 %v2973_v50, %v15513_v0  ;;  %v2983_v21 = vand.u32 2147483647, %v2982_v1  ;;  %v2335_v0 = vmul.f32 %v15387_v7, %v2160_v10  ;;  %v15678_v7 = vld [vmem:[%s18125_s11 + $0x10] sm:$0xff]  ;;  %v3294_v1 = vld [vmem:[#allocation5 + $0x78] sm:$0xff] }
 0x42b   :  { %v13125_v39 = vpop.f32.mrf.mxu0 }
 0x42c   :  { %2976 = vst.msk [vmem:[#allocation8 + $0x78] sm:$0xff] %vm114_vm0, %v2974_v63  ;;  %v2984_v45 = vadd.f32 %v2983_v21, %v2981_v51  ;;  %13153 = vmatmul.mubr.msk.f32.vlgmr.msra.gmra.mxu1 %vm114_vm0, %v2974_v63  ;;  %13167 = vmatmul.mubr.msk.f32.vlgmr.msra.gmra.mxu0 %vm114_vm0, %v2974_v63  ;;  %v15668_v21 = vld [vmem:[%s18125_s11 + $0x18] sm:$0xff] }
 0x42d   :  { %13156 = vmatpush3.msra.mxu1 %v15650_v47  ;;  %13159 = vmatprep.mubr.msk.f32.mxu1 %vm14436_vm1, %v18131_v35 }
 0x42e   :  { %13157 = vmatprep.subr.mxu1 %v18131_v35  ;;  %13184 = vmatprep.mubr.msk.f32.mxu0 %vm14436_vm1, %v18131_v35  ;;  %v2985_v52 = vmul.f32 %v2984_v45, %v2805_v16  ;;  %v15747_v45 = vld [vmem:[%s18124_s29 + $0x8] sm:$0xff] }
 0x42f   :  { %13158 = vmatpush3.msra.mxu1 %v15658_v55 }
 0x430   :  { %13169 = vmatprep.subr.mxu1 %v18131_v35  ;;  %13160 = vmatmul.mubr.msk.f32.vlgmr.msra.gmra.mxu1 %vm114_vm0, %v2974_v63  ;;  %v15680_v20 = vadd.f32 %v2985_v52, %v2335_v0  ;;  %v15753_v52 = vld [vmem:[%s18129_s21 + $0x8] sm:$0xff] }
 0x431   :  { %v15682_v30 = vpop.f32.mrf.mxu0  ;;  %13170 = vmatpush3.msra.mxu1 %v15668_v21  ;;  %13177 = vmatprep.mubr.msk.f32.mxu1 %vm14436_vm1, %v18131_v35 }
 0x432   :  { %13171 = vmatprep.subr.mxu1 %v18131_v35 }
 0x433   :  { %v13147_v44 = vpop.f32.mrf.mxu0  ;;  %13172 = vmatpush3.msra.mxu1 %v15678_v7 }
 0x434   :  { %13173 = vmatprep.subr.mxu1 %v18131_v35 }
 0x435   :  { %13174 = vmatpush3.msra.mxu1 %v15691_v43 }
 0x436   :  { %13175 = vmatprep.subr.mxu1 %v18131_v35 }
 0x437   :  { %13176 = vmatpush3.msra.mxu1 %v15698_v46 }
 0x438   :  { %13178 = vmatmul.mubr.msk.f32.vlgmr.msra.gmra.mxu1 %vm1005_vm2, %v15703_v48  ;;  %13198 = vmatprep.subr.mxu1 %v18131_v35 }
 0x439   :  { %13199 = vmatpush3.msra.mxu1 %v15270_v31  ;;  %13206 = vmatprep.mubr.msk.f32.mxu1 %vm14436_vm1, %v18131_v35  ;;  %v15730_v31 = vld [vmem:[%s18127_s5 + $0x8] sm:$0xff] }
 0x43a   :  { %13200 = vmatprep.subr.mxu1 %v18131_v35  ;;  %13181 = vmatpush3.msra.mxu0 %v15730_v31 }
 0x43b   :  { %13201 = vmatpush3.msra.mxu1 %v15276_v34  ;;  %13182 = vmatprep.subr.mxu0 %v18131_v35  ;;  %v15737_v34 = vld [vmem:[%s18127_s5] sm:$0xff] }
 0x43c   :  { %13202 = vmatprep.subr.mxu1 %v18131_v35  ;;  %13183 = vmatpush3.msra.mxu0 %v15737_v34 }
 0x43d   :  { %13203 = vmatpush3.msra.mxu1 %v15287_v37  ;;  %13187 = vmatprep.subr.mxu0 %v18131_v35  ;;  %v3216_v37 = vld [vmem:[#allocation4 + $0x78] sm:$0xff] }
 0x43e   :  { %13204 = vmatprep.subr.mxu1 %v18131_v35 }
 0x43f   :  { %13205 = vmatpush3.msra.mxu1 %v15294_v40 }
 0x440   :  { %13207 = vmatmul.mubr.msk.f32.vlgmr.msra.gmra.mxu1 %vm1005_vm2, %v15703_v48  ;;  %13220 = vmatprep.subr.mxu1 %v18131_v35 }
 0x441   :  { %13221 = vmatpush3.msra.mxu1 %v15313_v58  ;;  %13224 = vmatprep.mubr.msk.f32.mxu1 %vm14436_vm1, %v18131_v35 }
 0x442   :  { %13222 = vmatprep.subr.mxu1 %v18131_v35 }
 0x443   :  { %13223 = vmatpush3.msra.mxu1 %v15326_v29 }
 0x444   :  { %13227 = vmatprep.subr.mxu1 %v18131_v35 }
 0x4ec   :  { %v3286_v40 = vpop.f32.mrf.mxu1  ;;  %v15741_v58 = vpop.f32.mrf.mxu0 }
 0x4ed   :  { %v3287_v29 = vadd.f32 %v3286_v40, %v3216_v37  ;;  %v15761_v40 = vmul.f32 %v15747_v45, %v15753_v52 }
 0x4ee   :  { %v13154_v54 = vpop.f32.mrf.mxu1  ;;  %v13168_v50 = vpop.f32.mrf.mxu0 }
 0x4ef   :  { %v3440_v51 = vadd.f32 %v3287_v29, %v15644_v5  ;;  %v18075_v5 = vsub.f32 1.0, %v15747_v45  ;;  %v15770_v50 = vld [vmem:[%s18055_s24 + $0x18] sm:$0xff] }
 0x4f0   :  { %v3361_v63 = vpop.f32.mrf.mxu1  ;;  %18132 = vst [vmem:[#allocation12_spill] sm:$0xff] %v15770_v50 }
 0x4f1   :  { %v11947_v10 = vmul.f32 -1.442695, %v3440_v51  ;;  %v3362_v39 = vadd.f32 %v3361_v63, %v3294_v1 }
 0x4f2   :  { %v13161_v16 = vpop.f32.mrf.mxu1 }
 0x4f3   :  { %14262 = vpow2.f32 %v11947_v10  ;;  %v3447_v0 = vadd.f32 %v3362_v39, %v15531_v56  ;;  %v15787_v10 = vld [vmem:[%s18055_s24 + $0x8] sm:$0xff]  ;;  %v15794_v16 = vld [vmem:[%s18055_s24] sm:$0xff] }
 0x4f4   :  { %18134 = vst [vmem:[#allocation14_spill] sm:$0xff] %v15787_v10  ;;  %18135 = vst [vmem:[#allocation15_spill] sm:$0xff] %v15794_v16 }
 0x4f5   :  { %v11948_v42 = vmul.f32 -1.442695, %v3447_v0  ;;  %v15801_v0 = vld [vmem:[%s18057_s26 + $0x18] sm:$0xff] }
 0x4f6   :  { %18136 = vst [vmem:[#allocation16_spill] sm:$0xff] %v15801_v0 }
 0x4f7   :  { %14264 = vpow2.f32 %v11948_v42  ;;  %v15819_v42 = vld [vmem:[%s18057_s26 + $0x8] sm:$0xff] }
 0x4f8   :  { %v3543_v44 = vpop.f32.mrf.mxu1  ;;  %18138 = vst [vmem:[#allocation18_spill] sm:$0xff] %v15819_v42 }
 0x4f9   :  { %v15757_v37 = vadd.f32 %v15248_v61, %v3543_v44  ;;  %v15776_v61 = vld [vmem:[%s18055_s24 + $0x10] sm:$0xff] }
 0x4fa   :  { %v13179_v29 = vpop.f32.mrf.mxu1  ;;  %18133 = vst [vmem:[#allocation13_spill] sm:$0xff] %v15776_v61  ;;  %v15810_v44 = vld [vmem:[%s18057_s26 + $0x10] sm:$0xff] }
 0x4fb   :  { %v3549_v56 = vmul.f32 %v18075_v5, %v15757_v37  ;;  %18137 = vst [vmem:[#allocation17_spill] sm:$0xff] %v15810_v44  ;;  %v3369_v5 = vld [vmem:[#allocation6 + $0x78] sm:$0xff] }
 0x4fd   :  { %v3550_v54 = vadd.f32 %v3549_v56, %v15761_v40  ;;  %v15826_v56 = vld [vmem:[%s18057_s26] sm:$0xff] }
 0x4fe   :  { %18139 = vst [vmem:[#allocation19_spill] sm:$0xff] %v15826_v56 }
 0x4ff   :  { %13185 = vmatmul.mubr.msk.f32.vlgmr.msra.gmra.mxu0 %vm114_vm0, %v3550_v54  ;;  %v15831_v54 = vld [vmem:[%s18054_s23 + $0x1] ss:$0 sm:$0xff] }
 0x500   :  { %v14263_v51 = vpop.eup %14262  ;;  %13188 = vmatpush3.msra.mxu0 %v15770_v50  ;;  %v15779_v1 = vpop.f32.mrf.mxu1  ;;  %13195 = vmatprep.mubr.msk.f32.mxu0 %vm14436_vm1, %v18131_v35  ;;  %18140 = vst [vmem:[#allocation20_spill] sm:$0xff] %v15831_v54 }
 0x501   :  { %v3444_v63 = vadd.f32 1.0, %v14263_v51  ;;  %13189 = vmatprep.subr.mxu0 %v18131_v35 }
 0x502   :  { %13190 = vmatpush3.msra.mxu0 %v15776_v61  ;;  %v13208_v39 = vpop.f32.mrf.mxu1 }
 0x503   :  { %14266 = vrcp.f32 %v3444_v63  ;;  %13191 = vmatprep.subr.mxu0 %v18131_v35  ;;  %v3209_v63 = vadd.f32 %v15831_v54, %v15682_v30 }
 0x504   :  { %13192 = vmatpush3.msra.mxu0 %v15787_v10  ;;  %v14265_v29 = vpop.eup %14264  ;;  %v3468_v10 = vld [vmem:[#allocation3 + $0x8] sm:$0xff] }
 0x505   :  { %13193 = vmatprep.subr.mxu0 %v18131_v35  ;;  %v3451_v51 = vadd.f32 1.0, %v14265_v29  ;;  %v3437_v29 = vadd.f32 %v15741_v58, %v3369_v5  ;;  %v3634_v58 = vsub.f32 %v15753_v52, %v15757_v37 }
 0x506   :  { %13194 = vmatpush3.msra.mxu0 %v15794_v16 }
 0x507   :  { %13196 = vmatmul.mubr.msk.f32.vlgmr.msra.gmra.mxu0 %vm1005_vm2, %v15703_v48  ;;  %13209 = vmatprep.subr.mxu0 %v18131_v35  ;;  %14268 = vrcp.f32 %v3451_v51  ;;  %v3627_v51 = vsub.f32 1.0, %v3468_v10 }
 0x508   :  { %13210 = vmatpush3.msra.mxu0 %v15801_v0  ;;  %13217 = vmatprep.mubr.msk.f32.mxu0 %vm14436_vm1, %v18131_v35 }
 0x509   :  { %13211 = vmatprep.subr.mxu0 %v18131_v35 }
 0x50a   :  { %13212 = vmatpush3.msra.mxu0 %v15810_v44 }
 0x50b   :  { %13213 = vmatprep.subr.mxu0 %v18131_v35 }
 0x50c   :  { %13214 = vmatpush3.msra.mxu0 %v15819_v42 }
 0x50d   :  { %13215 = vmatprep.subr.mxu0 %v18131_v35 }
 0x50e   :  { %13216 = vmatpush3.msra.mxu0 %v15826_v56 }
 0x50f   :  { %13218 = vmatmul.mubr.msk.f32.vlgmr.msra.gmra.mxu0 %vm1005_vm2, %v15703_v48  ;;  %13234 = vmatprep.subr.mxu0 %v18131_v35 }
 0x510   :  { %v14267_v39 = vpop.eup %14266  ;;  %13235 = vmatpush3.msra.mxu0 %v15319_v59  ;;  %13238 = vmatprep.mubr.msk.f32.mxu0 %vm14436_vm1, %v18131_v35 }
 0x511   :  { %v3454_v42 = vmul.f32 %v14267_v39, %v3209_v63  ;;  %13236 = vmatprep.subr.mxu0 %v18131_v35  ;;  %v3628_v63 = vmul.f32 %v3627_v51, %v15757_v37 }
 0x512   :  { %13237 = vmatpush3.msra.mxu0 %v15333_v60 }
 0x513   :  { %v3455_v30 = vadd.f32 %v3454_v42, %v3437_v29  ;;  %13252 = vmatprep.subr.mxu0 %v18131_v35  ;;  %v3635_v29 = vand.u32 2147483647, %v3634_v58 }
 0x514   :  { %v14269_v54 = vpop.eup %14268 }
 0x515   :  { %14270 = vtanh.f32 %v3455_v30  ;;  %v3457_v56 = vsub.f32 1.0, %v14269_v54  ;;  %v3459_v59 = vmul.f32 %v14269_v54, %v15433_v11  ;;  %v18141_v11 = vsub.f32 1.0, %v15747_v45 }
 0x522   :  { %v14271_v44 = vpop.eup %14270 }
 0x523   :  { %v3458_v0 = vmul.f32 %v14271_v44, %v3457_v56 }
 0x525   :  { %v3460_v16 = vadd.f32 %v3459_v59, %v3458_v0 }
 0x5bf   :  { %v3622_v61 = vpop.f32.mrf.mxu0 }
 0x5c0   :  { %v3623_v5 = vadd.f32 %v15368_v38, %v3622_v61  ;;  %v3464_v61 = vld [vmem:[#allocation7 + $0x8] sm:$0xff] }
 0x5c1   :  { %v13186_v60 = vpop.f32.mrf.mxu0 }
 0x5c2   :  { %v3626_v42 = vmul.f32 %v3623_v5, %v3468_v10  ;;  %v3636_v39 = vsub.f32 %v15753_v52, %v3623_v5 }
 0x5c4   :  { %v3629_v30 = vadd.f32 %v3628_v63, %v3626_v42  ;;  %v3637_v44 = vand.u32 2147483647, %v3636_v39 }
 0x5c6   :  { %v3630_v0 = vmul.f32 %v3629_v30, %v18141_v11  ;;  %v3638_v56 = vadd.f32 %v3637_v44, %v3635_v29  ;;  %v3639_v54 = vsub.f32 %v15753_v52, %v3629_v30 }
 0x5c7   :  { %v3714_v59 = vpop.f32.mrf.mxu0 }
 0x5c8   :  { %v3631_v50 = vadd.f32 %v3630_v0, %v15761_v40  ;;  %v3640_v38 = vand.u32 2147483647, %v3639_v54 }
 0x5c9   :  { %v13197_v60 = vpop.f32.mrf.mxu0 }
 0x5ca   :  { %3633 = vst.msk [vmem:[#allocation8 + $0x8] sm:$0xff] %vm114_vm0, %v3631_v50  ;;  %v3641_v37 = vadd.f32 %v3640_v38, %v3638_v56  ;;  %13225 = vmatmul.mubr.msk.f32.vlgmr.msra.gmra.mxu1 %vm114_vm0, %v3631_v50  ;;  %13239 = vmatmul.mubr.msk.f32.vlgmr.msra.gmra.mxu0 %vm114_vm0, %v3631_v50 }
 0x5cb   :  { %13228 = vmatpush3.msra.mxu1 %v15384_v23  ;;  %13231 = vmatprep.mubr.msk.f32.mxu1 %vm14436_vm1, %v18131_v35 }
 0x5cc   :  { %v3642_v45 = vmul.f32 %v3641_v37, %v3464_v61  ;;  %13229 = vmatprep.subr.mxu1 %v18131_v35  ;;  %13253 = vmatpush3.msra.mxu0 %v15478_v26 }
 0x5cd   :  { %13230 = vmatpush3.msra.mxu1 %v15394_v17  ;;  %13254 = vmatprep.subr.mxu0 %v18131_v35 }
 0x5ce   :  { %v15869_v52 = vadd.f32 %v3642_v45, %v15680_v20  ;;  %13241 = vmatprep.subr.mxu1 %v18131_v35  ;;  %13232 = vmatmul.mubr.msk.f32.vlgmr.msra.gmra.mxu1 %vm114_vm0, %v3631_v50 }
 0x5cf   :  { %v15873_v23 = vpop.f32.mrf.mxu0  ;;  %13242 = vmatpush3.msra.mxu1 %v15403_v19  ;;  %13249 = vmatprep.mubr.msk.f32.mxu1 %vm14436_vm1, %v18131_v35  ;;  %v4117_v19 = vld [vmem:[#allocation2 + $0x70] sm:$0xff] }
 0x5d0   :  { %13243 = vmatprep.subr.mxu1 %v18131_v35  ;;  %13255 = vmatpush3.msra.mxu0 %v15485_v18  ;;  %v15887_v26 = vmul.f32 %v4117_v19, %v3460_v16  ;;  %v3946_v18 = vld [vmem:[#allocation5 + $0x8] sm:$0xff]  ;;  %v4199_v16 = vsub.f32 1.0, %v15352_v14 }
 0x5d1   :  { %v13219_v17 = vpop.f32.mrf.mxu0  ;;  %13244 = vmatpush3.msra.mxu1 %v15413_v49  ;;  %13256 = vmatprep.mubr.msk.f32.mxu0 %vm14436_vm1, %v18131_v35  ;;  %v3869_v49 = vld [vmem:[#allocation4 + $0x8] sm:$0xff] }
 0x5d2   :  { %13245 = vmatprep.subr.mxu1 %v18131_v35  ;;  %13259 = vmatprep.subr.mxu0 %v18131_v35 }
 0x5d3   :  { %13246 = vmatpush3.msra.mxu1 %v15422_v25 }
 0x5d4   :  { %13247 = vmatprep.subr.mxu1 %v18131_v35 }
 0x5d5   :  { %13248 = vmatpush3.msra.mxu1 %v15429_v4 }
 0x5d6   :  { %13250 = vmatmul.mubr.msk.f32.vlgmr.msra.gmra.mxu1 %vm1005_vm2, %v15887_v26  ;;  %13270 = vmatprep.subr.mxu1 %v18131_v35 }
 0x5d7   :  { %13271 = vmatpush3.msra.mxu1 %v15438_v12  ;;  %13278 = vmatprep.mubr.msk.f32.mxu1 %vm14436_vm1, %v18131_v35 }
 0x5d8   :  { %13272 = vmatprep.subr.mxu1 %v18131_v35 }
 0x5d9   :  { %13273 = vmatpush3.msra.mxu1 %v15447_v13 }
 0x5da   :  { %13274 = vmatprep.subr.mxu1 %v18131_v35 }
 0x5db   :  { %13275 = vmatpush3.msra.mxu1 %v15457_v9 }
 0x5dc   :  { %13276 = vmatprep.subr.mxu1 %v18131_v35 }
 0x5dd   :  { %13277 = vmatpush3.msra.mxu1 %v15465_v27 }
 0x5de   :  { %13279 = vmatmul.mubr.msk.f32.vlgmr.msra.gmra.mxu1 %vm1005_vm2, %v15887_v26  ;;  %13292 = vmatprep.subr.mxu1 %v18131_v35 }
 0x5df   :  { %13293 = vmatpush3.msra.mxu1 %v15604_v57  ;;  %13296 = vmatprep.mubr.msk.f32.mxu1 %vm14436_vm1, %v18131_v35 }
 0x5e0   :  { %13294 = vmatprep.subr.mxu1 %v18131_v35 }
 0x5e1   :  { %13295 = vmatpush3.msra.mxu1 %v15617_v62  ;;  %v15915_v62 = vld [vmem:[%s18129_s21 + $0x30] sm:$0xff] }
 0x5e2   :  { %13299 = vmatprep.subr.mxu1 %v18131_v35  ;;  %v15921_v42 = vmul.f32 %v15915_v62, %v15352_v14 }
 0x68a   :  { %v3939_v25 = vpop.f32.mrf.mxu1  ;;  %v4087_v4 = vpop.f32.mrf.mxu0 }
 0x68b   :  { %v3940_v12 = vadd.f32 %v3939_v25, %v3869_v49 }
 0x68c   :  { %v13226_v13 = vpop.f32.mrf.mxu1  ;;  %v13240_v9 = vpop.f32.mrf.mxu0 }
 0x68d   :  { %v4091_v27 = vadd.f32 %v3940_v12, %v3714_v59  ;;  %v4119_v59 = vld [vmem:[#allocation3 + $0x70] sm:$0xff] }
 0x68e   :  { %v4013_v20 = vpop.f32.mrf.mxu1  ;;  %v4278_v37 = vsub.f32 1.0, %v4119_v59 }
 0x68f   :  { %v11959_v40 = vmul.f32 -1.442695, %v4091_v27  ;;  %v4014_v57 = vadd.f32 %v4013_v20, %v3946_v18 }
 0x690   :  { %v13233_v50 = vpop.f32.mrf.mxu1 }
 0x691   :  { %14272 = vpow2.f32 %v11959_v40  ;;  %v4098_v10 = vadd.f32 %v4014_v57, %v15779_v1 }
 0x693   :  { %v11960_v5 = vmul.f32 -1.442695, %v4098_v10 }
 0x695   :  { %14274 = vpow2.f32 %v11960_v5  ;;  %v4597_v5 = vld [vmem:[#allocation5 + $0x70] sm:$0xff] }
 0x696   :  { %v4194_v58 = vpop.f32.mrf.mxu1 }
 0x697   :  { %v4195_v51 = vadd.f32 %v15500_v22, %v4194_v58 }
 0x698   :  { %v13251_v63 = vpop.f32.mrf.mxu1 }
 0x699   :  { %v4200_v39 = vmul.f32 %v4199_v16, %v4195_v51  ;;  %v4285_v61 = vsub.f32 %v15915_v62, %v4195_v51 }
 0x69b   :  { %v4201_v1 = vadd.f32 %v4200_v39, %v15921_v42  ;;  %v4286_v19 = vand.u32 2147483647, %v4285_v61 }
 0x69d   :  { %13257 = vmatmul.mubr.msk.f32.vlgmr.msra.gmra.mxu0 %vm114_vm0, %v4201_v1  ;;  %v16041_v1 = vld [vmem:[%s18124_s29 + $0x10] sm:$0xff] }
 0x69e   :  { %v14273_v29 = vpop.eup %14272  ;;  %13260 = vmatpush3.msra.mxu0 %v15522_v53  ;;  %v15928_v30 = vpop.f32.mrf.mxu1  ;;  %13267 = vmatprep.mubr.msk.f32.mxu0 %vm14436_vm1, %v18131_v35 }
 0x69f   :  { %v4095_v22 = vadd.f32 1.0, %v14273_v29  ;;  %13261 = vmatprep.subr.mxu0 %v18131_v35 }
 0x6a0   :  { %13262 = vmatpush3.msra.mxu0 %v15528_v24  ;;  %v13280_v44 = vpop.f32.mrf.mxu1 }
 0x6a1   :  { %14276 = vrcp.f32 %v4095_v22  ;;  %13263 = vmatprep.subr.mxu0 %v18131_v35  ;;  %v16047_v22 = vld [vmem:[%s18129_s21 + $0x10] sm:$0xff]  ;;  %v4850_v44 = vsub.f32 1.0, %v16041_v1 }
 0x6a2   :  { %13264 = vmatpush3.msra.mxu0 %v15539_v33  ;;  %v14275_v53 = vpop.eup %14274  ;;  %v3863_v33 = vadd.f32 %v15585_v28, %v15873_v23  ;;  %v4279_v23 = vmul.f32 %v4278_v37, %v4195_v51  ;;  %v18148_v37 = vld [vmem:[#allocation18_spill] sm:$0xff] }
 0x6a3   :  { %13265 = vmatprep.subr.mxu0 %v18131_v35  ;;  %v4102_v24 = vadd.f32 1.0, %v14275_v53 }
 0x6a4   :  { %13266 = vmatpush3.msra.mxu0 %v15546_v3 }
 0x6a5   :  { %13268 = vmatmul.mubr.msk.f32.vlgmr.msra.gmra.mxu0 %vm1005_vm2, %v15887_v26  ;;  %13281 = vmatprep.subr.mxu0 %v18131_v35  ;;  %14278 = vrcp.f32 %v4102_v24 }
 0x6a6   :  { %13282 = vmatpush3.msra.mxu0 %v15554_v2  ;;  %13289 = vmatprep.mubr.msk.f32.mxu0 %vm14436_vm1, %v18131_v35  ;;  %v4020_v2 = vld [vmem:[#allocation6 + $0x8] sm:$0xff] }
 0x6a7   :  { %13283 = vmatprep.subr.mxu0 %v18131_v35 }
 0x6a8   :  { %13284 = vmatpush3.msra.mxu0 %v15564_v41  ;;  %v4088_v41 = vadd.f32 %v4087_v4, %v4020_v2 }
 0x6a9   :  { %13285 = vmatprep.subr.mxu0 %v18131_v35 }
 0x6aa   :  { %13286 = vmatpush3.msra.mxu0 %v15573_v6 }
 0x6ab   :  { %13287 = vmatprep.subr.mxu0 %v18131_v35 }
 0x6ac   :  { %13288 = vmatpush3.msra.mxu0 %v15580_v36 }
 0x6ad   :  { %13290 = vmatmul.mubr.msk.f32.vlgmr.msra.gmra.mxu0 %vm1005_vm2, %v15887_v26  ;;  %13306 = vmatprep.subr.mxu0 %v18131_v35 }
 0x6ae   :  { %v14277_v3 = vpop.eup %14276  ;;  %13307 = vmatpush3.msra.mxu0 %v15610_v15  ;;  %13310 = vmatprep.mubr.msk.f32.mxu0 %vm14436_vm1, %v18131_v35 }
 0x6af   :  { %v4105_v6 = vmul.f32 %v14277_v3, %v3863_v33  ;;  %13308 = vmatprep.subr.mxu0 %v18131_v35  ;;  %v16053_v33 = vld [vmem:[%s18128_s19] ss:$0 sm:$0xff] }
 0x6b0   :  { %13309 = vmatpush3.msra.mxu0 %v15625_v8 }
 0x6b1   :  { %v4106_v36 = vadd.f32 %v4105_v6, %v4088_v41  ;;  %13324 = vmatprep.subr.mxu0 %v18131_v35 }
 0x6b2   :  { %v14279_v28 = vpop.eup %14278 }
 0x6b3   :  { %14280 = vtanh.f32 %v4106_v36  ;;  %v4108_v11 = vsub.f32 1.0, %v14279_v28  ;;  %v4110_v15 = vmul.f32 %v14279_v28, %v15703_v48  ;;  %v18142_v28 = vld [vmem:[#allocation12_spill] sm:$0xff] }
 0x6c0   :  { %v14281_v0 = vpop.eup %14280 }
 0x6c1   :  { %v4109_v56 = vmul.f32 %v14281_v0, %v4108_v11 }
 0x6c3   :  { %v4111_v54 = vadd.f32 %v4110_v15, %v4109_v56  ;;  %v18143_v56 = vld [vmem:[#allocation13_spill] sm:$0xff] }
 0x75d   :  { %v4273_v38 = vpop.f32.mrf.mxu0 }
 0x75e   :  { %v4274_v60 = vadd.f32 %v15634_v32, %v4273_v38  ;;  %v4115_v32 = vld [vmem:[#allocation7 + $0x30] sm:$0xff]  ;;  %v18146_v38 = vld [vmem:[#allocation16_spill] sm:$0xff] }
 0x75f   :  { %v13258_v45 = vpop.f32.mrf.mxu0 }
 0x760   :  { %v4277_v8 = vmul.f32 %v4274_v60, %v4119_v59  ;;  %v4287_v17 = vsub.f32 %v15915_v62, %v4274_v60  ;;  %v18145_v59 = vld [vmem:[#allocation15_spill] sm:$0xff]  ;;  %v18147_v60 = vld [vmem:[#allocation17_spill] sm:$0xff] }
 0x762   :  { %v4280_v49 = vadd.f32 %v4279_v23, %v4277_v8  ;;  %v4288_v25 = vand.u32 2147483647, %v4287_v17  ;;  %v18149_v8 = vld [vmem:[#allocation19_spill] sm:$0xff]  ;;  %v18150_v23 = vld [vmem:[#allocation20_spill] sm:$0xff] }
 0x764   :  { %v4281_v4 = vmul.f32 %v4280_v49, %v4199_v16  ;;  %v4289_v48 = vadd.f32 %v4288_v25, %v4286_v19  ;;  %v4290_v12 = vsub.f32 %v15915_v62, %v4280_v49  ;;  %v4671_v49 = vld [vmem:[#allocation6 + $0x70] sm:$0xff] }
 0x765   :  { %v4365_v13 = vpop.f32.mrf.mxu0 }
 0x766   :  { %v4282_v9 = vadd.f32 %v4281_v4, %v15921_v42  ;;  %v4291_v27 = vand.u32 2147483647, %v4290_v12 }
 0x767   :  { %v13269_v18 = vpop.f32.mrf.mxu0 }
 0x768   :  { %4284 = vst.msk [vmem:[#allocation8 + $0x70] sm:$0xff] %vm114_vm0, %v4282_v9  ;;  %v4292_v20 = vadd.f32 %v4291_v27, %v4289_v48  ;;  %13297 = vmatmul.mubr.msk.f32.vlgmr.msra.gmra.mxu1 %vm114_vm0, %v4282_v9  ;;  %13311 = vmatmul.mubr.msk.f32.vlgmr.msra.gmra.mxu0 %vm114_vm0, %v4282_v9 }
 0x769   :  { %13300 = vmatpush3.msra.mxu1 %v15650_v47  ;;  %13303 = vmatprep.mubr.msk.f32.mxu1 %vm14436_vm1, %v18131_v35 }
 0x76a   :  { %v4293_v14 = vmul.f32 %v4292_v20, %v4115_v32  ;;  %13301 = vmatprep.subr.mxu1 %v18131_v35  ;;  %13325 = vmatpush3.msra.mxu0 %v15730_v31  ;;  %v16103_v20 = vld [vmem:[%s18045_s14 + $0x8] sm:$0xff] }
 0x76b   :  { %13302 = vmatpush3.msra.mxu1 %v15658_v55  ;;  %13326 = vmatprep.subr.mxu0 %v18131_v35 }
 0x76c   :  { %v15980_v40 = vadd.f32 %v4293_v14, %v15869_v52  ;;  %13313 = vmatprep.subr.mxu1 %v18131_v35  ;;  %13304 = vmatmul.mubr.msk.f32.vlgmr.msra.gmra.mxu1 %vm114_vm0, %v4282_v9  ;;  %v4520_v52 = vld [vmem:[#allocation4 + $0x70] sm:$0xff]  ;;  %v16109_v14 = vld [vmem:[%s18047_s16 + $0x8] sm:$0xff] }
 0x76d   :  { %v15984_v47 = vpop.f32.mrf.mxu0  ;;  %13314 = vmatpush3.msra.mxu1 %v15668_v21  ;;  %13321 = vmatprep.mubr.msk.f32.mxu1 %vm14436_vm1, %v18131_v35  ;;  %v4768_v21 = vld [vmem:[#allocation2 + $0x10] sm:$0xff] }
 0x76e   :  { %13315 = vmatprep.subr.mxu1 %v18131_v35  ;;  %13327 = vmatpush3.msra.mxu0 %v15737_v34  ;;  %v15998_v31 = vmul.f32 %v4768_v21, %v4111_v54  ;;  %v16003_v34 = vld [vmem:[%s18056_s25 + $0x18] sm:$0xff]  ;;  %v4514_v17 = vadd.f32 %v18150_v23, %v15984_v47  ;;  %v16123_v47 = vld [vmem:[%s18047_s16] sm:$0xff]  ;;  %v16250_v23 = vld [vmem:[%s18127_s5 + $0x10] sm:$0xff] }
 0x76f   :  { %v13291_v55 = vpop.f32.mrf.mxu0  ;;  %13316 = vmatpush3.msra.mxu1 %v15678_v7  ;;  %13328 = vmatprep.mubr.msk.f32.mxu0 %vm14436_vm1, %v18131_v35  ;;  %v16012_v7 = vld [vmem:[%s18056_s25 + $0x10] sm:$0xff] }
 0x770   :  { %13317 = vmatprep.subr.mxu1 %v18131_v35  ;;  %13331 = vmatprep.subr.mxu0 %v18131_v35  ;;  %v18144_v54 = vld [vmem:[#allocation14_spill] sm:$0xff] }
 0x771   :  { %13318 = vmatpush3.msra.mxu1 %v15691_v43  ;;  %v16021_v43 = vld [vmem:[%s18056_s25 + $0x8] sm:$0xff]  ;;  %v4770_v55 = vld [vmem:[#allocation3 + $0x10] sm:$0xff] }
 0x772   :  { %13319 = vmatprep.subr.mxu1 %v18131_v35 }
 0x773   :  { %13320 = vmatpush3.msra.mxu1 %v15698_v46  ;;  %v16028_v46 = vld [vmem:[%s18056_s25] sm:$0xff] }
 0x774   :  { %13322 = vmatmul.mubr.msk.f32.vlgmr.msra.gmra.mxu1 %vm1005_vm2, %v15998_v31  ;;  %13342 = vmatprep.subr.mxu1 %v18131_v35 }
 0x775   :  { %13343 = vmatpush3.msra.mxu1 %v16003_v34  ;;  %13350 = vmatprep.mubr.msk.f32.mxu1 %vm14436_vm1, %v18131_v35 }
 0x776   :  { %13344 = vmatprep.subr.mxu1 %v18131_v35 }
 0x777   :  { %13345 = vmatpush3.msra.mxu1 %v16012_v7 }
 0x778   :  { %13346 = vmatprep.subr.mxu1 %v18131_v35 }
 0x779   :  { %13347 = vmatpush3.msra.mxu1 %v16021_v43 }
 0x77a   :  { %13348 = vmatprep.subr.mxu1 %v18131_v35 }
 0x77b   :  { %13349 = vmatpush3.msra.mxu1 %v16028_v46 }
 0x77c   :  { %13351 = vmatmul.mubr.msk.f32.vlgmr.msra.gmra.mxu1 %vm1005_vm2, %v15998_v31  ;;  %13364 = vmatprep.subr.mxu1 %v18131_v35 }
 0x77d   :  { %13368 = vmatprep.mubr.msk.f32.mxu1 %vm14436_vm1, %v18131_v35  ;;  %13365 = vmatpush3.msra.mxu1 %v16103_v20 }
 0x77e   :  { %13366 = vmatprep.subr.mxu1 %v18131_v35 }
 0x828   :  { %v4590_v57 = vpop.f32.mrf.mxu1  ;;  %v4738_v50 = vpop.f32.mrf.mxu0 }
 0x829   :  { %v4591_v10 = vadd.f32 %v4590_v57, %v4520_v52  ;;  %v4739_v25 = vadd.f32 %v4738_v50, %v4671_v49  ;;  %v16133_v57 = vld [vmem:[%s18130_s8] ss:$0 sm:$0xff] }
 0x82a   :  { %v13298_v62 = vpop.f32.mrf.mxu1  ;;  %v13312_v16 = vpop.f32.mrf.mxu0 }
 0x82b   :  { %v4742_v58 = vadd.f32 %v4591_v10, %v4365_v13  ;;  %v4929_v10 = vsub.f32 1.0, %v4770_v55 }
 0x82c   :  { %v4664_v51 = vpop.f32.mrf.mxu1 }
 0x82d   :  { %v11995_v42 = vmul.f32 -1.442695, %v4742_v58  ;;  %v4665_v63 = vadd.f32 %v4664_v51, %v4597_v5 }
 0x82e   :  { %v13305_v39 = vpop.f32.mrf.mxu1 }
 0x82f   :  { %14282 = vpow2.f32 %v11995_v42  ;;  %v4749_v29 = vadd.f32 %v4665_v63, %v15928_v30  ;;  %v16060_v30 = vmul.f32 %v16041_v1, %v16047_v22  ;;  %v16155_v1 = vld [vmem:[%s18046_s15] sm:$0xff] }
 0x831   :  { %v11996_v24 = vmul.f32 -1.442695, %v4749_v29 }
 0x833   :  { %14284 = vpow2.f32 %v11996_v24 }
 0x834   :  { %v4845_v53 = vpop.f32.mrf.mxu1 }
 0x835   :  { %v16056_v3 = vadd.f32 %v16053_v33, %v4845_v53 }
 0x836   :  { %v13323_v2 = vpop.f32.mrf.mxu1 }
 0x837   :  { %v4851_v41 = vmul.f32 %v4850_v44, %v16056_v3  ;;  %v4936_v52 = vsub.f32 %v16047_v22, %v16056_v3  ;;  %v4930_v58 = vmul.f32 %v4929_v10, %v16056_v3  ;;  %v16147_v3 = vld [vmem:[%s18046_s15 + $0x8] sm:$0xff] }
 0x839   :  { %v4852_v6 = vadd.f32 %v4851_v41, %v16060_v30  ;;  %v4937_v51 = vand.u32 2147483647, %v4936_v52  ;;  %v16266_v52 = vld [vmem:[%s18129_s21 + $0x28] sm:$0xff] }
 0x83b   :  { %13329 = vmatmul.mubr.msk.f32.vlgmr.msra.gmra.mxu0 %vm114_vm0, %v4852_v6  ;;  %v4766_v6 = vld [vmem:[#allocation7 + $0x10] sm:$0xff] }
 0x83c   :  { %v14283_v36 = vpop.eup %14282  ;;  %13332 = vmatpush3.msra.mxu0 %v18142_v28  ;;  %v16068_v11 = vpop.f32.mrf.mxu1  ;;  %13339 = vmatprep.mubr.msk.f32.mxu0 %vm14436_vm1, %v18131_v35 }
 0x83d   :  { %v4746_v0 = vadd.f32 1.0, %v14283_v36  ;;  %13333 = vmatprep.subr.mxu0 %v18131_v35 }
 0x83e   :  { %13334 = vmatpush3.msra.mxu0 %v18143_v56  ;;  %v13352_v15 = vpop.f32.mrf.mxu1 }
 0x83f   :  { %14286 = vrcp.f32 %v4746_v0  ;;  %13335 = vmatprep.subr.mxu0 %v18131_v35  ;;  %v16177_v0 = vld [vmem:[%s18125_s11 + $0x30] sm:$0xff] }
 0x840   :  { %13336 = vmatpush3.msra.mxu0 %v18144_v54  ;;  %v14285_v61 = vpop.eup %14284  ;;  %v16195_v54 = vld [vmem:[%s18125_s11 + $0x20] sm:$0xff] }
 0x841   :  { %13337 = vmatprep.subr.mxu0 %v18131_v35  ;;  %v4753_v45 = vadd.f32 1.0, %v14285_v61  ;;  %v16205_v61 = vld [vmem:[%s18056_s25 + $0x38] sm:$0xff] }
 0x842   :  { %13338 = vmatpush3.msra.mxu0 %v18145_v59  ;;  %v5419_v59 = vld [vmem:[#allocation2 + $0x68] sm:$0xff] }
 0x843   :  { %13340 = vmatmul.mubr.msk.f32.vlgmr.msra.gmra.mxu0 %vm1005_vm2, %v15998_v31  ;;  %13353 = vmatprep.subr.mxu0 %v18131_v35  ;;  %14288 = vrcp.f32 %v4753_v45  ;;  %v16230_v45 = vld [vmem:[%s18056_s25 + $0x20] sm:$0xff] }
 0x844   :  { %13354 = vmatpush3.msra.mxu0 %v18146_v38  ;;  %13361 = vmatprep.mubr.msk.f32.mxu0 %vm14436_vm1, %v18131_v35 }
 0x845   :  { %13355 = vmatprep.subr.mxu0 %v18131_v35 }
 0x846   :  { %13356 = vmatpush3.msra.mxu0 %v18147_v60  ;;  %v16214_v60 = vld [vmem:[%s18056_s25 + $0x30] sm:$0xff] }
 0x847   :  { %13357 = vmatprep.subr.mxu0 %v18131_v35 }
 0x848   :  { %13358 = vmatpush3.msra.mxu0 %v18148_v37  ;;  %v16223_v37 = vld [vmem:[%s18056_s25 + $0x28] sm:$0xff] }
 0x849   :  { %13359 = vmatprep.subr.mxu0 %v18131_v35 }
 0x84a   :  { %13360 = vmatpush3.msra.mxu0 %v18149_v8  ;;  %v16243_v8 = vld [vmem:[%s18127_s5 + $0x18] sm:$0xff] }
 0x84b   :  { %13362 = vmatmul.mubr.msk.f32.vlgmr.msra.gmra.mxu0 %vm1005_vm2, %v15998_v31  ;;  %13378 = vmatprep.subr.mxu0 %v18131_v35 }
 0x84c   :  { %v14287_v19 = vpop.eup %14286  ;;  %13382 = vmatprep.mubr.msk.f32.mxu0 %vm14436_vm1, %v18131_v35  ;;  %13379 = vmatpush3.msra.mxu0 %v16109_v14 }
 0x84d   :  { %v4756_v4 = vmul.f32 %v14287_v19, %v4514_v17  ;;  %13380 = vmatprep.subr.mxu0 %v18131_v35  ;;  %v5171_v17 = vld [vmem:[#allocation4 + $0x10] sm:$0xff] }
 0x84e   :  { %13381 = vmatpush3.msra.mxu0 %v16123_v47 }
 0x84f   :  { %v4757_v48 = vadd.f32 %v4756_v4, %v4739_v25  ;;  %13396 = vmatprep.subr.mxu0 %v18131_v35 }
 0x850   :  { %v14289_v12 = vpop.eup %14288 }
 0x851   :  { %14290 = vtanh.f32 %v4757_v48  ;;  %v4759_v13 = vsub.f32 1.0, %v14289_v12  ;;  %v4761_v32 = vmul.f32 %v14289_v12, %v15887_v26  ;;  %v16116_v26 = vld [vmem:[%s18045_s14] sm:$0xff] }
 0x852   :  { %13367 = vmatpush3.msra.mxu1 %v16116_v26 }
 0x853   :  { %13371 = vmatprep.subr.mxu1 %v18131_v35 }
 0x85e   :  { %v14291_v9 = vpop.eup %14290 }
 0x85f   :  { %v4760_v27 = vmul.f32 %v14291_v9, %v4759_v13  ;;  %v5248_v13 = vld [vmem:[#allocation5 + $0x10] sm:$0xff] }
 0x861   :  { %v16098_v18 = vadd.f32 %v4761_v32, %v4760_v27 }
 0x863   :  { %v16200_v38 = vmul.f32 %v5419_v59, %v16098_v18  ;;  %v16344_v59 = vld [vmem:[%s18057_s26 + $0x20] sm:$0xff] }
 0x8fb   :  { %v4924_v21 = vpop.f32.mrf.mxu0 }
 0x8fc   :  { %v4925_v50 = vadd.f32 %v16133_v57, %v4924_v21 }
 0x8fd   :  { %v13330_v62 = vpop.f32.mrf.mxu0 }
 0x8fe   :  { %v4928_v16 = vmul.f32 %v4925_v50, %v4770_v55  ;;  %v4938_v5 = vsub.f32 %v16047_v22, %v4925_v50  ;;  %v16260_v55 = vld [vmem:[%s18124_s29 + $0x28] sm:$0xff] }
 0x8ff   :  { %v5501_v50 = vsub.f32 1.0, %v16260_v55 }
 0x900   :  { %v4931_v42 = vadd.f32 %v4930_v58, %v4928_v16  ;;  %v4939_v63 = vand.u32 2147483647, %v4938_v5  ;;  %v16272_v16 = vld [vmem:[%s18128_s19 + $0x1] ss:$0 sm:$0xff] }
 0x902   :  { %v4932_v39 = vmul.f32 %v4931_v42, %v4850_v44  ;;  %v4940_v29 = vadd.f32 %v4939_v63, %v4937_v51  ;;  %v4941_v53 = vsub.f32 %v16047_v22, %v4931_v42  ;;  %v16164_v44 = vld [vmem:[%s18125_s11 + $0x38] sm:$0xff] }
 0x903   :  { %v16141_v24 = vpop.f32.mrf.mxu0  ;;  %v16288_v63 = vld [vmem:[%s18055_s24 + $0x38] sm:$0xff] }
 0x904   :  { %v4933_v2 = vadd.f32 %v4932_v39, %v16060_v30  ;;  %v4942_v41 = vand.u32 2147483647, %v4941_v53  ;;  %v16294_v39 = vld [vmem:[%s18055_s24 + $0x30] sm:$0xff] }
 0x905   :  { %v13341_v36 = vpop.f32.mrf.mxu0 }
 0x906   :  { %4935 = vst.msk [vmem:[#allocation8 + $0x10] sm:$0xff] %vm114_vm0, %v4933_v2  ;;  %v4943_v28 = vadd.f32 %v4942_v41, %v4940_v29  ;;  %13369 = vmatmul.mubr.msk.f32.vlgmr.msra.gmra.mxu1 %vm114_vm0, %v4933_v2  ;;  %13383 = vmatmul.mubr.msk.f32.vlgmr.msra.gmra.mxu0 %vm114_vm0, %v4933_v2  ;;  %v16319_v36 = vld [vmem:[%s18057_s26 + $0x38] sm:$0xff] }
 0x907   :  { %13372 = vmatpush3.msra.mxu1 %v16147_v3  ;;  %13375 = vmatprep.mubr.msk.f32.mxu1 %vm14436_vm1, %v18131_v35 }
 0x908   :  { %v4944_v22 = vmul.f32 %v4943_v28, %v4766_v6  ;;  %13373 = vmatprep.subr.mxu1 %v18131_v35  ;;  %13400 = vmatprep.mubr.msk.f32.mxu0 %vm14436_vm1, %v18131_v35  ;;  %v16312_v6 = vld [vmem:[%s18055_s24 + $0x20] sm:$0xff]  ;;  %v16328_v28 = vld [vmem:[%s18057_s26 + $0x30] sm:$0xff] }
 0x909   :  { %13374 = vmatpush3.msra.mxu1 %v16155_v1  ;;  %13397 = vmatpush3.msra.mxu0 %v16243_v8 }
 0x90a   :  { %v16170_v30 = vadd.f32 %v4944_v22, %v15980_v40  ;;  %13385 = vmatprep.subr.mxu1 %v18131_v35  ;;  %13376 = vmatmul.mubr.msk.f32.vlgmr.msra.gmra.mxu1 %vm114_vm0, %v4933_v2  ;;  %v16188_v40 = vld [vmem:[%s18125_s11 + $0x28] sm:$0xff] }
 0x90b   :  { %v16179_v56 = vpop.f32.mrf.mxu0  ;;  %13386 = vmatpush3.msra.mxu1 %v16164_v44  ;;  %13393 = vmatprep.mubr.msk.f32.mxu1 %vm14436_vm1, %v18131_v35  ;;  %v16305_v2 = vld [vmem:[%s18055_s24 + $0x28] sm:$0xff] }
 0x90c   :  { %13387 = vmatprep.subr.mxu1 %v18131_v35  ;;  %13398 = vmatprep.subr.mxu0 %v18131_v35  ;;  %v16337_v22 = vld [vmem:[%s18057_s26 + $0x28] sm:$0xff] }
 0x90d   :  { %v13363_v15 = vpop.f32.mrf.mxu0  ;;  %13388 = vmatpush3.msra.mxu1 %v16177_v0  ;;  %13399 = vmatpush3.msra.mxu0 %v16250_v23 }
 0x90e   :  { %13389 = vmatprep.subr.mxu1 %v18131_v35  ;;  %13403 = vmatprep.subr.mxu0 %v18131_v35 }
 0x90f   :  { %13390 = vmatpush3.msra.mxu1 %v16188_v40 }
 0x910   :  { %13391 = vmatprep.subr.mxu1 %v18131_v35 }
 0x911   :  { %13392 = vmatpush3.msra.mxu1 %v16195_v54 }
 0x912   :  { %13394 = vmatmul.mubr.msk.f32.vlgmr.msra.gmra.mxu1 %vm1005_vm2, %v16200_v38  ;;  %13414 = vmatprep.subr.mxu1 %v18131_v35 }
 0x913   :  { %13415 = vmatpush3.msra.mxu1 %v16205_v61  ;;  %13422 = vmatprep.mubr.msk.f32.mxu1 %vm14436_vm1, %v18131_v35 }
 0x914   :  { %13416 = vmatprep.subr.mxu1 %v18131_v35 }
 0x915   :  { %13417 = vmatpush3.msra.mxu1 %v16214_v60 }
 0x916   :  { %13418 = vmatprep.subr.mxu1 %v18131_v35 }
 0x917   :  { %13419 = vmatpush3.msra.mxu1 %v16223_v37 }
 0x918   :  { %13420 = vmatprep.subr.mxu1 %v18131_v35 }
 0x919   :  { %13421 = vmatpush3.msra.mxu1 %v16230_v45 }
 0x91a   :  { %13423 = vmatmul.mubr.msk.f32.vlgmr.msra.gmra.mxu1 %vm1005_vm2, %v16200_v38  ;;  %13436 = vmatprep.subr.mxu1 %v18131_v35 }
 0x91b   :  { %13440 = vmatprep.mubr.msk.f32.mxu1 %vm14436_vm1, %v18131_v35 }
 0x9c6   :  { %v5241_v19 = vpop.f32.mrf.mxu1  ;;  %v16254_v49 = vpop.f32.mrf.mxu0 }
 0x9c7   :  { %v5242_v25 = vadd.f32 %v5241_v19, %v5171_v17  ;;  %v16352_v19 = vld [vmem:[%s18054_s23] ss:$0 sm:$0xff] }
 0x9c8   :  { %v13370_v4 = vpop.f32.mrf.mxu1  ;;  %v13384_v48 = vpop.f32.mrf.mxu0 }
 0x9c9   :  { %v5393_v12 = vadd.f32 %v5242_v25, %v16141_v24  ;;  %v5165_v25 = vadd.f32 %v16352_v19, %v16179_v56  ;;  %v5322_v48 = vld [vmem:[#allocation6 + $0x10] sm:$0xff] }
 0x9ca   :  { %v5315_v9 = vpop.f32.mrf.mxu1 }
 0x9cb   :  { %v12007_v27 = vmul.f32 -1.442695, %v5393_v12  ;;  %v5316_v32 = vadd.f32 %v5315_v9, %v5248_v13  ;;  %v5390_v12 = vadd.f32 %v16254_v49, %v5322_v48  ;;  %v16374_v49 = vld [vmem:[%s18047_s16 + $0x18] sm:$0xff] }
 0x9cc   :  { %v13377_v18 = vpop.f32.mrf.mxu1 }
 0x9cd   :  { %14292 = vpow2.f32 %v12007_v27  ;;  %v5400_v21 = vadd.f32 %v5316_v32, %v16068_v11  ;;  %v16279_v11 = vmul.f32 %v16260_v55, %v16266_v52  ;;  %v16420_v55 = vld [vmem:[%s18046_s15 + $0x10] sm:$0xff] }
 0x9cf   :  { %v12008_v62 = vmul.f32 -1.442695, %v5400_v21 }
 0x9d1   :  { %14294 = vpow2.f32 %v12008_v62  ;;  %v16368_v62 = vld [vmem:[%s18045_s14 + $0x18] sm:$0xff] }
 0x9d2   :  { %v5496_v10 = vpop.f32.mrf.mxu1  ;;  %13437 = vmatpush3.msra.mxu1 %v16368_v62 }
 0x9d3   :  { %v16275_v58 = vadd.f32 %v16272_v16, %v5496_v10  ;;  %13438 = vmatprep.subr.mxu1 %v18131_v35 }
 0x9d4   :  { %v13395_v5 = vpop.f32.mrf.mxu1 }
 0x9d5   :  { %v5502_v51 = vmul.f32 %v5501_v50, %v16275_v58  ;;  %v16388_v5 = vld [vmem:[%s18047_s16 + $0x10] sm:$0xff] }
 0x9d7   :  { %v5503_v42 = vadd.f32 %v5502_v51, %v16279_v11  ;;  %v5421_v51 = vld [vmem:[#allocation3 + $0x68] sm:$0xff] }
 0x9d9   :  { %13401 = vmatmul.mubr.msk.f32.vlgmr.msra.gmra.mxu0 %vm114_vm0, %v5503_v42 }
 0x9da   :  { %v14293_v29 = vpop.eup %14292  ;;  %13404 = vmatpush3.msra.mxu0 %v16288_v63  ;;  %v16297_v53 = vpop.f32.mrf.mxu1  ;;  %13411 = vmatprep.mubr.msk.f32.mxu0 %vm14436_vm1, %v18131_v35 }
 0x9db   :  { %v5397_v24 = vadd.f32 1.0, %v14293_v29  ;;  %13405 = vmatprep.subr.mxu0 %v18131_v35  ;;  %v5587_v29 = vsub.f32 %v16266_v52, %v16275_v58 }
 0x9dc   :  { %13406 = vmatpush3.msra.mxu0 %v16294_v39  ;;  %v13424_v41 = vpop.f32.mrf.mxu1 }
 0x9dd   :  { %14296 = vrcp.f32 %v5397_v24  ;;  %13407 = vmatprep.subr.mxu0 %v18131_v35  ;;  %v16398_v24 = vld [vmem:[%s18130_s8 + $0x1] ss:$0 sm:$0xff] }
 0x9de   :  { %13408 = vmatpush3.msra.mxu0 %v16305_v2  ;;  %v14295_v15 = vpop.eup %14294 }
 0x9df   :  { %13409 = vmatprep.subr.mxu0 %v18131_v35  ;;  %v5404_v17 = vadd.f32 1.0, %v14295_v15  ;;  %v5580_v15 = vsub.f32 1.0, %v5421_v51 }
 0x9e0   :  { %13410 = vmatpush3.msra.mxu0 %v16312_v6 }
 0x9e1   :  { %13412 = vmatmul.mubr.msk.f32.vlgmr.msra.gmra.mxu0 %vm1005_vm2, %v16200_v38  ;;  %13425 = vmatprep.subr.mxu0 %v18131_v35  ;;  %14298 = vrcp.f32 %v5404_v17 }
 0x9e2   :  { %13426 = vmatpush3.msra.mxu0 %v16319_v36  ;;  %13433 = vmatprep.mubr.msk.f32.mxu0 %vm14436_vm1, %v18131_v35 }
 0x9e3   :  { %13427 = vmatprep.subr.mxu0 %v18131_v35 }
 0x9e4   :  { %13428 = vmatpush3.msra.mxu0 %v16328_v28 }
 0x9e5   :  { %13429 = vmatprep.subr.mxu0 %v18131_v35 }
 0x9e6   :  { %13430 = vmatpush3.msra.mxu0 %v16337_v22 }
 0x9e7   :  { %13431 = vmatprep.subr.mxu0 %v18131_v35 }
 0x9e8   :  { %13432 = vmatpush3.msra.mxu0 %v16344_v59 }
 0x9e9   :  { %13434 = vmatmul.mubr.msk.f32.vlgmr.msra.gmra.mxu0 %vm1005_vm2, %v16200_v38  ;;  %13450 = vmatprep.subr.mxu0 %v18131_v35 }
 0x9ea   :  { %v14297_v4 = vpop.eup %14296  ;;  %13454 = vmatprep.mubr.msk.f32.mxu0 %vm14436_vm1, %v18131_v35  ;;  %13451 = vmatpush3.msra.mxu0 %v16374_v49 }
 0x9eb   :  { %v5407_v13 = vmul.f32 %v14297_v4, %v5165_v25  ;;  %13452 = vmatprep.subr.mxu0 %v18131_v35  ;;  %v5581_v4 = vmul.f32 %v5580_v15, %v16275_v58  ;;  %v16412_v58 = vld [vmem:[%s18046_s15 + $0x18] sm:$0xff]  ;;  %v16442_v15 = vld [vmem:[%s18125_s11 + $0x10] sm:$0xff] }
 0x9ec   :  { %13453 = vmatpush3.msra.mxu0 %v16388_v5 }
 0x9ed   :  { %v5408_v9 = vadd.f32 %v5407_v13, %v5390_v12  ;;  %13468 = vmatprep.subr.mxu0 %v18131_v35  ;;  %v5588_v12 = vand.u32 2147483647, %v5587_v29 }
 0x9ee   :  { %v14299_v27 = vpop.eup %14298 }
 0x9ef   :  { %14300 = vtanh.f32 %v5408_v9  ;;  %v5410_v32 = vsub.f32 1.0, %v14299_v27  ;;  %v5412_v21 = vmul.f32 %v14299_v27, %v15998_v31  ;;  %v16381_v31 = vld [vmem:[%s18045_s14 + $0x10] sm:$0xff] }
 0x9f0   :  { %13439 = vmatpush3.msra.mxu1 %v16381_v31 }
 0x9f1   :  { %13443 = vmatprep.subr.mxu1 %v18131_v35 }
 0x9fc   :  { %v14301_v18 = vpop.eup %14300 }
 0x9fd   :  { %v5411_v56 = vmul.f32 %v14301_v18, %v5410_v32 }
 0x9ff   :  { %v16363_v10 = vadd.f32 %v5412_v21, %v5411_v56 }
 0xa99   :  { %v5575_v42 = vpop.f32.mrf.mxu0 }
 0xa9a   :  { %v5576_v41 = vadd.f32 %v16398_v24, %v5575_v42 }
 0xa9b   :  { %v13402_v17 = vpop.f32.mrf.mxu0 }
 0xa9c   :  { %v5579_v25 = vmul.f32 %v5576_v41, %v5421_v51  ;;  %v5589_v48 = vsub.f32 %v16266_v52, %v5576_v41  ;;  %v5417_v51 = vld [vmem:[#allocation7 + $0x28] sm:$0xff] }
 0xa9e   :  { %v5582_v13 = vadd.f32 %v5581_v4, %v5579_v25  ;;  %v5590_v9 = vand.u32 2147483647, %v5589_v48  ;;  %v16460_v4 = vld [vmem:[%s18125_s11] sm:$0xff]  ;;  %v6070_v48 = vld [vmem:[#allocation2 + $0x18] sm:$0xff] }
 0xaa0   :  { %v5583_v27 = vmul.f32 %v5582_v13, %v5501_v50  ;;  %v5591_v32 = vadd.f32 %v5590_v9, %v5588_v12  ;;  %v5592_v18 = vsub.f32 %v16266_v52, %v5582_v13  ;;  %v16429_v50 = vld [vmem:[%s18125_s11 + $0x18] sm:$0xff]  ;;  %v16465_v12 = vmul.f32 %v6070_v48, %v16363_v10 }
 0xaa1   :  { %v16406_v56 = vpop.f32.mrf.mxu0 }
 0xaa2   :  { %v5584_v21 = vadd.f32 %v5583_v27, %v16279_v11  ;;  %v5593_v42 = vand.u32 2147483647, %v5592_v18  ;;  %v5899_v27 = vld [vmem:[#allocation5 + $0x68] sm:$0xff] }
 0xaa3   :  { %v13413_v29 = vpop.f32.mrf.mxu0 }
 0xaa4   :  { %5586 = vst.msk [vmem:[#allocation8 + $0x68] sm:$0xff] %vm114_vm0, %v5584_v21  ;;  %v5594_v41 = vadd.f32 %v5593_v42, %v5591_v32  ;;  %13441 = vmatmul.mubr.msk.f32.vlgmr.msra.gmra.mxu1 %vm114_vm0, %v5584_v21  ;;  %13455 = vmatmul.mubr.msk.f32.vlgmr.msra.gmra.mxu0 %vm114_vm0, %v5584_v21 }
 0xaa5   :  { %13444 = vmatpush3.msra.mxu1 %v16412_v58  ;;  %13447 = vmatprep.mubr.msk.f32.mxu1 %vm14436_vm1, %v18131_v35 }
 0xaa6   :  { %v5595_v52 = vmul.f32 %v5594_v41, %v5417_v51  ;;  %13445 = vmatprep.subr.mxu1 %v18131_v35  ;;  %13472 = vmatprep.mubr.msk.f32.mxu0 %vm14436_vm1, %v18131_v35  ;;  %v12046_v51 = vld [vmem:[%s18124_s29 + $0x18] sm:$0xff] }
 0xaa7   :  { %13446 = vmatpush3.msra.mxu1 %v16420_v55  ;;  %v16513_v41 = vld [vmem:[%s18129_s21 + $0x18] sm:$0xff] }
 0xaa8   :  { %v16435_v11 = vadd.f32 %v5595_v52, %v16170_v30  ;;  %13457 = vmatprep.subr.mxu1 %v18131_v35  ;;  %13448 = vmatmul.mubr.msk.f32.vlgmr.msra.gmra.mxu1 %vm114_vm0, %v5584_v21  ;;  %v16453_v30 = vld [vmem:[%s18125_s11 + $0x8] sm:$0xff]  ;;  %v16515_v52 = vsub.f32 1.0, %v12046_v51 }
 0xaa9   :  { %v16444_v17 = vpop.f32.mrf.mxu0  ;;  %13458 = vmatpush3.msra.mxu1 %v16429_v50  ;;  %13465 = vmatprep.mubr.msk.f32.mxu1 %vm14436_vm1, %v18131_v35 }
 0xaaa   :  { %13459 = vmatprep.subr.mxu1 %v18131_v35 }
 0xaab   :  { %v13435_v25 = vpop.f32.mrf.mxu0  ;;  %13460 = vmatpush3.msra.mxu1 %v16442_v15 }
 0xaac   :  { %13461 = vmatprep.subr.mxu1 %v18131_v35 }
 0xaad   :  { %13462 = vmatpush3.msra.mxu1 %v16453_v30 }
 0xaae   :  { %13463 = vmatprep.subr.mxu1 %v18131_v35 }
 0xaaf   :  { %13464 = vmatpush3.msra.mxu1 %v16460_v4 }
 0xab0   :  { %13466 = vmatmul.mubr.msk.f32.vlgmr.msra.gmra.mxu1 %vm1005_vm2, %v16465_v12  ;;  %13486 = vmatprep.subr.mxu1 %v18131_v35 }
 0xab1   :  { %13487 = vmatpush3.msra.mxu1 %v16003_v34  ;;  %13494 = vmatprep.mubr.msk.f32.mxu1 %vm14436_vm1, %v18131_v35  ;;  %v16492_v34 = vld [vmem:[%s18127_s5 + $0x8] sm:$0xff] }
 0xab2   :  { %13488 = vmatprep.subr.mxu1 %v18131_v35  ;;  %13469 = vmatpush3.msra.mxu0 %v16492_v34 }
 0xab3   :  { %13489 = vmatpush3.msra.mxu1 %v16012_v7  ;;  %13470 = vmatprep.subr.mxu0 %v18131_v35  ;;  %v16499_v7 = vld [vmem:[%s18127_s5] sm:$0xff] }
 0xab4   :  { %13490 = vmatprep.subr.mxu1 %v18131_v35  ;;  %13471 = vmatpush3.msra.mxu0 %v16499_v7 }
 0xab5   :  { %13491 = vmatpush3.msra.mxu1 %v16021_v43  ;;  %13475 = vmatprep.subr.mxu0 %v18131_v35  ;;  %v5822_v43 = vld [vmem:[#allocation4 + $0x68] sm:$0xff] }
 0xab6   :  { %13492 = vmatprep.subr.mxu1 %v18131_v35 }
 0xab7   :  { %13493 = vmatpush3.msra.mxu1 %v16028_v46 }
 0xab8   :  { %13495 = vmatmul.mubr.msk.f32.vlgmr.msra.gmra.mxu1 %vm1005_vm2, %v16465_v12  ;;  %13508 = vmatprep.subr.mxu1 %v18131_v35 }
 0xab9   :  { %13509 = vmatpush3.msra.mxu1 %v16103_v20  ;;  %13512 = vmatprep.mubr.msk.f32.mxu1 %vm14436_vm1, %v18131_v35 }
 0xaba   :  { %13510 = vmatprep.subr.mxu1 %v18131_v35 }
 0xabb   :  { %13511 = vmatpush3.msra.mxu1 %v16116_v26 }
 0xabc   :  { %13515 = vmatprep.subr.mxu1 %v18131_v35 }
 0xb64   :  { %v5892_v46 = vpop.f32.mrf.mxu1  ;;  %v16503_v20 = vpop.f32.mrf.mxu0 }
 0xb65   :  { %v5893_v26 = vadd.f32 %v5892_v46, %v5822_v43  ;;  %v16521_v43 = vmul.f32 %v12046_v51, %v16513_v41  ;;  %v16569_v51 = vld [vmem:[%s18057_s26 + $0x10] sm:$0xff] }
 0xb66   :  { %v13442_v10 = vpop.f32.mrf.mxu1  ;;  %v13456_v13 = vpop.f32.mrf.mxu0  ;;  %18155 = vst [vmem:[#allocation16_spill] sm:$0xff] %v16569_v51 }
 0xb67   :  { %v6044_v9 = vadd.f32 %v5893_v26, %v16406_v56  ;;  %v16529_v10 = vld [vmem:[%s18055_s24 + $0x18] sm:$0xff] }
 0xb68   :  { %v5966_v32 = vpop.f32.mrf.mxu1 }
 0xb69   :  { %v12043_v18 = vmul.f32 -1.442695, %v6044_v9  ;;  %v5967_v21 = vadd.f32 %v5966_v32, %v5899_v27  ;;  %v16546_v32 = vld [vmem:[%s18055_s24 + $0x8] sm:$0xff] }
 0xb6a   :  { %v13449_v42 = vpop.f32.mrf.mxu1  ;;  %18152 = vst [vmem:[#allocation13_spill] sm:$0xff] %v16546_v32 }
 0xb6b   :  { %14302 = vpow2.f32 %v12043_v18  ;;  %v6051_v29 = vadd.f32 %v5967_v21, %v16297_v53  ;;  %v16553_v21 = vld [vmem:[%s18055_s24] sm:$0xff]  ;;  %v16560_v42 = vld [vmem:[%s18057_s26 + $0x18] sm:$0xff] }
 0xb6c   :  { %18153 = vst [vmem:[#allocation14_spill] sm:$0xff] %v16553_v21  ;;  %18154 = vst [vmem:[#allocation15_spill] sm:$0xff] %v16560_v42 }
 0xb6d   :  { %v12044_v25 = vmul.f32 -1.442695, %v6051_v29  ;;  %v16578_v29 = vld [vmem:[%s18057_s26 + $0x8] sm:$0xff] }
 0xb6e   :  { %18156 = vst [vmem:[#allocation17_spill] sm:$0xff] %v16578_v29 }
 0xb6f   :  { %14304 = vpow2.f32 %v12044_v25  ;;  %v16585_v25 = vld [vmem:[%s18057_s26] sm:$0xff] }
 0xb70   :  { %v6147_v56 = vpop.f32.mrf.mxu1  ;;  %18157 = vst [vmem:[#allocation18_spill] sm:$0xff] %v16585_v25 }
 0xb71   :  { %v16518_v48 = vadd.f32 %v16053_v33, %v6147_v56  ;;  %v16535_v33 = vld [vmem:[%s18055_s24 + $0x10] sm:$0xff] }
 0xb72   :  { %v13467_v46 = vpop.f32.mrf.mxu1  ;;  %18151 = vst [vmem:[#allocation12_spill] sm:$0xff] %v16535_v33 }
 0xb73   :  { %v6153_v26 = vmul.f32 %v16515_v52, %v16518_v48 }
 0xb75   :  { %v6154_v53 = vadd.f32 %v6153_v26, %v16521_v43  ;;  %v16593_v26 = vld [vmem:[%s18054_s23 + $0x1] ss:$0 sm:$0xff] }
 0xb76   :  { %18158 = vst [vmem:[#allocation19_spill] sm:$0xff] %v16593_v26 }
 0xb77   :  { %13473 = vmatmul.mubr.msk.f32.vlgmr.msra.gmra.mxu0 %vm114_vm0, %v6154_v53  ;;  %v5816_v53 = vadd.f32 %v16593_v26, %v16444_v17 }
 0xb78   :  { %v14303_v13 = vpop.eup %14302  ;;  %13476 = vmatpush3.msra.mxu0 %v16529_v10  ;;  %v16538_v9 = vpop.f32.mrf.mxu1  ;;  %13483 = vmatprep.mubr.msk.f32.mxu0 %vm14436_vm1, %v18131_v35 }
 0xb79   :  { %v6048_v27 = vadd.f32 1.0, %v14303_v13  ;;  %13477 = vmatprep.subr.mxu0 %v18131_v35 }
 0xb7a   :  { %13478 = vmatpush3.msra.mxu0 %v16535_v33  ;;  %v13496_v18 = vpop.f32.mrf.mxu1 }
 0xb7b   :  { %14306 = vrcp.f32 %v6048_v27  ;;  %13479 = vmatprep.subr.mxu0 %v18131_v35  ;;  %v5973_v27 = vld [vmem:[#allocation6 + $0x68] sm:$0xff] }
 0xb7c   :  { %13480 = vmatpush3.msra.mxu0 %v16546_v32  ;;  %v14305_v56 = vpop.eup %14304  ;;  %v6041_v18 = vadd.f32 %v16503_v20, %v5973_v27  ;;  %v6238_v20 = vsub.f32 %v16513_v41, %v16518_v48 }
 0xb7d   :  { %13481 = vmatprep.subr.mxu0 %v18131_v35  ;;  %v6055_v46 = vadd.f32 1.0, %v14305_v56 }
 0xb7e   :  { %13482 = vmatpush3.msra.mxu0 %v16553_v21  ;;  %v6072_v21 = vld [vmem:[#allocation3 + $0x18] sm:$0xff] }
 0xb7f   :  { %13484 = vmatmul.mubr.msk.f32.vlgmr.msra.gmra.mxu0 %vm1005_vm2, %v16465_v12  ;;  %13497 = vmatprep.subr.mxu0 %v18131_v35  ;;  %14308 = vrcp.f32 %v6055_v46 }
 0xb80   :  { %13498 = vmatpush3.msra.mxu0 %v16560_v42  ;;  %13505 = vmatprep.mubr.msk.f32.mxu0 %vm14436_vm1, %v18131_v35 }
 0xb81   :  { %13499 = vmatprep.subr.mxu0 %v18131_v35 }
 0xb82   :  { %13500 = vmatpush3.msra.mxu0 %v16569_v51 }
 0xb83   :  { %13501 = vmatprep.subr.mxu0 %v18131_v35 }
 0xb84   :  { %13502 = vmatpush3.msra.mxu0 %v16578_v29 }
 0xb85   :  { %13503 = vmatprep.subr.mxu0 %v18131_v35 }
 0xb86   :  { %13504 = vmatpush3.msra.mxu0 %v16585_v25 }
 0xb87   :  { %13506 = vmatmul.mubr.msk.f32.vlgmr.msra.gmra.mxu0 %vm1005_vm2, %v16465_v12  ;;  %13522 = vmatprep.subr.mxu0 %v18131_v35 }
 0xb88   :  { %v14307_v13 = vpop.eup %14306  ;;  %13523 = vmatpush3.msra.mxu0 %v16109_v14  ;;  %13526 = vmatprep.mubr.msk.f32.mxu0 %vm14436_vm1, %v18131_v35 }
 0xb89   :  { %v6058_v56 = vmul.f32 %v14307_v13, %v5816_v53  ;;  %13524 = vmatprep.subr.mxu0 %v18131_v35  ;;  %v6231_v53 = vsub.f32 1.0, %v6072_v21 }
 0xb8a   :  { %13525 = vmatpush3.msra.mxu0 %v16123_v47 }
 0xb8b   :  { %v6059_v17 = vadd.f32 %v6058_v56, %v6041_v18  ;;  %13540 = vmatprep.subr.mxu0 %v18131_v35  ;;  %v6232_v27 = vmul.f32 %v6231_v53, %v16518_v48  ;;  %v6239_v56 = vand.u32 2147483647, %v6238_v20  ;;  %v16679_v53 = vld [vmem:[%s18129_s21 + $0x20] sm:$0xff] }
 0xb8c   :  { %v14309_v26 = vpop.eup %14308 }
 0xb8d   :  { %14310 = vtanh.f32 %v6059_v17  ;;  %v6061_v25 = vsub.f32 1.0, %v14309_v26  ;;  %v6063_v14 = vmul.f32 %v14309_v26, %v16200_v38 }
 0xb9a   :  { %v14311_v29 = vpop.eup %14310 }
 0xb9b   :  { %v6062_v51 = vmul.f32 %v14311_v29, %v6061_v25 }
 0xb9d   :  { %v6064_v42 = vadd.f32 %v6063_v14, %v6062_v51 }
 0xc37   :  { %v6226_v32 = vpop.f32.mrf.mxu0 }
 0xc38   :  { %v6227_v46 = vadd.f32 %v16133_v57, %v6226_v32  ;;  %v16616_v57 = vld [vmem:[#allocation7 + $0x18] sm:$0xff] }
 0xc39   :  { %v13474_v47 = vpop.f32.mrf.mxu0 }
 0xc3a   :  { %v6230_v13 = vmul.f32 %v6227_v46, %v6072_v21  ;;  %v6240_v18 = vsub.f32 %v16513_v41, %v6227_v46  ;;  %v12058_v46 = vld [vmem:[%s18124_s29 + $0x20] sm:$0xff] }
 0xc3b   :  { %v16681_v47 = vsub.f32 1.0, %v12058_v46 }
 0xc3c   :  { %v6233_v17 = vadd.f32 %v6232_v27, %v6230_v13  ;;  %v6241_v29 = vand.u32 2147483647, %v6240_v18 }
 0xc3e   :  { %v6234_v38 = vmul.f32 %v6233_v17, %v16515_v52  ;;  %v6242_v51 = vadd.f32 %v6241_v29, %v6239_v56  ;;  %v6243_v25 = vsub.f32 %v16513_v41, %v6233_v17  ;;  %v16685_v56 = vmul.f32 %v12058_v46, %v16679_v53  ;;  %v16731_v46 = vld [vmem:[#allocation7 + $0x20] sm:$0xff] }
 0xc3f   :  { %v6318_v26 = vpop.f32.mrf.mxu0 }
 0xc40   :  { %v6235_v14 = vadd.f32 %v6234_v38, %v16521_v43  ;;  %v6244_v33 = vand.u32 2147483647, %v6243_v25 }
 0xc41   :  { %v13485_v32 = vpop.f32.mrf.mxu0 }
 0xc42   :  { %6237 = vst.msk [vmem:[#allocation8 + $0x18] sm:$0xff] %vm114_vm0, %v6235_v14  ;;  %v6245_v48 = vadd.f32 %v6244_v33, %v6242_v51  ;;  %13513 = vmatmul.mubr.msk.f32.vlgmr.msra.gmra.mxu1 %vm114_vm0, %v6235_v14  ;;  %13527 = vmatmul.mubr.msk.f32.vlgmr.msra.gmra.mxu0 %vm114_vm0, %v6235_v14 }
 0xc43   :  { %13516 = vmatpush3.msra.mxu1 %v16147_v3  ;;  %13519 = vmatprep.mubr.msk.f32.mxu1 %vm14436_vm1, %v18131_v35 }
 0xc44   :  { %v6246_v21 = vmul.f32 %v6245_v48, %v16616_v57  ;;  %13517 = vmatprep.subr.mxu1 %v18131_v35  ;;  %13541 = vmatpush3.msra.mxu0 %v16243_v8 }
 0xc45   :  { %13518 = vmatpush3.msra.mxu1 %v16155_v1  ;;  %13542 = vmatprep.subr.mxu0 %v18131_v35 }
 0xc46   :  { %v16630_v33 = vadd.f32 %v6246_v21, %v16435_v11  ;;  %13529 = vmatprep.subr.mxu1 %v18131_v35  ;;  %13520 = vmatmul.mubr.msk.f32.vlgmr.msra.gmra.mxu1 %vm114_vm0, %v6235_v14  ;;  %v6723_v21 = vld [vmem:[#allocation3 + $0x60] sm:$0xff] }
 0xc47   :  { %v16634_v3 = vpop.f32.mrf.mxu0  ;;  %13530 = vmatpush3.msra.mxu1 %v16164_v44  ;;  %13537 = vmatprep.mubr.msk.f32.mxu1 %vm14436_vm1, %v18131_v35  ;;  %v6721_v44 = vld [vmem:[#allocation2 + $0x60] sm:$0xff] }
 0xc48   :  { %13531 = vmatprep.subr.mxu1 %v18131_v35  ;;  %13543 = vmatpush3.msra.mxu0 %v16250_v23  ;;  %v16648_v8 = vmul.f32 %v6721_v44, %v6064_v42  ;;  %v6550_v23 = vld [vmem:[#allocation5 + $0x18] sm:$0xff] }
 0xc49   :  { %v13507_v1 = vpop.f32.mrf.mxu0  ;;  %13532 = vmatpush3.msra.mxu1 %v16177_v0  ;;  %13544 = vmatprep.mubr.msk.f32.mxu0 %vm14436_vm1, %v18131_v35  ;;  %v6473_v0 = vld [vmem:[#allocation4 + $0x18] sm:$0xff] }
 0xc4a   :  { %13533 = vmatprep.subr.mxu1 %v18131_v35  ;;  %13547 = vmatprep.subr.mxu0 %v18131_v35 }
 0xc4b   :  { %13534 = vmatpush3.msra.mxu1 %v16188_v40 }
 0xc4c   :  { %13535 = vmatprep.subr.mxu1 %v18131_v35 }
 0xc4d   :  { %13536 = vmatpush3.msra.mxu1 %v16195_v54 }
 0xc4e   :  { %13538 = vmatmul.mubr.msk.f32.vlgmr.msra.gmra.mxu1 %vm1005_vm2, %v16648_v8  ;;  %13558 = vmatprep.subr.mxu1 %v18131_v35 }
 0xc4f   :  { %13559 = vmatpush3.msra.mxu1 %v16205_v61  ;;  %13566 = vmatprep.mubr.msk.f32.mxu1 %vm14436_vm1, %v18131_v35 }
 0xc50   :  { %13560 = vmatprep.subr.mxu1 %v18131_v35 }
 0xc51   :  { %13561 = vmatpush3.msra.mxu1 %v16214_v60 }
 0xc52   :  { %13562 = vmatprep.subr.mxu1 %v18131_v35 }
 0xc53   :  { %13563 = vmatpush3.msra.mxu1 %v16223_v37 }
 0xc54   :  { %13564 = vmatprep.subr.mxu1 %v18131_v35 }
 0xc55   :  { %13565 = vmatpush3.msra.mxu1 %v16230_v45 }
 0xc56   :  { %13567 = vmatmul.mubr.msk.f32.vlgmr.msra.gmra.mxu1 %vm1005_vm2, %v16648_v8  ;;  %13580 = vmatprep.subr.mxu1 %v18131_v35 }
 0xc57   :  { %13581 = vmatpush3.msra.mxu1 %v16368_v62  ;;  %13584 = vmatprep.mubr.msk.f32.mxu1 %vm14436_vm1, %v18131_v35 }
 0xc58   :  { %13582 = vmatprep.subr.mxu1 %v18131_v35 }
 0xc59   :  { %13583 = vmatpush3.msra.mxu1 %v16381_v31 }
 0xc5a   :  { %13587 = vmatprep.subr.mxu1 %v18131_v35 }
 0xd02   :  { %v6543_v40 = vpop.f32.mrf.mxu1  ;;  %v6691_v54 = vpop.f32.mrf.mxu0 }
 0xd03   :  { %v6544_v61 = vadd.f32 %v6543_v40, %v6473_v0  ;;  %v6882_v0 = vsub.f32 1.0, %v6723_v21 }
 0xd04   :  { %v13514_v60 = vpop.f32.mrf.mxu1  ;;  %v13528_v37 = vpop.f32.mrf.mxu0 }
 0xd05   :  { %v6695_v45 = vadd.f32 %v6544_v61, %v6318_v26 }
 0xd06   :  { %v6617_v11 = vpop.f32.mrf.mxu1 }
 0xd07   :  { %v12055_v42 = vmul.f32 -1.442695, %v6695_v45  ;;  %v6618_v62 = vadd.f32 %v6617_v11, %v6550_v23 }
 0xd08   :  { %v13521_v20 = vpop.f32.mrf.mxu1 }
 0xd09   :  { %14312 = vpow2.f32 %v12055_v42  ;;  %v6702_v31 = vadd.f32 %v6618_v62, %v16538_v9 }
 0xd0b   :  { %v12056_v27 = vmul.f32 -1.442695, %v6702_v31 }
 0xd0d   :  { %14314 = vpow2.f32 %v12056_v27 }
 0xd0e   :  { %v6798_v13 = vpop.f32.mrf.mxu1 }
 0xd0f   :  { %v6799_v18 = vadd.f32 %v16272_v16, %v6798_v13 }
 0xd10   :  { %v13539_v17 = vpop.f32.mrf.mxu1 }
 0xd11   :  { %v6804_v29 = vmul.f32 %v16681_v47, %v6799_v18  ;;  %v6889_v1 = vsub.f32 %v16679_v53, %v6799_v18 }
 0xd13   :  { %v6805_v9 = vadd.f32 %v6804_v29, %v16685_v56  ;;  %v6890_v60 = vand.u32 2147483647, %v6889_v1  ;;  %v18160_v1 = vld [vmem:[#allocation13_spill] sm:$0xff] }
 0xd15   :  { %13545 = vmatmul.mubr.msk.f32.vlgmr.msra.gmra.mxu0 %vm114_vm0, %v6805_v9 }
 0xd16   :  { %v14313_v38 = vpop.eup %14312  ;;  %13548 = vmatpush3.msra.mxu0 %v16288_v63  ;;  %v16691_v51 = vpop.f32.mrf.mxu1  ;;  %13555 = vmatprep.mubr.msk.f32.mxu0 %vm14436_vm1, %v18131_v35 }
 0xd17   :  { %v6699_v16 = vadd.f32 1.0, %v14313_v38  ;;  %13549 = vmatprep.subr.mxu0 %v18131_v35 }
 0xd18   :  { %13550 = vmatpush3.msra.mxu0 %v16294_v39  ;;  %v13568_v25 = vpop.f32.mrf.mxu1 }
 0xd19   :  { %14316 = vrcp.f32 %v6699_v16  ;;  %13551 = vmatprep.subr.mxu0 %v18131_v35  ;;  %v7201_v25 = vld [vmem:[#allocation5 + $0x60] sm:$0xff] }
 0xd1a   :  { %13552 = vmatpush3.msra.mxu0 %v16305_v2  ;;  %v14315_v63 = vpop.eup %14314  ;;  %v6467_v2 = vadd.f32 %v16352_v19, %v16634_v3 }
 0xd1b   :  { %13553 = vmatprep.subr.mxu0 %v18131_v35  ;;  %v6706_v39 = vadd.f32 1.0, %v14315_v63 }
 0xd1c   :  { %13554 = vmatpush3.msra.mxu0 %v16312_v6 }
 0xd1d   :  { %13556 = vmatmul.mubr.msk.f32.vlgmr.msra.gmra.mxu0 %vm1005_vm2, %v16648_v8  ;;  %13569 = vmatprep.subr.mxu0 %v18131_v35  ;;  %14318 = vrcp.f32 %v6706_v39 }
 0xd1e   :  { %13570 = vmatpush3.msra.mxu0 %v16319_v36  ;;  %13577 = vmatprep.mubr.msk.f32.mxu0 %vm14436_vm1, %v18131_v35  ;;  %v6624_v36 = vld [vmem:[#allocation6 + $0x18] sm:$0xff] }
 0xd1f   :  { %13571 = vmatprep.subr.mxu0 %v18131_v35 }
 0xd20   :  { %13572 = vmatpush3.msra.mxu0 %v16328_v28  ;;  %v6692_v28 = vadd.f32 %v6691_v54, %v6624_v36  ;;  %v6883_v54 = vmul.f32 %v6882_v0, %v6799_v18 }
 0xd21   :  { %13573 = vmatprep.subr.mxu0 %v18131_v35 }
 0xd22   :  { %13574 = vmatpush3.msra.mxu0 %v16337_v22 }
 0xd23   :  { %13575 = vmatprep.subr.mxu0 %v18131_v35 }
 0xd24   :  { %13576 = vmatpush3.msra.mxu0 %v16344_v59 }
 0xd25   :  { %13578 = vmatmul.mubr.msk.f32.vlgmr.msra.gmra.mxu0 %vm1005_vm2, %v16648_v8  ;;  %13594 = vmatprep.subr.mxu0 %v18131_v35 }
 0xd26   :  { %v14317_v6 = vpop.eup %14316  ;;  %13595 = vmatpush3.msra.mxu0 %v16374_v49  ;;  %13598 = vmatprep.mubr.msk.f32.mxu0 %vm14436_vm1, %v18131_v35 }
 0xd27   :  { %v6709_v22 = vmul.f32 %v14317_v6, %v6467_v2  ;;  %13596 = vmatprep.subr.mxu0 %v18131_v35 }
 0xd28   :  { %13597 = vmatpush3.msra.mxu0 %v16388_v5 }
 0xd29   :  { %v6710_v59 = vadd.f32 %v6709_v22, %v6692_v28  ;;  %13612 = vmatprep.subr.mxu0 %v18131_v35 }
 0xd2a   :  { %v14319_v19 = vpop.eup %14318 }
 0xd2b   :  { %14320 = vtanh.f32 %v6710_v59  ;;  %v6712_v26 = vsub.f32 1.0, %v14319_v19  ;;  %v6714_v49 = vmul.f32 %v14319_v19, %v16465_v12  ;;  %v16807_v59 = vld [vmem:[%s18128_s19] ss:$0 sm:$0xff] }
 0xd38   :  { %v14321_v14 = vpop.eup %14320 }
 0xd39   :  { %v6713_v32 = vmul.f32 %v14321_v14, %v6712_v26 }
 0xd3b   :  { %v6715_v48 = vadd.f32 %v6714_v49, %v6713_v32 }
 0xdd5   :  { %v6877_v3 = vpop.f32.mrf.mxu0 }
 0xdd6   :  { %v6878_v44 = vadd.f32 %v16398_v24, %v6877_v3 }
 0xdd7   :  { %v13546_v40 = vpop.f32.mrf.mxu0 }
 0xdd8   :  { %v6881_v5 = vmul.f32 %v6878_v44, %v6723_v21  ;;  %v6891_v61 = vsub.f32 %v16679_v53, %v6878_v44  ;;  %v18159_v21 = vld [vmem:[#allocation12_spill] sm:$0xff]  ;;  %v18161_v44 = vld [vmem:[#allocation14_spill] sm:$0xff] }
 0xdd9   :  { %v18163_v40 = vld [vmem:[#allocation16_spill] sm:$0xff] }
 0xdda   :  { %v6884_v37 = vadd.f32 %v6883_v54, %v6881_v5  ;;  %v6892_v45 = vand.u32 2147483647, %v6891_v61  ;;  %v18164_v5 = vld [vmem:[#allocation17_spill] sm:$0xff]  ;;  %v18165_v61 = vld [vmem:[#allocation18_spill] sm:$0xff] }
 0xddc   :  { %v6885_v23 = vmul.f32 %v6884_v37, %v16681_v47  ;;  %v6893_v11 = vadd.f32 %v6892_v45, %v6890_v60  ;;  %v6894_v12 = vsub.f32 %v16679_v53, %v6884_v37  ;;  %v18166_v60 = vld [vmem:[#allocation19_spill] sm:$0xff] }
 0xddd   :  { %v6969_v42 = vpop.f32.mrf.mxu0 }
 0xdde   :  { %v6886_v62 = vadd.f32 %v6885_v23, %v16685_v56  ;;  %v6895_v20 = vand.u32 2147483647, %v6894_v12  ;;  %v7275_v23 = vld [vmem:[#allocation6 + $0x60] sm:$0xff] }
 0xddf   :  { %v13557_v24 = vpop.f32.mrf.mxu0 }
 0xde0   :  { %6888 = vst.msk [vmem:[#allocation8 + $0x60] sm:$0xff] %vm114_vm0, %v6886_v62  ;;  %v6896_v31 = vadd.f32 %v6895_v20, %v6893_v11  ;;  %13585 = vmatmul.mubr.msk.f32.vlgmr.msra.gmra.mxu1 %vm114_vm0, %v6886_v62  ;;  %13599 = vmatmul.mubr.msk.f32.vlgmr.msra.gmra.mxu0 %vm114_vm0, %v6886_v62 }
 0xde1   :  { %13588 = vmatpush3.msra.mxu1 %v16412_v58  ;;  %13591 = vmatprep.mubr.msk.f32.mxu1 %vm14436_vm1, %v18131_v35 }
 0xde2   :  { %v6897_v13 = vmul.f32 %v6896_v31, %v16731_v46  ;;  %13589 = vmatprep.subr.mxu1 %v18131_v35  ;;  %13613 = vmatpush3.msra.mxu0 %v16492_v34 }
 0xde3   :  { %13590 = vmatpush3.msra.mxu1 %v16420_v55  ;;  %13614 = vmatprep.subr.mxu0 %v18131_v35 }
 0xde4   :  { %v16745_v27 = vadd.f32 %v6897_v13, %v16630_v33  ;;  %13601 = vmatprep.subr.mxu1 %v18131_v35  ;;  %13592 = vmatmul.mubr.msk.f32.vlgmr.msra.gmra.mxu1 %vm114_vm0, %v6886_v62  ;;  %v7124_v33 = vld [vmem:[#allocation4 + $0x60] sm:$0xff] }
 0xde5   :  { %v16749_v58 = vpop.f32.mrf.mxu0  ;;  %13602 = vmatpush3.msra.mxu1 %v16429_v50  ;;  %13609 = vmatprep.mubr.msk.f32.mxu1 %vm14436_vm1, %v18131_v35  ;;  %v7371_v50 = vld [vmem:[#allocation2 + $0x20] sm:$0xff] }
 0xde6   :  { %13603 = vmatprep.subr.mxu1 %v18131_v35  ;;  %13615 = vmatpush3.msra.mxu0 %v16499_v7  ;;  %v16763_v34 = vmul.f32 %v7371_v50, %v6715_v48  ;;  %v16768_v7 = vld [vmem:[%s18056_s25 + $0x18] sm:$0xff]  ;;  %v7118_v37 = vadd.f32 %v18166_v60, %v16749_v58  ;;  %v16858_v50 = vld [vmem:[%s18047_s16 + $0x8] sm:$0xff] }
 0xde7   :  { %v13579_v55 = vpop.f32.mrf.mxu0  ;;  %13604 = vmatpush3.msra.mxu1 %v16442_v15  ;;  %13616 = vmatprep.mubr.msk.f32.mxu0 %vm14436_vm1, %v18131_v35  ;;  %v16777_v15 = vld [vmem:[%s18056_s25 + $0x10] sm:$0xff]  ;;  %v8021_v60 = vld [vmem:[#allocation2 + $0x58] sm:$0xff] }
 0xde8   :  { %13605 = vmatprep.subr.mxu1 %v18131_v35  ;;  %13619 = vmatprep.subr.mxu0 %v18131_v35  ;;  %v16852_v55 = vld [vmem:[%s18045_s14 + $0x8] sm:$0xff] }
 0xde9   :  { %13606 = vmatpush3.msra.mxu1 %v16453_v30  ;;  %v16786_v30 = vld [vmem:[%s18056_s25 + $0x8] sm:$0xff] }
 0xdea   :  { %13607 = vmatprep.subr.mxu1 %v18131_v35 }
 0xdeb   :  { %13608 = vmatpush3.msra.mxu1 %v16460_v4  ;;  %v16793_v4 = vld [vmem:[%s18056_s25] sm:$0xff] }
 0xdec   :  { %13610 = vmatmul.mubr.msk.f32.vlgmr.msra.gmra.mxu1 %vm1005_vm2, %v16763_v34  ;;  %13630 = vmatprep.subr.mxu1 %v18131_v35 }
 0xded   :  { %13631 = vmatpush3.msra.mxu1 %v16768_v7  ;;  %13638 = vmatprep.mubr.msk.f32.mxu1 %vm14436_vm1, %v18131_v35 }
 0xdee   :  { %13632 = vmatprep.subr.mxu1 %v18131_v35 }
 0xdef   :  { %13633 = vmatpush3.msra.mxu1 %v16777_v15 }
 0xdf0   :  { %13634 = vmatprep.subr.mxu1 %v18131_v35 }
 0xdf1   :  { %13635 = vmatpush3.msra.mxu1 %v16786_v30 }
 0xdf2   :  { %13636 = vmatprep.subr.mxu1 %v18131_v35 }
 0xdf3   :  { %13637 = vmatpush3.msra.mxu1 %v16793_v4 }
 0xdf4   :  { %13639 = vmatmul.mubr.msk.f32.vlgmr.msra.gmra.mxu1 %vm1005_vm2, %v16763_v34  ;;  %13652 = vmatprep.subr.mxu1 %v18131_v35 }
 0xdf5   :  { %13656 = vmatprep.mubr.msk.f32.mxu1 %vm14436_vm1, %v18131_v35  ;;  %13653 = vmatpush3.msra.mxu1 %v16852_v55 }
 0xdf6   :  { %13654 = vmatprep.subr.mxu1 %v18131_v35 }
 0xea0   :  { %v7194_v18 = vpop.f32.mrf.mxu1  ;;  %v7342_v17 = vpop.f32.mrf.mxu0 }
 0xea1   :  { %v7195_v29 = vadd.f32 %v7194_v18, %v7124_v33  ;;  %v7343_v11 = vadd.f32 %v7342_v17, %v7275_v23  ;;  %v16872_v33 = vld [vmem:[%s18047_s16] sm:$0xff] }
 0xea2   :  { %v13586_v9 = vpop.f32.mrf.mxu1  ;;  %v13600_v38 = vpop.f32.mrf.mxu0  ;;  %v7373_v18 = vld [vmem:[#allocation3 + $0x20] sm:$0xff] }
 0xea3   :  { %v7346_v16 = vadd.f32 %v7195_v29, %v6969_v42  ;;  %v16882_v9 = vld [vmem:[%s18130_s8] ss:$0 sm:$0xff] }
 0xea4   :  { %v7268_v63 = vpop.f32.mrf.mxu1 }
 0xea5   :  { %v12091_v39 = vmul.f32 -1.442695, %v7346_v16  ;;  %v7269_v2 = vadd.f32 %v7268_v63, %v7201_v25  ;;  %v7532_v16 = vsub.f32 1.0, %v7373_v18 }
 0xea6   :  { %v13593_v6 = vpop.f32.mrf.mxu1 }
 0xea7   :  { %14322 = vpow2.f32 %v12091_v39  ;;  %v7353_v36 = vadd.f32 %v7269_v2, %v16691_v51 }
 0xea9   :  { %v12092_v22 = vmul.f32 -1.442695, %v7353_v36 }
 0xeab   :  { %14324 = vpow2.f32 %v12092_v22 }
 0xeac   :  { %v7448_v28 = vpop.f32.mrf.mxu1 }
 0xead   :  { %v16810_v19 = vadd.f32 %v16807_v59, %v7448_v28 }
 0xeae   :  { %v13611_v26 = vpop.f32.mrf.mxu1 }
 0xeaf   :  { %v7454_v14 = vmul.f32 %v16810_v19, %v16681_v47  ;;  %v7539_v29 = vsub.f32 %v16679_v53, %v16810_v19  ;;  %v7533_v39 = vmul.f32 %v7532_v16, %v16810_v19 }
 0xeb1   :  { %v7455_v32 = vadd.f32 %v7454_v14, %v16685_v56  ;;  %v7540_v6 = vand.u32 2147483647, %v7539_v29 }
 0xeb3   :  { %13617 = vmatmul.mubr.msk.f32.vlgmr.msra.gmra.mxu0 %vm114_vm0, %v7455_v32 }
 0xeb4   :  { %v14323_v51 = vpop.eup %14322  ;;  %13620 = vmatpush3.msra.mxu0 %v16529_v10  ;;  %v16817_v49 = vpop.f32.mrf.mxu1  ;;  %13627 = vmatprep.mubr.msk.f32.mxu0 %vm14436_vm1, %v18131_v35  ;;  %v18162_v10 = vld [vmem:[#allocation15_spill] sm:$0xff] }
 0xeb5   :  { %v7350_v48 = vadd.f32 1.0, %v14323_v51  ;;  %13621 = vmatprep.subr.mxu0 %v18131_v35 }
 0xeb6   :  { %13622 = vmatpush3.msra.mxu0 %v18159_v21  ;;  %v13640_v3 = vpop.f32.mrf.mxu1  ;;  %v16895_v21 = vld [vmem:[%s18046_s15 + $0x8] sm:$0xff] }
 0xeb7   :  { %14326 = vrcp.f32 %v7350_v48  ;;  %13623 = vmatprep.subr.mxu0 %v18131_v35 }
 0xeb8   :  { %13624 = vmatpush3.msra.mxu0 %v18160_v1  ;;  %v14325_v0 = vpop.eup %14324 }
 0xeb9   :  { %13625 = vmatprep.subr.mxu0 %v18131_v35  ;;  %v7357_v54 = vadd.f32 1.0, %v14325_v0 }
 0xeba   :  { %13626 = vmatpush3.msra.mxu0 %v18161_v44 }
 0xebb   :  { %13628 = vmatmul.mubr.msk.f32.vlgmr.msra.gmra.mxu0 %vm1005_vm2, %v16763_v34  ;;  %13641 = vmatprep.subr.mxu0 %v18131_v35  ;;  %14328 = vrcp.f32 %v7357_v54 }
 0xebc   :  { %13642 = vmatpush3.msra.mxu0 %v18162_v10  ;;  %13649 = vmatprep.mubr.msk.f32.mxu0 %vm14436_vm1, %v18131_v35 }
 0xebd   :  { %13643 = vmatprep.subr.mxu0 %v18131_v35 }
 0xebe   :  { %13644 = vmatpush3.msra.mxu0 %v18163_v40  ;;  %v16942_v40 = vld [vmem:[#allocation8 + $0x60] sm:$0xff] }
 0xebf   :  { %13645 = vmatprep.subr.mxu0 %v18131_v35  ;;  %18168 = vst [vmem:[#allocation12_spill] sm:$0xff] %v16942_v40 }
 0xec0   :  { %13646 = vmatpush3.msra.mxu0 %v18164_v5  ;;  %v16948_v5 = vld [vmem:[%s18125_s11 + $0x20] sm:$0xff] }
 0xec1   :  { %13647 = vmatprep.subr.mxu0 %v18131_v35 }
 0xec2   :  { %13648 = vmatpush3.msra.mxu0 %v18165_v61 }
 0xec3   :  { %13650 = vmatmul.mubr.msk.f32.vlgmr.msra.gmra.mxu0 %vm1005_vm2, %v16763_v34  ;;  %13666 = vmatprep.subr.mxu0 %v18131_v35 }
 0xec4   :  { %v14327_v45 = vpop.eup %14326  ;;  %13670 = vmatprep.mubr.msk.f32.mxu0 %vm14436_vm1, %v18131_v35  ;;  %13667 = vmatpush3.msra.mxu0 %v16858_v50 }
 0xec5   :  { %v7360_v12 = vmul.f32 %v14327_v45, %v7118_v37  ;;  %13668 = vmatprep.subr.mxu0 %v18131_v35  ;;  %v16962_v45 = vld [vmem:[%s18056_s25 + $0x38] sm:$0xff] }
 0xec6   :  { %13669 = vmatpush3.msra.mxu0 %v16872_v33 }
 0xec7   :  { %v7361_v42 = vadd.f32 %v7360_v12, %v7343_v11  ;;  %13684 = vmatprep.subr.mxu0 %v18131_v35  ;;  %v16971_v11 = vld [vmem:[%s18056_s25 + $0x30] sm:$0xff]  ;;  %v16984_v12 = vld [vmem:[%s18056_s25 + $0x28] sm:$0xff] }
 0xec8   :  { %v14329_v62 = vpop.eup %14328 }
 0xec9   :  { %14330 = vtanh.f32 %v7361_v42  ;;  %v7363_v20 = vsub.f32 1.0, %v14329_v62  ;;  %v7365_v13 = vmul.f32 %v14329_v62, %v16648_v8  ;;  %v16865_v8 = vld [vmem:[%s18045_s14] sm:$0xff]  ;;  %v17004_v62 = vld [vmem:[%s18127_s5 + $0x18] sm:$0xff] }
 0xeca   :  { %13655 = vmatpush3.msra.mxu1 %v16865_v8  ;;  %v16991_v42 = vld [vmem:[%s18056_s25 + $0x20] sm:$0xff] }
 0xecb   :  { %13659 = vmatprep.subr.mxu1 %v18131_v35 }
 0xed6   :  { %v14331_v24 = vpop.eup %14330 }
 0xed7   :  { %v7364_v31 = vmul.f32 %v14331_v24, %v7363_v20  ;;  %v17011_v20 = vld [vmem:[%s18127_s5 + $0x10] sm:$0xff]  ;;  %v7774_v24 = vld [vmem:[#allocation4 + $0x20] sm:$0xff] }
 0xed9   :  { %v16847_v58 = vadd.f32 %v7365_v13, %v7364_v31 }
 0xedb   :  { %v16957_v37 = vmul.f32 %v8021_v60, %v16847_v58  ;;  %v17062_v60 = vld [vmem:[%s18057_s26 + $0x38] sm:$0xff] }
 0xf73   :  { %v7527_v17 = vpop.f32.mrf.mxu0 }
 0xf74   :  { %v7528_v38 = vadd.f32 %v16882_v9, %v7527_v17 }
 0xf75   :  { %v13618_v25 = vpop.f32.mrf.mxu0 }
 0xf76   :  { %v7531_v63 = vmul.f32 %v7528_v38, %v7373_v18  ;;  %v7541_v2 = vsub.f32 %v16679_v53, %v7528_v38  ;;  %v7851_v38 = vld [vmem:[#allocation5 + $0x20] sm:$0xff] }
 0xf78   :  { %v7534_v36 = vadd.f32 %v7533_v39, %v7531_v63  ;;  %v7542_v28 = vand.u32 2147483647, %v7541_v2 }
 0xf7a   :  { %v7535_v22 = vmul.f32 %v7534_v36, %v16681_v47  ;;  %v7543_v26 = vadd.f32 %v7542_v28, %v7540_v6  ;;  %v7544_v14 = vsub.f32 %v16679_v53, %v7534_v36  ;;  %v16903_v53 = vld [vmem:[%s18046_s15] sm:$0xff] }
 0xf7b   :  { %v16889_v32 = vpop.f32.mrf.mxu0  ;;  %v17020_v28 = vld [vmem:[%s18128_s19 + $0x1] ss:$0 sm:$0xff] }
 0xf7c   :  { %v7536_v51 = vadd.f32 %v7535_v22, %v16685_v56  ;;  %v7545_v48 = vand.u32 2147483647, %v7544_v14  ;;  %v16913_v56 = vld [vmem:[%s18125_s11 + $0x38] sm:$0xff] }
 0xf7d   :  { %v13629_v19 = vpop.f32.mrf.mxu0 }
 0xf7e   :  { %7538 = vst.msk [vmem:[#allocation8 + $0x20] sm:$0xff] %vm114_vm0, %v7536_v51  ;;  %v7546_v3 = vadd.f32 %v7545_v48, %v7543_v26  ;;  %13657 = vmatmul.mubr.msk.f32.vlgmr.msra.gmra.mxu1 %vm114_vm0, %v7536_v51  ;;  %13671 = vmatmul.mubr.msk.f32.vlgmr.msra.gmra.mxu0 %vm114_vm0, %v7536_v51 }
 0xf7f   :  { %13660 = vmatpush3.msra.mxu1 %v16895_v21  ;;  %13663 = vmatprep.mubr.msk.f32.mxu1 %vm14436_vm1, %v18131_v35 }
 0xf80   :  { %v7547_v47 = vmul.f32 %v7546_v3, %v16731_v46  ;;  %13661 = vmatprep.subr.mxu1 %v18131_v35  ;;  %13688 = vmatprep.mubr.msk.f32.mxu0 %vm14436_vm1, %v18131_v35  ;;  %v16926_v46 = vld [vmem:[%s18125_s11 + $0x30] sm:$0xff] }
 0xf81   :  { %13662 = vmatpush3.msra.mxu1 %v16903_v53  ;;  %13685 = vmatpush3.msra.mxu0 %v17004_v62 }
 0xf82   :  { %v16919_v1 = vadd.f32 %v7547_v47, %v16745_v27  ;;  %13673 = vmatprep.subr.mxu1 %v18131_v35  ;;  %13664 = vmatmul.mubr.msk.f32.vlgmr.msra.gmra.mxu1 %vm114_vm0, %v7536_v51  ;;  %v16937_v27 = vld [vmem:[%s18125_s11 + $0x28] sm:$0xff]  ;;  %v17037_v51 = vld [vmem:[%s18055_s24 + $0x30] sm:$0xff] }
 0xf83   :  { %v16928_v44 = vpop.f32.mrf.mxu0  ;;  %13674 = vmatpush3.msra.mxu1 %v16913_v56  ;;  %13681 = vmatprep.mubr.msk.f32.mxu1 %vm14436_vm1, %v18131_v35  ;;  %v17048_v47 = vld [vmem:[%s18055_s24 + $0x28] sm:$0xff] }
 0xf84   :  { %13675 = vmatprep.subr.mxu1 %v18131_v35  ;;  %13686 = vmatprep.subr.mxu0 %v18131_v35 }
 0xf85   :  { %v13651_v10 = vpop.f32.mrf.mxu0  ;;  %13676 = vmatpush3.msra.mxu1 %v16926_v46  ;;  %v16940_v0 = vld [vmem:[#allocation8 + $0x20] sm:$0xff]  ;;  %13687 = vmatpush3.msra.mxu0 %v17011_v20 }
 0xf86   :  { %18167 = vst [vmem:[#allocation20_spill] sm:$0xff] %v16940_v0  ;;  %13677 = vmatprep.subr.mxu1 %v18131_v35  ;;  %v11649_v54 = vadd.f32 %v16942_v40, %v16940_v0  ;;  %13691 = vmatprep.subr.mxu0 %v18131_v35 }
 0xf87   :  { %13678 = vmatpush3.msra.mxu1 %v16937_v27 }
 0xf88   :  { %13679 = vmatprep.subr.mxu1 %v18131_v35  ;;  %v11657_v23 = vmul.f32 0.5, %v11649_v54  ;;  %v17055_v54 = vld [vmem:[%s18055_s24 + $0x20] sm:$0xff] }
 0xf89   :  { %13680 = vmatpush3.msra.mxu1 %v16948_v5 }
 0xf8a   :  { %13682 = vmatmul.mubr.msk.f32.vlgmr.msra.gmra.mxu1 %vm1005_vm2, %v16957_v37  ;;  %13702 = vmatprep.subr.mxu1 %v18131_v35  ;;  %11665 = vst.msk [vmem:[%s18058_s27 + $0x20] sm:$0xff] %vm114_vm0, %v11657_v23  ;;  %v17071_v23 = vld [vmem:[%s18057_s26 + $0x30] sm:$0xff] }
 0xf8b   :  { %13703 = vmatpush3.msra.mxu1 %v16962_v45  ;;  %13710 = vmatprep.mubr.msk.f32.mxu1 %vm14436_vm1, %v18131_v35 }
 0xf8c   :  { %13704 = vmatprep.subr.mxu1 %v18131_v35 }
 0xf8d   :  { %13705 = vmatpush3.msra.mxu1 %v16971_v11 }
 0xf8e   :  { %13706 = vmatprep.subr.mxu1 %v18131_v35 }
 0xf8f   :  { %13707 = vmatpush3.msra.mxu1 %v16984_v12 }
 0xf90   :  { %13708 = vmatprep.subr.mxu1 %v18131_v35 }
 0xf91   :  { %13709 = vmatpush3.msra.mxu1 %v16991_v42 }
 0xf92   :  { %13711 = vmatmul.mubr.msk.f32.vlgmr.msra.gmra.mxu1 %vm1005_vm2, %v16957_v37  ;;  %13724 = vmatprep.subr.mxu1 %v18131_v35 }
 0xf93   :  { %13728 = vmatprep.mubr.msk.f32.mxu1 %vm14436_vm1, %v18131_v35 }
0x103e   :  { %v7844_v31 = vpop.f32.mrf.mxu1  ;;  %v7992_v13 = vpop.f32.mrf.mxu0 }
0x103f   :  { %v7845_v58 = vadd.f32 %v7844_v31, %v7774_v24  ;;  %v17080_v24 = vld [vmem:[%s18057_s26 + $0x28] sm:$0xff] }
0x1040   :  { %v13658_v18 = vpop.f32.mrf.mxu1  ;;  %v13672_v17 = vpop.f32.mrf.mxu0 }
0x1041   :  { %v7996_v29 = vadd.f32 %v7845_v58, %v16889_v32  ;;  %v17087_v58 = vld [vmem:[%s18057_s26 + $0x20] sm:$0xff] }
0x1042   :  { %v7918_v16 = vpop.f32.mrf.mxu1  ;;  %v17095_v17 = vld [vmem:[%s18054_s23] ss:$0 sm:$0xff] }
0x1043   :  { %v12103_v25 = vmul.f32 -1.442695, %v7996_v29  ;;  %v7919_v63 = vadd.f32 %v7918_v16, %v7851_v38  ;;  %v7768_v29 = vadd.f32 %v17095_v17, %v16928_v44  ;;  %v7925_v16 = vld [vmem:[#allocation6 + $0x20] sm:$0xff] }
0x1044   :  { %v13665_v39 = vpop.f32.mrf.mxu1 }
0x1045   :  { %14332 = vpow2.f32 %v12103_v25  ;;  %v8003_v2 = vadd.f32 %v7919_v63, %v16817_v49  ;;  %v17031_v49 = vld [vmem:[%s18055_s24 + $0x38] sm:$0xff]  ;;  %v7993_v25 = vadd.f32 %v7992_v13, %v7925_v16 }
0x1046   :  { %v17116_v13 = vld [vmem:[%s18047_s16 + $0x18] sm:$0xff] }
0x1047   :  { %v12104_v36 = vmul.f32 -1.442695, %v8003_v2 }
0x1049   :  { %14334 = vpow2.f32 %v12104_v36 }
0x104a   :  { %v8098_v6 = vpop.f32.mrf.mxu1 }
0x104b   :  { %v17023_v22 = vadd.f32 %v17020_v28, %v8098_v6 }
0x104c   :  { %v13683_v26 = vpop.f32.mrf.mxu1 }
0x104d   :  { %v8104_v14 = vmul.f32 %v17023_v22, %v16515_v52 }
0x104f   :  { %v8105_v32 = vadd.f32 %v8104_v14, %v16521_v43 }
0x1051   :  { %13689 = vmatmul.mubr.msk.f32.vlgmr.msra.gmra.mxu0 %vm114_vm0, %v8105_v32  ;;  %v17110_v32 = vld [vmem:[%s18045_s14 + $0x18] sm:$0xff] }
0x1052   :  { %v14333_v48 = vpop.eup %14332  ;;  %13692 = vmatpush3.msra.mxu0 %v17031_v49  ;;  %v17040_v19 = vpop.f32.mrf.mxu1  ;;  %13699 = vmatprep.mubr.msk.f32.mxu0 %vm14436_vm1, %v18131_v35 }
0x1053   :  { %v8000_v3 = vadd.f32 1.0, %v14333_v48  ;;  %13693 = vmatprep.subr.mxu0 %v18131_v35  ;;  %13725 = vmatpush3.msra.mxu1 %v17110_v32  ;;  %v17130_v48 = vld [vmem:[%s18047_s16 + $0x10] sm:$0xff] }
0x1054   :  { %13694 = vmatpush3.msra.mxu0 %v17037_v51  ;;  %v13712_v10 = vpop.f32.mrf.mxu1  ;;  %13726 = vmatprep.subr.mxu1 %v18131_v35 }
0x1055   :  { %14336 = vrcp.f32 %v8000_v3  ;;  %13695 = vmatprep.subr.mxu0 %v18131_v35  ;;  %v8023_v3 = vld [vmem:[#allocation3 + $0x58] sm:$0xff] }
0x1056   :  { %13696 = vmatpush3.msra.mxu0 %v17048_v47  ;;  %v14335_v31 = vpop.eup %14334 }
0x1057   :  { %13697 = vmatprep.subr.mxu0 %v18131_v35  ;;  %v8007_v18 = vadd.f32 1.0, %v14335_v31  ;;  %v8189_v31 = vsub.f32 %v16513_v41, %v17023_v22 }
0x1058   :  { %13698 = vmatpush3.msra.mxu0 %v17055_v54 }
0x1059   :  { %13700 = vmatmul.mubr.msk.f32.vlgmr.msra.gmra.mxu0 %vm1005_vm2, %v16957_v37  ;;  %13713 = vmatprep.subr.mxu0 %v18131_v35  ;;  %14338 = vrcp.f32 %v8007_v18  ;;  %v17140_v18 = vld [vmem:[%s18130_s8 + $0x1] ss:$0 sm:$0xff] }
0x105a   :  { %13714 = vmatpush3.msra.mxu0 %v17062_v60  ;;  %13721 = vmatprep.mubr.msk.f32.mxu0 %vm14436_vm1, %v18131_v35 }
0x105b   :  { %13715 = vmatprep.subr.mxu0 %v18131_v35 }
0x105c   :  { %13716 = vmatpush3.msra.mxu0 %v17071_v23 }
0x105d   :  { %13717 = vmatprep.subr.mxu0 %v18131_v35 }
0x105e   :  { %13718 = vmatpush3.msra.mxu0 %v17080_v24 }
0x105f   :  { %13719 = vmatprep.subr.mxu0 %v18131_v35 }
0x1060   :  { %13720 = vmatpush3.msra.mxu0 %v17087_v58 }
0x1061   :  { %13722 = vmatmul.mubr.msk.f32.vlgmr.msra.gmra.mxu0 %vm1005_vm2, %v16957_v37  ;;  %13738 = vmatprep.subr.mxu0 %v18131_v35 }
0x1062   :  { %v14337_v38 = vpop.eup %14336  ;;  %13742 = vmatprep.mubr.msk.f32.mxu0 %vm14436_vm1, %v18131_v35  ;;  %13739 = vmatpush3.msra.mxu0 %v17116_v13 }
0x1063   :  { %v8010_v63 = vmul.f32 %v14337_v38, %v7768_v29  ;;  %13740 = vmatprep.subr.mxu0 %v18131_v35  ;;  %v8182_v38 = vsub.f32 1.0, %v8023_v3 }
0x1064   :  { %13741 = vmatpush3.msra.mxu0 %v17130_v48 }
0x1065   :  { %v8011_v39 = vadd.f32 %v8010_v63, %v7993_v25  ;;  %13756 = vmatprep.subr.mxu0 %v18131_v35  ;;  %v8183_v63 = vmul.f32 %v8182_v38, %v17023_v22  ;;  %v17154_v22 = vld [vmem:[%s18046_s15 + $0x18] sm:$0xff] }
0x1066   :  { %v14339_v2 = vpop.eup %14338 }
0x1067   :  { %14340 = vtanh.f32 %v8011_v39  ;;  %v8013_v6 = vsub.f32 1.0, %v14339_v2  ;;  %v8015_v44 = vmul.f32 %v14339_v2, %v16763_v34  ;;  %v17123_v34 = vld [vmem:[%s18045_s14 + $0x10] sm:$0xff]  ;;  %v14405_v39 = vld [vmem:[%s18129_s21 + $0x18] sm:$0xff] }
0x1068   :  { %13727 = vmatpush3.msra.mxu1 %v17123_v34 }
0x1069   :  { %13731 = vmatprep.subr.mxu1 %v18131_v35 }
0x1074   :  { %v14341_v36 = vpop.eup %14340 }
0x1075   :  { %v8014_v26 = vmul.f32 %v14341_v36, %v8013_v6  ;;  %v8190_v6 = vand.u32 2147483647, %v8189_v31 }
0x1077   :  { %v17105_v14 = vadd.f32 %v8015_v44, %v8014_v26 }
0x1111   :  { %v8177_v10 = vpop.f32.mrf.mxu0 }
0x1112   :  { %v8178_v29 = vadd.f32 %v17140_v18, %v8177_v10 }
0x1113   :  { %v13690_v16 = vpop.f32.mrf.mxu0 }
0x1114   :  { %v8181_v25 = vmul.f32 %v8178_v29, %v8023_v3  ;;  %v8191_v2 = vsub.f32 %v14405_v39, %v8178_v29 }
0x1116   :  { %v8184_v36 = vadd.f32 %v8183_v63, %v8181_v25  ;;  %v8192_v41 = vand.u32 2147483647, %v8191_v2  ;;  %v17199_v63 = vld [vmem:[#allocation8 + $0x18] sm:$0xff]  ;;  %v17207_v2 = vld [vmem:[%s18125_s11] sm:$0xff] }
0x1117   :  { %18169 = vst [vmem:[#allocation13_spill] sm:$0xff] %v17199_v63 }
0x1118   :  { %v8185_v26 = vmul.f32 %v8184_v36, %v16515_v52  ;;  %v8193_v44 = vadd.f32 %v8192_v41, %v8190_v6  ;;  %v8194_v61 = vsub.f32 %v14405_v39, %v8184_v36  ;;  %v17162_v52 = vld [vmem:[%s18046_s15 + $0x10] sm:$0xff]  ;;  %v8671_v41 = vld [vmem:[#allocation2 + $0x28] sm:$0xff]  ;;  %v17351_v36 = vld [vmem:[%s18054_s23 + $0x1] ss:$0 sm:$0xff] }
0x1119   :  { %v17148_v40 = vpop.f32.mrf.mxu0  ;;  %18177 = vst [vmem:[#allocation22_spill] sm:$0xff] %v17351_v36 }
0x111a   :  { %v8186_v10 = vadd.f32 %v8185_v26, %v16521_v43  ;;  %v8195_v16 = vand.u32 2147483647, %v8194_v61  ;;  %v17172_v61 = vld [vmem:[%s18125_s11 + $0x18] sm:$0xff]  ;;  %v17216_v26 = vmul.f32 %v8671_v41, %v17105_v14  ;;  %v17264_v41 = vld [vmem:[%s18124_s29 + $0x28] sm:$0xff] }
0x111b   :  { %v13701_v3 = vpop.f32.mrf.mxu0 }
0x111c   :  { %8188 = vst.msk [vmem:[#allocation8 + $0x58] sm:$0xff] %vm114_vm0, %v8186_v10  ;;  %v8196_v31 = vadd.f32 %v8195_v16, %v8193_v44  ;;  %13729 = vmatmul.mubr.msk.f32.vlgmr.msra.gmra.mxu1 %vm114_vm0, %v8186_v10  ;;  %13743 = vmatmul.mubr.msk.f32.vlgmr.msra.gmra.mxu0 %vm114_vm0, %v8186_v10  ;;  %v8501_v3 = vld [vmem:[#allocation5 + $0x58] sm:$0xff] }
0x111d   :  { %13732 = vmatpush3.msra.mxu1 %v17154_v22  ;;  %13735 = vmatprep.mubr.msk.f32.mxu1 %vm14436_vm1, %v18131_v35 }
0x111e   :  { %v8197_v43 = vmul.f32 %v8196_v31, %v16616_v57  ;;  %13733 = vmatprep.subr.mxu1 %v18131_v35  ;;  %13760 = vmatprep.mubr.msk.f32.mxu0 %vm14436_vm1, %v18131_v35  ;;  %v17185_v57 = vld [vmem:[%s18125_s11 + $0x10] sm:$0xff] }
0x111f   :  { %13734 = vmatpush3.msra.mxu1 %v17162_v52 }
0x1120   :  { %v17178_v29 = vadd.f32 %v8197_v43, %v16919_v1  ;;  %13745 = vmatprep.subr.mxu1 %v18131_v35  ;;  %13736 = vmatmul.mubr.msk.f32.vlgmr.msra.gmra.mxu1 %vm114_vm0, %v8186_v10  ;;  %v17196_v1 = vld [vmem:[%s18125_s11 + $0x8] sm:$0xff] }
0x1121   :  { %v17187_v38 = vpop.f32.mrf.mxu0  ;;  %13746 = vmatpush3.msra.mxu1 %v17172_v61  ;;  %13753 = vmatprep.mubr.msk.f32.mxu1 %vm14436_vm1, %v18131_v35 }
0x1122   :  { %13747 = vmatprep.subr.mxu1 %v18131_v35 }
0x1123   :  { %v13723_v25 = vpop.f32.mrf.mxu0  ;;  %13748 = vmatpush3.msra.mxu1 %v17185_v57  ;;  %v17201_v39 = vld [vmem:[#allocation8 + $0x58] sm:$0xff] }
0x1124   :  { %18170 = vst [vmem:[#allocation14_spill] sm:$0xff] %v17201_v39  ;;  %13749 = vmatprep.subr.mxu1 %v18131_v35  ;;  %v11648_v6 = vadd.f32 %v17201_v39, %v17199_v63  ;;  %v8575_v39 = vld [vmem:[#allocation6 + $0x58] sm:$0xff] }
0x1125   :  { %13750 = vmatpush3.msra.mxu1 %v17196_v1 }
0x1126   :  { %13751 = vmatprep.subr.mxu1 %v18131_v35  ;;  %v11656_v44 = vmul.f32 0.5, %v11648_v6 }
0x1127   :  { %13752 = vmatpush3.msra.mxu1 %v17207_v2 }
0x1128   :  { %13754 = vmatmul.mubr.msk.f32.vlgmr.msra.gmra.mxu1 %vm1005_vm2, %v17216_v26  ;;  %13774 = vmatprep.subr.mxu1 %v18131_v35  ;;  %11664 = vst.msk [vmem:[%s18058_s27 + $0x18] sm:$0xff] %vm114_vm0, %v11656_v44 }
0x1129   :  { %13775 = vmatpush3.msra.mxu1 %v16768_v7  ;;  %13782 = vmatprep.mubr.msk.f32.mxu1 %vm14436_vm1, %v18131_v35  ;;  %v17247_v7 = vld [vmem:[%s18127_s5 + $0x8] sm:$0xff] }
0x112a   :  { %13776 = vmatprep.subr.mxu1 %v18131_v35  ;;  %13757 = vmatpush3.msra.mxu0 %v17247_v7 }
0x112b   :  { %13777 = vmatpush3.msra.mxu1 %v16777_v15  ;;  %13758 = vmatprep.subr.mxu0 %v18131_v35  ;;  %v17254_v15 = vld [vmem:[%s18127_s5] sm:$0xff] }
0x112c   :  { %13778 = vmatprep.subr.mxu1 %v18131_v35  ;;  %13759 = vmatpush3.msra.mxu0 %v17254_v15 }
0x112d   :  { %13779 = vmatpush3.msra.mxu1 %v16786_v30  ;;  %13763 = vmatprep.subr.mxu0 %v18131_v35  ;;  %v8424_v30 = vld [vmem:[#allocation4 + $0x58] sm:$0xff] }
0x112e   :  { %13780 = vmatprep.subr.mxu1 %v18131_v35 }
0x112f   :  { %13781 = vmatpush3.msra.mxu1 %v16793_v4 }
0x1130   :  { %13783 = vmatmul.mubr.msk.f32.vlgmr.msra.gmra.mxu1 %vm1005_vm2, %v17216_v26  ;;  %13796 = vmatprep.subr.mxu1 %v18131_v35 }
0x1131   :  { %13797 = vmatpush3.msra.mxu1 %v16852_v55  ;;  %13800 = vmatprep.mubr.msk.f32.mxu1 %vm14436_vm1, %v18131_v35 }
0x1132   :  { %13798 = vmatprep.subr.mxu1 %v18131_v35 }
0x1133   :  { %13799 = vmatpush3.msra.mxu1 %v16865_v8 }
0x1134   :  { %13803 = vmatprep.subr.mxu1 %v18131_v35 }
0x11dc   :  { %v8494_v4 = vpop.f32.mrf.mxu1  ;;  %v17258_v55 = vpop.f32.mrf.mxu0 }
0x11dd   :  { %v8495_v8 = vadd.f32 %v8494_v4, %v8424_v30  ;;  %v17270_v30 = vld [vmem:[%s18129_s21 + $0x28] sm:$0xff] }
0x11de   :  { %v13730_v14 = vpop.f32.mrf.mxu1  ;;  %v13744_v10 = vpop.f32.mrf.mxu0 }
0x11df   :  { %v8646_v16 = vadd.f32 %v8495_v8, %v17148_v40  ;;  %v18094_v40 = vsub.f32 1.0, %v17264_v41  ;;  %v17278_v10 = vmul.f32 %v17264_v41, %v17270_v30 }
0x11e0   :  { %v8568_v31 = vpop.f32.mrf.mxu1 }
0x11e1   :  { %v12139_v43 = vmul.f32 -1.442695, %v8646_v16  ;;  %v8569_v25 = vadd.f32 %v8568_v31, %v8501_v3  ;;  %v17287_v31 = vld [vmem:[%s18055_s24 + $0x18] sm:$0xff] }
0x11e2   :  { %v13737_v6 = vpop.f32.mrf.mxu1 }
0x11e3   :  { %14342 = vpow2.f32 %v12139_v43  ;;  %v8653_v44 = vadd.f32 %v8569_v25, %v17040_v19 }
0x11e5   :  { %v12140_v8 = vmul.f32 -1.442695, %v8653_v44  ;;  %v17304_v44 = vld [vmem:[%s18055_s24 + $0x8] sm:$0xff] }
0x11e6   :  { %18171 = vst [vmem:[#allocation15_spill] sm:$0xff] %v17304_v44 }
0x11e7   :  { %14344 = vpow2.f32 %v12140_v8  ;;  %v17311_v8 = vld [vmem:[%s18055_s24] sm:$0xff] }
0x11e8   :  { %v8748_v4 = vpop.f32.mrf.mxu1  ;;  %18172 = vst [vmem:[#allocation16_spill] sm:$0xff] %v17311_v8 }
0x11e9   :  { %v17274_v14 = vadd.f32 %v16807_v59, %v8748_v4  ;;  %v17293_v59 = vld [vmem:[%s18055_s24 + $0x10] sm:$0xff] }
0x11ea   :  { %v13755_v16 = vpop.f32.mrf.mxu1 }
0x11eb   :  { %v8754_v19 = vmul.f32 %v18094_v40, %v17274_v14  ;;  %v17318_v16 = vld [vmem:[%s18057_s26 + $0x18] sm:$0xff]  ;;  %v8418_v40 = vadd.f32 %v17351_v36, %v17187_v38 }
0x11ec   :  { %18173 = vst [vmem:[#allocation17_spill] sm:$0xff] %v17318_v16 }
0x11ed   :  { %v8755_v3 = vadd.f32 %v8754_v19, %v17278_v10  ;;  %v17327_v19 = vld [vmem:[%s18057_s26 + $0x10] sm:$0xff] }
0x11ee   :  { %18174 = vst [vmem:[#allocation18_spill] sm:$0xff] %v17327_v19 }
0x11ef   :  { %13761 = vmatmul.mubr.msk.f32.vlgmr.msra.gmra.mxu0 %vm114_vm0, %v8755_v3  ;;  %v17336_v3 = vld [vmem:[%s18057_s26 + $0x8] sm:$0xff] }
0x11f0   :  { %v14343_v43 = vpop.eup %14342  ;;  %13764 = vmatpush3.msra.mxu0 %v17287_v31  ;;  %v17296_v25 = vpop.f32.mrf.mxu1  ;;  %13771 = vmatprep.mubr.msk.f32.mxu0 %vm14436_vm1, %v18131_v35  ;;  %18175 = vst [vmem:[#allocation19_spill] sm:$0xff] %v17336_v3 }
0x11f1   :  { %v8650_v6 = vadd.f32 1.0, %v14343_v43  ;;  %13765 = vmatprep.subr.mxu0 %v18131_v35 }
0x11f2   :  { %13766 = vmatpush3.msra.mxu0 %v17293_v59  ;;  %v13784_v4 = vpop.f32.mrf.mxu1 }
0x11f3   :  { %14346 = vrcp.f32 %v8650_v6  ;;  %13767 = vmatprep.subr.mxu0 %v18131_v35  ;;  %v17343_v6 = vld [vmem:[%s18057_s26] sm:$0xff] }
0x11f4   :  { %13768 = vmatpush3.msra.mxu0 %v17304_v44  ;;  %v14345_v43 = vpop.eup %14344  ;;  %18176 = vst [vmem:[#allocation21_spill] sm:$0xff] %v17343_v6 }
0x11f5   :  { %13769 = vmatprep.subr.mxu0 %v18131_v35  ;;  %v8657_v4 = vadd.f32 1.0, %v14345_v43  ;;  %v8643_v43 = vadd.f32 %v17258_v55, %v8575_v39 }
0x11f6   :  { %13770 = vmatpush3.msra.mxu0 %v17311_v8  ;;  %v8673_v8 = vld [vmem:[#allocation3 + $0x28] sm:$0xff] }
0x11f7   :  { %13772 = vmatmul.mubr.msk.f32.vlgmr.msra.gmra.mxu0 %vm1005_vm2, %v17216_v26  ;;  %13785 = vmatprep.subr.mxu0 %v18131_v35  ;;  %14348 = vrcp.f32 %v8657_v4  ;;  %v8832_v55 = vsub.f32 1.0, %v8673_v8 }
0x11f8   :  { %13786 = vmatpush3.msra.mxu0 %v17318_v16  ;;  %13793 = vmatprep.mubr.msk.f32.mxu0 %vm14436_vm1, %v18131_v35 }
0x11f9   :  { %13787 = vmatprep.subr.mxu0 %v18131_v35 }
0x11fa   :  { %13788 = vmatpush3.msra.mxu0 %v17327_v19 }
0x11fb   :  { %13789 = vmatprep.subr.mxu0 %v18131_v35 }
0x11fc   :  { %13790 = vmatpush3.msra.mxu0 %v17336_v3 }
0x11fd   :  { %13791 = vmatprep.subr.mxu0 %v18131_v35 }
0x11fe   :  { %13792 = vmatpush3.msra.mxu0 %v17343_v6 }
0x11ff   :  { %13794 = vmatmul.mubr.msk.f32.vlgmr.msra.gmra.mxu0 %vm1005_vm2, %v17216_v26  ;;  %13810 = vmatprep.subr.mxu0 %v18131_v35 }
0x1200   :  { %v14347_v0 = vpop.eup %14346  ;;  %13811 = vmatpush3.msra.mxu0 %v16858_v50  ;;  %13814 = vmatprep.mubr.msk.f32.mxu0 %vm14436_vm1, %v18131_v35 }
0x1201   :  { %v8660_v63 = vmul.f32 %v14347_v0, %v8418_v40  ;;  %13812 = vmatprep.subr.mxu0 %v18131_v35  ;;  %v8839_v0 = vsub.f32 %v17270_v30, %v17274_v14  ;;  %v8833_v40 = vmul.f32 %v8832_v55, %v17274_v14 }
0x1202   :  { %13813 = vmatpush3.msra.mxu0 %v16872_v33 }
0x1203   :  { %v8661_v38 = vadd.f32 %v8660_v63, %v8643_v43  ;;  %13828 = vmatprep.subr.mxu0 %v18131_v35  ;;  %v8840_v43 = vand.u32 2147483647, %v8839_v0 }
0x1204   :  { %v14349_v36 = vpop.eup %14348 }
0x1205   :  { %14350 = vtanh.f32 %v8661_v38  ;;  %v8663_v6 = vsub.f32 1.0, %v14349_v36  ;;  %v8665_v50 = vmul.f32 %v14349_v36, %v16957_v37  ;;  %v18178_v37 = vsub.f32 1.0, %v17264_v41 }
0x1212   :  { %v14351_v3 = vpop.eup %14350 }
0x1213   :  { %v8664_v19 = vmul.f32 %v14351_v3, %v8663_v6 }
0x1215   :  { %v8666_v16 = vadd.f32 %v8665_v50, %v8664_v19 }
0x12af   :  { %v8827_v44 = vpop.f32.mrf.mxu0 }
0x12b0   :  { %v8828_v39 = vadd.f32 %v16882_v9, %v8827_v44 }
0x12b1   :  { %v13762_v33 = vpop.f32.mrf.mxu0 }
0x12b2   :  { %v8831_v63 = vmul.f32 %v8828_v39, %v8673_v8  ;;  %v8841_v4 = vsub.f32 %v17270_v30, %v8828_v39  ;;  %v8669_v33 = vld [vmem:[#allocation7 + $0x28] sm:$0xff] }
0x12b3   :  { %v9151_v39 = vld [vmem:[#allocation5 + $0x28] sm:$0xff] }
0x12b4   :  { %v8834_v38 = vadd.f32 %v8833_v40, %v8831_v63  ;;  %v8842_v3 = vand.u32 2147483647, %v8841_v4 }
0x12b6   :  { %v8835_v36 = vmul.f32 %v8834_v38, %v18178_v37  ;;  %v8843_v19 = vadd.f32 %v8842_v3, %v8840_v43  ;;  %v8844_v6 = vsub.f32 %v17270_v30, %v8834_v38  ;;  %v17452_v43 = vld [vmem:[%s18129_s21 + $0x10] sm:$0xff] }
0x12b7   :  { %v17374_v50 = vpop.f32.mrf.mxu0 }
0x12b8   :  { %v8836_v9 = vadd.f32 %v8835_v36, %v17278_v10  ;;  %v8845_v44 = vand.u32 2147483647, %v8844_v6 }
0x12b9   :  { %v13773_v8 = vpop.f32.mrf.mxu0 }
0x12ba   :  { %8838 = vst.msk [vmem:[#allocation8 + $0x28] sm:$0xff] %vm114_vm0, %v8836_v9  ;;  %v8846_v14 = vadd.f32 %v8845_v44, %v8843_v19  ;;  %13801 = vmatmul.mubr.msk.f32.vlgmr.msra.gmra.mxu1 %vm114_vm0, %v8836_v9  ;;  %13815 = vmatmul.mubr.msk.f32.vlgmr.msra.gmra.mxu0 %vm114_vm0, %v8836_v9 }
0x12bb   :  { %13804 = vmatpush3.msra.mxu1 %v16895_v21  ;;  %13807 = vmatprep.mubr.msk.f32.mxu1 %vm14436_vm1, %v18131_v35 }
0x12bc   :  { %v8847_v41 = vmul.f32 %v8846_v14, %v8669_v33  ;;  %13805 = vmatprep.subr.mxu1 %v18131_v35  ;;  %13829 = vmatpush3.msra.mxu0 %v17004_v62 }
0x12bd   :  { %13806 = vmatpush3.msra.mxu1 %v16903_v53  ;;  %13830 = vmatprep.subr.mxu0 %v18131_v35 }
0x12be   :  { %v17388_v30 = vadd.f32 %v8847_v41, %v17178_v29  ;;  %13817 = vmatprep.subr.mxu1 %v18131_v35  ;;  %13808 = vmatmul.mubr.msk.f32.vlgmr.msra.gmra.mxu1 %vm114_vm0, %v8836_v9  ;;  %v17404_v29 = vld [vmem:[#allocation8 + $0x68] sm:$0xff] }
0x12bf   :  { %v17392_v21 = vpop.f32.mrf.mxu0  ;;  %13818 = vmatpush3.msra.mxu1 %v16913_v56  ;;  %13825 = vmatprep.mubr.msk.f32.mxu1 %vm14436_vm1, %v18131_v35 }
0x12c0   :  { %13819 = vmatprep.subr.mxu1 %v18131_v35  ;;  %13831 = vmatpush3.msra.mxu0 %v17011_v20 }
0x12c1   :  { %v13795_v53 = vpop.f32.mrf.mxu0  ;;  %13820 = vmatpush3.msra.mxu1 %v16926_v46  ;;  %13832 = vmatprep.mubr.msk.f32.mxu0 %vm14436_vm1, %v18131_v35  ;;  %v17402_v62 = vld [vmem:[#allocation8 + $0x28] sm:$0xff]  ;;  %v9321_v46 = vld [vmem:[#allocation2 + $0x50] sm:$0xff] }
0x12c2   :  { %13821 = vmatprep.subr.mxu1 %v18131_v35  ;;  %13835 = vmatprep.subr.mxu0 %v18131_v35  ;;  %v11650_v56 = vadd.f32 %v17404_v29, %v17402_v62  ;;  %v11674_v20 = vsub.f32 %v17402_v62, %v17404_v29  ;;  %v17414_v10 = vmul.f32 %v9321_v46, %v8666_v16  ;;  %v9323_v53 = vld [vmem:[#allocation3 + $0x50] sm:$0xff] }
0x12c3   :  { %13822 = vmatpush3.msra.mxu1 %v16937_v27  ;;  %v9074_v27 = vld [vmem:[#allocation4 + $0x28] sm:$0xff] }
0x12c4   :  { %13823 = vmatprep.subr.mxu1 %v18131_v35  ;;  %v11658_v0 = vmul.f32 0.5, %v11650_v56 }
0x12c5   :  { %13824 = vmatpush3.msra.mxu1 %v16948_v5 }
0x12c6   :  { %13826 = vmatmul.mubr.msk.f32.vlgmr.msra.gmra.mxu1 %vm1005_vm2, %v17414_v10  ;;  %13846 = vmatprep.subr.mxu1 %v18131_v35  ;;  %11666 = vst.msk [vmem:[%s18058_s27 + $0x28] sm:$0xff] %vm114_vm0, %v11658_v0 }
0x12c7   :  { %13847 = vmatpush3.msra.mxu1 %v16962_v45  ;;  %13854 = vmatprep.mubr.msk.f32.mxu1 %vm14436_vm1, %v18131_v35 }
0x12c8   :  { %13848 = vmatprep.subr.mxu1 %v18131_v35 }
0x12c9   :  { %13849 = vmatpush3.msra.mxu1 %v16971_v11 }
0x12ca   :  { %13850 = vmatprep.subr.mxu1 %v18131_v35 }
0x12cb   :  { %13851 = vmatpush3.msra.mxu1 %v16984_v12 }
0x12cc   :  { %13852 = vmatprep.subr.mxu1 %v18131_v35 }
0x12cd   :  { %13853 = vmatpush3.msra.mxu1 %v16991_v42 }
0x12ce   :  { %13855 = vmatmul.mubr.msk.f32.vlgmr.msra.gmra.mxu1 %vm1005_vm2, %v17414_v10  ;;  %13868 = vmatprep.subr.mxu1 %v18131_v35 }
0x12cf   :  { %13869 = vmatpush3.msra.mxu1 %v17110_v32  ;;  %13872 = vmatprep.mubr.msk.f32.mxu1 %vm14436_vm1, %v18131_v35 }
0x12d0   :  { %13870 = vmatprep.subr.mxu1 %v18131_v35 }
0x12d1   :  { %13871 = vmatpush3.msra.mxu1 %v17123_v34  ;;  %v17446_v34 = vld [vmem:[%s18124_s29 + $0x10] sm:$0xff] }
0x12d2   :  { %13875 = vmatprep.subr.mxu1 %v18131_v35  ;;  %v9403_v38 = vsub.f32 1.0, %v17446_v34  ;;  %v17458_v19 = vmul.f32 %v17446_v34, %v17452_v43 }
0x137a   :  { %v9144_v5 = vpop.f32.mrf.mxu1  ;;  %v9292_v45 = vpop.f32.mrf.mxu0 }
0x137b   :  { %v9145_v11 = vadd.f32 %v9144_v5, %v9074_v27  ;;  %v9482_v27 = vsub.f32 1.0, %v9323_v53 }
0x137c   :  { %v13802_v12 = vpop.f32.mrf.mxu1  ;;  %v13816_v42 = vpop.f32.mrf.mxu0 }
0x137d   :  { %v9296_v16 = vadd.f32 %v9145_v11, %v17374_v50 }
0x137e   :  { %v9218_v55 = vpop.f32.mrf.mxu1 }
0x137f   :  { %v12151_v32 = vmul.f32 -1.442695, %v9296_v16  ;;  %v9219_v63 = vadd.f32 %v9218_v55, %v9151_v39 }
0x1380   :  { %v13809_v40 = vpop.f32.mrf.mxu1 }
0x1381   :  { %14352 = vpow2.f32 %v12151_v32  ;;  %v9303_v4 = vadd.f32 %v9219_v63, %v17296_v25  ;;  %v9319_v40 = vld [vmem:[#allocation7 + $0x10] sm:$0xff] }
0x1383   :  { %v12152_v37 = vmul.f32 -1.442695, %v9303_v4 }
0x1385   :  { %14354 = vpow2.f32 %v12152_v37  ;;  %v10226_v37 = vld [vmem:[%s18056_s25 + $0x18] sm:$0xff] }
0x1386   :  { %v9398_v3 = vpop.f32.mrf.mxu1 }
0x1387   :  { %v9399_v36 = vadd.f32 %v17020_v28, %v9398_v3 }
0x1388   :  { %v13827_v6 = vpop.f32.mrf.mxu1 }
0x1389   :  { %v9404_v50 = vmul.f32 %v9403_v38, %v9399_v36  ;;  %v9489_v46 = vsub.f32 %v17452_v43, %v9399_v36  ;;  %v9724_v6 = vld [vmem:[#allocation4 + $0x50] sm:$0xff] }
0x138b   :  { %v9405_v25 = vadd.f32 %v9404_v50, %v17458_v19  ;;  %v9490_v12 = vand.u32 2147483647, %v9489_v46 }
0x138d   :  { %13833 = vmatmul.mubr.msk.f32.vlgmr.msra.gmra.mxu0 %vm114_vm0, %v9405_v25 }
0x138e   :  { %v14353_v9 = vpop.eup %14352  ;;  %13836 = vmatpush3.msra.mxu0 %v17031_v49  ;;  %v17465_v44 = vpop.f32.mrf.mxu1  ;;  %13843 = vmatprep.mubr.msk.f32.mxu0 %vm14436_vm1, %v18131_v35 }
0x138f   :  { %v9300_v28 = vadd.f32 1.0, %v14353_v9  ;;  %13837 = vmatprep.subr.mxu0 %v18131_v35 }
0x1390   :  { %13838 = vmatpush3.msra.mxu0 %v17037_v51  ;;  %v13856_v33 = vpop.f32.mrf.mxu1 }
0x1391   :  { %14356 = vrcp.f32 %v9300_v28  ;;  %13839 = vmatprep.subr.mxu0 %v18131_v35 }
0x1392   :  { %13840 = vmatpush3.msra.mxu0 %v17048_v47  ;;  %v14355_v49 = vpop.eup %14354  ;;  %v9068_v47 = vadd.f32 %v17095_v17, %v17392_v21 }
0x1393   :  { %13841 = vmatprep.subr.mxu0 %v18131_v35  ;;  %v9307_v51 = vadd.f32 1.0, %v14355_v49 }
0x1394   :  { %13842 = vmatpush3.msra.mxu0 %v17055_v54 }
0x1395   :  { %13844 = vmatmul.mubr.msk.f32.vlgmr.msra.gmra.mxu0 %vm1005_vm2, %v17414_v10  ;;  %13857 = vmatprep.subr.mxu0 %v18131_v35  ;;  %14358 = vrcp.f32 %v9307_v51  ;;  %v9801_v51 = vld [vmem:[#allocation5 + $0x50] sm:$0xff] }
0x1396   :  { %13858 = vmatpush3.msra.mxu0 %v17062_v60  ;;  %13865 = vmatprep.mubr.msk.f32.mxu0 %vm14436_vm1, %v18131_v35  ;;  %v9225_v60 = vld [vmem:[#allocation6 + $0x28] sm:$0xff] }
0x1397   :  { %13859 = vmatprep.subr.mxu0 %v18131_v35 }
0x1398   :  { %13860 = vmatpush3.msra.mxu0 %v17071_v23  ;;  %v9293_v23 = vadd.f32 %v9292_v45, %v9225_v60  ;;  %v9483_v45 = vmul.f32 %v9482_v27, %v9399_v36 }
0x1399   :  { %13861 = vmatprep.subr.mxu0 %v18131_v35 }
0x139a   :  { %13862 = vmatpush3.msra.mxu0 %v17080_v24 }
0x139b   :  { %13863 = vmatprep.subr.mxu0 %v18131_v35 }
0x139c   :  { %13864 = vmatpush3.msra.mxu0 %v17087_v58 }
0x139d   :  { %13866 = vmatmul.mubr.msk.f32.vlgmr.msra.gmra.mxu0 %vm1005_vm2, %v17414_v10  ;;  %13882 = vmatprep.subr.mxu0 %v18131_v35 }
0x139e   :  { %v14357_v54 = vpop.eup %14356  ;;  %13883 = vmatpush3.msra.mxu0 %v17116_v13  ;;  %13886 = vmatprep.mubr.msk.f32.mxu0 %vm14436_vm1, %v18131_v35 }
0x139f   :  { %v9310_v24 = vmul.f32 %v14357_v54, %v9068_v47  ;;  %13884 = vmatprep.subr.mxu0 %v18131_v35 }
0x13a0   :  { %13885 = vmatpush3.msra.mxu0 %v17130_v48 }
0x13a1   :  { %v9311_v58 = vadd.f32 %v9310_v24, %v9293_v23  ;;  %13900 = vmatprep.subr.mxu0 %v18131_v35  ;;  %v17581_v24 = vld [vmem:[%s18124_s29 + $0x30] sm:$0xff] }
0x13a2   :  { %v14359_v17 = vpop.eup %14358 }
0x13a3   :  { %14360 = vtanh.f32 %v9311_v58  ;;  %v9313_v8 = vsub.f32 1.0, %v14359_v17  ;;  %v9315_v13 = vmul.f32 %v14359_v17, %v17216_v26  ;;  %v17587_v17 = vld [vmem:[%s18129_s21 + $0x30] sm:$0xff] }
0x13b0   :  { %v14361_v14 = vpop.eup %14360 }
0x13b1   :  { %v9314_v41 = vmul.f32 %v14361_v14, %v9313_v8  ;;  %v10053_v8 = vsub.f32 1.0, %v17581_v24 }
0x13b3   :  { %v9316_v21 = vadd.f32 %v9315_v13, %v9314_v41  ;;  %v17593_v13 = vld [vmem:[%s18128_s19] ss:$0 sm:$0xff] }
0x144d   :  { %v9477_v56 = vpop.f32.mrf.mxu0 }
0x144e   :  { %v9478_v0 = vadd.f32 %v17140_v18, %v9477_v56 }
0x144f   :  { %v13834_v5 = vpop.f32.mrf.mxu0 }
0x1450   :  { %v9481_v48 = vmul.f32 %v9478_v0, %v9323_v53  ;;  %v9491_v11 = vsub.f32 %v17452_v43, %v9478_v0 }
0x1452   :  { %v9484_v42 = vadd.f32 %v9483_v45, %v9481_v48  ;;  %v9492_v16 = vand.u32 2147483647, %v9491_v11  ;;  %v18179_v45 = vld [vmem:[#allocation15_spill] sm:$0xff]  ;;  %v18180_v11 = vld [vmem:[#allocation16_spill] sm:$0xff] }
0x1454   :  { %v9485_v39 = vmul.f32 %v9484_v42, %v9403_v38  ;;  %v9493_v26 = vadd.f32 %v9492_v16, %v9490_v12  ;;  %v9494_v55 = vsub.f32 %v17452_v43, %v9484_v42  ;;  %v18182_v12 = vld [vmem:[#allocation18_spill] sm:$0xff]  ;;  %v18183_v42 = vld [vmem:[#allocation19_spill] sm:$0xff] }
0x1455   :  { %v17505_v32 = vpop.f32.mrf.mxu0 }
0x1456   :  { %v9486_v63 = vadd.f32 %v9485_v39, %v17458_v19  ;;  %v9495_v18 = vand.u32 2147483647, %v9494_v55  ;;  %v10223_v19 = vld [vmem:[%s18056_s25] sm:$0xff]  ;;  %v18184_v39 = vld [vmem:[#allocation21_spill] sm:$0xff] }
0x1457   :  { %v13845_v4 = vpop.f32.mrf.mxu0 }
0x1458   :  { %9488 = vst.msk [vmem:[#allocation8 + $0x50] sm:$0xff] %vm114_vm0, %v9486_v63  ;;  %v9496_v3 = vadd.f32 %v9495_v18, %v9493_v26  ;;  %13873 = vmatmul.mubr.msk.f32.vlgmr.msra.gmra.mxu1 %vm114_vm0, %v9486_v63  ;;  %13887 = vmatmul.mubr.msk.f32.vlgmr.msra.gmra.mxu0 %vm114_vm0, %v9486_v63  ;;  %v18185_v26 = vld [vmem:[#allocation22_spill] sm:$0xff] }
0x1459   :  { %13876 = vmatpush3.msra.mxu1 %v17154_v22  ;;  %13879 = vmatprep.mubr.msk.f32.mxu1 %vm14436_vm1, %v18131_v35 }
0x145a   :  { %v9497_v34 = vmul.f32 %v9496_v3, %v9319_v40  ;;  %13877 = vmatprep.subr.mxu1 %v18131_v35  ;;  %13901 = vmatpush3.msra.mxu0 %v17247_v7  ;;  %v17533_v7 = vld [vmem:[#allocation8 + $0x10] sm:$0xff] }
0x145b   :  { %13878 = vmatpush3.msra.mxu1 %v17162_v52  ;;  %13902 = vmatprep.subr.mxu0 %v18131_v35 }
0x145c   :  { %13889 = vmatprep.subr.mxu1 %v18131_v35  ;;  %13880 = vmatmul.mubr.msk.f32.vlgmr.msra.gmra.mxu1 %vm114_vm0, %v9486_v63  ;;  %v17521_v43 = vadd.f32 %v9497_v34, %v17388_v30  ;;  %v9875_v63 = vld [vmem:[#allocation6 + $0x50] sm:$0xff] }
0x145d   :  { %v17523_v22 = vpop.f32.mrf.mxu0  ;;  %13890 = vmatpush3.msra.mxu1 %v17172_v61  ;;  %13897 = vmatprep.mubr.msk.f32.mxu1 %vm14436_vm1, %v18131_v35 }
0x145e   :  { %13891 = vmatprep.subr.mxu1 %v18131_v35  ;;  %13903 = vmatpush3.msra.mxu0 %v17254_v15  ;;  %v9718_v55 = vadd.f32 %v18185_v26, %v17523_v22 }
0x145f   :  { %v13867_v52 = vpop.f32.mrf.mxu0  ;;  %13892 = vmatpush3.msra.mxu1 %v17185_v57  ;;  %13904 = vmatprep.mubr.msk.f32.mxu0 %vm14436_vm1, %v18131_v35  ;;  %v17535_v30 = vld [vmem:[#allocation8 + $0x50] sm:$0xff] }
0x1460   :  { %13893 = vmatprep.subr.mxu1 %v18131_v35  ;;  %13907 = vmatprep.subr.mxu0 %v18131_v35  ;;  %v11647_v61 = vadd.f32 %v17535_v30, %v17533_v7  ;;  %v11671_v15 = vsub.f32 %v17533_v7, %v17535_v30  ;;  %v9971_v57 = vld [vmem:[#allocation2 + $0x30] sm:$0xff] }
0x1461   :  { %13894 = vmatpush3.msra.mxu1 %v17196_v1  ;;  %v17545_v38 = vmul.f32 %v9971_v57, %v9316_v21  ;;  %v10225_v1 = vld [vmem:[%s18056_s25 + $0x10] sm:$0xff] }
0x1462   :  { %13895 = vmatprep.subr.mxu1 %v18131_v35  ;;  %v11655_v36 = vmul.f32 0.5, %v11647_v61 }
0x1463   :  { %13896 = vmatpush3.msra.mxu1 %v17207_v2  ;;  %v10224_v2 = vld [vmem:[%s18056_s25 + $0x8] sm:$0xff] }
0x1464   :  { %13898 = vmatmul.mubr.msk.f32.vlgmr.msra.gmra.mxu1 %vm1005_vm2, %v17545_v38  ;;  %13918 = vmatprep.subr.mxu1 %v18131_v35  ;;  %11663 = vst.msk [vmem:[%s18058_s27 + $0x10] sm:$0xff] %vm114_vm0, %v11655_v36  ;;  %v10523_v36 = vld [vmem:[%s18047_s16 + $0x8] sm:$0xff] }
0x1465   :  { %13919 = vmatpush3.msra.mxu1 %v10226_v37  ;;  %13926 = vmatprep.mubr.msk.f32.mxu1 %vm14436_vm1, %v18131_v35  ;;  %v10372_v37 = vld [vmem:[%s18045_s14 + $0x8] sm:$0xff] }
0x1466   :  { %13920 = vmatprep.subr.mxu1 %v18131_v35 }
0x1467   :  { %13921 = vmatpush3.msra.mxu1 %v10225_v1  ;;  %v10371_v1 = vld [vmem:[%s18045_s14] sm:$0xff] }
0x1468   :  { %13922 = vmatprep.subr.mxu1 %v18131_v35 }
0x1469   :  { %13923 = vmatpush3.msra.mxu1 %v10224_v2  ;;  %v9973_v2 = vld [vmem:[#allocation3 + $0x30] sm:$0xff] }
0x146a   :  { %13924 = vmatprep.subr.mxu1 %v18131_v35 }
0x146b   :  { %13925 = vmatpush3.msra.mxu1 %v10223_v19 }
0x146c   :  { %13927 = vmatmul.mubr.msk.f32.vlgmr.msra.gmra.mxu1 %vm1005_vm2, %v17545_v38  ;;  %13940 = vmatprep.subr.mxu1 %v18131_v35 }
0x146d   :  { %13944 = vmatprep.mubr.msk.f32.mxu1 %vm14436_vm1, %v18131_v35  ;;  %13941 = vmatpush3.msra.mxu1 %v10372_v37 }
0x146e   :  { %13942 = vmatprep.subr.mxu1 %v18131_v35 }
0x146f   :  { %13943 = vmatpush3.msra.mxu1 %v10371_v1  ;;  %v10451_v1 = vld [vmem:[#allocation5 + $0x30] sm:$0xff] }
0x1470   :  { %13947 = vmatprep.subr.mxu1 %v18131_v35 }
0x1518   :  { %v9794_v50 = vpop.f32.mrf.mxu1  ;;  %v9942_v25 = vpop.f32.mrf.mxu0 }
0x1519   :  { %v9795_v9 = vadd.f32 %v9794_v50, %v9724_v6  ;;  %v9943_v18 = vadd.f32 %v9942_v25, %v9875_v63  ;;  %v17661_v50 = vld [vmem:[%s18130_s8] ss:$0 sm:$0xff]  ;;  %v12218_v63 = vld [vmem:[%s18056_s25 + $0x30] sm:$0xff] }
0x151a   :  { %v13874_v28 = vpop.f32.mrf.mxu1  ;;  %v13888_v33 = vpop.f32.mrf.mxu0 }
0x151b   :  { %v9946_v49 = vadd.f32 %v9795_v9, %v17505_v32  ;;  %v10132_v9 = vsub.f32 1.0, %v9973_v2 }
0x151c   :  { %v9868_v47 = vpop.f32.mrf.mxu1 }
0x151d   :  { %v12187_v54 = vmul.f32 -1.442695, %v9946_v49  ;;  %v9869_v60 = vadd.f32 %v9868_v47, %v9801_v51 }
0x151e   :  { %v13881_v23 = vpop.f32.mrf.mxu1 }
0x151f   :  { %14362 = vpow2.f32 %v12187_v54  ;;  %v9953_v58 = vadd.f32 %v9869_v60, %v17465_v44  ;;  %v17600_v44 = vmul.f32 %v17581_v24, %v17587_v17  ;;  %v10448_v24 = vld [vmem:[%s18046_s15] sm:$0xff] }
0x1521   :  { %v12188_v41 = vmul.f32 -1.442695, %v9953_v58 }
0x1523   :  { %14364 = vpow2.f32 %v12188_v41 }
0x1524   :  { %v10048_v14 = vpop.f32.mrf.mxu1 }
0x1525   :  { %v17596_v21 = vadd.f32 %v17593_v13, %v10048_v14 }
0x1526   :  { %v13899_v53 = vpop.f32.mrf.mxu1 }
0x1527   :  { %v10054_v56 = vmul.f32 %v10053_v8, %v17596_v21  ;;  %v10139_v6 = vsub.f32 %v17587_v17, %v17596_v21  ;;  %v10133_v49 = vmul.f32 %v10132_v9, %v17596_v21  ;;  %v10449_v21 = vld [vmem:[%s18046_s15 + $0x8] sm:$0xff] }
0x1529   :  { %v10055_v46 = vadd.f32 %v10054_v56, %v17600_v44  ;;  %v10140_v47 = vand.u32 2147483647, %v10139_v6 }
0x152b   :  { %13905 = vmatmul.mubr.msk.f32.vlgmr.msra.gmra.mxu0 %vm114_vm0, %v10055_v46  ;;  %v9969_v46 = vld [vmem:[#allocation7 + $0x30] sm:$0xff] }
0x152c   :  { %v14363_v0 = vpop.eup %14362  ;;  %13908 = vmatpush3.msra.mxu0 %v17287_v31  ;;  %v17608_v27 = vpop.f32.mrf.mxu1  ;;  %13915 = vmatprep.mubr.msk.f32.mxu0 %vm14436_vm1, %v18131_v35  ;;  %v18181_v31 = vld [vmem:[#allocation17_spill] sm:$0xff] }
0x152d   :  { %v9950_v5 = vadd.f32 1.0, %v14363_v0  ;;  %13909 = vmatprep.subr.mxu0 %v18131_v35 }
0x152e   :  { %13910 = vmatpush3.msra.mxu0 %v17293_v59  ;;  %v13928_v48 = vpop.f32.mrf.mxu1 }
0x152f   :  { %14366 = vrcp.f32 %v9950_v5  ;;  %13911 = vmatprep.subr.mxu0 %v18131_v35 }
0x1530   :  { %13912 = vmatpush3.msra.mxu0 %v18179_v45  ;;  %v14365_v59 = vpop.eup %14364 }
0x1531   :  { %13913 = vmatprep.subr.mxu0 %v18131_v35  ;;  %v9957_v16 = vadd.f32 1.0, %v14365_v59 }
0x1532   :  { %13914 = vmatpush3.msra.mxu0 %v18180_v11  ;;  %v17710_v11 = vld [vmem:[%s18125_s11 + $0x28] sm:$0xff] }
0x1533   :  { %13916 = vmatmul.mubr.msk.f32.vlgmr.msra.gmra.mxu0 %vm1005_vm2, %v17545_v38  ;;  %13929 = vmatprep.subr.mxu0 %v18131_v35  ;;  %14368 = vrcp.f32 %v9957_v16 }
0x1534   :  { %13930 = vmatpush3.msra.mxu0 %v18181_v31  ;;  %13937 = vmatprep.mubr.msk.f32.mxu0 %vm14436_vm1, %v18131_v35 }
0x1535   :  { %13931 = vmatprep.subr.mxu0 %v18131_v35 }
0x1536   :  { %13932 = vmatpush3.msra.mxu0 %v18182_v12  ;;  %v17721_v12 = vld [vmem:[%s18125_s11 + $0x20] sm:$0xff] }
0x1537   :  { %13933 = vmatprep.subr.mxu0 %v18131_v35 }
0x1538   :  { %13934 = vmatpush3.msra.mxu0 %v18183_v42 }
0x1539   :  { %13935 = vmatprep.subr.mxu0 %v18131_v35 }
0x153a   :  { %13936 = vmatpush3.msra.mxu0 %v18184_v39  ;;  %v10621_v39 = vld [vmem:[#allocation2 + $0x48] sm:$0xff] }
0x153b   :  { %13938 = vmatmul.mubr.msk.f32.vlgmr.msra.gmra.mxu0 %vm1005_vm2, %v17545_v38  ;;  %13954 = vmatprep.subr.mxu0 %v18131_v35 }
0x153c   :  { %v14367_v32 = vpop.eup %14366  ;;  %13958 = vmatprep.mubr.msk.f32.mxu0 %vm14436_vm1, %v18131_v35  ;;  %13955 = vmatpush3.msra.mxu0 %v10523_v36 }
0x153d   :  { %v9960_v40 = vmul.f32 %v14367_v32, %v9718_v55  ;;  %13956 = vmatprep.subr.mxu0 %v18131_v35  ;;  %v12219_v55 = vld [vmem:[%s18056_s25 + $0x38] sm:$0xff] }
0x153f   :  { %v9961_v4 = vadd.f32 %v9960_v40, %v9943_v18  ;;  %v12217_v18 = vld [vmem:[%s18056_s25 + $0x28] sm:$0xff]  ;;  %v12216_v40 = vld [vmem:[%s18056_s25 + $0x20] sm:$0xff]  ;;  %s11732_s25 = sshll.u32 %s14437_s7, 4  ;;  %s11733_s25 = int_to_ptr.vmem [resolvable:$true] %s11732_s25 }
0x1540   :  { %v14369_v3 = vpop.eup %14368  ;;  %s14417_s1 = scalar_lea.vmem %s11733_s25, 32  ;;  %p14418_p1 = scmp.lt.s32.totalorder %s11733_s25, %s11733_s25 }
0x1541   :  { %14370 = vtanh.f32 %v9961_v4  ;;  %v9963_v34 = vsub.f32 1.0, %v14369_v3  ;;  %v9965_v22 = vmul.f32 %v14369_v3, %v17414_v10  ;;  %v10522_v10 = vld [vmem:[%s18047_s16] sm:$0xff]  ;;  %v17765_v4 = vld [vmem:[%s18127_s5 + $0x18] sm:$0xff]  ;;  %v17772_v3 = vld [vmem:[%s18127_s5 + $0x10] sm:$0xff] }
0x1542   :  { %13957 = vmatpush3.msra.mxu0 %v10522_v10 }
0x1543   :  { %13972 = vmatprep.subr.mxu0 %v18131_v35 }
0x154e   :  { %v14371_v52 = vpop.eup %14370 }
0x154f   :  { %v9964_v61 = vmul.f32 %v14371_v52, %v9963_v34  ;;  %v10374_v34 = vld [vmem:[#allocation4 + $0x30] sm:$0xff] }
0x1551   :  { %v17638_v57 = vadd.f32 %v9965_v22, %v9964_v61 }
0x1553   :  { %v17730_v26 = vmul.f32 %v10621_v39, %v17638_v57  ;;  %v12221_v39 = vld [vmem:[%s18057_s26 + $0x20] sm:$0xff] }
0x15eb   :  { %v10127_v19 = vpop.f32.mrf.mxu0 }
0x15ec   :  { %v10128_v25 = vadd.f32 %v17661_v50, %v10127_v19 }
0x15ed   :  { %v13906_v28 = vpop.f32.mrf.mxu0 }
0x15ee   :  { %v10131_v33 = vmul.f32 %v10128_v25, %v9973_v2  ;;  %v10141_v51 = vsub.f32 %v17587_v17, %v10128_v25  ;;  %v17782_v25 = vld [vmem:[%s18124_s29 + $0x8] sm:$0xff] }
0x15ef   :  { %v17788_v28 = vld [vmem:[%s18129_s21 + $0x8] sm:$0xff] }
0x15f0   :  { %v10134_v54 = vadd.f32 %v10133_v49, %v10131_v33  ;;  %v10142_v60 = vand.u32 2147483647, %v10141_v51  ;;  %v10703_v33 = vsub.f32 1.0, %v17782_v25 }
0x15f2   :  { %v10135_v23 = vmul.f32 %v10134_v54, %v10053_v8  ;;  %v10143_v58 = vadd.f32 %v10142_v60, %v10140_v47  ;;  %v10144_v14 = vsub.f32 %v17587_v17, %v10134_v54  ;;  %v17687_v8 = vld [vmem:[%s18125_s11 + $0x38] sm:$0xff]  ;;  %v17794_v47 = vld [vmem:[%s18128_s19 + $0x1] ss:$0 sm:$0xff] }
0x15f3   :  { %v17669_v41 = vpop.f32.mrf.mxu0 }
0x15f4   :  { %v10136_v53 = vadd.f32 %v10135_v23, %v17600_v44  ;;  %v10145_v56 = vand.u32 2147483647, %v10144_v14  ;;  %v17696_v44 = vld [vmem:[%s18125_s11 + $0x30] sm:$0xff]  ;;  %v12214_v14 = vld [vmem:[%s18055_s24 + $0x38] sm:$0xff] }
0x15f5   :  { %v13917_v0 = vpop.f32.mrf.mxu0 }
0x15f6   :  { %10138 = vst.msk [vmem:[#allocation8 + $0x30] sm:$0xff] %vm114_vm0, %v10136_v53  ;;  %v10146_v5 = vadd.f32 %v10145_v56, %v10143_v58  ;;  %13945 = vmatmul.mubr.msk.f32.vlgmr.msra.gmra.mxu1 %vm114_vm0, %v10136_v53  ;;  %13959 = vmatmul.mubr.msk.f32.vlgmr.msra.gmra.mxu0 %vm114_vm0, %v10136_v53 }
0x15f7   :  { %13948 = vmatpush3.msra.mxu1 %v10449_v21  ;;  %13951 = vmatprep.mubr.msk.f32.mxu1 %vm14436_vm1, %v18131_v35 }
0x15f8   :  { %v10147_v17 = vmul.f32 %v10146_v5, %v9969_v46  ;;  %13949 = vmatprep.subr.mxu1 %v18131_v35  ;;  %13976 = vmatprep.mubr.msk.f32.mxu0 %vm14436_vm1, %v18131_v35  ;;  %v12212_v46 = vld [vmem:[%s18055_s24 + $0x28] sm:$0xff]  ;;  %v12211_v5 = vld [vmem:[%s18055_s24 + $0x20] sm:$0xff] }
0x15f9   :  { %13950 = vmatpush3.msra.mxu1 %v10448_v24  ;;  %13973 = vmatpush3.msra.mxu0 %v17765_v4  ;;  %v12224_v24 = vld [vmem:[%s18057_s26 + $0x38] sm:$0xff] }
0x15fa   :  { %13961 = vmatprep.subr.mxu1 %v18131_v35  ;;  %13952 = vmatmul.mubr.msk.f32.vlgmr.msra.gmra.mxu1 %vm114_vm0, %v10136_v53  ;;  %v17699_v48 = vadd.f32 %v10147_v17, %v17521_v43  ;;  %v17715_v43 = vld [vmem:[#allocation8 + $0x70] sm:$0xff] }
0x15fb   :  { %v17701_v45 = vpop.f32.mrf.mxu0  ;;  %13962 = vmatpush3.msra.mxu1 %v17687_v8  ;;  %13969 = vmatprep.mubr.msk.f32.mxu1 %vm14436_vm1, %v18131_v35  ;;  %v12223_v17 = vld [vmem:[%s18057_s26 + $0x30] sm:$0xff] }
0x15fc   :  { %13963 = vmatprep.subr.mxu1 %v18131_v35  ;;  %13974 = vmatprep.subr.mxu0 %v18131_v35 }
0x15fd   :  { %v13939_v31 = vpop.f32.mrf.mxu0  ;;  %13964 = vmatpush3.msra.mxu1 %v17696_v44  ;;  %v17713_v59 = vld [vmem:[#allocation8 + $0x30] sm:$0xff]  ;;  %13975 = vmatpush3.msra.mxu0 %v17772_v3 }
0x15fe   :  { %13965 = vmatprep.subr.mxu1 %v18131_v35  ;;  %v11675_v42 = vsub.f32 %v17713_v59, %v17715_v43  ;;  %v11651_v16 = vadd.f32 %v17715_v43, %v17713_v59  ;;  %13979 = vmatprep.subr.mxu0 %v18131_v35  ;;  %v12222_v31 = vld [vmem:[%s18057_s26 + $0x28] sm:$0xff] }
0x15ff   :  { %13966 = vmatpush3.msra.mxu1 %v17710_v11 }
0x1600   :  { %13967 = vmatprep.subr.mxu1 %v18131_v35  ;;  %v11659_v32 = vmul.f32 0.5, %v11651_v16 }
0x1601   :  { %13968 = vmatpush3.msra.mxu1 %v17721_v12 }
0x1602   :  { %13970 = vmatmul.mubr.msk.f32.vlgmr.msra.gmra.mxu1 %vm1005_vm2, %v17730_v26  ;;  %13990 = vmatprep.subr.mxu1 %v18131_v35  ;;  %11667 = vst.msk [vmem:[%s18058_s27 + $0x30] sm:$0xff] %vm114_vm0, %v11659_v32  ;;  %v14410_v32 = vld [vmem:[%s18054_s23] ss:$0 sm:$0xff] }
0x1603   :  { %13991 = vmatpush3.msra.mxu1 %v12219_v55  ;;  %13998 = vmatprep.mubr.msk.f32.mxu1 %vm14436_vm1, %v18131_v35 }
0x1604   :  { %13992 = vmatprep.subr.mxu1 %v18131_v35 }
0x1605   :  { %13993 = vmatpush3.msra.mxu1 %v12218_v63  ;;  %v10368_v63 = vadd.f32 %v14410_v32, %v17701_v45  ;;  %v10619_v32 = vld [vmem:[#allocation7 + $0x8] sm:$0xff] }
0x1606   :  { %13994 = vmatprep.subr.mxu1 %v18131_v35 }
0x1607   :  { %13995 = vmatpush3.msra.mxu1 %v12217_v18 }
0x1608   :  { %13996 = vmatprep.subr.mxu1 %v18131_v35 }
0x1609   :  { %13997 = vmatpush3.msra.mxu1 %v12216_v40  ;;  %v10525_v40 = vld [vmem:[#allocation6 + $0x30] sm:$0xff] }
0x160a   :  { %13999 = vmatmul.mubr.msk.f32.vlgmr.msra.gmra.mxu1 %vm1005_vm2, %v17730_v26  ;;  %14012 = vmatprep.subr.mxu1 %v18131_v35 }
0x160b   :  { %14016 = vmatprep.mubr.msk.f32.mxu1 %vm14436_vm1, %v18131_v35 }
0x16b6   :  { %v10444_v52 = vpop.f32.mrf.mxu1  ;;  %v17776_v61 = vpop.f32.mrf.mxu0 }
0x16b7   :  { %v10445_v22 = vadd.f32 %v10444_v52, %v10374_v34  ;;  %v10593_v34 = vadd.f32 %v17776_v61, %v10525_v40  ;;  %v12233_v61 = vld [vmem:[%s18047_s16 + $0x18] sm:$0xff] }
0x16b8   :  { %v13946_v57 = vpop.f32.mrf.mxu1  ;;  %v13960_v37 = vpop.f32.mrf.mxu0 }
0x16b9   :  { %v10596_v36 = vadd.f32 %v10445_v22, %v17669_v41  ;;  %v12213_v41 = vld [vmem:[%s18055_s24 + $0x30] sm:$0xff]  ;;  %s14413_s24 = scalar_lea.vmem %s11733_s25, 16 }
0x16ba   :  { %v10518_v10 = vpop.f32.mrf.mxu1  ;;  %p14414_p0 = scmp.ne.s32.totalorder %s11733_s25, %s14413_s24  ;;  %p14419_p2 = scmp.lt.s32.totalorder %s14417_s1, %s14413_s24 }
0x16bb   :  { %v12199_v2 = vmul.f32 -1.442695, %v10596_v36  ;;  %v10519_v19 = vadd.f32 %v10518_v10, %v10451_v1 }
0x16bc   :  { %v13953_v6 = vpop.f32.mrf.mxu1  ;;  %p14420_p3 = por %p14419_p2, %p14418_p1 }
0x16bd   :  { %14372 = vpow2.f32 %v12199_v2  ;;  %v10603_v9 = vadd.f32 %v10519_v19, %v17608_v27  ;;  %v17801_v27 = vmul.f32 %v17782_v25, %v17788_v28  ;;  %v12227_v2 = vld [vmem:[%s18045_s14 + $0x18] sm:$0xff]  ;;  %v12226_v19 = vld [vmem:[%s18045_s14 + $0x10] sm:$0xff]  ;;  %v10623_v6 = vld [vmem:[#allocation3 + $0x48] sm:$0xff] }
0x16be   :  { %14013 = vmatpush3.msra.mxu1 %v12227_v2  ;;  %v12229_v25 = vld [vmem:[%s18046_s15 + $0x10] sm:$0xff]  ;;  %p14421_p4 = pnand %p14420_p3, %p14414_p0 }
0x16bf   :  { %v12200_v51 = vmul.f32 -1.442695, %v10603_v9  ;;  %14014 = vmatprep.subr.mxu1 %v18131_v35 }
0x16c0   :  { %14015 = vmatpush3.msra.mxu1 %v12226_v19 }
0x16c1   :  { %14374 = vpow2.f32 %v12200_v51  ;;  %14019 = vmatprep.subr.mxu1 %v18131_v35  ;;  %v17881_v51 = vld [vmem:[%s18130_s8 + $0x1] ss:$0 sm:$0xff] }
0x16c2   :  { %v10698_v49 = vpop.f32.mrf.mxu1 }
0x16c3   :  { %v17797_v54 = vadd.f32 %v17794_v47, %v10698_v49 }
0x16c4   :  { %v13971_v60 = vpop.f32.mrf.mxu1 }
0x16c5   :  { %v10704_v23 = vmul.f32 %v10703_v33, %v17797_v54  ;;  %v10789_v49 = vsub.f32 %v17788_v28, %v17797_v54 }
0x16c7   :  { %v10705_v58 = vadd.f32 %v10704_v23, %v17801_v27  ;;  %v10782_v23 = vsub.f32 1.0, %v10623_v6 }
0x16c9   :  { %13977 = vmatmul.mubr.msk.f32.vlgmr.msra.gmra.mxu0 %vm114_vm0, %v10705_v58 }
0x16ca   :  { %v14373_v53 = vpop.eup %14372  ;;  %13980 = vmatpush3.msra.mxu0 %v12214_v14  ;;  %v17814_v56 = vpop.f32.mrf.mxu1  ;;  %13987 = vmatprep.mubr.msk.f32.mxu0 %vm14436_vm1, %v18131_v35 }
0x16cb   :  { %v10600_v21 = vadd.f32 1.0, %v14373_v53  ;;  %13981 = vmatprep.subr.mxu0 %v18131_v35 }
0x16cc   :  { %13982 = vmatpush3.msra.mxu0 %v12213_v41  ;;  %v14000_v0 = vpop.f32.mrf.mxu1  ;;  %v10783_v41 = vmul.f32 %v10782_v23, %v17797_v54 }
0x16cd   :  { %14376 = vrcp.f32 %v10600_v21  ;;  %13983 = vmatprep.subr.mxu0 %v18131_v35  ;;  %v10790_v21 = vand.u32 2147483647, %v10789_v49 }
0x16ce   :  { %13984 = vmatpush3.msra.mxu0 %v12212_v46  ;;  %v14375_v16 = vpop.eup %14374 }
0x16cf   :  { %13985 = vmatprep.subr.mxu0 %v18131_v35  ;;  %v10607_v55 = vadd.f32 1.0, %v14375_v16 }
0x16d0   :  { %13986 = vmatpush3.msra.mxu0 %v12211_v5 }
0x16d1   :  { %13988 = vmatmul.mubr.msk.f32.vlgmr.msra.gmra.mxu0 %vm1005_vm2, %v17730_v26  ;;  %14001 = vmatprep.subr.mxu0 %v18131_v35  ;;  %14378 = vrcp.f32 %v10607_v55  ;;  %v12230_v55 = vld [vmem:[%s18046_s15 + $0x18] sm:$0xff] }
0x16d2   :  { %14002 = vmatpush3.msra.mxu0 %v12224_v24  ;;  %14009 = vmatprep.mubr.msk.f32.mxu0 %vm14436_vm1, %v18131_v35 }
0x16d3   :  { %14003 = vmatprep.subr.mxu0 %v18131_v35 }
0x16d4   :  { %14004 = vmatpush3.msra.mxu0 %v12223_v17 }
0x16d5   :  { %14005 = vmatprep.subr.mxu0 %v18131_v35 }
0x16d6   :  { %14006 = vmatpush3.msra.mxu0 %v12222_v31 }
0x16d7   :  { %14007 = vmatprep.subr.mxu0 %v18131_v35 }
0x16d8   :  { %14008 = vmatpush3.msra.mxu0 %v12221_v39 }
0x16d9   :  { %14010 = vmatmul.mubr.msk.f32.vlgmr.msra.gmra.mxu0 %vm1005_vm2, %v17730_v26  ;;  %14026 = vmatprep.subr.mxu0 %v18131_v35 }
0x16da   :  { %v14377_v18 = vpop.eup %14376  ;;  %14030 = vmatprep.mubr.msk.f32.mxu0 %vm14436_vm1, %v18131_v35  ;;  %14027 = vmatpush3.msra.mxu0 %v12233_v61  ;;  %v11356_v61 = vld [vmem:[%s18127_s5] sm:$0xff] }
0x16db   :  { %v10610_v52 = vmul.f32 %v14377_v18, %v10368_v63  ;;  %14028 = vmatprep.subr.mxu0 %v18131_v35 }
0x16dd   :  { %v10611_v22 = vadd.f32 %v10610_v52, %v10593_v34  ;;  %v11276_v34 = vld [vmem:[%s18125_s11 + $0x8] sm:$0xff] }
0x16de   :  { %v14379_v57 = vpop.eup %14378 }
0x16df   :  { %14380 = vtanh.f32 %v10611_v22  ;;  %v10613_v37 = vsub.f32 1.0, %v14379_v57  ;;  %v10615_v1 = vmul.f32 %v14379_v57, %v17545_v38  ;;  %v12232_v38 = vld [vmem:[%s18047_s16 + $0x10] sm:$0xff]  ;;  %v17923_v22 = vld [vmem:[#allocation8 + $0x8] sm:$0xff] }
0x16e0   :  { %14029 = vmatpush3.msra.mxu0 %v12232_v38 }
0x16e1   :  { %14044 = vmatprep.subr.mxu0 %v18131_v35 }
0x16ec   :  { %v14381_v36 = vpop.eup %14380 }
0x16ed   :  { %v10614_v45 = vmul.f32 %v14381_v36, %v10613_v37 }
0x16ef   :  { %v17858_v10 = vadd.f32 %v10615_v1, %v10614_v45  ;;  %v11271_v45 = vld [vmem:[#allocation2 + $0x38] sm:$0xff] }
0x16f1   :  { %v11274_v1 = vmul.f32 %v11271_v45, %v17858_v10  ;;  %v11357_v10 = vld [vmem:[%s18127_s5 + $0x8] sm:$0xff] }
0x1789   :  { %v10777_v9 = vpop.f32.mrf.mxu0 }
0x178a   :  { %v10778_v60 = vadd.f32 %v17881_v51, %v10777_v9 }
0x178b   :  { %v13978_v58 = vpop.f32.mrf.mxu0 }
0x178c   :  { %v10781_v14 = vmul.f32 %v10778_v60, %v10623_v6  ;;  %v10791_v53 = vsub.f32 %v17788_v28, %v10778_v60  ;;  %v11101_v60 = vld [vmem:[#allocation5 + $0x48] sm:$0xff] }
0x178e   :  { %v10784_v46 = vadd.f32 %v10783_v41, %v10781_v14  ;;  %v10792_v0 = vand.u32 2147483647, %v10791_v53  ;;  %v12238_v53 = vld [vmem:[%s18124_s29 + $0x38] sm:$0xff] }
0x1790   :  { %v10785_v5 = vmul.f32 %v10784_v46, %v10703_v33  ;;  %v10793_v24 = vadd.f32 %v10792_v0, %v10790_v21  ;;  %v10794_v17 = vsub.f32 %v17788_v28, %v10784_v46  ;;  %v11278_v28 = vld [vmem:[%s18125_s11 + $0x18] sm:$0xff]  ;;  %v11353_v0 = vsub.f32 1.0, %v12238_v53 }
0x1791   :  { %v10869_v31 = vpop.f32.mrf.mxu0  ;;  %v12237_v46 = vld [vmem:[%s18129_s21 + $0x38] sm:$0xff] }
0x1792   :  { %v10786_v16 = vadd.f32 %v10785_v5, %v17801_v27  ;;  %v10795_v39 = vand.u32 2147483647, %v10794_v17  ;;  %v11277_v27 = vld [vmem:[%s18125_s11 + $0x10] sm:$0xff] }
0x1793   :  { %v13989_v54 = vpop.f32.mrf.mxu0 }
0x1794   :  { %10788 = vst.msk [vmem:[#allocation8 + $0x48] sm:$0xff] %vm114_vm0, %v10786_v16  ;;  %v10796_v63 = vadd.f32 %v10795_v39, %v10793_v24  ;;  %14017 = vmatmul.mubr.msk.f32.vlgmr.msra.gmra.mxu1 %vm114_vm0, %v10786_v16  ;;  %14031 = vmatmul.mubr.msk.f32.vlgmr.msra.gmra.mxu0 %vm114_vm0, %v10786_v16 }
0x1795   :  { %14020 = vmatpush3.msra.mxu1 %v12230_v55  ;;  %14023 = vmatprep.mubr.msk.f32.mxu1 %vm14436_vm1, %v18131_v35 }
0x1796   :  { %14021 = vmatprep.subr.mxu1 %v18131_v35  ;;  %14048 = vmatprep.mubr.msk.f32.mxu0 %vm14436_vm1, %v18131_v35  ;;  %v10797_v33 = vmul.f32 %v10796_v63, %v10619_v32 }
0x1797   :  { %14022 = vmatpush3.msra.mxu1 %v12229_v25  ;;  %14045 = vmatpush3.msra.mxu0 %v11357_v10 }
0x1798   :  { %14033 = vmatprep.subr.mxu1 %v18131_v35  ;;  %14024 = vmatmul.mubr.msk.f32.vlgmr.msra.gmra.mxu1 %vm114_vm0, %v10786_v16  ;;  %v17913_v18 = vadd.f32 %v10797_v33, %v17699_v48  ;;  %v11275_v48 = vld [vmem:[%s18125_s11] sm:$0xff] }
0x1799   :  { %v17915_v40 = vpop.f32.mrf.mxu0  ;;  %14034 = vmatpush3.msra.mxu1 %v11278_v28  ;;  %14041 = vmatprep.mubr.msk.f32.mxu1 %vm14436_vm1, %v18131_v35  ;;  %v11175_v28 = vld [vmem:[#allocation6 + $0x48] sm:$0xff] }
0x179a   :  { %14035 = vmatprep.subr.mxu1 %v18131_v35  ;;  %14046 = vmatprep.subr.mxu0 %v18131_v35 }
0x179b   :  { %v14011_v52 = vpop.f32.mrf.mxu0  ;;  %14036 = vmatpush3.msra.mxu1 %v11277_v27  ;;  %v17925_v57 = vld [vmem:[#allocation8 + $0x48] sm:$0xff]  ;;  %14047 = vmatpush3.msra.mxu0 %v11356_v61 }
0x179c   :  { %14037 = vmatprep.subr.mxu1 %v18131_v35  ;;  %v11646_v37 = vadd.f32 %v17925_v57, %v17923_v22  ;;  %v11670_v36 = vsub.f32 %v17923_v22, %v17925_v57  ;;  %14051 = vmatprep.subr.mxu0 %v18131_v35 }
0x179d   :  { %14038 = vmatpush3.msra.mxu1 %v11276_v34 }
0x179e   :  { %14039 = vmatprep.subr.mxu1 %v18131_v35  ;;  %v11654_v2 = vmul.f32 0.5, %v11646_v37  ;;  %v11452_v37 = vld [vmem:[#allocation2 + $0x40] sm:$0xff] }
0x179f   :  { %14040 = vmatpush3.msra.mxu1 %v11275_v48 }
0x17a0   :  { %14042 = vmatmul.mubr.msk.f32.vlgmr.msra.gmra.mxu1 %vm1005_vm2, %v11274_v1  ;;  %14062 = vmatprep.subr.mxu1 %v18131_v35  ;;  %11662 = vst.msk [vmem:[%s18058_s27 + $0x8] sm:$0xff] %vm114_vm0, %v11654_v2  ;;  %v11273_v1 = vld [vmem:[#allocation3 + $0x38] sm:$0xff] }
0x17a1   :  { %14063 = vmatpush3.msra.mxu1 %v17765_v4  ;;  %14066 = vmatprep.mubr.msk.f32.mxu1 %vm14436_vm1, %v18131_v35  ;;  %v11024_v4 = vld [vmem:[#allocation4 + $0x48] sm:$0xff]  ;;  %v11432_v61 = vsub.f32 1.0, %v11273_v1 }
0x17a2   :  { %14064 = vmatprep.subr.mxu1 %v18131_v35 }
0x17a3   :  { %14065 = vmatpush3.msra.mxu1 %v17772_v3 }
0x1854   :  { %v11094_v19 = vpop.f32.mrf.mxu1  ;;  %v11242_v38 = vpop.f32.mrf.mxu0 }
0x1855   :  { %v11095_v6 = vadd.f32 %v11094_v19, %v11024_v4 }
0x1856   :  { %v14018_v9 = vpop.f32.mrf.mxu1  ;;  %v14032_v3 = vpop.f32.mrf.mxu0 }
0x1857   :  { %v11246_v49 = vadd.f32 %v11095_v6, %v10869_v31  ;;  %v11352_v31 = vmul.f32 %v12238_v53, %v12237_v46 }
0x1858   :  { %v11168_v23 = vpop.f32.mrf.mxu1 }
0x1859   :  { %v12235_v58 = vmul.f32 -1.442695, %v11246_v49  ;;  %v11169_v14 = vadd.f32 %v11168_v23, %v11101_v60 }
0x185a   :  { %v14025_v41 = vpop.f32.mrf.mxu1 }
0x185b   :  { %14382 = vpow2.f32 %v12235_v58  ;;  %v11253_v21 = vadd.f32 %v11169_v14, %v17814_v56  ;;  %v11269_v41 = vld [vmem:[#allocation7 + $0x38] sm:$0xff] }
0x185d   :  { %v12236_v24 = vmul.f32 -1.442695, %v11253_v21 }
0x185f   :  { %14384 = vpow2.f32 %v12236_v24  ;;  %v11644_v24 = vld [vmem:[#allocation8 + $0x78] sm:$0xff] }
0x1860   :  { %v11348_v5 = vpop.f32.mrf.mxu1 }
0x1861   :  { %v11349_v17 = vadd.f32 %v17593_v13, %v11348_v5 }
0x1862   :  { %v14043_v16 = vpop.f32.mrf.mxu1 }
0x1863   :  { %v11354_v39 = vmul.f32 %v11353_v0, %v11349_v17  ;;  %v11439_v2 = vsub.f32 %v12237_v46, %v11349_v17 }
0x1865   :  { %v11355_v55 = vadd.f32 %v11354_v39, %v11352_v31  ;;  %v11440_v9 = vand.u32 2147483647, %v11439_v2  ;;  %v11451_v2 = vld [vmem:[#allocation7] sm:$0xff] }
0x1867   :  { %14049 = vmatmul.mubr.msk.f32.vlgmr.msra.gmra.mxu0 %vm114_vm0, %v11355_v55 }
0x1868   :  { %v14383_v54 = vpop.eup %14382  ;;  %14052 = vmatpush3.msra.mxu0 %v17687_v8  ;;  %14059 = vmatprep.mubr.msk.f32.mxu0 %vm14436_vm1, %v18131_v35  ;;  %v14412_v8 = vld [vmem:[%s18054_s23 + $0x1] ss:$0 sm:$0xff] }
0x1869   :  { %v11250_v56 = vadd.f32 1.0, %v14383_v54  ;;  %14053 = vmatprep.subr.mxu0 %v18131_v35  ;;  %v11018_v63 = vadd.f32 %v14412_v8, %v17915_v40  ;;  %v11453_v8 = vld [vmem:[#allocation3 + $0x40] sm:$0xff] }
0x186a   :  { %14054 = vmatpush3.msra.mxu0 %v17696_v44  ;;  %v11243_v44 = vadd.f32 %v11242_v38, %v11175_v28  ;;  %v11433_v38 = vmul.f32 %v11432_v61, %v11349_v17  ;;  %v11612_v28 = vsub.f32 1.0, %v11453_v8 }
0x186b   :  { %14386 = vrcp.f32 %v11250_v56  ;;  %14055 = vmatprep.subr.mxu0 %v18131_v35 }
0x186c   :  { %14056 = vmatpush3.msra.mxu0 %v17710_v11  ;;  %v14385_v13 = vpop.eup %14384 }
0x186d   :  { %14057 = vmatprep.subr.mxu0 %v18131_v35  ;;  %v11257_v32 = vadd.f32 1.0, %v14385_v13 }
0x186e   :  { %14058 = vmatpush3.msra.mxu0 %v17721_v12 }
0x186f   :  { %14388 = vrcp.f32 %v11257_v32 }
0x1878   :  { %v14387_v25 = vpop.eup %14386 }
0x1879   :  { %v11260_v33 = vmul.f32 %v14387_v25, %v11018_v63 }
0x187b   :  { %v11261_v27 = vadd.f32 %v11260_v33, %v11243_v44 }
0x187c   :  { %v14389_v11 = vpop.eup %14388 }
0x187d   :  { %14390 = vtanh.f32 %v11261_v27  ;;  %v11263_v34 = vsub.f32 1.0, %v14389_v11  ;;  %v11265_v12 = vmul.f32 %v14389_v11, %v17730_v26 }
0x188a   :  { %v14391_v35 = vpop.eup %14390 }
0x188b   :  { %v11264_v52 = vmul.f32 %v14391_v35, %v11263_v34 }
0x188d   :  { %v11266_v48 = vadd.f32 %v11265_v12, %v11264_v52 }
0x188f   :  { %v11454_v45 = vmul.f32 %v11452_v37, %v11266_v48 }
0x1891   :  { %14060 = vmatmul.mubr.msk.f32.vlgmr.msra.gmra.mxu0 %vm1005_vm2, %v11454_v45 }
0x1927   :  { %v11427_v40 = vpop.f32.mrf.mxu0 }
0x1928   :  { %v11428_v10 = vadd.f32 %v17661_v50, %v11427_v40 }
0x1929   :  { %v14050_v4 = vpop.f32.mrf.mxu0 }
0x192a   :  { %v11431_v19 = vmul.f32 %v11428_v10, %v11273_v1  ;;  %v11441_v6 = vsub.f32 %v12237_v46, %v11428_v10  ;;  %v11629_v4 = vld [vmem:[#allocation8] sm:$0xff] }
0x192c   :  { %v11434_v3 = vadd.f32 %v11433_v38, %v11431_v19  ;;  %v11442_v49 = vand.u32 2147483647, %v11441_v6 }
0x192e   :  { %v11435_v60 = vmul.f32 %v11434_v3, %v11353_v0  ;;  %v11443_v26 = vadd.f32 %v11442_v49, %v11440_v9  ;;  %v11444_v23 = vsub.f32 %v12237_v46, %v11434_v3  ;;  %v11450_v46 = vld [vmem:[%s18124_s29] sm:$0xff]  ;;  %v11678_v9 = vand.u32 2147483647, %v11670_v36 }
0x192f   :  { %v11449_v0 = vld [vmem:[%s18129_s21] sm:$0xff] }
0x1930   :  { %v11436_v58 = vadd.f32 %v11435_v60, %v11352_v31  ;;  %v11445_v14 = vand.u32 2147483647, %v11444_v23  ;;  %v11533_v31 = vsub.f32 1.0, %v11450_v46  ;;  %v11532_v54 = vmul.f32 %v11450_v46, %v11449_v0  ;;  %v18187_v23 = vld [vmem:[#allocation14_spill] sm:$0xff]  ;;  %v18189_v36 = vld [vmem:[#allocation20_spill] sm:$0xff] }
0x1931   :  { %v11679_v60 = vand.u32 2147483647, %v11671_v15  ;;  %v11686_v22 = vsel %vm114_vm0, %v11678_v9, 0.0  ;;  %v11682_v15 = vand.u32 2147483647, %v11674_v20 }
0x1932   :  { %11438 = vst.msk [vmem:[#allocation8 + $0x38] sm:$0xff] %vm114_vm0, %v11436_v58  ;;  %v11446_v53 = vadd.f32 %v11445_v14, %v11443_v26  ;;  %v18186_v26 = vld [vmem:[#allocation13_spill] sm:$0xff] }
0x1933   :  { %v18188_v58 = vsub.f32 %v18186_v26, %v18187_v23  ;;  %v11688_v7 = vsel %vm114_vm0, %v11679_v60, 0.0 }
0x1934   :  { %v11447_v21 = vmul.f32 %v11446_v53, %v11269_v41  ;;  %v18190_v53 = vld [vmem:[#allocation12_spill] sm:$0xff] }
0x1935   :  { %v11680_v14 = vand.u32 2147483647, %v18188_v58 }
0x1936   :  { %v11448_v50 = vadd.f32 %v11447_v21, %v17913_v18  ;;  %v18191_v21 = vsub.f32 %v18189_v36, %v18190_v53 }
0x1939   :  { %v11636_v5 = vld [vmem:[#allocation8 + $0x38] sm:$0xff] }
0x193a   :  { %v11652_v16 = vadd.f32 %v11644_v24, %v11636_v5  ;;  %v11676_v17 = vsub.f32 %v11636_v5, %v11644_v24  ;;  %v11690_v5 = vsel %vm114_vm0, %v11680_v14, 0.0 }
0x193c   :  { %v11660_v39 = vmul.f32 0.5, %v11652_v16  ;;  %v11683_v16 = vand.u32 2147483647, %v11675_v42 }
0x193e   :  { %11668 = vst.msk [vmem:[%s18058_s27 + $0x38] sm:$0xff] %vm114_vm0, %v11660_v39 }
0x1951   :  { %v11528_v18 = vpop.f32.mrf.mxu0 }
0x1952   :  { %v11529_v55 = vadd.f32 %v17794_v47, %v11528_v18 }
0x1953   :  { %v14061_v56 = vpop.f32.mrf.mxu0 }
0x1954   :  { %v11534_v13 = vmul.f32 %v11533_v31, %v11529_v55  ;;  %v11619_v33 = vsub.f32 %v11449_v0, %v11529_v55  ;;  %v11613_v11 = vmul.f32 %v11612_v28, %v11529_v55  ;;  %v11696_v55 = vsel %vm114_vm0, %v11683_v16, 0.0 }
0x1956   :  { %v11535_v32 = vadd.f32 %v11534_v13, %v11532_v54  ;;  %v11620_v12 = vand.u32 2147483647, %v11619_v33 }
0x1958   :  { %14067 = vmatmul.mubr.msk.f32.vlgmr.msra.gmra.mxu1 %vm114_vm0, %v11535_v32 }
0x1a18   :  { %v11607_v63 = vpop.f32.mrf.mxu1 }
0x1a19   :  { %v11608_v25 = vadd.f32 %v17881_v51, %v11607_v63 }
0x1a1a   :  { %v14068_v44 = vpop.f32.mrf.mxu1 }
0x1a1b   :  { %v11611_v27 = vmul.f32 %v11608_v25, %v11453_v8  ;;  %v11621_v34 = vsub.f32 %v11449_v0, %v11608_v25 }
0x1a1d   :  { %v11614_v35 = vadd.f32 %v11613_v11, %v11611_v27  ;;  %v11622_v52 = vand.u32 2147483647, %v11621_v34 }
0x1a1f   :  { %v11615_v47 = vmul.f32 %v11614_v35, %v11533_v31  ;;  %v11624_v48 = vsub.f32 %v11449_v0, %v11614_v35  ;;  %v11623_v45 = vadd.f32 %v11622_v52, %v11620_v12  ;;  %v11684_v0 = vand.u32 2147483647, %v11676_v17 }
0x1a20   :  { %v11694_v31 = vsel %vm114_vm0, %v11682_v15, 0.0 }
0x1a21   :  { %v11616_v37 = vadd.f32 %v11615_v47, %v11532_v54  ;;  %v11625_v1 = vand.u32 2147483647, %v11624_v48  ;;  %v11698_v62 = vsel %vm114_vm0, %v11684_v0, 0.0 }
0x1a23   :  { %11618 = vst.msk [vmem:[#allocation8 + $0x40] sm:$0xff] %vm114_vm0, %v11616_v37  ;;  %v11626_v40 = vadd.f32 %v11625_v1, %v11623_v45 }
0x1a25   :  { %v11627_v10 = vmul.f32 %v11626_v40, %v11451_v2 }
0x1a27   :  { %v11628_v51 = vadd.f32 %v11627_v10, %v11448_v50  ;;  %v11681_v50 = vand.u32 2147483647, %v18191_v21 }
0x1a29   :  { %v11710_v61 = vsel %vm114_vm0, %v11628_v51, 0.0  ;;  %v11692_v39 = vsel %vm114_vm0, %v11681_v50, 0.0 }
0x1a2a   :  { %11711 = vadd.xlane.f32.xlu1 %v11710_v61  ;;  %v11637_v19 = vld [vmem:[#allocation8 + $0x40] sm:$0xff] }
0x1a2b   :  { %v11645_v38 = vadd.f32 %v11637_v19, %v11629_v4  ;;  %v11669_v6 = vsub.f32 %v11629_v4, %v11637_v19 }
0x1a2d   :  { %v11653_v3 = vmul.f32 0.5, %v11645_v38  ;;  %v11677_v49 = vand.u32 2147483647, %v11669_v6 }
0x1a2f   :  { %11661 = vst.msk [vmem:[%s18058_s27] sm:$0xff] %vm114_vm0, %v11653_v3  ;;  %v11685_v41 = vsel %vm114_vm0, %v11677_v49, 0.0 }
0x1a30   :  { %v11687_v57 = vadd.f32 %v11686_v22, %v11685_v41 }
0x1a32   :  { %v11689_v30 = vadd.f32 %v11688_v7, %v11687_v57 }
0x1a34   :  { %v11691_v24 = vadd.f32 %v11690_v5, %v11689_v30 }
0x1a36   :  { %v11693_v46 = vadd.f32 %v11692_v39, %v11691_v24 }
0x1a38   :  { %v11695_v18 = vadd.f32 %v11694_v31, %v11693_v46 }
0x1a3a   :  { %v11697_v54 = vadd.f32 %v11696_v55, %v11695_v18 }
0x1a3c   :  { %v11699_v29 = vadd.f32 %v11698_v62, %v11697_v54 }
0x1a3e   :  { %11700 = vadd.xlane.f32.xlu0 %v11699_v29 }
0x1ab3   :  { %v11712_v20 = vpop.xlane.xlu1 %11711 }
0x1ab4   :  { %v11713_v56 = vrot.slane %v11712_v20, 4 }
0x1ab6   :  { %v11714_v13 = vadd.f32 %v11713_v56, %v11712_v20 }
0x1ab8   :  { %v11715_v32 = vrot.slane %v11714_v13, 2 }
0x1aba   :  { %v11716_v8 = vadd.f32 %v11715_v32, %v11714_v13 }
0x1abc   :  { %v11717_v25 = vrot.slane %v11716_v8, 1 }
0x1abe   :  { %v11718_v33 = vadd.f32 %v11717_v25, %v11716_v8 }
0x1ac7   :  { %v11701_v59 = vpop.xlane.xlu0 %11700 }
0x1ac8   :  { %v11702_v43 = vrot.slane %v11701_v59, 4 }
0x1aca   :  { %v11703_v42 = vadd.f32 %v11702_v43, %v11701_v59 }
0x1acc   :  { %v11704_v63 = vrot.slane %v11703_v42, 2 }
0x1ace   :  { %v11705_v17 = vadd.f32 %v11704_v63, %v11703_v42 }
0x1ad0   :  { %v11706_v28 = vrot.slane %v11705_v17, 1 }
0x1ad2   :  { %v11707_v44 = vadd.f32 %v11706_v28, %v11705_v17 }
0x1ad4   :  { %14101 = vpush %v11707_v44 }
0x1ad5   :  { %14103 = vpush %v11718_v33 }
0x1b05   :  { %s14102_s27 = spop %14101 }
0x1b06   :  { %s11709_s20 = smul.f32 9.765625e-05, %s14102_s27  ;;  %s14104_s15 = spop %14103 }
0x1b08   :  { %s11720_s22 = sadd.f32 %s14104_s15, %s11709_s20 }
0x1b0a   :  { %v11721_v27 = vstv %s11720_s22 }
0x1b0b   :  { %11723 = vst.msk [vmem:[#allocation9] sm:$0x1] %vm11722_vm3, %v11721_v27 }
0x1b0c   :  { %14424 = shalt.err (!%p14421_p4)
}
0x1b0d   :  { %11735 = dma.vmem_to_hbm [thread:$0]  %s11733_s25, 16, %s18059_s28, [#allocation10]  }
0x1b0e   :  { %14433 = dma.done.wait [#allocation10], 16  }
0x1b0f   :  { %14434 = vsyncadd [#allocation10], 4294967280 }
0x1b10   :  { %11741 = vsyncpa [#allocation10], 1 }

</bundles_post_ra>
